<compile_context>
chip_gen: v7x
topology: tpu7x:2x2x1
jax: 0.10.0
libtpu: 0.0.40
codegen_flags: <defaults>
</compile_context>

<pallas_src>
import functools

import jax
import jax.numpy as jnp
from jax import lax
from jax.experimental import pallas as pl
from jax.experimental.pallas import tpu as pltpu


# ----------------------------------------------------------------------------
# Tiling constants
# ----------------------------------------------------------------------------
LANE = 128            # lane width; feature/channel pad multiple (keep at 128)
ROW_TILE = 512        # max row / k tile for linear + GCN kernels
PROT_TILE = 32        # proteins per fused-conv-tower step (use ~16 on v7x for
                      # very long sequences; 64 MiB VMEM there)
EDGE_TILE = 8 * LANE  # edges per decoder step (one-hot gather stays in VMEM)


def _round_up(x, m):
    return -(-x // m) * m


def _pad_to(x, axis, mult):
    rem = (-x.shape[axis]) % mult
    if rem == 0:
        return x
    pads = [(0, 0)] * x.ndim
    pads[axis] = (0, rem)
    return jnp.pad(x, pads)


def _pad_rows(x, n_pad):
    if x.shape[0] == n_pad:
        return x
    pads = [(0, n_pad - x.shape[0])] + [(0, 0)] * (x.ndim - 1)
    return jnp.pad(x, pads)


def _node_pad_and_tile(n, max_tile=ROW_TILE):
    # Node dims are both matmul rows and the adjacency lane dim -> pad to 128.
    n_pad = _round_up(max(n, 1), LANE)
    if n_pad <= max_tile:
        return n_pad, n_pad
    return _round_up(n_pad, max_tile), max_tile


def _prot_pad_and_tile(n, max_tile=PROT_TILE):
    n_pad = _round_up(max(n, 1), 8)
    if n_pad <= max_tile:
        return n_pad, n_pad
    return _round_up(n_pad, max_tile), max_tile


# ----------------------------------------------------------------------------
# Pallas kernels
# ----------------------------------------------------------------------------
def linear_kernel(x_ref, w_ref, b_ref, o_ref, *, relu):
    # y = x @ W + b (+ ReLU); x/W bf16, f32 accumulation.
    y = jnp.dot(x_ref[...], w_ref[...], preferred_element_type=jnp.float32)
    y = y + b_ref[...]
    if relu:
        y = jnp.maximum(y, 0.0)
    o_ref[...] = y


def pallas_linear(x, w, b, *, relu, row_tile):
    m, k = x.shape
    n = w.shape[1]
    return pl.pallas_call(
        functools.partial(linear_kernel, relu=relu),
        out_shape=jax.ShapeDtypeStruct((m, n), jnp.float32),
        grid_spec=pltpu.PrefetchScalarGridSpec(
            num_scalar_prefetch=0,
            grid=(m // row_tile,),
            in_specs=[
                pl.BlockSpec((row_tile, k), lambda i: (i, 0)),
                pl.BlockSpec((k, n), lambda i: (0, 0)),
                pl.BlockSpec((1, n), lambda i: (0, 0)),
            ],
            out_specs=pl.BlockSpec((row_tile, n), lambda i: (i, 0))),
        compiler_params=pltpu.CompilerParams(
            dimension_semantics=("parallel",)),
    )(x, w, b)


def protein_tower_kernel(x_ref, w1_ref, b1_ref, w2_ref, b2_ref,
                         wfc_ref, bfc_ref, o_ref, *, ksize):
    # Fused: conv1+ReLU -> conv2+ReLU -> global max pool -> fc+ReLU.
    # Convs use an im2col build + one matmul with (K*Cin, Cout) weights so
    # each conv layer is a single MXU contraction instead of K tiny ones.
    # x: (TN, L, Cin) bf16 channels-last; w1/w2: (K*Cin, Cout) bf16.
    tn, seq_len, c_in = x_ref.shape
    c1 = w1_ref.shape[1]
    c2 = w2_ref.shape[1]
    l1 = seq_len - ksize + 1
    l2 = l1 - ksize + 1

    x = x_ref[...]
    cols1 = jnp.concatenate([x[:, k:k + l1, :] for k in range(ksize)], axis=-1)
    h1 = jnp.dot(cols1.reshape(tn * l1, ksize * c_in), w1_ref[...],
                 preferred_element_type=jnp.float32)
    h1 = jnp.maximum(h1 + b1_ref[...], 0.0).astype(jnp.bfloat16)
    h1 = h1.reshape(tn, l1, c1)

    cols2 = jnp.concatenate([h1[:, k:k + l2, :] for k in range(ksize)],
                            axis=-1)
    h2 = jnp.dot(cols2.reshape(tn * l2, ksize * c1), w2_ref[...],
                 preferred_element_type=jnp.float32)
    h2 = jnp.maximum(h2 + b2_ref[...], 0.0).reshape(tn, l2, c2)

    pooled = jnp.max(h2, axis=1)                  # global max pool over length
    y = jnp.dot(pooled.astype(jnp.bfloat16), wfc_ref[...],
                preferred_element_type=jnp.float32)
    o_ref[...] = jnp.maximum(y + bfc_ref[...], 0.0)


def pallas_protein_tower(x, w1, b1, w2, b2, wfc, bfc, *, ksize, prot_tile):
    # TODO(synk): for production sequence lengths raise vmem_limit_bytes via
    # CompilerParams and re-derive prot_tile against the per-chip VMEM.
    n, seq_len, c_in = x.shape
    e_out = wfc.shape[1]
    return pl.pallas_call(
        functools.partial(protein_tower_kernel, ksize=ksize),
        out_shape=jax.ShapeDtypeStruct((n, e_out), jnp.float32),
        grid_spec=pltpu.PrefetchScalarGridSpec(
            num_scalar_prefetch=0,
            grid=(n // prot_tile,),
            in_specs=[
                pl.BlockSpec((prot_tile, seq_len, c_in), lambda i: (i, 0, 0)),
                pl.BlockSpec(w1.shape, lambda i: (0, 0)),
                pl.BlockSpec(b1.shape, lambda i: (0, 0)),
                pl.BlockSpec(w2.shape, lambda i: (0, 0)),
                pl.BlockSpec(b2.shape, lambda i: (0, 0)),
                pl.BlockSpec(wfc.shape, lambda i: (0, 0)),
                pl.BlockSpec(bfc.shape, lambda i: (0, 0)),
            ],
            out_specs=pl.BlockSpec((prot_tile, e_out), lambda i: (i, 0))),
        compiler_params=pltpu.CompilerParams(
            dimension_semantics=("parallel",)),
    )(x, w1, b1, w2, b2, wfc, bfc)


def gcn_fused_kernel(a_ref, h_ref, w_ref, b_ref, o_ref):
    # out = relu(A @ (H @ W) + b). grid = (row tiles, k tiles).
    # The (k_tile, n) slice of H@W is computed in-kernel with W resident; the
    # f32 output block is resident across the k axis and used as accumulator.
    @pl.when(pl.program_id(1) == 0)
    def _():
        o_ref[...] = jnp.zeros_like(o_ref)

    hw = jnp.dot(h_ref[...].astype(jnp.bfloat16), w_ref[...],
                 preferred_element_type=jnp.float32).astype(jnp.bfloat16)
    o_ref[...] += jnp.dot(a_ref[...], hw, preferred_element_type=jnp.float32)

    @pl.when(pl.program_id(1) == pl.num_programs(1) - 1)
    def _():
        o_ref[...] = jnp.maximum(o_ref[...] + b_ref[...], 0.0)


def pallas_gcn(a, h, w, b, *, row_tile, k_tile):
    # TODO(synk): at production node counts exploit adjacency sparsity (skip
    # all-zero (row_tile, k_tile) A blocks via scalar-prefetched flags, or a
    # CSR/gather formulation) instead of the dense O(N^2) padded adjacency.
    m, kdim = a.shape
    kin, n = w.shape
    return pl.pallas_call(
        gcn_fused_kernel,
        out_shape=jax.ShapeDtypeStruct((m, n), jnp.float32),
        grid_spec=pltpu.PrefetchScalarGridSpec(
            num_scalar_prefetch=0,
            grid=(m // row_tile, kdim // k_tile),
            in_specs=[
                pl.BlockSpec((row_tile, k_tile), lambda i, k: (i, k)),
                pl.BlockSpec((k_tile, kin), lambda i, k: (k, 0)),
                pl.BlockSpec((kin, n), lambda i, k: (0, 0)),
                pl.BlockSpec((1, n), lambda i, k: (0, 0)),
            ],
            out_specs=pl.BlockSpec((row_tile, n), lambda i, k: (i, 0))),
        compiler_params=pltpu.CompilerParams(
            dimension_semantics=("parallel", "arbitrary")),
    )(a, h, w, b)


def ipd_kernel(src_ref, tar_ref, zd_ref, zp_ref, o_ref):
    # Inner-product decoder with the row gather done in-kernel: the padded
    # drug / protein embeddings stay resident in VMEM and rows are selected
    # with an exact one-hot f32 matmul (no (E,128) gathered copies in HBM).
    # Scores are laid out lane-dense as (edge_tile//128, 128).
    et = src_ref.shape[0]
    nd = zd_ref.shape[0]
    npn = zp_ref.shape[0]
    d = zd_ref.shape[1]
    oh_s = (src_ref[...] ==
            lax.broadcasted_iota(jnp.int32, (et, nd), 1)).astype(jnp.float32)
    oh_t = (tar_ref[...] ==
            lax.broadcasted_iota(jnp.int32, (et, npn), 1)).astype(jnp.float32)
    zs = jnp.dot(oh_s, zd_ref[...], preferred_element_type=jnp.float32)
    zt = jnp.dot(oh_t, zp_ref[...], preferred_element_type=jnp.float32)
    prod = zs * zt
    s = jnp.sum(prod.reshape(et // LANE, LANE, d), axis=-1)
    o_ref[...] = 1.0 / (1.0 + jnp.exp(-s))          # exact sigmoid


def pallas_ipd(src_idx, tar_idx, zd, zp, *, edge_tile=EDGE_TILE):
    # TODO(synk): for very large graphs the resident (N_pad,128) embeddings /
    # one-hot matmul should be replaced by a DMA or dynamic-gather path.
    e = src_idx.shape[0]
    nd, d = zd.shape
    npn = zp.shape[0]
    return pl.pallas_call(
        ipd_kernel,
        out_shape=jax.ShapeDtypeStruct((e // LANE, LANE), jnp.float32),
        grid_spec=pltpu.PrefetchScalarGridSpec(
            num_scalar_prefetch=0,
            grid=(e // edge_tile,),
            in_specs=[
                pl.BlockSpec((edge_tile, 1), lambda i: (i, 0)),
                pl.BlockSpec((edge_tile, 1), lambda i: (i, 0)),
                pl.BlockSpec((nd, d), lambda i: (0, 0)),
                pl.BlockSpec((npn, d), lambda i: (0, 0)),
            ],
            out_specs=pl.BlockSpec((edge_tile // LANE, LANE),
                                   lambda i: (i, 0))),
        compiler_params=pltpu.CompilerParams(
            dimension_semantics=("parallel",)),
    )(src_idx, tar_idx, zd, zp)


# ----------------------------------------------------------------------------
# Glue: parameter init, adjacency construction, STRGNN forward
# ----------------------------------------------------------------------------
def glorot(key, shape):
    fan_in, fan_out = shape[-2], shape[-1]
    lim = (6.0 / (fan_in + fan_out)) ** 0.5
    return jax.random.uniform(key, shape, jnp.float32, -lim, lim)


def init_params(key, *, ecfp_dim, emb_dim, vocab, ch_emb, channel1, channel2,
                kernel_size):
    keys = jax.random.split(key, 9)
    return {
        # ECFPEncoder (drug): Linear(ecfp_dim -> emb_dim) + ReLU
        "w_ecfp": glorot(keys[0], (ecfp_dim, emb_dim)),
        "b_ecfp": jnp.zeros((1, emb_dim), jnp.float32),
        # AminoSeqEncoder (protein): char embedding -> 2x Conv1d -> pool -> fc
        "e_char": glorot(keys[1], (vocab, ch_emb)),
        "w_conv1": glorot(keys[2], (kernel_size, ch_emb, channel1)),
        "b_conv1": jnp.zeros((1, channel1), jnp.float32),
        "w_conv2": glorot(keys[3], (kernel_size, channel1, channel2)),
        "b_conv2": jnp.zeros((1, channel2), jnp.float32),
        "w_pfc": glorot(keys[4], (channel2, emb_dim)),
        "b_pfc": jnp.zeros((1, emb_dim), jnp.float32),
        # MonoEncoders (drug_drug and protein_protein networks)
        "w_dd": glorot(keys[5], (emb_dim, emb_dim)),
        "b_dd": jnp.zeros((1, emb_dim), jnp.float32),
        "w_pp": glorot(keys[6], (emb_dim, emb_dim)),
        "b_pp": jnp.zeros((1, emb_dim), jnp.float32),
    }


def normalized_adj(edge_index, n):
    # Row-normalized adjacency with self-loops (symmetrized).
    # TODO(synk): exact MonoEncoder normalization unknown; GCN-style mean used.
    a = jnp.zeros((n, n), jnp.float32)
    a = a.at[edge_index[0], edge_index[1]].add(1.0)
    a = a + a.T + jnp.eye(n, dtype=jnp.float32)
    deg = jnp.sum(a, axis=1, keepdims=True)
    return a / deg


@functools.partial(jax.jit, static_argnames=("cycle_num",))
def strgnn_forward(params, feat, edge_index, pos_edge_index, neg_edge_index,
                   cycle_num=1):
    bf16 = jnp.bfloat16
    n_drug = feat["d_feat"].shape[0]
    n_protein = feat["p_feat"].shape[0]
    emb_dim = params["w_ecfp"].shape[1]
    ksize = params["w_conv1"].shape[0]

    # ---- pad parameters to lane-dense (multiples of 128) shapes ------------
    w_ecfp = _pad_to(_pad_to(params["w_ecfp"], 0, LANE), 1, LANE).astype(bf16)
    b_ecfp = _pad_to(params["b_ecfp"], 1, LANE)
    e_char = _pad_to(params["e_char"], 1, LANE)
    w1p = _pad_to(_pad_to(params["w_conv1"], 1, LANE), 2, LANE)
    w_conv1 = w1p.reshape(ksize * w1p.shape[1], w1p.shape[2]).astype(bf16)
    b_conv1 = _pad_to(params["b_conv1"], 1, LANE)
    w2p = _pad_to(_pad_to(params["w_conv2"], 1, LANE), 2, LANE)
    w_conv2 = w2p.reshape(ksize * w2p.shape[1], w2p.shape[2]).astype(bf16)
    b_conv2 = _pad_to(params["b_conv2"], 1, LANE)
    w_pfc = _pad_to(_pad_to(params["w_pfc"], 0, LANE), 1, LANE).astype(bf16)
    b_pfc = _pad_to(params["b_pfc"], 1, LANE)
    w_dd = _pad_to(_pad_to(params["w_dd"], 0, LANE), 1, LANE).astype(bf16)
    b_dd = _pad_to(params["b_dd"], 1, LANE)
    w_pp = _pad_to(_pad_to(params["w_pp"], 0, LANE), 1, LANE).astype(bf16)
    b_pp = _pad_to(params["b_pp"], 1, LANE)

    nd_pad, nd_tile = _node_pad_and_tile(n_drug)
    np_pad, np_tile = _node_pad_and_tile(n_protein)

    # ---- drug attribute encoder: ECFP linear + ReLU ------------------------
    xd = _pad_rows(_pad_to(feat["d_feat"], 1, LANE), nd_pad).astype(bf16)
    d_att_p = pallas_linear(xd, w_ecfp, b_ecfp, relu=True, row_tile=nd_tile)
    d_feat_att = d_att_p[:n_drug, :emb_dim]

    # ---- protein attribute encoder: fused conv tower ------------------------
    npc_pad, prot_tile = _prot_pad_and_tile(n_protein)
    tokens = _pad_rows(feat["p_feat"], npc_pad)               # (Np_ct, L) int32
    # TODO(synk): the char-embedding gather stays in XLA; could move in-kernel.
    p_emb = jnp.take(e_char, tokens, axis=0).astype(bf16)     # (Np_ct, L, Cpad)
    p_att_ct = pallas_protein_tower(p_emb, w_conv1, b_conv1, w_conv2, b_conv2,
                                    w_pfc, b_pfc, ksize=ksize,
                                    prot_tile=prot_tile)
    p_feat_att = p_att_ct[:n_protein, :emb_dim]
    p_att_p = _pad_rows(p_att_ct, np_pad)

    d_feat_p = d_att_p
    p_feat_p = p_att_p

    # ---- network (MonoEncoder) propagation over dd / pp networks -----------
    # TODO(synk): target network (drug_protein / BipartiteEncoder) is skipped,
    # as in MyEncoder when network == conf.target_network.
    a_dd = normalized_adj(edge_index["dd"], n_drug)
    a_pp = normalized_adj(edge_index["pp"], n_protein)
    a_dd_p = jnp.pad(a_dd, ((0, nd_pad - n_drug),
                            (0, nd_pad - n_drug))).astype(bf16)
    a_pp_p = jnp.pad(a_pp, ((0, np_pad - n_protein),
                            (0, np_pad - n_protein))).astype(bf16)

    for _ in range(cycle_num):
        # H@W is computed inside the fused GCN kernel (W resident); no HW /
        # bf16-cast round trips through HBM between cycles.
        d_feat_p = pallas_gcn(a_dd_p, d_feat_p, w_dd, b_dd,
                              row_tile=nd_tile, k_tile=nd_tile)
        p_feat_p = pallas_gcn(a_pp_p, p_feat_p, w_pp, b_pp,
                              row_tile=np_tile, k_tile=np_tile)

    ret_feat = {
        "d_feat": d_feat_p[:n_drug, :emb_dim],
        "p_feat": p_feat_p[:n_protein, :emb_dim],
        "d_feat_att": d_feat_att,
        "p_feat_att": p_feat_att,
    }

    # ---- decoder (IPD): pos + neg edges, gather done inside the kernel -----
    n_pos = pos_edge_index.shape[1]
    n_neg = neg_edge_index.shape[1]
    e_total = n_pos + n_neg
    e_pad = _round_up(e_total, EDGE_TILE)
    src = jnp.concatenate([pos_edge_index[0],
                           neg_edge_index[0]]).astype(jnp.int32)
    tar = jnp.concatenate([pos_edge_index[1],
                           neg_edge_index[1]]).astype(jnp.int32)
    src = jnp.pad(src, (0, e_pad - e_total)).reshape(e_pad, 1)
    tar = jnp.pad(tar, (0, e_pad - e_total)).reshape(e_pad, 1)
    scores = pallas_ipd(src, tar, d_feat_p, p_feat_p).reshape(-1)
    pos_score = scores[:n_pos]
    neg_score = scores[n_pos:e_total]

    return ret_feat, pos_score, neg_score


# ----------------------------------------------------------------------------
# Main
# ----------------------------------------------------------------------------
if __name__ == "__main__":
    # small, deterministic configuration
    n_drug, n_protein = 8, 8
    ecfp_dim, emb_dim = 64, 32
    vocab, mxlen = 20, 16          # protein_uniqchar, protein_mxlen
    ch_emb, channel1, channel2 = 8, 8, 8
    kernel_size, cycle_num = 3, 1

    key = jax.random.PRNGKey(0)
    k_param, k_dfeat, k_pfeat = jax.random.split(key, 3)

    params = init_params(k_param, ecfp_dim=ecfp_dim, emb_dim=emb_dim,
                         vocab=vocab, ch_emb=ch_emb, channel1=channel1,
                         channel2=channel2, kernel_size=kernel_size)

    # drug ECFP fingerprints (binary-valued floats), protein amino-acid tokens
    d_feat = jax.random.bernoulli(k_dfeat, 0.3, (n_drug, ecfp_dim)).astype(
        jnp.float32)
    p_feat = jax.random.randint(k_pfeat, (n_protein, mxlen), 0, vocab,
                                dtype=jnp.int32)
    feat = {"d_feat": d_feat, "p_feat": p_feat}

    # mono-network edge indices (ring graphs), deterministic
    idx = jnp.arange(n_drug, dtype=jnp.int32)
    edge_index = {
        "dd": jnp.stack([idx, (idx + 1) % n_drug]),
        "pp": jnp.stack([idx, (idx + 1) % n_protein]),
    }
    # positive / negative drug->protein edges for the decoder
    pos_edge_index = jnp.stack([idx, idx])
    neg_edge_index = jnp.stack([idx, (idx + 3) % n_protein])

    ret_feat, pos_score, neg_score = strgnn_forward(
        params, feat, edge_index, pos_edge_index, neg_edge_index,
        cycle_num=cycle_num)
    jax.block_until_ready((ret_feat, pos_score, neg_score))

    assert ret_feat["d_feat"].shape == (n_drug, emb_dim)
    assert ret_feat["p_feat"].shape == (n_protein, emb_dim)
    assert pos_score.shape == (n_drug,) and neg_score.shape == (n_drug,)
    print("KERNEL_OK")
</pallas_src>

<mosaic_0001>
module attributes {stable_mosaic.version = 11 : i64} {
  func.func @linear_kernel(%arg0: i32, %arg1: memref<128x128xbf16, #tpu.memory_space<vmem>>, %arg2: memref<128x128xbf16, #tpu.memory_space<vmem>>, %arg3: memref<1x128xf32, #tpu.memory_space<vmem>>, %arg4: memref<128x128xf32, #tpu.memory_space<vmem>>) attributes {dimension_semantics = [#tpu.dimension_semantics<parallel>], iteration_bounds = array<i64: 1>, scalar_prefetch = 0 : i64, scratch_operands = 0 : i64, tpu.core_type = #tpu.core_type<tc>, window_params = [{transform_indices = @transform_0, window_bounds = array<i64: 128, 128>}, {pipeline_mode = #tpu.pipeline_mode<synchronous>, transform_indices = @transform_1, window_bounds = array<i64: 128, 128>}, {pipeline_mode = #tpu.pipeline_mode<synchronous>, transform_indices = @transform_2, window_bounds = array<i64: 1, 128>}, {transform_indices = @transform_3, window_bounds = array<i64: 128, 128>}]} {
    %c0 = arith.constant 0 : index
    %c0_0 = arith.constant 0 : index
    %0 = vector.load %arg1[%c0, %c0_0] : memref<128x128xbf16, #tpu.memory_space<vmem>>, vector<128x128xbf16>
    %c0_1 = arith.constant 0 : index
    %c0_2 = arith.constant 0 : index
    %1 = vector.load %arg2[%c0_1, %c0_2] : memref<128x128xbf16, #tpu.memory_space<vmem>>, vector<128x128xbf16>
    %cst = arith.constant dense<0.000000e+00> : vector<128x128xf32>
    %2 = tpu.matmul %0, %1, %cst {dimension_numbers = #tpu.dot_dimension_numbers<[1], [0], [0], [1], [0, 0, 1, 1], [], []>} : vector<128x128xbf16>, vector<128x128xbf16>, vector<128x128xf32> -> vector<128x128xf32>
    %c0_3 = arith.constant 0 : index
    %c0_4 = arith.constant 0 : index
    %3 = vector.load %arg3[%c0_3, %c0_4] : memref<1x128xf32, #tpu.memory_space<vmem>>, vector<1x128xf32>
    %4 = vector.broadcast %3 : vector<1x128xf32> to vector<128x128xf32>
    %5 = arith.addf %2, %4 : vector<128x128xf32>
    %cst_5 = arith.constant 0.000000e+00 : f32
    %6 = vector.broadcast %cst_5 : f32 to vector<128x128xf32>
    %7 = arith.maximumf %5, %6 : vector<128x128xf32>
    %c0_6 = arith.constant 0 : index
    %c0_7 = arith.constant 0 : index
    %8 = vector.load %arg4[%c0_6, %c0_7] : memref<128x128xf32, #tpu.memory_space<vmem>>, vector<128x128xf32>
    tpu.vector_store %arg4[%c0_6, %c0_7], %7 {strides = array<i32>} : memref<128x128xf32, #tpu.memory_space<vmem>>, vector<128x128xf32>,
    return
  }
  func.func @transform_0(%arg0: i32) -> (i32, i32) {
    %c0_i32 = arith.constant 0 : i32
    %c0_i32_0 = arith.constant 0 : i32
    return %arg0, %c0_i32 : i32, i32
  }
  func.func @transform_1(%arg0: i32) -> (i32, i32) {
    %c0_i32 = arith.constant 0 : i32
    %c0_i32_0 = arith.constant 0 : i32
    %c0_i32_1 = arith.constant 0 : i32
    return %c0_i32, %c0_i32_0 : i32, i32
  }
  func.func @transform_2(%arg0: i32) -> (i32, i32) {
    %c0_i32 = arith.constant 0 : i32
    %c0_i32_0 = arith.constant 0 : i32
    %c0_i32_1 = arith.constant 0 : i32
    return %c0_i32, %c0_i32_0 : i32, i32
  }
  func.func @transform_3(%arg0: i32) -> (i32, i32) {
    %c0_i32 = arith.constant 0 : i32
    %c0_i32_0 = arith.constant 0 : i32
    return %arg0, %c0_i32 : i32, i32
  }
}

module attributes {stable_mosaic.version = 11 : i64} {
  func.func @gcn_fused_kernel(%arg0: i32, %arg1: i32, %arg2: memref<128x128xbf16, #tpu.memory_space<vmem>>, %arg3: memref<128x128xf32, #tpu.memory_space<vmem>>, %arg4: memref<128x128xbf16, #tpu.memory_space<vmem>>, %arg5: memref<1x128xf32, #tpu.memory_space<vmem>>, %arg6: memref<128x128xf32, #tpu.memory_space<vmem>>) attributes {dimension_semantics = [#tpu.dimension_semantics<parallel>, #tpu.dimension_semantics<arbitrary>], iteration_bounds = array<i64: 1, 1>, scalar_prefetch = 0 : i64, scratch_operands = 0 : i64, tpu.core_type = #tpu.core_type<tc>, window_params = [{transform_indices = @transform_0, window_bounds = array<i64: 128, 128>}, {transform_indices = @transform_1, window_bounds = array<i64: 128, 128>}, {pipeline_mode = #tpu.pipeline_mode<synchronous>, transform_indices = @transform_2, window_bounds = array<i64: 128, 128>}, {pipeline_mode = #tpu.pipeline_mode<synchronous>, transform_indices = @transform_3, window_bounds = array<i64: 1, 128>}, {transform_indices = @transform_4, window_bounds = array<i64: 128, 128>}]} {
    %c0_i32 = arith.constant 0 : i32
    %0 = arith.cmpi eq, %arg1, %c0_i32 : i32
    %1 = arith.extui %0 : i1 to i32
    %c0_i32_0 = arith.constant 0 : i32
    %2 = arith.cmpi ne, %1, %c0_i32_0 : i32
    scf.if %2 {
      %cst_13 = arith.constant 0.000000e+00 : f32
      %16 = vector.broadcast %cst_13 : f32 to vector<128x128xf32>
      %c0_14 = arith.constant 0 : index
      %c0_15 = arith.constant 0 : index
      %17 = vector.load %arg6[%c0_14, %c0_15] : memref<128x128xf32, #tpu.memory_space<vmem>>, vector<128x128xf32>
      tpu.vector_store %arg6[%c0_14, %c0_15], %16 {strides = array<i32>} : memref<128x128xf32, #tpu.memory_space<vmem>>, vector<128x128xf32>,
    } else {
    }
    %c0 = arith.constant 0 : index
    %c0_1 = arith.constant 0 : index
    %3 = vector.load %arg3[%c0, %c0_1] : memref<128x128xf32, #tpu.memory_space<vmem>>, vector<128x128xf32>
    %4 = arith.truncf %3 : vector<128x128xf32> to vector<128x128xbf16>
    %c0_2 = arith.constant 0 : index
    %c0_3 = arith.constant 0 : index
    %5 = vector.load %arg4[%c0_2, %c0_3] : memref<128x128xbf16, #tpu.memory_space<vmem>>, vector<128x128xbf16>
    %cst = arith.constant dense<0.000000e+00> : vector<128x128xf32>
    %6 = tpu.matmul %4, %5, %cst {dimension_numbers = #tpu.dot_dimension_numbers<[1], [0], [0], [1], [0, 0, 1, 1], [], []>} : vector<128x128xbf16>, vector<128x128xbf16>, vector<128x128xf32> -> vector<128x128xf32>
    %7 = arith.truncf %6 : vector<128x128xf32> to vector<128x128xbf16>
    %c0_4 = arith.constant 0 : index
    %c0_5 = arith.constant 0 : index
    %8 = vector.load %arg6[%c0_4, %c0_5] : memref<128x128xf32, #tpu.memory_space<vmem>>, vector<128x128xf32>
    %c0_6 = arith.constant 0 : index
    %c0_7 = arith.constant 0 : index
    %9 = vector.load %arg2[%c0_6, %c0_7] : memref<128x128xbf16, #tpu.memory_space<vmem>>, vector<128x128xbf16>
    %cst_8 = arith.constant dense<0.000000e+00> : vector<128x128xf32>
    %10 = tpu.matmul %9, %7, %cst_8 {dimension_numbers = #tpu.dot_dimension_numbers<[1], [0], [0], [1], [0, 0, 1, 1], [], []>} : vector<128x128xbf16>, vector<128x128xbf16>, vector<128x128xf32> -> vector<128x128xf32>
    %11 = arith.addf %8, %10 : vector<128x128xf32>
    %c0_9 = arith.constant 0 : index
    %c0_10 = arith.constant 0 : index
    %12 = vector.load %arg6[%c0_9, %c0_10] : memref<128x128xf32, #tpu.memory_space<vmem>>, vector<128x128xf32>
    tpu.vector_store %arg6[%c0_9, %c0_10], %11 {strides = array<i32>} : memref<128x128xf32, #tpu.memory_space<vmem>>, vector<128x128xf32>,
    %c0_i32_11 = arith.constant 0 : i32
    %13 = arith.cmpi eq, %arg1, %c0_i32_11 : i32
    %14 = arith.extui %13 : i1 to i32
    %c0_i32_12 = arith.constant 0 : i32
    %15 = arith.cmpi ne, %14, %c0_i32_12 : i32
    scf.if %15 {
      %c0_13 = arith.constant 0 : index
      %c0_14 = arith.constant 0 : index
      %16 = vector.load %arg6[%c0_13, %c0_14] : memref<128x128xf32, #tpu.memory_space<vmem>>, vector<128x128xf32>
      %c0_15 = arith.constant 0 : index
      %c0_16 = arith.constant 0 : index
      %17 = vector.load %arg5[%c0_15, %c0_16] : memref<1x128xf32, #tpu.memory_space<vmem>>, vector<1x128xf32>
      %18 = vector.broadcast %17 : vector<1x128xf32> to vector<128x128xf32>
      %19 = arith.addf %16, %18 : vector<128x128xf32>
      %cst_17 = arith.constant 0.000000e+00 : f32
      %20 = vector.broadcast %cst_17 : f32 to vector<128x128xf32>
      %21 = arith.maximumf %19, %20 : vector<128x128xf32>
      %c0_18 = arith.constant 0 : index
      %c0_19 = arith.constant 0 : index
      %22 = vector.load %arg6[%c0_18, %c0_19] : memref<128x128xf32, #tpu.memory_space<vmem>>, vector<128x128xf32>
      tpu.vector_store %arg6[%c0_18, %c0_19], %21 {strides = array<i32>} : memref<128x128xf32, #tpu.memory_space<vmem>>, vector<128x128xf32>,
    } else {
    }
    return
  }
  func.func @transform_0(%arg0: i32, %arg1: i32) -> (i32, i32) {
    %c0_i32 = arith.constant 0 : i32
    return %arg0, %arg1 : i32, i32
  }
  func.func @transform_1(%arg0: i32, %arg1: i32) -> (i32, i32) {
    %c0_i32 = arith.constant 0 : i32
    %c0_i32_0 = arith.constant 0 : i32
    return %arg1, %c0_i32 : i32, i32
  }
  func.func @transform_2(%arg0: i32, %arg1: i32) -> (i32, i32) {
    %c0_i32 = arith.constant 0 : i32
    %c0_i32_0 = arith.constant 0 : i32
    %c0_i32_1 = arith.constant 0 : i32
    return %c0_i32, %c0_i32_0 : i32, i32
  }
  func.func @transform_3(%arg0: i32, %arg1: i32) -> (i32, i32) {
    %c0_i32 = arith.constant 0 : i32
    %c0_i32_0 = arith.constant 0 : i32
    %c0_i32_1 = arith.constant 0 : i32
    return %c0_i32, %c0_i32_0 : i32, i32
  }
  func.func @transform_4(%arg0: i32, %arg1: i32) -> (i32, i32) {
    %c0_i32 = arith.constant 0 : i32
    %c0_i32_0 = arith.constant 0 : i32
    return %arg0, %c0_i32 : i32, i32
  }
}

module attributes {stable_mosaic.version = 11 : i64} {
  func.func @protein_tower_kernel(%arg0: i32, %arg1: memref<8x16x128xbf16, #tpu.memory_space<vmem>>, %arg2: memref<384x128xbf16, #tpu.memory_space<vmem>>, %arg3: memref<1x128xf32, #tpu.memory_space<vmem>>, %arg4: memref<384x128xbf16, #tpu.memory_space<vmem>>, %arg5: memref<1x128xf32, #tpu.memory_space<vmem>>, %arg6: memref<128x128xbf16, #tpu.memory_space<vmem>>, %arg7: memref<1x128xf32, #tpu.memory_space<vmem>>, %arg8: memref<8x128xf32, #tpu.memory_space<vmem>>) attributes {dimension_semantics = [#tpu.dimension_semantics<parallel>], iteration_bounds = array<i64: 1>, scalar_prefetch = 0 : i64, scratch_operands = 0 : i64, tpu.core_type = #tpu.core_type<tc>, window_params = [{transform_indices = @transform_0, window_bounds = array<i64: 8, 16, 128>}, {pipeline_mode = #tpu.pipeline_mode<synchronous>, transform_indices = @transform_1, window_bounds = array<i64: 384, 128>}, {pipeline_mode = #tpu.pipeline_mode<synchronous>, transform_indices = @transform_2, window_bounds = array<i64: 1, 128>}, {pipeline_mode = #tpu.pipeline_mode<synchronous>, transform_indices = @transform_3, window_bounds = array<i64: 384, 128>}, {pipeline_mode = #tpu.pipeline_mode<synchronous>, transform_indices = @transform_4, window_bounds = array<i64: 1, 128>}, {pipeline_mode = #tpu.pipeline_mode<synchronous>, transform_indices = @transform_5, window_bounds = array<i64: 128, 128>}, {pipeline_mode = #tpu.pipeline_mode<synchronous>, transform_indices = @transform_6, window_bounds = array<i64: 1, 128>}, {transform_indices = @transform_7, window_bounds = array<i64: 8, 128>}]} {
    %c0 = arith.constant 0 : index
    %c0_0 = arith.constant 0 : index
    %c0_1 = arith.constant 0 : index
    %0 = vector.load %arg1[%c0, %c0_0, %c0_1] : memref<8x16x128xbf16, #tpu.memory_space<vmem>>, vector<8x16x128xbf16>
    %1 = vector.extract_strided_slice %0 {offsets = [0, 0, 0], sizes = [8, 14, 128], strides = [1, 1, 1]} : vector<8x16x128xbf16> to vector<8x14x128xbf16>
    %2 = vector.extract_strided_slice %0 {offsets = [0, 1, 0], sizes = [8, 14, 128], strides = [1, 1, 1]} : vector<8x16x128xbf16> to vector<8x14x128xbf16>
    %3 = vector.extract_strided_slice %0 {offsets = [0, 2, 0], sizes = [8, 14, 128], strides = [1, 1, 1]} : vector<8x16x128xbf16> to vector<8x14x128xbf16>
    %4 = tpu.concatenate %1, %2, %3 in 2 : vector<8x14x128xbf16>, vector<8x14x128xbf16>, vector<8x14x128xbf16> -> vector<8x14x384xbf16>
    %5 = vector.shape_cast %4 : vector<8x14x384xbf16> to vector<112x384xbf16>
    %c0_2 = arith.constant 0 : index
    %c0_3 = arith.constant 0 : index
    %6 = vector.load %arg2[%c0_2, %c0_3] : memref<384x128xbf16, #tpu.memory_space<vmem>>, vector<384x128xbf16>
    %cst = arith.constant dense<0.000000e+00> : vector<112x128xf32>
    %7 = tpu.matmul %5, %6, %cst {dimension_numbers = #tpu.dot_dimension_numbers<[1], [0], [0], [1], [0, 0, 1, 1], [], []>} : vector<112x384xbf16>, vector<384x128xbf16>, vector<112x128xf32> -> vector<112x128xf32>
    %c0_4 = arith.constant 0 : index
    %c0_5 = arith.constant 0 : index
    %8 = vector.load %arg3[%c0_4, %c0_5] : memref<1x128xf32, #tpu.memory_space<vmem>>, vector<1x128xf32>
    %9 = vector.broadcast %8 : vector<1x128xf32> to vector<112x128xf32>
    %10 = arith.addf %7, %9 : vector<112x128xf32>
    %cst_6 = arith.constant 0.000000e+00 : f32
    %11 = vector.broadcast %cst_6 : f32 to vector<112x128xf32>
    %12 = arith.maximumf %10, %11 : vector<112x128xf32>
    %13 = arith.truncf %12 : vector<112x128xf32> to vector<112x128xbf16>
    %14 = vector.shape_cast %13 : vector<112x128xbf16> to vector<8x14x128xbf16>
    %15 = vector.extract_strided_slice %14 {offsets = [0, 0, 0], sizes = [8, 12, 128], strides = [1, 1, 1]} : vector<8x14x128xbf16> to vector<8x12x128xbf16>
    %16 = vector.extract_strided_slice %14 {offsets = [0, 1, 0], sizes = [8, 12, 128], strides = [1, 1, 1]} : vector<8x14x128xbf16> to vector<8x12x128xbf16>
    %17 = vector.extract_strided_slice %14 {offsets = [0, 2, 0], sizes = [8, 12, 128], strides = [1, 1, 1]} : vector<8x14x128xbf16> to vector<8x12x128xbf16>
    %18 = tpu.concatenate %15, %16, %17 in 2 : vector<8x12x128xbf16>, vector<8x12x128xbf16>, vector<8x12x128xbf16> -> vector<8x12x384xbf16>
    %19 = vector.shape_cast %18 : vector<8x12x384xbf16> to vector<96x384xbf16>
    %c0_7 = arith.constant 0 : index
    %c0_8 = arith.constant 0 : index
    %20 = vector.load %arg4[%c0_7, %c0_8] : memref<384x128xbf16, #tpu.memory_space<vmem>>, vector<384x128xbf16>
    %cst_9 = arith.constant dense<0.000000e+00> : vector<96x128xf32>
    %21 = tpu.matmul %19, %20, %cst_9 {dimension_numbers = #tpu.dot_dimension_numbers<[1], [0], [0], [1], [0, 0, 1, 1], [], []>} : vector<96x384xbf16>, vector<384x128xbf16>, vector<96x128xf32> -> vector<96x128xf32>
    %c0_10 = arith.constant 0 : index
    %c0_11 = arith.constant 0 : index
    %22 = vector.load %arg5[%c0_10, %c0_11] : memref<1x128xf32, #tpu.memory_space<vmem>>, vector<1x128xf32>
    %23 = vector.broadcast %22 : vector<1x128xf32> to vector<96x128xf32>
    %24 = arith.addf %21, %23 : vector<96x128xf32>
    %cst_12 = arith.constant 0.000000e+00 : f32
    %25 = vector.broadcast %cst_12 : f32 to vector<96x128xf32>
    %26 = arith.maximumf %24, %25 : vector<96x128xf32>
    %27 = vector.shape_cast %26 : vector<96x128xf32> to vector<8x12x128xf32>
    %cst_13 = arith.constant dense<0xFF800000> : vector<8x128xf32>
    %28 = vector.multi_reduction <maximumf>, %27, %cst_13 [1] : vector<8x12x128xf32> to vector<8x128xf32>
    %29 = arith.truncf %28 : vector<8x128xf32> to vector<8x128xbf16>
    %c0_14 = arith.constant 0 : index
    %c0_15 = arith.constant 0 : index
    %30 = vector.load %arg6[%c0_14, %c0_15] : memref<128x128xbf16, #tpu.memory_space<vmem>>, vector<128x128xbf16>
    %cst_16 = arith.constant dense<0.000000e+00> : vector<8x128xf32>
    %31 = tpu.matmul %29, %30, %cst_16 {dimension_numbers = #tpu.dot_dimension_numbers<[1], [0], [0], [1], [0, 0, 1, 1], [], []>} : vector<8x128xbf16>, vector<128x128xbf16>, vector<8x128xf32> -> vector<8x128xf32>
    %c0_17 = arith.constant 0 : index
    %c0_18 = arith.constant 0 : index
    %32 = vector.load %arg7[%c0_17, %c0_18] : memref<1x128xf32, #tpu.memory_space<vmem>>, vector<1x128xf32>
    %33 = vector.broadcast %32 : vector<1x128xf32> to vector<8x128xf32>
    %34 = arith.addf %31, %33 : vector<8x128xf32>
    %cst_19 = arith.constant 0.000000e+00 : f32
    %35 = vector.broadcast %cst_19 : f32 to vector<8x128xf32>
    %36 = arith.maximumf %34, %35 : vector<8x128xf32>
    %c0_20 = arith.constant 0 : index
    %c0_21 = arith.constant 0 : index
    %37 = vector.load %arg8[%c0_20, %c0_21] : memref<8x128xf32, #tpu.memory_space<vmem>>, vector<8x128xf32>
    tpu.vector_store %arg8[%c0_20, %c0_21], %36 {strides = array<i32>} : memref<8x128xf32, #tpu.memory_space<vmem>>, vector<8x128xf32>,
    return
  }
  func.func @transform_0(%arg0: i32) -> (i32, i32, i32) {
    %c0_i32 = arith.constant 0 : i32
    %c0_i32_0 = arith.constant 0 : i32
    %c0_i32_1 = arith.constant 0 : i32
    return %arg0, %c0_i32, %c0_i32_0 : i32, i32, i32
  }
  func.func @transform_1(%arg0: i32) -> (i32, i32) {
    %c0_i32 = arith.constant 0 : i32
    %c0_i32_0 = arith.constant 0 : i32
    %c0_i32_1 = arith.constant 0 : i32
    return %c0_i32, %c0_i32_0 : i32, i32
  }
  func.func @transform_2(%arg0: i32) -> (i32, i32) {
    %c0_i32 = arith.constant 0 : i32
    %c0_i32_0 = arith.constant 0 : i32
    %c0_i32_1 = arith.constant 0 : i32
    return %c0_i32, %c0_i32_0 : i32, i32
  }
  func.func @transform_3(%arg0: i32) -> (i32, i32) {
    %c0_i32 = arith.constant 0 : i32
    %c0_i32_0 = arith.constant 0 : i32
    %c0_i32_1 = arith.constant 0 : i32
    return %c0_i32, %c0_i32_0 : i32, i32
  }
  func.func @transform_4(%arg0: i32) -> (i32, i32) {
    %c0_i32 = arith.constant 0 : i32
    %c0_i32_0 = arith.constant 0 : i32
    %c0_i32_1 = arith.constant 0 : i32
    return %c0_i32, %c0_i32_0 : i32, i32
  }
  func.func @transform_5(%arg0: i32) -> (i32, i32) {
    %c0_i32 = arith.constant 0 : i32
    %c0_i32_0 = arith.constant 0 : i32
    %c0_i32_1 = arith.constant 0 : i32
    return %c0_i32, %c0_i32_0 : i32, i32
  }
  func.func @transform_6(%arg0: i32) -> (i32, i32) {
    %c0_i32 = arith.constant 0 : i32
    %c0_i32_0 = arith.constant 0 : i32
    %c0_i32_1 = arith.constant 0 : i32
    return %c0_i32, %c0_i32_0 : i32, i32
  }
  func.func @transform_7(%arg0: i32) -> (i32, i32) {
    %c0_i32 = arith.constant 0 : i32
    %c0_i32_0 = arith.constant 0 : i32
    return %arg0, %c0_i32 : i32, i32
  }
}

module attributes {stable_mosaic.version = 11 : i64} {
  func.func @ipd_kernel(%arg0: i32, %arg1: memref<1024x1xi32, #tpu.memory_space<vmem>>, %arg2: memref<1024x1xi32, #tpu.memory_space<vmem>>, %arg3: memref<128x128xf32, #tpu.memory_space<vmem>>, %arg4: memref<128x128xf32, #tpu.memory_space<vmem>>, %arg5: memref<8x128xf32, #tpu.memory_space<vmem>>) attributes {dimension_semantics = [#tpu.dimension_semantics<parallel>], iteration_bounds = array<i64: 1>, scalar_prefetch = 0 : i64, scratch_operands = 0 : i64, tpu.core_type = #tpu.core_type<tc>, window_params = [{transform_indices = @transform_0, window_bounds = array<i64: 1024, 1>}, {transform_indices = @transform_1, window_bounds = array<i64: 1024, 1>}, {pipeline_mode = #tpu.pipeline_mode<synchronous>, transform_indices = @transform_2, window_bounds = array<i64: 128, 128>}, {pipeline_mode = #tpu.pipeline_mode<synchronous>, transform_indices = @transform_3, window_bounds = array<i64: 128, 128>}, {transform_indices = @transform_4, window_bounds = array<i64: 8, 128>}]} {
    %c0 = arith.constant 0 : index
    %c0_0 = arith.constant 0 : index
    %0 = vector.load %arg1[%c0, %c0_0] : memref<1024x1xi32, #tpu.memory_space<vmem>>, vector<1024x1xi32>
    %1 = tpu.iota {dimensions = array<i32: 1>} : vector<1024x128xi32>
    %2 = vector.broadcast %0 : vector<1024x1xi32> to vector<1024x128xi32>
    %3 = arith.cmpi eq, %2, %1 : vector<1024x128xi32>
    %4 = arith.extui %3 : vector<1024x128xi1> to vector<1024x128xi32>
    %5 = arith.sitofp %4 : vector<1024x128xi32> to vector<1024x128xf32>
    %c0_1 = arith.constant 0 : index
    %c0_2 = arith.constant 0 : index
    %6 = vector.load %arg2[%c0_1, %c0_2] : memref<1024x1xi32, #tpu.memory_space<vmem>>, vector<1024x1xi32>
    %7 = tpu.iota {dimensions = array<i32: 1>} : vector<1024x128xi32>
    %8 = vector.broadcast %6 : vector<1024x1xi32> to vector<1024x128xi32>
    %9 = arith.cmpi eq, %8, %7 : vector<1024x128xi32>
    %10 = arith.extui %9 : vector<1024x128xi1> to vector<1024x128xi32>
    %11 = arith.sitofp %10 : vector<1024x128xi32> to vector<1024x128xf32>
    %c0_3 = arith.constant 0 : index
    %c0_4 = arith.constant 0 : index
    %12 = vector.load %arg3[%c0_3, %c0_4] : memref<128x128xf32, #tpu.memory_space<vmem>>, vector<128x128xf32>
    %cst = arith.constant dense<0.000000e+00> : vector<1024x128xf32>
    %13 = tpu.matmul %5, %12, %cst {dimension_numbers = #tpu.dot_dimension_numbers<[1], [0], [0], [1], [0, 0, 1, 1], [], []>} : vector<1024x128xf32>, vector<128x128xf32>, vector<1024x128xf32> -> vector<1024x128xf32>
    %c0_5 = arith.constant 0 : index
    %c0_6 = arith.constant 0 : index
    %14 = vector.load %arg4[%c0_5, %c0_6] : memref<128x128xf32, #tpu.memory_space<vmem>>, vector<128x128xf32>
    %cst_7 = arith.constant dense<0.000000e+00> : vector<1024x128xf32>
    %15 = tpu.matmul %11, %14, %cst_7 {dimension_numbers = #tpu.dot_dimension_numbers<[1], [0], [0], [1], [0, 0, 1, 1], [], []>} : vector<1024x128xf32>, vector<128x128xf32>, vector<1024x128xf32> -> vector<1024x128xf32>
    %16 = arith.mulf %13, %15 : vector<1024x128xf32>
    %17 = vector.shape_cast %16 : vector<1024x128xf32> to vector<8x128x128xf32>
    %cst_8 = arith.constant dense<0.000000e+00> : vector<8x128xf32>
    %18 = vector.multi_reduction <add>, %17, %cst_8 [2] : vector<8x128x128xf32> to vector<8x128xf32>
    %cst_9 = arith.constant 0.000000e+00 : f32
    %19 = vector.broadcast %cst_9 : f32 to vector<8x128xf32>
    %20 = arith.subf %19, %18 : vector<8x128xf32>
    %21 = math.exp %20 : vector<8x128xf32>
    %cst_10 = arith.constant 1.000000e+00 : f32
    %22 = vector.broadcast %cst_10 : f32 to vector<8x128xf32>
    %23 = arith.addf %22, %21 : vector<8x128xf32>
    %cst_11 = arith.constant 1.000000e+00 : f32
    %24 = vector.broadcast %cst_11 : f32 to vector<8x128xf32>
    %25 = arith.divf %24, %23 : vector<8x128xf32>
    %c0_12 = arith.constant 0 : index
    %c0_13 = arith.constant 0 : index
    %26 = vector.load %arg5[%c0_12, %c0_13] : memref<8x128xf32, #tpu.memory_space<vmem>>, vector<8x128xf32>
    tpu.vector_store %arg5[%c0_12, %c0_13], %25 {strides = array<i32>} : memref<8x128xf32, #tpu.memory_space<vmem>>, vector<8x128xf32>,
    return
  }
  func.func @transform_0(%arg0: i32) -> (i32, i32) {
    %c0_i32 = arith.constant 0 : i32
    %c0_i32_0 = arith.constant 0 : i32
    return %arg0, %c0_i32 : i32, i32
  }
  func.func @transform_1(%arg0: i32) -> (i32, i32) {
    %c0_i32 = arith.constant 0 : i32
    %c0_i32_0 = arith.constant 0 : i32
    return %arg0, %c0_i32 : i32, i32
  }
  func.func @transform_2(%arg0: i32) -> (i32, i32) {
    %c0_i32 = arith.constant 0 : i32
    %c0_i32_0 = arith.constant 0 : i32
    %c0_i32_1 = arith.constant 0 : i32
    return %c0_i32, %c0_i32_0 : i32, i32
  }
  func.func @transform_3(%arg0: i32) -> (i32, i32) {
    %c0_i32 = arith.constant 0 : i32
    %c0_i32_0 = arith.constant 0 : i32
    %c0_i32_1 = arith.constant 0 : i32
    return %c0_i32, %c0_i32_0 : i32, i32
  }
  func.func @transform_4(%arg0: i32) -> (i32, i32) {
    %c0_i32 = arith.constant 0 : i32
    %c0_i32_0 = arith.constant 0 : i32
    return %arg0, %c0_i32 : i32, i32
  }
}

</mosaic_0001>

<bundles_post_ra>
// kernel: strgnn_forward.5
= control target key start
LH: loop header
LB: loop body
LE: loop exit
PB: predicated region body
PF: predicated region fallthrough
CT: control target
= control target key end

     0   :  { %s499_s1 = inlined_call_operand.vmem [shape: bf16[128,128], index: 1, kind: input, shape index: {}]   ;;  %s500_s0 = inlined_call_operand.vmem [shape: bf16[128,128], index: 0, kind: input, shape index: {}]   ;;  %s501_s2 = inlined_call_operand.vmem [shape: f32[1,128], index: 2, kind: input, shape index: {}]   ;;  %s502_s3 = inlined_call_operand.vmem [shape: f32[128,128], index: 3, kind: output, shape index: {}]  }
   0x1   :  { %v364_v0 = vld [vmem:[%s499_s1] sm:$0xff]   ;;  %v365_v1 = vld [vmem:[%s499_s1 + $0x8] sm:$0xff]   ;;  %v366_v2 = vld [vmem:[%s499_s1 + $0x10] sm:$0xff]  }
   0x2   :  { %316 = vmatprep.subr.bf16.mxu0 %v364_v0  ;;  %348 = vmatprep.subr.bf16.mxu1 %v364_v0  ;;  %v367_v3 = vld [vmem:[%s499_s1 + $0x18] sm:$0xff]   ;;  %v372_v4 = vld [vmem:[%s500_s0] sm:$0xff]   ;;  %v369_v7 = vld [vmem:[%s499_s1 + $0x28] sm:$0xff]  }
   0x3   :  { %317 = vmatpush3.bf16.msra.mxu0 %v364_v0  ;;  %356 = vmatpush3.bf16.msra.mxu1 %v364_v0  ;;  %v373_v5 = vld [vmem:[%s500_s0 + $0x20] sm:$0xff]   ;;  %v370_v8 = vld [vmem:[%s499_s1 + $0x30] sm:$0xff]   ;;  %v371_v9 = vld [vmem:[%s499_s1 + $0x38] sm:$0xff]  }
   0x4   :  { %318 = vmatprep.subr.bf16.mxu0 %v365_v1  ;;  %349 = vmatprep.subr.bf16.mxu1 %v365_v1  ;;  %v368_v6 = vld [vmem:[%s499_s1 + $0x20] sm:$0xff]   ;;  %v374_v10 = vld [vmem:[%s500_s0 + $0x8] sm:$0xff]   ;;  %v376_v12 = vld [vmem:[%s500_s0 + $0x10] sm:$0xff]  }
   0x5   :  { %332 = vmatprep.mubr.bf16.mxu0 %v372_v4  ;;  %340 = vmatprep.mubr.bf16.mxu1 %v373_v5  ;;  %v375_v11 = vld [vmem:[%s500_s0 + $0x28] sm:$0xff]   ;;  %v377_v13 = vld [vmem:[%s500_s0 + $0x30] sm:$0xff]   ;;  %v378_v14 = vld [vmem:[%s500_s0 + $0x18] sm:$0xff]  }
   0x6   :  { %v379_v15 = vld [vmem:[%s500_s0 + $0x38] sm:$0xff]   ;;  %v283_v16 = vld [vmem:[%s501_s2] ss:$0 sm:$0xff] }
   0x7   :  { %319 = vmatpush3.bf16.msra.mxu0 %v365_v1  ;;  %357 = vmatpush3.bf16.msra.mxu1 %v365_v1 }
   0x8   :  { %320 = vmatprep.subr.bf16.mxu0 %v366_v2  ;;  %350 = vmatprep.subr.bf16.mxu1 %v366_v2 }
   0xb   :  { %321 = vmatpush3.bf16.msra.mxu0 %v366_v2  ;;  %358 = vmatpush3.bf16.msra.mxu1 %v366_v2 }
   0xc   :  { %322 = vmatprep.subr.bf16.mxu0 %v367_v3  ;;  %351 = vmatprep.subr.bf16.mxu1 %v367_v3 }
   0xf   :  { %323 = vmatpush3.bf16.msra.mxu0 %v367_v3  ;;  %359 = vmatpush3.bf16.msra.mxu1 %v367_v3 }
  0x10   :  { %324 = vmatprep.subr.bf16.mxu0 %v368_v6  ;;  %352 = vmatprep.subr.bf16.mxu1 %v368_v6 }
  0x13   :  { %325 = vmatpush3.bf16.msra.mxu0 %v368_v6  ;;  %360 = vmatpush3.bf16.msra.mxu1 %v368_v6 }
  0x14   :  { %326 = vmatprep.subr.bf16.mxu0 %v369_v7  ;;  %353 = vmatprep.subr.bf16.mxu1 %v369_v7 }
  0x17   :  { %327 = vmatpush3.bf16.msra.mxu0 %v369_v7  ;;  %361 = vmatpush3.bf16.msra.mxu1 %v369_v7 }
  0x18   :  { %328 = vmatprep.subr.bf16.mxu0 %v370_v8  ;;  %354 = vmatprep.subr.bf16.mxu1 %v370_v8 }
  0x1b   :  { %329 = vmatpush3.bf16.msra.mxu0 %v370_v8  ;;  %362 = vmatpush3.bf16.msra.mxu1 %v370_v8 }
  0x1c   :  { %330 = vmatprep.subr.bf16.mxu0 %v371_v9  ;;  %355 = vmatprep.subr.bf16.mxu1 %v371_v9 }
  0x1f   :  { %331 = vmatpush3.bf16.msra.mxu0 %v371_v9  ;;  %363 = vmatpush3.bf16.msra.mxu1 %v371_v9 }
  0x22   :  { %333 = vmatmul.mubr.bf16.vlgmr.msra.gmra.mrb[0].mxu0 %v374_v10  ;;  %341 = vmatmul.mubr.bf16.vlgmr.msra.gmra.mrb[0].mxu1 %v375_v11 }
  0x23   :  { %336 = vmatprep.mubr.bf16.mxu0 %v376_v12  ;;  %344 = vmatprep.mubr.bf16.mxu1 %v377_v13 }
  0x2a   :  { %337 = vmatmul.mubr.bf16.gmra.mrb[4].mxu0 %v378_v14  ;;  %345 = vmatmul.mubr.bf16.gmra.mrb[4].mxu1 %v379_v15 }
  0xf5   :  { %v334_v17 = vpop.f32.mrb[0].mxu0  ;;  %v342_v18 = vpop.f32.mrb[0].mxu1 }
  0xf6   :  { %v193_v19 = vadd.f32 %v334_v17, %v283_v16  ;;  %v225_v20 = vadd.f32 %v342_v18, %v283_v16  ;;  %v184_v21 = vpop.f32.mrb[1].mxu0  ;;  %v216_v22 = vpop.f32.mrb[1].mxu1 }
  0xf7   :  { %v185_v23 = vadd.f32 %v283_v16, %v184_v21  ;;  %v217_v24 = vadd.f32 %v283_v16, %v216_v22  ;;  %v335_v25 = vpop.f32.mrb[2].mxu0  ;;  %v343_v26 = vpop.f32.mrb[2].mxu1 }
  0xf8   :  { %v249_v27 = vmax.f32 %v193_v19, 0.0  ;;  %v257_v28 = vmax.f32 %v225_v20, 0.0  ;;  %v196_v29 = vadd.f32 %v335_v25, %v283_v16  ;;  %v228_v30 = vadd.f32 %v343_v26, %v283_v16  ;;  %v187_v31 = vpop.f32.mrb[3].mxu0  ;;  %v219_v32 = vpop.f32.mrb[3].mxu1 }
  0xf9   :  { %v247_v33 = vmax.f32 %v185_v23, 0.0  ;;  %v255_v34 = vmax.f32 %v217_v24, 0.0  ;;  %v188_v35 = vadd.f32 %v283_v16, %v187_v31  ;;  %v220_v36 = vadd.f32 %v283_v16, %v219_v32 }
  0xfa   :  { %265 = vst [vmem:[%s502_s3 + $0x10] sm:$0xff] %v249_v27  ;;  %273 = vst [vmem:[%s502_s3 + $0x50] sm:$0xff] %v257_v28  ;;  %v250_v37 = vmax.f32 %v196_v29, 0.0  ;;  %v258_v38 = vmax.f32 %v228_v30, 0.0 }
  0xfb   :  { %263 = vst [vmem:[%s502_s3] sm:$0xff] %v247_v33  ;;  %271 = vst [vmem:[%s502_s3 + $0x40] sm:$0xff] %v255_v34  ;;  %v248_v39 = vmax.f32 %v188_v35, 0.0  ;;  %v256_v40 = vmax.f32 %v220_v36, 0.0 }
  0xfc   :  { %266 = vst [vmem:[%s502_s3 + $0x18] sm:$0xff] %v250_v37  ;;  %274 = vst [vmem:[%s502_s3 + $0x58] sm:$0xff] %v258_v38 }
  0xfd   :  { %264 = vst [vmem:[%s502_s3 + $0x8] sm:$0xff] %v248_v39  ;;  %272 = vst [vmem:[%s502_s3 + $0x48] sm:$0xff] %v256_v40  ;;  %v338_v41 = vpop.f32.mrb[4].mxu0  ;;  %v346_v42 = vpop.f32.mrb[4].mxu1 }
  0xfe   :  { %v209_v43 = vadd.f32 %v338_v41, %v283_v16  ;;  %v241_v44 = vadd.f32 %v346_v42, %v283_v16  ;;  %v200_v45 = vpop.f32.mrb[5].mxu0  ;;  %v232_v46 = vpop.f32.mrb[5].mxu1 }
  0xff   :  { %v201_v47 = vadd.f32 %v283_v16, %v200_v45  ;;  %v233_v48 = vadd.f32 %v283_v16, %v232_v46  ;;  %v339_v49 = vpop.f32.mrb[6].mxu0  ;;  %v347_v50 = vpop.f32.mrb[6].mxu1 }
 0x100   :  { %v253_v51 = vmax.f32 %v209_v43, 0.0  ;;  %v261_v52 = vmax.f32 %v241_v44, 0.0  ;;  %v212_v53 = vadd.f32 %v339_v49, %v283_v16  ;;  %v244_v54 = vadd.f32 %v347_v50, %v283_v16  ;;  %v203_v55 = vpop.f32.mrb[7].mxu0  ;;  %v235_v56 = vpop.f32.mrb[7].mxu1 }
 0x101   :  { %v251_v57 = vmax.f32 %v201_v47, 0.0  ;;  %v259_v58 = vmax.f32 %v233_v48, 0.0  ;;  %v204_v59 = vadd.f32 %v283_v16, %v203_v55  ;;  %v236_v60 = vadd.f32 %v283_v16, %v235_v56 }
 0x102   :  { %269 = vst [vmem:[%s502_s3 + $0x30] sm:$0xff] %v253_v51  ;;  %277 = vst [vmem:[%s502_s3 + $0x70] sm:$0xff] %v261_v52  ;;  %v254_v61 = vmax.f32 %v212_v53, 0.0  ;;  %v262_v62 = vmax.f32 %v244_v54, 0.0 }
 0x103   :  { %267 = vst [vmem:[%s502_s3 + $0x20] sm:$0xff] %v251_v57  ;;  %275 = vst [vmem:[%s502_s3 + $0x60] sm:$0xff] %v259_v58  ;;  %v252_v63 = vmax.f32 %v204_v59, 0.0  ;;  %v260_v0 = vmax.f32 %v236_v60, 0.0 }
 0x104   :  { %270 = vst [vmem:[%s502_s3 + $0x38] sm:$0xff] %v254_v61  ;;  %278 = vst [vmem:[%s502_s3 + $0x78] sm:$0xff] %v262_v62 }
 0x105   :  { %268 = vst [vmem:[%s502_s3 + $0x28] sm:$0xff] %v252_v63  ;;  %276 = vst [vmem:[%s502_s3 + $0x68] sm:$0xff] %v260_v0 }

// kernel: strgnn_forward.7
= control target key start
LH: loop header
LB: loop body
LE: loop exit
PB: predicated region body
PF: predicated region fallthrough
CT: control target
= control target key end

     0   :  { %s820_s2 = inlined_call_operand.vmem [shape: bf16[128,128], index: 2, kind: input, shape index: {}]   ;;  %s821_s1 = inlined_call_operand.vmem [shape: f32[128,128], index: 1, kind: input, shape index: {}]   ;;  %s822_s0 = inlined_call_operand.vmem [shape: bf16[128,128], index: 0, kind: input, shape index: {}]   ;;  %s823_s3 = inlined_call_operand.vmem [shape: f32[1,128], index: 3, kind: input, shape index: {}]   ;;  %s824_s4 = inlined_call_operand.vmem [shape: f32[128,128], index: 4, kind: output, shape index: {}]  }
   0x1   :  { %v632_v0 = vld [vmem:[%s820_s2] sm:$0xff]   ;;  %v633_v1 = vld [vmem:[%s820_s2 + $0x8] sm:$0xff]   ;;  %v634_v2 = vld [vmem:[%s820_s2 + $0x10] sm:$0xff]  }
   0x2   :  { %567 = vmatprep.subr.bf16.mxu0 %v632_v0  ;;  %v635_v3 = vld [vmem:[%s820_s2 + $0x18] sm:$0xff]   ;;  %v38_v4 = vld [vmem:[%s821_s1] sm:$0xff]  ;;  %v39_v5 = vld [vmem:[%s821_s1 + $0x8] sm:$0xff] }
   0x3   :  { %568 = vmatpush3.bf16.msra.mxu0 %v632_v0  ;;  %v54_v6 = vpack.c.bf16 %v39_v5, %v38_v4  ;;  %v636_v7 = vld [vmem:[%s820_s2 + $0x20] sm:$0xff]   ;;  %v637_v8 = vld [vmem:[%s820_s2 + $0x28] sm:$0xff]   ;;  %v638_v9 = vld [vmem:[%s820_s2 + $0x30] sm:$0xff]  }
   0x4   :  { %569 = vmatprep.subr.bf16.mxu0 %v633_v1  ;;  %v639_v10 = vld [vmem:[%s820_s2 + $0x38] sm:$0xff]   ;;  %v40_v11 = vld [vmem:[%s821_s1 + $0x10] sm:$0xff]  ;;  %v42_v13 = vld [vmem:[%s821_s1 + $0x20] sm:$0xff] }
   0x5   :  { %583 = vmatprep.mubr.bf16.mxu0 %v54_v6  ;;  %v41_v12 = vld [vmem:[%s821_s1 + $0x18] sm:$0xff]  ;;  %v43_v14 = vld [vmem:[%s821_s1 + $0x28] sm:$0xff]  ;;  %v44_v17 = vld [vmem:[%s821_s1 + $0x30] sm:$0xff] }
   0x6   :  { %v55_v15 = vpack.c.bf16 %v41_v12, %v40_v11  ;;  %v56_v16 = vpack.c.bf16 %v43_v14, %v42_v13  ;;  %v45_v18 = vld [vmem:[%s821_s1 + $0x38] sm:$0xff]  ;;  %v46_v19 = vld [vmem:[%s821_s1 + $0x40] sm:$0xff]  ;;  %v47_v20 = vld [vmem:[%s821_s1 + $0x48] sm:$0xff] }
   0x7   :  { %570 = vmatpush3.bf16.msra.mxu0 %v633_v1  ;;  %v57_v21 = vpack.c.bf16 %v45_v18, %v44_v17  ;;  %v58_v22 = vpack.c.bf16 %v47_v20, %v46_v19  ;;  %v48_v23 = vld [vmem:[%s821_s1 + $0x50] sm:$0xff]  ;;  %v49_v24 = vld [vmem:[%s821_s1 + $0x58] sm:$0xff]  ;;  %v50_v25 = vld [vmem:[%s821_s1 + $0x60] sm:$0xff] }
   0x8   :  { %571 = vmatprep.subr.bf16.mxu0 %v634_v2  ;;  %v51_v26 = vld [vmem:[%s821_s1 + $0x68] sm:$0xff]  ;;  %v59_v27 = vpack.c.bf16 %v49_v24, %v48_v23  ;;  %v52_v29 = vld [vmem:[%s821_s1 + $0x70] sm:$0xff]  ;;  %v53_v30 = vld [vmem:[%s821_s1 + $0x78] sm:$0xff] }
   0x9   :  { %v60_v28 = vpack.c.bf16 %v51_v26, %v50_v25  ;;  %v61_v31 = vpack.c.bf16 %v53_v30, %v52_v29  ;;  %v640_v32 = vld [vmem:[%s822_s0] sm:$0xff]   ;;  %v641_v57 = vld [vmem:[%s822_s0 + $0x8] sm:$0xff]   ;;  %v642_v58 = vld [vmem:[%s822_s0 + $0x10] sm:$0xff]  }
   0xa   :  { %615 = vmatprep.mubr.bf16.mxu1 %v640_v32  ;;  %v643_v59 = vld [vmem:[%s822_s0 + $0x18] sm:$0xff]   ;;  %v644_v60 = vld [vmem:[%s822_s0 + $0x20] sm:$0xff]   ;;  %v645_v61 = vld [vmem:[%s822_s0 + $0x28] sm:$0xff]  }
   0xb   :  { %572 = vmatpush3.bf16.msra.mxu0 %v634_v2  ;;  %v646_v62 = vld [vmem:[%s822_s0 + $0x30] sm:$0xff]   ;;  %v647_v63 = vld [vmem:[%s822_s0 + $0x38] sm:$0xff]   ;;  %v534_v1 = vld [vmem:[%s823_s3] ss:$0 sm:$0xff] }
   0xc   :  { %573 = vmatprep.subr.bf16.mxu0 %v635_v3 }
   0xf   :  { %574 = vmatpush3.bf16.msra.mxu0 %v635_v3 }
  0x10   :  { %575 = vmatprep.subr.bf16.mxu0 %v636_v7 }
  0x13   :  { %576 = vmatpush3.bf16.msra.mxu0 %v636_v7 }
  0x14   :  { %577 = vmatprep.subr.bf16.mxu0 %v637_v8 }
  0x17   :  { %578 = vmatpush3.bf16.msra.mxu0 %v637_v8 }
  0x18   :  { %579 = vmatprep.subr.bf16.mxu0 %v638_v9 }
  0x1b   :  { %580 = vmatpush3.bf16.msra.mxu0 %v638_v9 }
  0x1c   :  { %581 = vmatprep.subr.bf16.mxu0 %v639_v10 }
  0x1f   :  { %582 = vmatpush3.bf16.msra.mxu0 %v639_v10 }
  0x22   :  { %584 = vmatmul.mubr.bf16.vlgmr.msra.gmra.mrb[0].mxu0 %v55_v15 }
  0x23   :  { %587 = vmatprep.mubr.bf16.mxu0 %v56_v16 }
  0x2a   :  { %588 = vmatmul.mubr.bf16.gmra.mrb[4].mxu0 %v57_v21 }
  0x2b   :  { %591 = vmatprep.mubr.bf16.mxu0 %v58_v22 }
  0x32   :  { %592 = vmatmul.mubr.bf16.gmra.mrb[8].mxu0 %v59_v27 }
  0x33   :  { %595 = vmatprep.mubr.bf16.mxu0 %v60_v28 }
  0x3a   :  { %596 = vmatmul.mubr.bf16.gmra.mrb[12].mxu0 %v61_v31 }
  0xf5   :  { %v585_v33 = vpop.f32.mrb[0].mxu0 }
  0xf6   :  { %v160_v34 = vpop.f32.mrb[1].mxu0 }
  0xf7   :  { %v586_v35 = vpop.f32.mrb[2].mxu0 }
  0xf8   :  { %v224_v36 = vpack.c.bf16 %v586_v35, %v585_v33  ;;  %v163_v37 = vpop.f32.mrb[3].mxu0 }
  0xf9   :  { %v223_v38 = vpack.c.bf16 %v163_v37, %v160_v34 }
  0xfb   :  { %599 = vmatprep.subr.bf16.mxu1 %v223_v38 }
  0xfc   :  { %600 = vmatpush3.bf16.msra.mxu1 %v223_v38 }
  0xfd   :  { %v589_v39 = vpop.f32.mrb[4].mxu0  ;;  %601 = vmatprep.subr.bf16.mxu1 %v224_v36 }
  0xfe   :  { %v176_v40 = vpop.f32.mrb[5].mxu0 }
  0xff   :  { %v590_v41 = vpop.f32.mrb[6].mxu0 }
 0x100   :  { %v226_v42 = vpack.c.bf16 %v590_v41, %v589_v39  ;;  %v179_v43 = vpop.f32.mrb[7].mxu0  ;;  %602 = vmatpush3.bf16.msra.mxu1 %v224_v36 }
 0x101   :  { %v225_v44 = vpack.c.bf16 %v179_v43, %v176_v40 }
 0x103   :  { %603 = vmatprep.subr.bf16.mxu1 %v225_v44 }
 0x104   :  { %604 = vmatpush3.bf16.msra.mxu1 %v225_v44 }
 0x105   :  { %v593_v45 = vpop.f32.mrb[8].mxu0  ;;  %605 = vmatprep.subr.bf16.mxu1 %v226_v42 }
 0x106   :  { %v192_v46 = vpop.f32.mrb[9].mxu0 }
 0x107   :  { %v594_v47 = vpop.f32.mrb[10].mxu0 }
 0x108   :  { %v228_v48 = vpack.c.bf16 %v594_v47, %v593_v45  ;;  %v195_v49 = vpop.f32.mrb[11].mxu0  ;;  %606 = vmatpush3.bf16.msra.mxu1 %v226_v42 }
 0x109   :  { %v227_v50 = vpack.c.bf16 %v195_v49, %v192_v46 }
 0x10b   :  { %607 = vmatprep.subr.bf16.mxu1 %v227_v50 }
 0x10c   :  { %608 = vmatpush3.bf16.msra.mxu1 %v227_v50 }
 0x10d   :  { %v597_v51 = vpop.f32.mrb[12].mxu0  ;;  %609 = vmatprep.subr.bf16.mxu1 %v228_v48 }
 0x10e   :  { %v208_v52 = vpop.f32.mrb[13].mxu0 }
 0x10f   :  { %v598_v53 = vpop.f32.mrb[14].mxu0 }
 0x110   :  { %v230_v54 = vpack.c.bf16 %v598_v53, %v597_v51  ;;  %v211_v55 = vpop.f32.mrb[15].mxu0  ;;  %610 = vmatpush3.bf16.msra.mxu1 %v228_v48 }
 0x111   :  { %v229_v56 = vpack.c.bf16 %v211_v55, %v208_v52 }
 0x113   :  { %611 = vmatprep.subr.bf16.mxu1 %v229_v56 }
 0x114   :  { %612 = vmatpush3.bf16.msra.mxu1 %v229_v56 }
 0x115   :  { %613 = vmatprep.subr.bf16.mxu1 %v230_v54 }
 0x118   :  { %614 = vmatpush3.bf16.msra.mxu1 %v230_v54 }
 0x11b   :  { %616 = vmatmul.mubr.bf16.vlgmr.msra.gmra.mrb[0].mxu1 %v641_v57 }
 0x11c   :  { %619 = vmatprep.mubr.bf16.mxu1 %v642_v58 }
 0x123   :  { %620 = vmatmul.mubr.bf16.gmra.mrb[4].mxu1 %v643_v59 }
 0x124   :  { %623 = vmatprep.mubr.bf16.mxu1 %v644_v60 }
 0x12b   :  { %624 = vmatmul.mubr.bf16.gmra.mrb[8].mxu1 %v645_v61 }
 0x12c   :  { %627 = vmatprep.mubr.bf16.mxu1 %v646_v62 }
 0x133   :  { %628 = vmatmul.mubr.bf16.gmra.mrb[12].mxu1 %v647_v63 }
 0x1ee   :  { %v617_v0 = vpop.f32.mrb[0].mxu1 }
 0x1ef   :  { %v345_v2 = vpop.f32.mrb[1].mxu1  ;;  %v468_v4 = vadd.f32 %v617_v0, %v534_v1 }
 0x1f0   :  { %v618_v3 = vpop.f32.mrb[2].mxu1  ;;  %v466_v6 = vadd.f32 %v534_v1, %v345_v2 }
 0x1f1   :  { %v348_v5 = vpop.f32.mrb[3].mxu1  ;;  %v484_v7 = vmax.f32 %v468_v4, 0.0  ;;  %v469_v8 = vadd.f32 %v618_v3, %v534_v1 }
 0x1f2   :  { %v482_v9 = vmax.f32 %v466_v6, 0.0  ;;  %v467_v10 = vadd.f32 %v534_v1, %v348_v5 }
 0x1f3   :  { %500 = vst [vmem:[%s824_s4 + $0x10] sm:$0xff] %v484_v7  ;;  %v485_v11 = vmax.f32 %v469_v8, 0.0 }
 0x1f4   :  { %498 = vst [vmem:[%s824_s4] sm:$0xff] %v482_v9  ;;  %v483_v12 = vmax.f32 %v467_v10, 0.0 }
 0x1f5   :  { %501 = vst [vmem:[%s824_s4 + $0x18] sm:$0xff] %v485_v11 }
 0x1f6   :  { %v621_v13 = vpop.f32.mrb[4].mxu1  ;;  %499 = vst [vmem:[%s824_s4 + $0x8] sm:$0xff] %v483_v12 }
 0x1f7   :  { %v361_v14 = vpop.f32.mrb[5].mxu1  ;;  %v472_v16 = vadd.f32 %v621_v13, %v534_v1 }
 0x1f8   :  { %v622_v15 = vpop.f32.mrb[6].mxu1  ;;  %v470_v18 = vadd.f32 %v534_v1, %v361_v14 }
 0x1f9   :  { %v364_v17 = vpop.f32.mrb[7].mxu1  ;;  %v488_v19 = vmax.f32 %v472_v16, 0.0  ;;  %v473_v20 = vadd.f32 %v622_v15, %v534_v1 }
 0x1fa   :  { %v486_v21 = vmax.f32 %v470_v18, 0.0  ;;  %v471_v22 = vadd.f32 %v534_v1, %v364_v17 }
 0x1fb   :  { %504 = vst [vmem:[%s824_s4 + $0x30] sm:$0xff] %v488_v19  ;;  %v489_v23 = vmax.f32 %v473_v20, 0.0 }
 0x1fc   :  { %502 = vst [vmem:[%s824_s4 + $0x20] sm:$0xff] %v486_v21  ;;  %v487_v24 = vmax.f32 %v471_v22, 0.0 }
 0x1fd   :  { %505 = vst [vmem:[%s824_s4 + $0x38] sm:$0xff] %v489_v23 }
 0x1fe   :  { %v625_v25 = vpop.f32.mrb[8].mxu1  ;;  %503 = vst [vmem:[%s824_s4 + $0x28] sm:$0xff] %v487_v24 }
 0x1ff   :  { %v377_v26 = vpop.f32.mrb[9].mxu1  ;;  %v476_v28 = vadd.f32 %v625_v25, %v534_v1 }
 0x200   :  { %v626_v27 = vpop.f32.mrb[10].mxu1  ;;  %v474_v30 = vadd.f32 %v534_v1, %v377_v26 }
 0x201   :  { %v380_v29 = vpop.f32.mrb[11].mxu1  ;;  %v492_v31 = vmax.f32 %v476_v28, 0.0  ;;  %v477_v32 = vadd.f32 %v626_v27, %v534_v1 }
 0x202   :  { %v490_v33 = vmax.f32 %v474_v30, 0.0  ;;  %v475_v34 = vadd.f32 %v534_v1, %v380_v29 }
 0x203   :  { %508 = vst [vmem:[%s824_s4 + $0x50] sm:$0xff] %v492_v31  ;;  %v493_v35 = vmax.f32 %v477_v32, 0.0 }
 0x204   :  { %506 = vst [vmem:[%s824_s4 + $0x40] sm:$0xff] %v490_v33  ;;  %v491_v36 = vmax.f32 %v475_v34, 0.0 }
 0x205   :  { %509 = vst [vmem:[%s824_s4 + $0x58] sm:$0xff] %v493_v35 }
 0x206   :  { %v629_v37 = vpop.f32.mrb[12].mxu1  ;;  %507 = vst [vmem:[%s824_s4 + $0x48] sm:$0xff] %v491_v36 }
 0x207   :  { %v393_v38 = vpop.f32.mrb[13].mxu1  ;;  %v480_v40 = vadd.f32 %v629_v37, %v534_v1 }
 0x208   :  { %v630_v39 = vpop.f32.mrb[14].mxu1  ;;  %v478_v42 = vadd.f32 %v534_v1, %v393_v38 }
 0x209   :  { %v396_v41 = vpop.f32.mrb[15].mxu1  ;;  %v496_v43 = vmax.f32 %v480_v40, 0.0  ;;  %v481_v44 = vadd.f32 %v630_v39, %v534_v1 }
 0x20a   :  { %v494_v45 = vmax.f32 %v478_v42, 0.0  ;;  %v479_v46 = vadd.f32 %v534_v1, %v396_v41 }
 0x20b   :  { %512 = vst [vmem:[%s824_s4 + $0x70] sm:$0xff] %v496_v43  ;;  %v497_v47 = vmax.f32 %v481_v44, 0.0 }
 0x20c   :  { %510 = vst [vmem:[%s824_s4 + $0x60] sm:$0xff] %v494_v45  ;;  %v495_v48 = vmax.f32 %v479_v46, 0.0 }
 0x20d   :  { %513 = vst [vmem:[%s824_s4 + $0x78] sm:$0xff] %v497_v47 }
 0x20e   :  { %511 = vst [vmem:[%s824_s4 + $0x68] sm:$0xff] %v495_v48 }

// kernel: strgnn_forward.6
= control target key start
LH: loop header
LB: loop body
LE: loop exit
PB: predicated region body
PF: predicated region fallthrough
CT: control target
= control target key end

     0   :  { %v5351_v1 = vmov 0.0   ;;  %vm4315_vm0 = vmmov 0   ;;  %v4316_v17 = vmov 1966171168   ;;  %v153_v19 = vlaneseq  ;;  %s5343_s1 = inlined_call_operand.vmem [shape: bf16[384,128], index: 1, kind: input, shape index: {}]   ;;  %s5344_s0 = inlined_call_operand.vmem [shape: bf16[8,16,128], index: 0, kind: input, shape index: {}]   ;;  %s5345_s3 = inlined_call_operand.vmem [shape: bf16[384,128], index: 3, kind: input, shape index: {}]   ;;  %s5346_s2 = inlined_call_operand.vmem [shape: f32[1,128], index: 2, kind: input, shape index: {}]   ;;  %s5347_s5 = inlined_call_operand.vmem [shape: bf16[128,128], index: 5, kind: input, shape index: {}]   ;;  %s5348_s4 = inlined_call_operand.vmem [shape: f32[1,128], index: 4, kind: input, shape index: {}]   ;;  %s5349_s6 = inlined_call_operand.vmem [shape: f32[1,128], index: 6, kind: input, shape index: {}]   ;;  %s5350_s7 = inlined_call_operand.vmem [shape: f32[8,128], index: 7, kind: output, shape index: {}]  }
   0x1   :  { %v4250_v0 = vld [vmem:[%s5343_s1 + $0x40] sm:$0xff]   ;;  %4154 = vmatprep.subr.bf16.mxu1 %v5351_v1  ;;  %4170 = vmatprep.mubr.msk.bf16.mxu1 %vm4315_vm0, %v5351_v1  ;;  %v4253_v4 = vld [vmem:[%s5343_s1 + $0x48] sm:$0xff]   ;;  %v4256_v7 = vld [vmem:[%s5343_s1 + $0x50] sm:$0xff]   ;;  %v151_v18 = vunpack.c.l.s4 %v4316_v17  ;;  %vm3654_vm1 = vcmask 1043456   ;;  %vm3766_vm2 = vcmask 1041409   ;;  %vm3768_vm3 = vcmask 1042434  }
   0x2   :  { %v4251_v2 = vld [vmem:[%s5343_s1] sm:$0xff]   ;;  %4006 = vmatprep.subr.bf16.mxu0 %v4250_v0  ;;  %v4254_v5 = vld [vmem:[%s5343_s1 + $0x8] sm:$0xff]   ;;  %v4257_v8 = vld [vmem:[%s5343_s1 + $0x10] sm:$0xff]   ;;  %v4426_v25 = vshrl.u32 %v153_v19, 7  ;;  %vm3770_vm4 = vcmask 1043459   ;;  %vm3772_vm5 = vcmask 1044484  }
   0x3   :  { %v4252_v3 = vld [vmem:[%s5343_s1 + $0x80] sm:$0xff]   ;;  %4007 = vmatpush3.bf16.msra.mxu0 %v4251_v2  ;;  %v4255_v6 = vld [vmem:[%s5343_s1 + $0x88] sm:$0xff]   ;;  %v4258_v9 = vld [vmem:[%s5343_s1 + $0x90] sm:$0xff]   ;;  %v152_v24 = vunpack.c.0.s8 %v151_v18  ;;  %vm3774_vm6 = vcmask 1045509   ;;  %vm3776_vm7 = vcmask 1046534   ;;  %vm3778_vm8 = vcmask 1047559  }
   0x4   :  { %4155 = vmatpush3.bf16.msra.mxu1 %v4252_v3  ;;  %4008 = vmatprep.subr.bf16.mxu0 %v4253_v4  ;;  %v4259_v10 = vld [vmem:[%s5343_s1 + $0x58] sm:$0xff]   ;;  %v4262_v13 = vld [vmem:[%s5343_s1 + $0x60] sm:$0xff]   ;;  %v4265_v16 = vld [vmem:[%s5343_s1 + $0x68] sm:$0xff]  }
   0x5   :  { %4156 = vmatprep.subr.bf16.mxu1 %v5351_v1  ;;  %v4260_v11 = vld [vmem:[%s5343_s1 + $0x18] sm:$0xff]   ;;  %v4263_v14 = vld [vmem:[%s5343_s1 + $0x20] sm:$0xff]   ;;  %v4266_v20 = vld [vmem:[%s5343_s1 + $0x28] sm:$0xff]   ;;  %v4448_v34 = vsub.s32 %v152_v24, %v4426_v25 }
   0x6   :  { %v4261_v12 = vld [vmem:[%s5343_s1 + $0x98] sm:$0xff]   ;;  %v4264_v15 = vld [vmem:[%s5343_s1 + $0xa0] sm:$0xff]   ;;  %v4267_v21 = vld [vmem:[%s5343_s1 + $0xa8] sm:$0xff]  }
   0x7   :  { %4009 = vmatpush3.bf16.msra.mxu0 %v4254_v5  ;;  %v4268_v22 = vld [vmem:[%s5343_s1 + $0x70] sm:$0xff]   ;;  %v4271_v27 = vld [vmem:[%s5343_s1 + $0x78] sm:$0xff]   ;;  %v27_v28 = vld [vmem:[%s5344_s0] sm:$0xf] }
   0x8   :  { %4157 = vmatpush3.bf16.msra.mxu1 %v4255_v6  ;;  %4010 = vmatprep.subr.bf16.mxu0 %v4256_v7  ;;  %v4269_v23 = vld [vmem:[%s5343_s1 + $0x30] sm:$0xff]   ;;  %v28_v29 = vld [vmem:[%s5344_s0 + $0x4] sm:$0xf]  ;;  %v29_v30 = vld [vmem:[%s5344_s0 + $0x8] sm:$0xf] }
   0x9   :  { %4158 = vmatprep.subr.bf16.mxu1 %v5351_v1  ;;  %v4270_v26 = vld [vmem:[%s5343_s1 + $0xb0] sm:$0xff]   ;;  %v30_v31 = vld [vmem:[%s5344_s0 + $0xc] sm:$0xf]  ;;  %v3876_v32 = vcombine.low %v27_v28, %v28_v29  ;;  %v4272_v37 = vld [vmem:[%s5343_s1 + $0x38] sm:$0xff]  }
   0xa   :  { %v3877_v33 = vcombine.low %v29_v30, %v30_v31  ;;  %v4453_v35 = vld [vmem:[%s5344_s0 + $0x10] sm:$0xf]  ;;  %v32_v36 = vld [vmem:[%s5344_s0 + $0x14] sm:$0xf]  ;;  %v4467_v42 = vld [vmem:[%s5344_s0 + $0x18] sm:$0xf] }
   0xb   :  { %4011 = vmatpush3.bf16.msra.mxu0 %v4257_v8  ;;  %v84_v38 = vshrl.u32 %v3876_v32, 16  ;;  %v86_v39 = vshll.u32 %v3876_v32, 16  ;;  %v139_v40 = vrot.slane %v3876_v32, 1  ;;  %v4462_v41 = vcombine.low %v4453_v35, %v32_v36  ;;  %v4275_v46 = vld [vmem:[%s5343_s1 + $0xb8] sm:$0xff]   ;;  %v4480_v52 = vld [vmem:[%s5344_s0 + $0x20] sm:$0xf] }
   0xc   :  { %4159 = vmatpush3.bf16.msra.mxu1 %v4258_v9  ;;  %4012 = vmatprep.subr.bf16.mxu0 %v4259_v10  ;;  %v91_v43 = vshrl.u32 %v3877_v33, 16  ;;  %v93_v44 = vshll.u32 %v3877_v33, 16  ;;  %v140_v45 = vrot.slane %v3877_v33, 1  ;;  %v34_v47 = vld [vmem:[%s5344_s0 + $0x1c] sm:$0xf] }
   0xd   :  { %4160 = vmatprep.subr.bf16.mxu1 %v5351_v1  ;;  %v88_v48 = vrot.slane %v86_v39, 1  ;;  %v149_v49 = vcombine.high %v139_v40, %v139_v40  ;;  %v170_v50 = vrot.slane %v139_v40, %v4448_v34  ;;  %v98_v51 = vshrl.u32 %v4462_v41, 16  ;;  %v36_v53 = vld [vmem:[%s5344_s0 + $0x24] sm:$0xf] }
   0xe   :  { %v95_v54 = vrot.slane %v93_v44, 1  ;;  %v215_v55 = vcombine.high %v140_v45, %v140_v45  ;;  %v236_v56 = vrot.slane %v140_v45, %v4448_v34  ;;  %v100_v57 = vshll.u32 %v4462_v41, 16 }
   0xf   :  { %4013 = vmatpush3.bf16.msra.mxu0 %v4260_v11  ;;  %v89_v58 = vor.u32 %v88_v48, %v84_v38  ;;  %v177_v59 = vrot.slane %v149_v49, %v4448_v34  ;;  %v4490_v60 = vrot.slane %v4462_v41, 1  ;;  %v4493_v61 = vcombine.low %v4467_v42, %v34_v47 }
  0x10   :  { %4161 = vmatpush3.bf16.msra.mxu1 %v4261_v12  ;;  %4014 = vmatprep.subr.bf16.mxu0 %v4262_v13  ;;  %v96_v62 = vor.u32 %v95_v54, %v91_v43  ;;  %v102_v63 = vrot.slane %v100_v57, 1  ;;  %v243_v0 = vrot.slane %v215_v55, %v4448_v34  ;;  %v4497_v2 = vcombine.low %v4480_v52, %v36_v53 }
  0x11   :  { %4162 = vmatprep.subr.bf16.mxu1 %v5351_v1  ;;  %v3884_v3 = vcombine.low %v27_v28, %v89_v58  ;;  %v148_v4 = vcombine.high %v3876_v32, %v89_v58  ;;  %v302_v5 = vrot.slane %v4490_v60, %v4448_v34  ;;  %v105_v6 = vshrl.u32 %v4493_v61, 16 }
  0x12   :  { %v3885_v7 = vcombine.low %v29_v30, %v96_v62  ;;  %v4502_v8 = vor.u32 %v102_v63, %v98_v51  ;;  %v214_v9 = vcombine.high %v3877_v33, %v96_v62  ;;  %v107_v10 = vshll.u32 %v4493_v61, 16 }
  0x13   :  { %4015 = vmatpush3.bf16.msra.mxu0 %v4263_v14  ;;  %v156_v11 = vrot.slane %v3884_v3, %v4448_v34  ;;  %v163_v12 = vrot.slane %v148_v4, %v4448_v34  ;;  %v4508_v13 = vrot.slane %v4493_v61, 1  ;;  %v281_v14 = vcombine.high %v4490_v60, %v4490_v60 }
  0x14   :  { %4163 = vmatpush3.bf16.msra.mxu1 %v4264_v15  ;;  %4016 = vmatprep.subr.bf16.mxu0 %v4265_v16  ;;  %v222_v15 = vrot.slane %v3885_v7, %v4448_v34  ;;  %v229_v16 = vrot.slane %v214_v9, %v4448_v34  ;;  %v3886_v17 = vcombine.low %v4453_v35, %v4502_v8  ;;  %v109_v18 = vrot.slane %v107_v10, 1 }
  0x15   :  { %4164 = vmatprep.subr.bf16.mxu1 %v5351_v1  ;;  %v178_v19 = vcombine.low %v156_v11, %v170_v50 }
  0x16   :  { %v245_v24 = vcombine.high %v222_v15, %v236_v56 }
  0x17   :  { %4017 = vmatpush3.bf16.msra.mxu0 %v4266_v20  ;;  %v179_v20 = vcombine.high %v156_v11, %v170_v50  ;;  %v188_v28 = vrot.slane %v178_v19, %v4448_v34  ;;  %v280_v19 = vcombine.high %v4462_v41, %v4502_v8  ;;  %v368_v41 = vrot.slane %v4508_v13, %v4448_v34 }
  0x18   :  { %4165 = vmatpush3.bf16.msra.mxu1 %v4267_v21  ;;  %4018 = vmatprep.subr.bf16.mxu0 %v4268_v22  ;;  %v180_v21 = vcombine.low %v163_v12, %v177_v59  ;;  %v181_v22 = vcombine.high %v163_v12, %v177_v59  ;;  %v268_v35 = vrot.slane %v245_v24, %v4448_v34 }
  0x19   :  { %4166 = vmatprep.subr.bf16.mxu1 %v5351_v1  ;;  %v202_v30 = vrot.slane %v179_v20, %v4448_v34 }
  0x1a   :  { %v195_v29 = vrot.slane %v180_v21, %v4448_v34  ;;  %v209_v31 = vrot.slane %v181_v22, %v4448_v34  ;;  %v278_v45 = vcombine.high %v268_v35, %v268_v35 }
  0x1b   :  { %4019 = vmatpush3.bf16.msra.mxu0 %v4269_v23  ;;  %v244_v23 = vcombine.low %v222_v15, %v236_v56  ;;  %v730_v38 = vcombine.low %v188_v28, %v202_v30  ;;  %v3893_v39 = vcombine.high %v188_v28, %v202_v30  ;;  %v295_v28 = vrot.slane %v280_v19, %v4448_v34 }
  0x1c   :  { %4167 = vmatpush3.bf16.msra.mxu1 %v4270_v26  ;;  %4020 = vmatprep.subr.bf16.mxu0 %v4271_v27  ;;  %v246_v26 = vcombine.low %v229_v16, %v243_v0  ;;  %v247_v27 = vcombine.high %v229_v16, %v243_v0  ;;  %v732_v40 = vcombine.low %v195_v29, %v209_v31 }
  0x1d   :  { %4168 = vmatprep.subr.bf16.mxu1 %v5351_v1  ;;  %v254_v32 = vrot.slane %v244_v23, %v4448_v34  ;;  %v740_v48 = vrot.slane %v730_v38, %v4448_v34  ;;  %v747_v49 = vrot.slane %v3893_v39, %v4448_v34  ;;  %v309_v23 = vrot.slane %v281_v14, %v4448_v34 }
  0x1e   :  { %v261_v33 = vrot.slane %v246_v26, %v4448_v34  ;;  %v275_v36 = vrot.slane %v247_v27, %v4448_v34  ;;  %v754_v50 = vrot.slane %v732_v40, %v4448_v34  ;;  %v4561_v39 = vrot.slane %v4497_v2, 1 }
  0x1f   :  { %4021 = vmatpush3.bf16.msra.mxu0 %v4272_v37  ;;  %v211_v37 = vcombine.high %v195_v29, %v195_v29  ;;  %v276_v43 = vcombine.high %v254_v32, %v254_v32  ;;  %v763_v57 = vcombine.high %v740_v48, %v747_v49  ;;  %v762_v58 = vcombine.low %v740_v48, %v747_v49 }
  0x20   :  { %4169 = vmatpush3.bf16.msra.mxu1 %v4275_v46  ;;  %v277_v44 = vcombine.high %v261_v33, %v261_v33  ;;  %v288_v46 = vrot.slane %v3886_v17, %v4448_v34  ;;  %v798_v55 = vcombine.low %v278_v45, %v261_v33  ;;  %v110_v17 = vor.u32 %v109_v18, %v105_v6 }
  0x21   :  { %v733_v47 = vcombine.low %v211_v37, %v254_v32  ;;  %v797_v54 = vcombine.low %v268_v35, %v276_v43  ;;  %v779_v4 = vrot.slane %v763_v57, %v4448_v34  ;;  %v312_v8 = vcombine.low %v295_v28, %v309_v23 }
  0x22   :  { %v310_v51 = vcombine.low %v288_v46, %v302_v5  ;;  %v311_v53 = vcombine.high %v288_v46, %v302_v5  ;;  %v799_v59 = vcombine.low %v275_v36, %v277_v44  ;;  %v814_v0 = vrot.slane %v798_v55, %v4448_v34  ;;  %v4566_v46 = vld [vmem:[%s5344_s0 + $0x28] sm:$0xf] }
  0x23   :  { %v761_v56 = vrot.slane %v733_v47, %v4448_v34  ;;  %v807_v63 = vrot.slane %v797_v54, %v4448_v34  ;;  %v772_v5 = vrot.slane %v762_v58, %v4448_v34  ;;  %v3887_v6 = vcombine.low %v4467_v42, %v110_v17  ;;  %v38_v47 = vld [vmem:[%s5344_s0 + $0x2c] sm:$0xf] }
  0x24   :  { %v320_v60 = vrot.slane %v310_v51, %v4448_v34  ;;  %v334_v62 = vrot.slane %v311_v53, %v4448_v34  ;;  %v821_v10 = vrot.slane %v799_v59, %v4448_v34  ;;  %v313_v18 = vcombine.high %v295_v28, %v309_v23 }
  0x25   :  { %v765_v3 = vcombine.high %v754_v50, %v761_v56  ;;  %v764_v7 = vcombine.low %v754_v50, %v761_v56  ;;  %v830_v11 = vcombine.high %v807_v63, %v814_v0  ;;  %v829_v12 = vcombine.low %v807_v63, %v814_v0 }
  0x26   :  { %v800_v9 = vcombine.low %v320_v60, %v334_v62  ;;  %v3894_v31 = vcombine.high %v320_v60, %v334_v62  ;;  %v112_v32 = vshrl.u32 %v4497_v2, 16  ;;  %v354_v42 = vrot.slane %v3887_v6, %v4448_v34 }
  0x27   :  { %v793_v15 = vrot.slane %v765_v3, %v4448_v34  ;;  %v786_v16 = vrot.slane %v764_v7, %v4448_v34  ;;  %v846_v21 = vrot.slane %v830_v11, %v4448_v34  ;;  %v839_v22 = vrot.slane %v829_v12, %v4448_v34 }
  0x28   :  { %v828_v20 = vrot.slane %v800_v9, %v4448_v34  ;;  %v114_v35 = vshll.u32 %v4497_v2, 16  ;;  %v327_v36 = vrot.slane %v312_v8, %v4448_v34  ;;  %v341_v37 = vrot.slane %v313_v18, %v4448_v34 }
  0x29   :  { %v796_v24 = vcombine.low %v779_v4, %v793_v15  ;;  %v794_v26 = vcombine.low %v772_v5, %v786_v16  ;;  %v795_v27 = vcombine.high %v772_v5, %v786_v16  ;;  %v874_v38 = vrot.slane %v3894_v31, %v4448_v34 }
  0x2a   :  { %v832_v29 = vcombine.high %v821_v10, %v828_v20  ;;  %v831_v30 = vcombine.low %v821_v10, %v828_v20  ;;  %v376_v45 = vcombine.low %v354_v42, %v368_v41  ;;  %v343_v48 = vcombine.high %v327_v36, %v327_v36 }
  0x2b   :  { %1396 = vmatprep.mubr.bf16.mxu0 %v796_v24  ;;  %4171 = vmatmul.mubr.bf16.vlgmr.msra.gmra.mrb[0].mxu1 %v795_v27  ;;  %v377_v49 = vcombine.high %v354_v42, %v368_v41  ;;  %v865_v50 = vcombine.low %v327_v36, %v341_v37  ;;  %v116_v51 = vrot.slane %v114_v35, 1  ;;  %v346_v54 = vcombine.high %v4493_v61, %v110_v17 }
  0x2c   :  { %1397 = vmatmul.mubr.bf16.vlgmr.msra.gmra.mrb[0].mxu0 %v794_v26  ;;  %v860_v14 = vrot.slane %v832_v29, %v4448_v34  ;;  %v853_v33 = vrot.slane %v831_v30, %v4448_v34  ;;  %4174 = vmatprep.mubr.msk.bf16.mxu1 %vm4315_vm0, %v5351_v1  ;;  %v386_v53 = vrot.slane %v376_v45, %v4448_v34 }
  0x2d   :  { %v347_v55 = vcombine.high %v4508_v13, %v4508_v13  ;;  %v434_v56 = vrot.slane %v4561_v39, %v4448_v34  ;;  %v400_v57 = vrot.slane %v377_v49, %v4448_v34  ;;  %v881_v58 = vrot.slane %v865_v50, %v4448_v34 }
  0x2e   :  { %v863_v40 = vcombine.low %v846_v21, %v860_v14  ;;  %v861_v43 = vcombine.low %v839_v22, %v853_v33  ;;  %v862_v44 = vcombine.high %v839_v22, %v853_v33  ;;  %v117_v59 = vor.u32 %v116_v51, %v112_v32 }
  0x2f   :  { %v4580_v60 = vcombine.low %v4566_v46, %v38_v47  ;;  %v408_v62 = vcombine.high %v386_v53, %v386_v53  ;;  %v866_v63 = vcombine.low %v343_v48, %v386_v53  ;;  %v361_v0 = vrot.slane %v346_v54, %v4448_v34 }
  0x30   :  { %1404 = vmatprep.mubr.bf16.mxu0 %v863_v40  ;;  %v375_v61 = vrot.slane %v347_v55, %v4448_v34  ;;  %v897_v3 = vcombine.high %v874_v38, %v881_v58  ;;  %v896_v13 = vcombine.low %v874_v38, %v881_v58  ;;  %v410_v4 = vcombine.high %v400_v57, %v400_v57 }
  0x31   :  { %v3888_v7 = vcombine.low %v4480_v52, %v117_v59  ;;  %v867_v5 = vcombine.low %v400_v57, %v408_v62  ;;  %v888_v9 = vrot.slane %v866_v63, %v4448_v34  ;;  %v119_v11 = vshrl.u32 %v4580_v60, 16  ;;  %v39_v63 = vld [vmem:[%s5344_s0 + $0x30] sm:$0xf] }
  0x32   :  { %v378_v10 = vcombine.low %v361_v0, %v375_v61  ;;  %v913_v12 = vrot.slane %v897_v3, %v4448_v34  ;;  %v906_v15 = vrot.slane %v896_v13, %v4448_v34  ;;  %v379_v16 = vcombine.high %v361_v0, %v375_v61 }
  0x33   :  { %4175 = vmatmul.mubr.bf16.gmra.mrb[4].mxu1 %v862_v44  ;;  %v420_v17 = vrot.slane %v3888_v7, %v4448_v34  ;;  %v895_v19 = vrot.slane %v867_v5, %v4448_v34  ;;  %v121_v20 = vshll.u32 %v4580_v60, 16  ;;  %v144_v21 = vrot.slane %v4580_v60, 1  ;;  %v4633_v7 = vld [vmem:[%s5344_s0 + $0x38] sm:$0xf]  ;;  %v42_v5 = vld [vmem:[%s5344_s0 + $0x3c] sm:$0xf] }
  0x34   :  { %1405 = vmatmul.mubr.bf16.gmra.mrb[4].mxu0 %v861_v43  ;;  %4178 = vmatprep.mubr.msk.bf16.mxu1 %vm4315_vm0, %v5351_v1  ;;  %v393_v52 = vrot.slane %v378_v10, %v4448_v34  ;;  %v407_v22 = vrot.slane %v379_v16, %v4448_v34  ;;  %v412_v26 = vcombine.high %v4497_v2, %v117_v59 }
  0x35   :  { %v442_v23 = vcombine.low %v420_v17, %v434_v56  ;;  %v443_v24 = vcombine.high %v420_v17, %v434_v56  ;;  %v899_v27 = vcombine.high %v888_v9, %v895_v19  ;;  %v898_v28 = vcombine.low %v888_v9, %v895_v19 }
  0x36   :  { %v409_v29 = vcombine.high %v393_v52, %v393_v52  ;;  %v931_v30 = vcombine.low %v410_v4, %v393_v52  ;;  %v123_v8 = vrot.slane %v121_v20, 1  ;;  %v413_v18 = vcombine.high %v4561_v39, %v4561_v39  ;;  %v40_v4 = vld [vmem:[%s5344_s0 + $0x34] sm:$0xf] }
  0x37   :  { %v452_v6 = vrot.slane %v442_v23, %v4448_v34  ;;  %v466_v41 = vrot.slane %v443_v24, %v4448_v34  ;;  %v927_v31 = vrot.slane %v899_v27, %v4448_v34  ;;  %v920_v32 = vrot.slane %v898_v28, %v4448_v34 }
  0x38   :  { %v932_v14 = vcombine.low %v407_v22, %v409_v29  ;;  %v941_v33 = vrot.slane %v931_v30, %v4448_v34  ;;  %v124_v35 = vor.u32 %v123_v8, %v119_v11  ;;  %v427_v36 = vrot.slane %v412_v26, %v4448_v34 }
  0x39   :  { %v933_v2 = vcombine.low %v452_v6, %v466_v41  ;;  %v3895_v42 = vcombine.high %v452_v6, %v466_v41  ;;  %v930_v37 = vcombine.low %v913_v12, %v927_v31  ;;  %v928_v38 = vcombine.low %v906_v15, %v920_v32 }
  0x3a   :  { %v929_v40 = vcombine.high %v906_v15, %v920_v32  ;;  %v948_v43 = vrot.slane %v932_v14, %v4448_v34  ;;  %v441_v45 = vrot.slane %v413_v18, %v4448_v34  ;;  %v3889_v47 = vcombine.low %v4566_v46, %v124_v35 }
  0x3b   :  { %v955_v44 = vrot.slane %v933_v2, %v4448_v34  ;;  %v962_v39 = vrot.slane %v3895_v42, %v4448_v34  ;;  %1412 = vmatprep.mubr.bf16.mxu0 %v930_v37  ;;  %v478_v50 = vcombine.high %v4580_v60, %v124_v35  ;;  %v479_v58 = vcombine.high %v144_v21, %v144_v21 }
  0x3c   :  { %4179 = vmatmul.mubr.bf16.gmra.mrb[8].mxu1 %v929_v40  ;;  %v964_v48 = vcombine.high %v941_v33, %v948_v43  ;;  %v963_v49 = vcombine.low %v941_v33, %v948_v43  ;;  %1413 = vmatmul.mubr.bf16.gmra.mrb[8].mxu0 %v928_v38  ;;  %v444_v54 = vcombine.low %v427_v36, %v441_v45 }
  0x3d   :  { %v966_v51 = vcombine.high %v955_v44, %v962_v39  ;;  %v965_v53 = vcombine.low %v955_v44, %v962_v39  ;;  %4182 = vmatprep.mubr.msk.bf16.mxu1 %vm4315_vm0, %v5351_v1  ;;  %v445_v57 = vcombine.high %v427_v36, %v441_v45  ;;  %v486_v60 = vrot.slane %v3889_v47, %v4448_v34 }
  0x3e   :  { %v980_v55 = vrot.slane %v964_v48, %v4448_v34  ;;  %v973_v56 = vrot.slane %v963_v49, %v4448_v34  ;;  %v459_v62 = vrot.slane %v444_v54, %v4448_v34  ;;  %v493_v61 = vrot.slane %v478_v50, %v4448_v34 }
  0x3f   :  { %v994_v46 = vrot.slane %v966_v51, %v4448_v34  ;;  %v987_v59 = vrot.slane %v965_v53, %v4448_v34  ;;  %v473_v0 = vrot.slane %v445_v57, %v4448_v34  ;;  %v500_v3 = vrot.slane %v144_v21, %v4448_v34 }
  0x40   :  { %v507_v13 = vrot.slane %v479_v58, %v4448_v34  ;;  %v475_v12 = vcombine.high %v459_v62, %v459_v62  ;;  %v3882_v52 = vcombine.low %v39_v63, %v40_v4  ;;  %v4639_v21 = vcombine.low %v4633_v7, %v42_v5 }
  0x41   :  { %v997_v9 = vcombine.low %v980_v55, %v994_v46  ;;  %v995_v10 = vcombine.low %v973_v56, %v987_v59  ;;  %v996_v11 = vcombine.high %v973_v56, %v987_v59  ;;  %v508_v15 = vcombine.low %v486_v60, %v500_v3 }
  0x42   :  { %v509_v16 = vcombine.high %v486_v60, %v500_v3  ;;  %v510_v17 = vcombine.low %v493_v61, %v507_v13  ;;  %v998_v19 = vcombine.low %v459_v62, %v473_v0  ;;  %v511_v20 = vcombine.high %v493_v61, %v507_v13 }
  0x43   :  { %1420 = vmatprep.mubr.bf16.mxu0 %v997_v9  ;;  %v518_v22 = vrot.slane %v508_v15, %v4448_v34  ;;  %v126_v27 = vshrl.u32 %v3882_v52, 16  ;;  %v128_v28 = vshll.u32 %v3882_v52, 16  ;;  %v145_v29 = vrot.slane %v3882_v52, 1 }
  0x44   :  { %4183 = vmatmul.mubr.bf16.gmra.mrb[12].mxu1 %v996_v11  ;;  %v525_v23 = vrot.slane %v510_v17, %v4448_v34  ;;  %v532_v24 = vrot.slane %v509_v16, %v4448_v34  ;;  %v1008_v26 = vrot.slane %v998_v19, %v4448_v34  ;;  %1421 = vmatmul.mubr.bf16.gmra.mrb[12].mxu0 %v995_v10  ;;  %v133_v35 = vshrl.u32 %v4639_v21, 16 }
  0x45   :  { %4186 = vmatprep.mubr.msk.bf16.mxu1 %vm4315_vm0, %v5351_v1  ;;  %v539_v30 = vrot.slane %v511_v20, %v4448_v34  ;;  %v540_v6 = vcombine.high %v518_v22, %v518_v22  ;;  %v999_v8 = vcombine.low %v475_v12, %v518_v22  ;;  %v130_v31 = vrot.slane %v128_v28, 1 }
  0x46   :  { %v542_v41 = vcombine.high %v532_v24, %v532_v24  ;;  %v541_v18 = vcombine.high %v525_v23, %v525_v23  ;;  %v545_v32 = vcombine.high %v145_v29, %v145_v29  ;;  %v566_v14 = vrot.slane %v145_v29, %v4448_v34 }
  0x47   :  { %v1000_v33 = vcombine.low %v532_v24, %v540_v6  ;;  %v1015_v42 = vrot.slane %v999_v8, %v4448_v34  ;;  %v131_v36 = vor.u32 %v130_v31, %v126_v27  ;;  %v135_v38 = vshll.u32 %v4639_v21, 16 }
  0x48   :  { %v1001_v2 = vcombine.low %v542_v41, %v525_v23  ;;  %v1065_v37 = vcombine.low %v539_v30, %v541_v18  ;;  %v146_v40 = vrot.slane %v4639_v21, 1  ;;  %v573_v49 = vrot.slane %v545_v32, %v4448_v34 }
  0x49   :  { %v1022_v43 = vrot.slane %v1000_v33, %v4448_v34  ;;  %v1031_v39 = vcombine.high %v1008_v26, %v1015_v42  ;;  %v1030_v45 = vcombine.low %v1008_v26, %v1015_v42  ;;  %v3890_v47 = vcombine.low %v39_v63, %v131_v36 }
  0x4a   :  { %v1029_v44 = vrot.slane %v1001_v2, %v4448_v34  ;;  %v544_v48 = vcombine.high %v3882_v52, %v131_v36  ;;  %v137_v50 = vrot.slane %v135_v38, 1  ;;  %v1075_v58 = vrot.slane %v1065_v37, %v4448_v34 }
  0x4b   :  { %v1047_v53 = vrot.slane %v1031_v39, %v4448_v34  ;;  %v1040_v55 = vrot.slane %v1030_v45, %v4448_v34  ;;  %v552_v56 = vrot.slane %v3890_v47, %v4448_v34  ;;  %v611_v60 = vcombine.high %v146_v40, %v146_v40 }
  0x4c   :  { %v1033_v51 = vcombine.high %v1022_v43, %v1029_v44  ;;  %v1032_v54 = vcombine.low %v1022_v43, %v1029_v44  ;;  %v559_v57 = vrot.slane %v544_v48, %v4448_v34  ;;  %v138_v46 = vor.u32 %v137_v50, %v133_v35 }
  0x4d   :  { %v632_v63 = vrot.slane %v146_v40, %v4448_v34  ;;  %v574_v0 = vcombine.low %v552_v56, %v566_v14  ;;  %v575_v61 = vcombine.high %v552_v56, %v566_v14  ;;  %v639_v52 = vrot.slane %v611_v60, %v4448_v34 }
  0x4e   :  { %v1061_v59 = vrot.slane %v1033_v51, %v4448_v34  ;;  %v1054_v62 = vrot.slane %v1032_v54, %v4448_v34  ;;  %v576_v3 = vcombine.low %v559_v57, %v573_v49  ;;  %v577_v13 = vcombine.high %v559_v57, %v573_v49 }
  0x4f   :  { %v3891_v10 = vcombine.low %v4633_v7, %v138_v46  ;;  %v584_v11 = vrot.slane %v574_v0, %v4448_v34  ;;  %v598_v15 = vrot.slane %v575_v61, %v4448_v34  ;;  %v610_v17 = vcombine.high %v4639_v21, %v138_v46 }
  0x50   :  { %v1064_v4 = vcombine.low %v1047_v53, %v1061_v59  ;;  %v1062_v5 = vcombine.low %v1040_v55, %v1054_v62  ;;  %v1063_v9 = vcombine.high %v1040_v55, %v1054_v62  ;;  %v591_v12 = vrot.slane %v576_v3, %v4448_v34 }
  0x51   :  { %v605_v16 = vrot.slane %v577_v13, %v4448_v34  ;;  %v618_v19 = vrot.slane %v3891_v10, %v4448_v34  ;;  %v1066_v20 = vcombine.low %v584_v11, %v598_v15  ;;  %v3896_v22 = vcombine.high %v584_v11, %v598_v15  ;;  %v4282_v13 = vld [vmem:[%s5345_s3 + $0x40] sm:$0xff]   ;;  %v4285_v10 = vld [vmem:[%s5345_s3 + $0x8] sm:$0xff]   ;;  %v4286_v11 = vld [vmem:[%s5345_s3 + $0x50] sm:$0xff]  }
  0x52   :  { %1428 = vmatprep.mubr.bf16.mxu0 %v1064_v4  ;;  %4187 = vmatmul.mubr.bf16.gmra.mrb[16].mxu1 %v1063_v9  ;;  %v625_v23 = vrot.slane %v610_v17, %v4448_v34  ;;  %v607_v29 = vcombine.high %v591_v12, %v591_v12  ;;  %v4283_v4 = vld [vmem:[%s5345_s3] sm:$0xff]   ;;  %v4291_v15 = vld [vmem:[%s5345_s3 + $0x88] sm:$0xff]   ;;  %v4288_v17 = vld [vmem:[%s5345_s3 + $0x58] sm:$0xff]  }
  0x53   :  { %1429 = vmatmul.mubr.bf16.gmra.mrb[16].mxu0 %v1062_v5  ;;  %v1068_v7 = vcombine.low %v591_v12, %v605_v16  ;;  %4190 = vmatprep.mubr.msk.bf16.mxu1 %vm4315_vm0, %v5351_v1  ;;  %v640_v24 = vcombine.low %v618_v19, %v632_v63  ;;  %v641_v26 = vcombine.high %v618_v19, %v632_v63  ;;  %v4284_v5 = vld [vmem:[%s5345_s3 + $0x48] sm:$0xff]   ;;  %v4290_v9 = vld [vmem:[%s5345_s3 + $0x80] sm:$0xff]   ;;  %v4287_v12 = vld [vmem:[%s5345_s3 + $0x10] sm:$0xff]  }
  0x54   :  { %v1082_v27 = vrot.slane %v1066_v20, %v4448_v34  ;;  %v1089_v28 = vrot.slane %v3896_v22, %v4448_v34  ;;  %v642_v30 = vcombine.low %v625_v23, %v639_v52  ;;  %v643_v6 = vcombine.high %v625_v23, %v639_v52  ;;  %4079 = vmatprep.subr.bf16.mxu0 %v4282_v13  ;;  %v4294_v16 = vld [vmem:[%s5345_s3 + $0x90] sm:$0xff]   ;;  %v4289_v19 = vld [vmem:[%s5345_s3 + $0x18] sm:$0xff]   ;;  %v4292_v20 = vld [vmem:[%s5345_s3 + $0x60] sm:$0xff]  }
  0x55   :  { %v1096_v21 = vrot.slane %v1068_v7, %v4448_v34  ;;  %v650_v41 = vrot.slane %v640_v24, %v4448_v34  ;;  %v664_v8 = vrot.slane %v641_v26, %v4448_v34  ;;  %4080 = vmatpush3.bf16.msra.mxu0 %v4283_v4  ;;  %4198 = vmatprep.subr.bf16.mxu1 %v4290_v9  ;;  %v4295_v52 = vld [vmem:[%s5345_s3 + $0x98] sm:$0xff]   ;;  %v4293_v22 = vld [vmem:[%s5345_s3 + $0x20] sm:$0xff]   ;;  %v4296_v23 = vld [vmem:[%s5345_s3 + $0x68] sm:$0xff]  }
  0x56   :  { %v1098_v18 = vcombine.high %v1075_v58, %v1082_v27  ;;  %v1097_v32 = vcombine.low %v1075_v58, %v1082_v27  ;;  %v657_v33 = vrot.slane %v642_v30, %v4448_v34  ;;  %v671_v2 = vrot.slane %v643_v6, %v4448_v34  ;;  %4081 = vmatprep.subr.bf16.mxu0 %v4284_v5  ;;  %v4298_v7 = vld [vmem:[%s5345_s3 + $0xa0] sm:$0xff]   ;;  %v4297_v24 = vld [vmem:[%s5345_s3 + $0x28] sm:$0xff]   ;;  %v4299_v27 = vld [vmem:[%s5345_s3 + $0x70] sm:$0xff]  }
  0x57   :  { %v1100_v31 = vcombine.high %v1089_v28, %v1096_v21  ;;  %v1099_v14 = vcombine.low %v1089_v28, %v1096_v21  ;;  %v672_v42 = vcombine.high %v650_v41, %v650_v41  ;;  %v674_v35 = vcombine.high %v664_v8, %v664_v8  ;;  %4199 = vmatpush3.bf16.msra.mxu1 %v4290_v9  ;;  %v4300_v26 = vld [vmem:[%s5345_s3 + $0xa8] sm:$0xff]   ;;  %v4301_v28 = vld [vmem:[%s5345_s3 + $0x30] sm:$0xff]   ;;  %v4304_v30 = vld [vmem:[%s5345_s3 + $0x38] sm:$0xff]  }
  0x58   :  { %v1114_v36 = vrot.slane %v1098_v18, %v4448_v34  ;;  %v1107_v38 = vrot.slane %v1097_v32, %v4448_v34  ;;  %v673_v43 = vcombine.high %v657_v33, %v657_v33  ;;  %v1132_v44 = vcombine.low %v607_v29, %v650_v41  ;;  %4200 = vmatprep.subr.bf16.mxu1 %v4291_v15  ;;  %v4302_v21 = vld [vmem:[%s5345_s3 + $0xb0] sm:$0xff]   ;;  %v4303_v29 = vld [vmem:[%s5345_s3 + $0x78] sm:$0xff]   ;;  %v4772_v32 = vld [vmem:[%s5346_s2] ss:$0 sm:$0xff] }
  0x59   :  { %v1128_v37 = vrot.slane %v1100_v31, %v4448_v34  ;;  %v1121_v40 = vrot.slane %v1099_v14, %v4448_v34  ;;  %v1133_v39 = vcombine.low %v664_v8, %v672_v42  ;;  %v1134_v45 = vcombine.low %v674_v35, %v657_v33  ;;  %4082 = vmatpush3.bf16.msra.mxu0 %v4285_v10  ;;  %v4305_v6 = vld [vmem:[%s5345_s3 + $0xb8] sm:$0xff]  }
  0x5a   :  { %v1135_v50 = vcombine.low %v671_v2, %v673_v43  ;;  %v1142_v51 = vrot.slane %v1132_v44, %v4448_v34  ;;  %4083 = vmatprep.subr.bf16.mxu0 %v4286_v11 }
  0x5b   :  { %v1131_v47 = vcombine.low %v1114_v36, %v1128_v37  ;;  %v1129_v48 = vcombine.low %v1107_v38, %v1121_v40  ;;  %v1130_v49 = vcombine.high %v1107_v38, %v1121_v40  ;;  %v1149_v53 = vrot.slane %v1133_v39, %v4448_v34  ;;  %4201 = vmatpush3.bf16.msra.mxu1 %v4291_v15 }
  0x5c   :  { %v1156_v54 = vrot.slane %v1134_v45, %v4448_v34  ;;  %v1163_v55 = vrot.slane %v1135_v50, %v4448_v34  ;;  %4202 = vmatprep.subr.bf16.mxu1 %v4294_v16 }
  0x5d   :  { %1436 = vmatprep.mubr.bf16.mxu0 %v1131_v47  ;;  %4191 = vmatmul.mubr.bf16.gmra.mrb[20].mxu1 %v1130_v49  ;;  %v1165_v56 = vcombine.high %v1142_v51, %v1149_v53  ;;  %v1164_v57 = vcombine.low %v1142_v51, %v1149_v53 }
  0x5e   :  { %1437 = vmatmul.mubr.bf16.gmra.mrb[20].mxu0 %v1129_v48  ;;  %4194 = vmatprep.mubr.msk.bf16.mxu1 %vm4315_vm0, %v5351_v1  ;;  %v1167_v58 = vcombine.high %v1156_v54, %v1163_v55  ;;  %v1166_v59 = vcombine.low %v1156_v54, %v1163_v55 }
  0x5f   :  { %v1181_v46 = vrot.slane %v1165_v56, %v4448_v34  ;;  %v1174_v62 = vrot.slane %v1164_v57, %v4448_v34  ;;  %4084 = vmatpush3.bf16.msra.mxu0 %v4287_v12  ;;  %4203 = vmatpush3.bf16.msra.mxu1 %v4294_v16  ;;  %v4317_v56 = vmov 1983009808  }
  0x60   :  { %v1195_v60 = vrot.slane %v1167_v58, %v4448_v34  ;;  %v1188_v63 = vrot.slane %v1166_v59, %v4448_v34  ;;  %4085 = vmatprep.subr.bf16.mxu0 %v4288_v17  ;;  %4204 = vmatprep.subr.bf16.mxu1 %v4295_v52  ;;  %v2741_v57 = vunpack.c.l.s4 %v4317_v56 }
  0x62   :  { %v1198_v0 = vcombine.low %v1181_v46, %v1195_v60  ;;  %v1196_v61 = vcombine.low %v1174_v62, %v1188_v63  ;;  %v1197_v3 = vcombine.high %v1174_v62, %v1188_v63 }
  0x63   :  { %4086 = vmatpush3.bf16.msra.mxu0 %v4289_v19  ;;  %4205 = vmatpush3.bf16.msra.mxu1 %v4295_v52 }
  0x64   :  { %1444 = vmatprep.mubr.bf16.mxu0 %v1198_v0  ;;  %4087 = vmatprep.subr.bf16.mxu0 %v4292_v20 }
  0x65   :  { %4195 = vmatmul.mubr.bf16.gmra.mrb[24].mxu1 %v1197_v3  ;;  %4206 = vmatprep.subr.bf16.mxu1 %v4298_v7  ;;  %v2742_v3 = vunpack.c.0.s8 %v2741_v57 }
  0x66   :  { %1445 = vmatmul.mubr.bf16.gmra.mrb[24].mxu0 %v1196_v61 }
  0x67   :  { %4088 = vmatpush3.bf16.msra.mxu0 %v4293_v22  ;;  %4207 = vmatpush3.bf16.msra.mxu1 %v4298_v7  ;;  %v4785_v52 = vsub.s32 %v2742_v3, %v4426_v25 }
  0x68   :  { %4089 = vmatprep.subr.bf16.mxu0 %v4296_v23  ;;  %4208 = vmatprep.subr.bf16.mxu1 %v4300_v26 }
  0x6b   :  { %4090 = vmatpush3.bf16.msra.mxu0 %v4297_v24  ;;  %4209 = vmatpush3.bf16.msra.mxu1 %v4300_v26 }
  0x6c   :  { %4091 = vmatprep.subr.bf16.mxu0 %v4299_v27  ;;  %4210 = vmatprep.subr.bf16.mxu1 %v4302_v21 }
  0x6f   :  { %4092 = vmatpush3.bf16.msra.mxu0 %v4301_v28  ;;  %4211 = vmatpush3.bf16.msra.mxu1 %v4302_v21 }
  0x70   :  { %4093 = vmatprep.subr.bf16.mxu0 %v4303_v29  ;;  %4212 = vmatprep.subr.bf16.mxu1 %v4305_v6 }
  0x73   :  { %4094 = vmatpush3.bf16.msra.mxu0 %v4304_v30  ;;  %4213 = vmatpush3.bf16.msra.mxu1 %v4305_v6 }
  0x74   :  { %4226 = vmatprep.subr.bf16.mxu1 %v5351_v1 }
  0xfe   :  { %v1487_v41 = vpop.f32.mrb[0].mxu1 }
  0xff   :  { %v4022_v8 = vpop.f32.mrb[0].mxu0  ;;  %v4172_v18 = vpop.f32.mrb[1].mxu1 }
 0x100   :  { %v4023_v31 = vpop.f32.mrb[1].mxu0  ;;  %v1490_v14 = vpop.f32.mrb[2].mxu1 }
 0x101   :  { %v4024_v33 = vadd.f32 %v4023_v31, %v4022_v8  ;;  %v4025_v2 = vpop.f32.mrb[2].mxu0  ;;  %v4173_v42 = vpop.f32.mrb[3].mxu1 }
 0x102   :  { %v4026_v35 = vpop.f32.mrb[3].mxu0 }
 0x103   :  { %v1399_v36 = vadd.f32 %v4024_v33, %v4772_v32  ;;  %v4027_v37 = vadd.f32 %v4026_v35, %v4025_v2 }
 0x105   :  { %v1488_v38 = vadd.f32 %v1487_v41, %v1399_v36  ;;  %v1402_v40 = vadd.f32 %v4027_v37, %v4772_v32 }
 0x106   :  { %v1495_v43 = vpop.f32.mrb[4].mxu1 }
 0x107   :  { %v1491_v44 = vadd.f32 %v1490_v14, %v1402_v40  ;;  %v4028_v39 = vpop.f32.mrb[4].mxu0  ;;  %v4176_v45 = vpop.f32.mrb[5].mxu1  ;;  %v1542_v49 = vmax.f32 %v1488_v38, 0.0 }
 0x108   :  { %v4029_v47 = vpop.f32.mrb[5].mxu0  ;;  %v1498_v48 = vpop.f32.mrb[6].mxu1 }
 0x109   :  { %v1543_v50 = vmax.f32 %v1491_v44, 0.0  ;;  %v4030_v51 = vadd.f32 %v4029_v47, %v4028_v39  ;;  %v4031_v53 = vpop.f32.mrb[6].mxu0  ;;  %v4177_v54 = vpop.f32.mrb[7].mxu1 }
 0x10a   :  { %v4032_v55 = vpop.f32.mrb[7].mxu0 }
 0x10b   :  { %v1556_v58 = vpack.c.bf16 %v1543_v50, %v1542_v49  ;;  %v3921_v46 = vpack.c.bf16 %v1543_v50, %v1543_v50  ;;  %v1407_v59 = vadd.f32 %v4030_v51, %v4772_v32  ;;  %v4033_v62 = vadd.f32 %v4032_v55, %v4031_v53 }
 0x10d   :  { %v1577_v60 = vrot.slane %v1556_v58, %v4448_v34  ;;  %v1584_v63 = vrot.slane %v3921_v46, %v4448_v34  ;;  %v1496_v0 = vadd.f32 %v1495_v43, %v1407_v59  ;;  %v1410_v61 = vadd.f32 %v4033_v62, %v4772_v32 }
 0x10f   :  { %v1585_v13 = vcombine.high %v1577_v60, %v1577_v60  ;;  %v1586_v4 = vcombine.high %v1584_v63, %v1584_v63  ;;  %v1593_v5 = vrot.slane %v1577_v60, %v4448_v34  ;;  %v1600_v9 = vrot.slane %v1584_v63, %v4448_v34  ;;  %v1503_v17 = vpop.f32.mrb[8].mxu1  ;;  %v4034_v20 = vpop.f32.mrb[8].mxu0 }
 0x110   :  { %v1499_v10 = vadd.f32 %v1498_v48, %v1410_v61  ;;  %v4180_v22 = vpop.f32.mrb[9].mxu1  ;;  %v1544_v26 = vmax.f32 %v1496_v0, 0.0  ;;  %v4035_v27 = vpop.f32.mrb[9].mxu0 }
 0x111   :  { %v1607_v11 = vrot.slane %v1585_v13, %v4448_v34  ;;  %v1614_v12 = vrot.slane %v1586_v4, %v4448_v34  ;;  %v1615_v15 = vcombine.high %v1593_v5, %v1593_v5  ;;  %v1616_v16 = vcombine.high %v1600_v9, %v1600_v9  ;;  %v1506_v28 = vpop.f32.mrb[10].mxu1  ;;  %v4037_v41 = vpop.f32.mrb[10].mxu0 }
 0x112   :  { %v1545_v19 = vmax.f32 %v1499_v10, 0.0  ;;  %v4181_v8 = vpop.f32.mrb[11].mxu1  ;;  %v4038_v33 = vpop.f32.mrb[11].mxu0  ;;  %v4036_v36 = vadd.f32 %v4035_v27, %v4034_v20 }
 0x113   :  { %v1617_v7 = vcombine.high %v1607_v11, %v1607_v11  ;;  %v1913_v23 = vcombine.low %v1593_v5, %v1607_v11  ;;  %v3928_v24 = vcombine.high %v1593_v5, %v1607_v11  ;;  %v1618_v21 = vcombine.high %v1614_v12, %v1614_v12 }
 0x114   :  { %v1915_v29 = vcombine.low %v1600_v9, %v1614_v12  ;;  %v2239_v30 = vrot.slane %v1616_v16, %v4448_v34  ;;  %v2417_v6 = vcombine.low %v1607_v11, %v1615_v15  ;;  %v1557_v14 = vpack.c.bf16 %v1545_v19, %v1544_v26 }
 0x115   :  { %v4789_v18 = vrot.slane %v1913_v23, %v4448_v34  ;;  %v4792_v25 = vrot.slane %v3928_v24, %v4448_v34  ;;  %v2418_v31 = vcombine.low %v1617_v7, %v1600_v9  ;;  %v2419_v42 = vcombine.low %v1614_v12, %v1616_v16 }
 0x116   :  { %v4795_v2 = vrot.slane %v1915_v29, %v4448_v34  ;;  %v3922_v35 = vpack.c.bf16 %v1545_v19, %v1545_v19  ;;  %v2426_v38 = vrot.slane %v2417_v6, %v4448_v34  ;;  %v1626_v40 = vrot.slane %v1557_v14, %v4448_v34 }
 0x117   :  { %v1937_v37 = vcombine.low %v4789_v18, %v4792_v25  ;;  %v4039_v43 = vadd.f32 %v4038_v33, %v4037_v41  ;;  %v2433_v39 = vrot.slane %v2418_v31, %v4448_v34  ;;  %v1415_v47 = vadd.f32 %v4036_v36, %v4772_v32  ;;  %v1511_v53 = vpop.f32.mrb[12].mxu1  ;;  %v4040_v57 = vpop.f32.mrb[12].mxu0 }
 0x118   :  { %v4802_v44 = vcombine.low %v4795_v2, %v2239_v30  ;;  %v1633_v45 = vrot.slane %v3922_v35, %v4448_v34  ;;  %v1951_v48 = vrot.slane %v4795_v2, %v4448_v34  ;;  %v1634_v49 = vcombine.high %v1626_v40, %v1626_v40  ;;  %v4184_v58 = vpop.f32.mrb[13].mxu1  ;;  %v4041_v0 = vpop.f32.mrb[13].mxu0 }
 0x119   :  { %v1642_v50 = vrot.slane %v1626_v40, %v4448_v34  ;;  %v1418_v51 = vadd.f32 %v4039_v43, %v4772_v32  ;;  %v1504_v56 = vadd.f32 %v1503_v17, %v1415_v47  ;;  %v2440_v46 = vrot.slane %v2419_v42, %v4448_v34  ;;  %v1514_v61 = vpop.f32.mrb[14].mxu1  ;;  %v4043_v5 = vpop.f32.mrb[14].mxu0 }
 0x11a   :  { %v2247_v54 = vrot.slane %v4802_v44, %v4448_v34  ;;  %v1635_v55 = vcombine.high %v1633_v45, %v1633_v45  ;;  %v1656_v59 = vrot.slane %v1634_v49, %v4448_v34  ;;  %v1649_v3 = vrot.slane %v1633_v45, %v4448_v34  ;;  %v4185_v9 = vpop.f32.mrb[15].mxu1  ;;  %v4044_v17 = vpop.f32.mrb[15].mxu0 }
 0x11b   :  { %v1664_v62 = vcombine.high %v1642_v50, %v1642_v50  ;;  %v4815_v60 = vcombine.low %v1618_v21, %v1642_v50  ;;  %v1507_v63 = vadd.f32 %v1506_v28, %v1418_v51  ;;  %v4042_v4 = vadd.f32 %v4041_v0, %v4040_v57 }
 0x11c   :  { %v1663_v13 = vrot.slane %v1635_v55, %v4448_v34  ;;  %v2441_v10 = vcombine.low %v2426_v38, %v2433_v39  ;;  %v1666_v11 = vcombine.high %v1656_v59, %v1656_v59  ;;  %v2457_v15 = vcombine.low %v1642_v50, %v1656_v59 }
 0x11d   :  { %v4819_v12 = vcombine.low %v1656_v59, %v1664_v62  ;;  %v1546_v16 = vmax.f32 %v1504_v56, 0.0  ;;  %v1962_v19 = vrot.slane %v4815_v60, %v4448_v34  ;;  %v3934_v22 = vcombine.high %v1642_v50, %v1656_v59 }
 0x11e   :  { %v3929_v20 = vcombine.high %v1649_v3, %v1663_v13  ;;  %v2459_v7 = vcombine.low %v1649_v3, %v1663_v13  ;;  %v1955_v23 = vcombine.low %v1666_v11, %v1649_v3  ;;  %v2255_v26 = vrot.slane %v1663_v13, %v4448_v34 }
 0x11f   :  { %v1969_v24 = vrot.slane %v4819_v12, %v4448_v34  ;;  %v1547_v27 = vmax.f32 %v1507_v63, 0.0  ;;  %v4830_v21 = vrot.slane %v2457_v15, %v4448_v34  ;;  %v4833_v29 = vrot.slane %v3934_v22, %v4448_v34 }
 0x120   :  { %v4827_v28 = vrot.slane %v3929_v20, %v4448_v34  ;;  %v2480_v30 = vrot.slane %v2459_v7, %v4448_v34  ;;  %v4837_v6 = vrot.slane %v1955_v23, %v4448_v34  ;;  %v1423_v31 = vadd.f32 %v4042_v4, %v4772_v32 }
 0x121   :  { %v1558_v41 = vpack.c.bf16 %v1547_v27, %v1546_v16  ;;  %v3923_v8 = vpack.c.bf16 %v1547_v27, %v1547_v27  ;;  %v4045_v33 = vadd.f32 %v4044_v17, %v4043_v5  ;;  %v2448_v42 = vrot.slane %v2441_v10, %v4448_v34 }
 0x122   :  { %v4841_v14 = vrot.slane %v2480_v30, %v4448_v34  ;;  %v4845_v35 = vrot.slane %v2440_v46, %v4448_v34  ;;  %v4848_v36 = vcombine.low %v4837_v6, %v2255_v26  ;;  %v1667_v38 = vcombine.high %v1663_v13, %v1663_v13 }
 0x123   :  { %v1675_v40 = vrot.slane %v1558_v41, %v4448_v34  ;;  %v1682_v43 = vrot.slane %v3923_v8, %v4448_v34  ;;  %v1512_v45 = vadd.f32 %v1511_v53, %v1423_v31  ;;  %v1426_v47 = vadd.f32 %v4045_v33, %v4772_v32 }
 0x124   :  { %v3943_v39 = vcombine.low %v4841_v14, %v4841_v14  ;;  %v4856_v49 = vcombine.low %v2448_v42, %v4845_v35  ;;  %v1991_v50 = vrot.slane %v4837_v6, %v4448_v34  ;;  %v2263_v57 = vrot.slane %v4848_v36, %v4448_v34 }
 0x125   :  { %v1683_v51 = vcombine.high %v1675_v40, %v1675_v40  ;;  %v1684_v55 = vcombine.high %v1682_v43, %v1682_v43  ;;  %v1691_v56 = vrot.slane %v1675_v40, %v4448_v34  ;;  %v1698_v53 = vrot.slane %v1682_v43, %v4448_v34  ;;  %v1519_v3 = vpop.f32.mrb[16].mxu1 }
 0x126   :  { %v4864_v58 = vrot.slane %v3943_v39, %v4785_v52  ;;  %v1515_v46 = vadd.f32 %v1514_v61, %v1426_v47  ;;  %v1548_v5 = vmax.f32 %v1512_v45, 0.0  ;;  %v4046_v10 = vpop.f32.mrb[16].mxu0  ;;  %v4188_v11 = vpop.f32.mrb[17].mxu1  ;;  %v2481_v61 = vcombine.low %v4830_v21, %v4833_v29 }
 0x127   :  { %v1705_v59 = vrot.slane %v1683_v51, %v4448_v34  ;;  %v1712_v62 = vrot.slane %v1684_v55, %v4448_v34  ;;  %v1713_v63 = vcombine.high %v1691_v56, %v1691_v56  ;;  %v2497_v0 = vcombine.low %v1667_v38, %v1691_v56  ;;  %v4047_v20 = vpop.f32.mrb[17].mxu0  ;;  %v1522_v22 = vpop.f32.mrb[18].mxu1 }
 0x128   :  { %v1714_v13 = vcombine.high %v1698_v53, %v1698_v53  ;;  %v2271_v4 = vrot.slane %v1698_v53, %v4448_v34  ;;  %v1549_v9 = vmax.f32 %v1515_v46, 0.0  ;;  %v4049_v30 = vpop.f32.mrb[18].mxu0  ;;  %v4189_v41 = vpop.f32.mrb[19].mxu1  ;;  %v4048_v51 = vadd.f32 %v4047_v20, %v4046_v10 }
 0x129   :  { %v1715_v15 = vcombine.high %v1705_v59, %v1705_v59  ;;  %v1994_v16 = vcombine.low %v1691_v56, %v1705_v59  ;;  %v3930_v17 = vcombine.high %v1691_v56, %v1705_v59  ;;  %v1716_v7 = vcombine.high %v1712_v62, %v1712_v62  ;;  %v4050_v38 = vpop.f32.mrb[19].mxu0 }
 0x12a   :  { %v4872_v23 = vcombine.low %v1712_v62, %v1714_v13  ;;  %v2498_v26 = vcombine.low %v1705_v59, %v1713_v63  ;;  %v2506_v27 = vrot.slane %v2497_v0, %v4448_v34  ;;  %v3935_v33 = vcombine.high %v1698_v53, %v1712_v62 }
 0x12b   :  { %v4876_v8 = vrot.slane %v3930_v17, %v4448_v34  ;;  %v2499_v31 = vcombine.low %v1715_v15, %v1698_v53  ;;  %v1559_v42 = vpack.c.bf16 %v1549_v9, %v1548_v5  ;;  %v4879_v40 = vrot.slane %v1994_v16, %v4448_v34 }
 0x12c   :  { %v2513_v29 = vrot.slane %v2498_v26, %v4448_v34  ;;  %v3924_v43 = vpack.c.bf16 %v1549_v9, %v1549_v9  ;;  %v4051_v53 = vadd.f32 %v4050_v38, %v4049_v30  ;;  %v2488_v46 = vrot.slane %v2481_v61, %v4448_v34 }
 0x12d   :  { %v4885_v39 = vcombine.low %v4876_v8, %v2271_v4  ;;  %v2520_v45 = vrot.slane %v2499_v31, %v4448_v34  ;;  %v1724_v47 = vrot.slane %v1559_v42, %v4448_v34  ;;  %v4894_v59 = vrot.slane %v3935_v33, %v4448_v34 }
 0x12e   :  { %v4889_v55 = vcombine.low %v2506_v27, %v2513_v29  ;;  %v1731_v56 = vrot.slane %v3924_v43, %v4448_v34  ;;  %v1431_v0 = vadd.f32 %v4048_v51, %v4772_v32  ;;  %v1434_v5 = vadd.f32 %v4051_v53, %v4772_v32 }
 0x12f   :  { %v1732_v62 = vcombine.high %v1724_v47, %v1724_v47  ;;  %v1740_v63 = vrot.slane %v1724_v47, %v4448_v34  ;;  %v2496_v9 = vcombine.low %v2488_v46, %v4841_v14  ;;  %v4905_v17 = vrot.slane %v2520_v45, %v4448_v34 }
 0x130   :  { %v1733_v13 = vcombine.high %v1731_v56, %v1731_v56  ;;  %v1747_v4 = vrot.slane %v1731_v56, %v4448_v34  ;;  %v1520_v16 = vadd.f32 %v1519_v3, %v1431_v0  ;;  %v1523_v26 = vadd.f32 %v1522_v22, %v1434_v5  ;;  %v1527_v27 = vpop.f32.mrb[20].mxu1 }
 0x131   :  { %v1754_v10 = vrot.slane %v1732_v62, %v4448_v34  ;;  %v1762_v11 = vcombine.high %v1740_v63, %v1740_v63  ;;  %v4902_v15 = vcombine.low %v1716_v7, %v1740_v63  ;;  %v4052_v33 = vpop.f32.mrb[20].mxu0  ;;  %v4192_v14 = vpop.f32.mrb[21].mxu1  ;;  %v3941_v42 = vcombine.low %v4845_v35, %v4845_v35 }
 0x132   :  { %v1761_v20 = vrot.slane %v1733_v13, %v4448_v34  ;;  %v1763_v61 = vcombine.high %v1747_v4, %v1747_v4  ;;  %v4053_v43 = vpop.f32.mrb[21].mxu0  ;;  %v1530_v45 = vpop.f32.mrb[22].mxu1  ;;  %v1550_v51 = vmax.f32 %v1520_v16, 0.0  ;;  %v1551_v56 = vmax.f32 %v1523_v26, 0.0 }
 0x133   :  { %v1764_v30 = vcombine.high %v1754_v10, %v1754_v10  ;;  %v4908_v41 = vcombine.low %v1754_v10, %v1762_v11  ;;  %v2538_v31 = vcombine.low %v1740_v63, %v1754_v10  ;;  %v3936_v3 = vcombine.high %v1740_v63, %v1754_v10  ;;  %v4055_v53 = vpop.f32.mrb[22].mxu0  ;;  %v4193_v46 = vpop.f32.mrb[23].mxu1 }
 0x134   :  { %v2073_v7 = vcombine.low %v1747_v4, %v1761_v20  ;;  %v3931_v38 = vcombine.high %v1747_v4, %v1761_v20  ;;  %v4912_v29 = vcombine.low %v1761_v20, %v1763_v61  ;;  %v4056_v13 = vpop.f32.mrb[23].mxu0  ;;  %v1560_v10 = vpack.c.bf16 %v1551_v56, %v1550_v51 }
 0x135   :  { %v4917_v47 = vrot.slane %v2538_v31, %v4448_v34  ;;  %v4926_v63 = vrot.slane %v1764_v30, %v4448_v34  ;;  %v4929_v0 = vrot.slane %v3936_v3, %v4448_v34  ;;  %v3925_v11 = vpack.c.bf16 %v1551_v56, %v1551_v56 }
 0x136   :  { %v4920_v62 = vrot.slane %v2073_v7, %v4448_v34  ;;  %v4923_v35 = vrot.slane %v3931_v38, %v4448_v34  ;;  %v1765_v61 = vcombine.high %v1761_v20, %v1761_v20  ;;  %v4054_v26 = vadd.f32 %v4053_v43, %v4052_v33 }
 0x137   :  { %v4057_v31 = vadd.f32 %v4056_v13, %v4055_v53  ;;  %v1773_v30 = vrot.slane %v1560_v10, %v4448_v34  ;;  %v1780_v14 = vrot.slane %v3925_v11, %v4448_v34  ;;  %v2760_v7 = vrot.slane %v4856_v49, %v4785_v52 }
 0x138   :  { %v4942_v38 = vrot.slane %v2496_v9, %v4785_v52  ;;  %v1439_v3 = vadd.f32 %v4054_v26, %v4772_v32  ;;  %v2767_v56 = vrot.slane %v3941_v42, %v4785_v52  ;;  %v4951_v20 = vrot.slane %v1937_v37, %v4448_v34  ;;  %v1535_v9 = vpop.f32.mrb[24].mxu1 }
 0x139   :  { %v1442_v51 = vadd.f32 %v4057_v31, %v4772_v32  ;;  %v1781_v33 = vcombine.high %v1773_v30, %v1773_v30  ;;  %v1782_v43 = vcombine.high %v1780_v14, %v1780_v14  ;;  %v1789_v53 = vrot.slane %v1773_v30, %v4448_v34  ;;  %v4058_v11 = vpop.f32.mrb[24].mxu0  ;;  %v4196_v26 = vpop.f32.mrb[25].mxu1 }
 0x13a   :  { %v1796_v49 = vrot.slane %v1780_v14, %v4448_v34  ;;  %v1528_v46 = vadd.f32 %v1527_v27, %v1439_v3  ;;  %v3958_v10 = vcombine.low %v2767_v56, %v4942_v38  ;;  %v4960_v18 = vcombine.low %v4951_v20, %v1951_v48  ;;  %v4059_v27 = vpop.f32.mrb[25].mxu0 }
 0x13b   :  { %v1531_v13 = vadd.f32 %v1530_v45, %v1442_v51  ;;  %v4963_v25 = vrot.slane %v1781_v33, %v4448_v34  ;;  %v1810_v37 = vrot.slane %v1782_v43, %v4448_v34  ;;  %v4966_v42 = vcombine.high %v1789_v53, %v1789_v53  ;;  %v1538_v45 = vpop.f32.mrb[26].mxu1  ;;  %v4061_v2 = vpop.f32.mrb[26].mxu0 }
 0x13c   :  { %v1812_v31 = vcombine.high %v1796_v49, %v1796_v49  ;;  %v4968_v30 = vcombine.low %v1765_v61, %v1789_v53  ;;  %v1552_v14 = vmax.f32 %v1528_v46, 0.0  ;;  %v3081_v51 = vrot.slane %v2760_v7, %v4785_v52  ;;  %v4197_v56 = vpop.f32.mrb[27].mxu1  ;;  %v4062_v1 = vpop.f32.mrb[27].mxu0 }
 0x13d   :  { %v1553_v3 = vmax.f32 %v1531_v13, 0.0  ;;  %v1813_v48 = vcombine.high %v4963_v25, %v4963_v25  ;;  %v2075_v33 = vcombine.low %v1789_v53, %v4963_v25  ;;  %v3095_v43 = vrot.slane %v3958_v10, %v4785_v52 }
 0x13e   :  { %v4974_v26 = vcombine.low %v1810_v37, %v1812_v31  ;;  %v2303_v61 = vrot.slane %v4966_v42, %v4448_v34  ;;  %v2617_v13 = vcombine.low %v1796_v49, %v1810_v37  ;;  %v3937_v7 = vcombine.high %v1796_v49, %v1810_v37 }
 0x13f   :  { %v4982_v56 = vrot.slane %v2075_v33, %v4448_v34  ;;  %v4984_v16 = vcombine.low %v1813_v48, %v1796_v49  ;;  %v1561_v31 = vpack.c.bf16 %v1553_v3, %v1552_v14  ;;  %v3926_v46 = vpack.c.bf16 %v1553_v3, %v1553_v3 }
 0x140   :  { %v4991_v5 = vrot.slane %v2617_v13, %v4448_v34  ;;  %v4994_v4 = vrot.slane %v3937_v7, %v4448_v34  ;;  %v1814_v48 = vcombine.high %v1810_v37, %v1810_v37  ;;  %v3098_v21 = vcombine.low %v3081_v51, %v3095_v43 }
 0x141   :  { %v2122_v49 = vrot.slane %v4984_v16, %v4448_v34  ;;  %v1822_v53 = vrot.slane %v1561_v31, %v4448_v34  ;;  %v1829_v14 = vrot.slane %v3926_v46, %v4448_v34  ;;  %v4060_v10 = vadd.f32 %v4059_v27, %v4058_v11 }
 0x142   :  { %v4063_v22 = vadd.f32 %v4062_v1, %v4061_v2  ;;  %v5003_v13 = vcombine.low %v4982_v56, %v2303_v61  ;;  %v1977_v37 = vcombine.low %v1962_v19, %v1969_v24  ;;  %4214 = vmatprep.mubr.bf16.mxu1 %v3098_v21  ;;  %v2248_v60 = vcombine.low %v4951_v20, %v2247_v54 }
 0x143   :  { %v1830_v7 = vcombine.high %v1822_v53, %v1822_v53  ;;  %v1838_v3 = vrot.slane %v1822_v53, %v4448_v34  ;;  %v1831_v33 = vcombine.high %v1829_v14, %v1829_v14  ;;  %v1845_v31 = vrot.slane %v1829_v14, %v4448_v34 }
 0x144   :  { %v1447_v11 = vadd.f32 %v4060_v10, %v4772_v32  ;;  %v1450_v1 = vadd.f32 %v4063_v22, %v4772_v32  ;;  %v5017_v2 = vrot.slane %v1977_v37, %v4448_v34  ;;  %v2311_v46 = vrot.slane %v5003_v13, %v4448_v34 }
 0x145   :  { %v1852_v27 = vrot.slane %v1830_v7, %v4448_v34  ;;  %v2115_v51 = vcombine.low %v1814_v48, %v1838_v3  ;;  %v1859_v12 = vrot.slane %v1831_v33, %v4448_v34  ;;  %v1861_v19 = vcombine.high %v1845_v31, %v1845_v31 }
 0x146   :  { %v1536_v24 = vadd.f32 %v1535_v9, %v1447_v11  ;;  %v1539_v21 = vadd.f32 %v1538_v45, %v1450_v1  ;;  %v2528_v6 = vrot.slane %v4889_v55, %v4448_v34  ;;  %v2031_v55 = vrot.slane %v4876_v8, %v4448_v34 }
 0x147   :  { %v1862_v43 = vcombine.high %v1852_v27, %v1852_v27  ;;  %v5025_v61 = vrot.slane %v2115_v51, %v4448_v34  ;;  %v3932_v32 = vcombine.high %v1838_v3, %v1852_v27  ;;  %v2319_v22 = vrot.slane %v1852_v27, %v4448_v34 }
 0x148   :  { %v2154_v53 = vcombine.low %v1845_v31, %v1859_v12  ;;  %v3933_v10 = vcombine.high %v1845_v31, %v1859_v12  ;;  %v2619_v44 = vcombine.low %v1838_v3, %v1852_v27  ;;  %v5038_v45 = vcombine.low %v1859_v12, %v1861_v19 }
 0x149   :  { %v5031_v54 = vrot.slane %v3932_v32, %v4448_v34  ;;  %v5034_v33 = vcombine.low %v5025_v61, %v2319_v22  ;;  %v5036_v9 = vcombine.low %v1862_v43, %v1845_v31  ;;  %v1554_v37 = vmax.f32 %v1536_v24, 0.0 }
 0x14a   :  { %v5043_v14 = vrot.slane %v2154_v53, %v4448_v34  ;;  %v2640_v7 = vrot.slane %v2619_v44, %v4448_v34  ;;  %v5047_v3 = vrot.slane %v3933_v10, %v4448_v34  ;;  %v1555_v1 = vmax.f32 %v1539_v21, 0.0 }
 0x14b   :  { %v5055_v31 = vcombine.low %v5017_v2, %v1991_v50  ;;  %v1863_v19 = vcombine.high %v1859_v12, %v1859_v12  ;;  %v2264_v24 = vcombine.low %v5017_v2, %v2263_v57  ;;  %v2364_v32 = vshll.u32 %v2248_v60, 16 }
 0x14c   :  { %v5060_v51 = vrot.slane %v2640_v7, %v4448_v34  ;;  %v1562_v43 = vpack.c.bf16 %v1555_v1, %v1554_v37  ;;  %v3927_v21 = vpack.c.bf16 %v1555_v1, %v1555_v1  ;;  %v2362_v50 = vshrl.u32 %v2248_v60, 16 }
 0x14d   :  { %v2371_v22 = vshll.u32 %v2264_v24, 16  ;;  %v2017_v53 = vcombine.low %v4827_v28, %v4879_v40  ;;  %v2279_v10 = vrot.slane %v4885_v39, %v4448_v34  ;;  %v2366_v44 = vrot.slane %v2364_v32, 1 }
 0x14e   :  { %v1871_v12 = vrot.slane %v1562_v43, %v4448_v34  ;;  %v1878_v36 = vrot.slane %v3927_v21, %v4448_v34  ;;  %v2536_v57 = vcombine.low %v2528_v6, %v4905_v17  ;;  %v2369_v7 = vshrl.u32 %v2264_v24, 16 }
 0x14f   :  { %v2373_v37 = vrot.slane %v2371_v22, 1  ;;  %v5076_v1 = vrot.slane %v2017_v53, %v4448_v34  ;;  %v2367_v43 = vor.u32 %v2366_v44, %v2362_v50  ;;  %v2056_v24 = vrot.slane %v4908_v41, %v4448_v34 }
 0x150   :  { %v1879_v60 = vcombine.high %v1871_v12, %v1871_v12  ;;  %v1880_v28 = vcombine.high %v1878_v36, %v1878_v36  ;;  %v1887_v40 = vrot.slane %v1871_v12, %v4448_v34  ;;  %v5082_v39 = vrot.slane %v1878_v36, %v4448_v34 }
 0x151   :  { %v2374_v21 = vor.u32 %v2373_v37, %v2369_v7  ;;  %v2280_v32 = vcombine.low %v5076_v1, %v2279_v10  ;;  %v3940_v50 = vcombine.low %v4951_v20, %v2367_v43  ;;  %v2738_v10 = vcombine.high %v4960_v18, %v2367_v43 }
 0x152   :  { %v1901_v6 = vrot.slane %v1879_v60, %v4448_v34  ;;  %v5089_v22 = vrot.slane %v1880_v28, %v4448_v34  ;;  %v1909_v8 = vcombine.high %v1887_v40, %v1887_v40  ;;  %v1910_v53 = vcombine.high %v5082_v39, %v5082_v39 }
 0x153   :  { %v2335_v12 = vrot.slane %v1887_v40, %v4448_v34  ;;  %v5094_v36 = vcombine.low %v1863_v19, %v1887_v40  ;;  %v2828_v37 = vrot.slane %v2536_v57, %v4785_v52  ;;  %v2378_v48 = vshll.u32 %v2280_v32, 16 }
 0x154   :  { %v1911_v44 = vcombine.high %v1901_v6, %v1901_v6  ;;  %v1912_v41 = vcombine.high %v5089_v22, %v5089_v22  ;;  %v2193_v7 = vcombine.low %v1901_v6, %v1909_v8  ;;  %v5102_v60 = vcombine.low %v5089_v22, %v1910_v53 }
 0x155   :  { %v5105_v28 = vcombine.low %v5047_v3, %v2335_v12  ;;  %v3938_v27 = vcombine.high %v1887_v40, %v1901_v6  ;;  %v2698_v19 = vcombine.low %v5082_v39, %v5089_v22  ;;  %v2746_v8 = vrot.slane %v3940_v50, %v4785_v52 }
 0x156   :  { %v2194_v20 = vcombine.low %v1911_v44, %v5082_v39  ;;  %v2202_v18 = vrot.slane %v2193_v7, %v4448_v34  ;;  %v5115_v57 = vrot.slane %v1912_v41, %v4448_v34  ;;  %v2753_v6 = vrot.slane %v2738_v10, %v4785_v52 }
 0x157   :  { %v5118_v53 = vrot.slane %v3938_v27, %v4448_v34  ;;  %v5121_v40 = vrot.slane %v2698_v19, %v4448_v34  ;;  %v3942_v44 = vcombine.low %v5017_v2, %v2374_v21  ;;  %v2772_v7 = vcombine.high %v5055_v31, %v2374_v21 }
 0x158   :  { %v2209_v12 = vrot.slane %v2194_v20, %v4448_v34  ;;  %v3074_v43 = vrot.slane %v2746_v8, %v4785_v52  ;;  %v3130_v41 = vrot.slane %v2828_v37, %v4785_v52  ;;  %v2376_v27 = vshrl.u32 %v2280_v32, 16 }
 0x159   :  { %v2721_v50 = vcombine.low %v5118_v53, %v5121_v40  ;;  %v2780_v19 = vrot.slane %v3942_v44, %v4785_v52  ;;  %v2787_v10 = vrot.slane %v2772_v7, %v4785_v52  ;;  %v2032_v20 = vcombine.low %v5076_v1, %v2031_v55 }
 0x15a   :  { %v5131_v11 = vcombine.low %v2202_v18, %v2209_v12  ;;  %v2380_v2 = vrot.slane %v2378_v48, 1  ;;  %v5353_v31 = vrot.slane %v4902_v15, %v4448_v34  ;;  %v5354_v21 = vrot.slane %v4872_v23, %v4448_v34 }
 0x15b   :  { %v2071_v37 = vrot.slane %v2056_v24, %v4448_v34  ;;  %v2288_v32 = vcombine.low %v2056_v24, %v4926_v63  ;;  %v3957_v18 = vcombine.low %v2753_v6, %v2780_v19  ;;  %v2804_v12 = vcombine.low %v2787_v10, %v4864_v58 }
 0x15c   :  { %v2057_v8 = vcombine.low %v5354_v21, %v5353_v31  ;;  %v2803_v44 = vcombine.high %v2780_v19, %v4942_v38  ;;  %v5355_v48 = vcombine.low %v4894_v59, %v4917_v47  ;;  %v2381_v7 = vor.u32 %v2380_v2, %v2376_v27 }
 0x15d   :  { %v2295_v23 = vrot.slane %v2288_v32, %v4448_v34  ;;  %v2575_v31 = vrot.slane %v4929_v0, %v4448_v34  ;;  %v3088_v63 = vrot.slane %v3957_v18, %v4785_v52  ;;  %v3960_v24 = vcombine.high %v4942_v38, %v2804_v12 }
 0x15e   :  { %v2568_v55 = vrot.slane %v5355_v48, %v4448_v34  ;;  %v2064_v15 = vrot.slane %v2057_v8, %v4448_v34  ;;  %v3959_v58 = vcombine.low %v2803_v44, %v2787_v10  ;;  %v3945_v6 = vcombine.low %v4905_v17, %v4905_v17 }
 0x15f   :  { %v3944_v19 = vcombine.low %v5076_v1, %v2381_v7  ;;  %v3096_v2 = vcombine.low %v3074_v43, %v3088_v63  ;;  %v3097_v21 = vcombine.high %v3074_v43, %v3088_v63  ;;  %v3116_v8 = vrot.slane %v3960_v24, %v4785_v52 }
 0x160   :  { %v2072_v59 = vcombine.low %v2064_v15, %v2071_v37  ;;  %v2296_v47 = vcombine.low %v2064_v15, %v2295_v23  ;;  %v2576_v27 = vcombine.low %v2568_v55, %v2575_v31  ;;  %v3109_v32 = vrot.slane %v3959_v58, %v4785_v52 }
 0x161   :  { %v2814_v0 = vrot.slane %v3944_v19, %v4785_v52  ;;  %v2806_v38 = vcombine.high %v2032_v20, %v2381_v7  ;;  %3468 = vmatprep.mubr.bf16.mxu0 %v3097_v21  ;;  %v3133_v10 = vcombine.low %v3116_v8, %v3130_v41  ;;  %v2835_v1 = vrot.slane %v3945_v6, %v4785_v52 }
 0x162   :  { %v2383_v18 = vshrl.u32 %v2296_v47, 16  ;;  %v2385_v48 = vshll.u32 %v2296_v47, 16  ;;  %v2862_v17 = vrot.slane %v2576_v27, %v4785_v52  ;;  %v3947_v37 = vcombine.low %v2575_v31, %v2575_v31  ;;  %3469 = vmatmul.mubr.bf16.vlgmr.msra.gmra.mrb[28].mxu0 %v3096_v2 }
 0x163   :  { %v3123_v12 = vrot.slane %v2814_v0, %v4785_v52  ;;  %v2821_v44 = vrot.slane %v2806_v38, %v4785_v52  ;;  %v5356_v55 = vcombine.low %v4963_v25, %v4966_v42  ;;  %4215 = vmatmul.mubr.bf16.vlgmr.msra.gmra.mrb[28].mxu1 %v3133_v10  ;;  %v5357_v7 = vrot.slane %v4968_v30, %v4448_v34 }
 0x164   :  { %v2387_v43 = vrot.slane %v2385_v48, 1  ;;  %v2869_v20 = vrot.slane %v3947_v37, %v4785_v52  ;;  %v3962_v41 = vcombine.low %v2835_v1, %v2862_v17  ;;  %v5358_v31 = vrot.slane %v4912_v29, %v4448_v34 }
 0x165   :  { %v2600_v23 = vrot.slane %v5356_v55, %v4448_v34  ;;  %v2641_v24 = vcombine.low %v4991_v5, %v4994_v4  ;;  %v3132_v58 = vcombine.high %v3109_v32, %v3123_v12  ;;  %v3131_v6 = vcombine.low %v3109_v32, %v3123_v12 }
 0x166   :  { %v2601_v63 = vcombine.low %v5358_v31, %v5357_v7  ;;  %v2388_v19 = vor.u32 %v2387_v43, %v2383_v18  ;;  %v3151_v42 = vrot.slane %v3962_v41, %v4785_v52  ;;  %v5359_v30 = vcombine.low %v4920_v62, %v4923_v35 }
 0x167   :  { %v2615_v25 = vrot.slane %v2600_v23, %v4448_v34  ;;  %v2648_v27 = vrot.slane %v2641_v24, %v4448_v34  ;;  %3476 = vmatprep.mubr.bf16.mxu0 %v3132_v58  ;;  %v5360_v5 = vrot.slane %v4974_v26, %v4448_v34  ;;  %v5361_v18 = vrot.slane %v4982_v56, %v4448_v34 }
 0x168   :  { %v2608_v47 = vrot.slane %v2601_v63, %v4448_v34  ;;  %v2104_v29 = vrot.slane %v5359_v30, %v4448_v34  ;;  %v3946_v2 = vcombine.low %v2064_v15, %v2388_v19  ;;  %v2840_v21 = vcombine.high %v2072_v59, %v2388_v19 }
 0x169   :  { %v3949_v4 = vcombine.low %v2615_v25, %v2615_v25  ;;  %v2137_v8 = vcombine.low %v2122_v49, %v5360_v5  ;;  %v2656_v0 = vcombine.low %v2648_v27, %v5060_v51  ;;  %v5363_v23 = vrot.slane %v5025_v61, %v4448_v34 }
 0x16a   :  { %v2616_v32 = vcombine.low %v2608_v47, %v2615_v25  ;;  %v2112_v48 = vcombine.low %v2104_v29, %v5361_v18  ;;  %v2312_v62 = vcombine.low %v2104_v29, %v2311_v46  ;;  %v2848_v35 = vrot.slane %v3946_v2, %v4785_v52  ;;  %3477 = vmatmul.mubr.bf16.gmra.mrb[32].mxu0 %v3131_v6 }
 0x16b   :  { %v2855_v15 = vrot.slane %v2840_v21, %v4785_v52  ;;  %v2903_v26 = vrot.slane %v3949_v4, %v4785_v52  ;;  %v2144_v16 = vrot.slane %v2137_v8, %v4448_v34  ;;  %v5206_v59 = vrot.slane %v2656_v0, %v4785_v52 }
 0x16c   :  { %v2896_v49 = vrot.slane %v2616_v32, %v4785_v52  ;;  %v2390_v38 = vshrl.u32 %v2312_v62, 16  ;;  %v2392_v56 = vshll.u32 %v2312_v62, 16  ;;  %v2871_v10 = vcombine.high %v2848_v35, %v2862_v17 }
 0x16d   :  { %v3961_v1 = vcombine.low %v2821_v44, %v2848_v35  ;;  %v2872_v13 = vcombine.low %v2855_v15, %v2869_v20  ;;  %v5362_v46 = vrot.slane %v5034_v33, %v4448_v34  ;;  %v3966_v12 = vcombine.low %v2903_v26, %v5206_v59 }
 0x16e   :  { %v3186_v43 = vrot.slane %v2896_v49, %v4785_v52  ;;  %v2394_v55 = vrot.slane %v2392_v56, 1  ;;  %v2152_v41 = vcombine.low %v2144_v16, %v5363_v23  ;;  %v3963_v7 = vcombine.low %v2871_v10, %v2855_v15 }
 0x16f   :  { %v2328_v37 = vcombine.low %v2144_v16, %v5362_v46  ;;  %v3144_v31 = vrot.slane %v3961_v1, %v4785_v52  ;;  %v3964_v63 = vcombine.high %v2862_v17, %v2872_v13  ;;  %v3200_v44 = vrot.slane %v3966_v12, %v4785_v52 }
 0x170   :  { %v2395_v20 = vor.u32 %v2394_v55, %v2390_v38  ;;  %v2666_v33 = vrot.slane %v5036_v9, %v4448_v34  ;;  %v3158_v6 = vrot.slane %v3963_v7, %v4785_v52  ;;  %v2673_v61 = vrot.slane %v5038_v45, %v4448_v34 }
 0x171   :  { %v2397_v24 = vshrl.u32 %v2328_v37, 16  ;;  %v2399_v58 = vshll.u32 %v2328_v37, 16  ;;  %v3165_v19 = vrot.slane %v3964_v63, %v4785_v52  ;;  %v2680_v25 = vrot.slane %v5094_v36, %v4448_v34 }
 0x172   :  { %v3203_v47 = vcombine.low %v3186_v43, %v3200_v44  ;;  %v3948_v27 = vcombine.low %v2104_v29, %v2395_v20  ;;  %v2874_v30 = vcombine.high %v2112_v48, %v2395_v20  ;;  %v3167_v2 = vcombine.high %v3144_v31, %v3158_v6 }
 0x173   :  { %v2401_v17 = vrot.slane %v2399_v58, 1  ;;  %v3168_v21 = vcombine.low %v3151_v42, %v3165_v19  ;;  %v3166_v4 = vcombine.low %v3144_v31, %v3158_v6  ;;  %v2681_v5 = vcombine.low %v2666_v33, %v2673_v61 }
 0x174   :  { %v5364_v9 = vcombine.high %v5082_v39, %v5089_v22  ;;  %v2882_v0 = vrot.slane %v3948_v27, %v4785_v52  ;;  %v2695_v45 = vrot.slane %v2680_v25, %v4448_v34  ;;  %3484 = vmatprep.mubr.bf16.mxu0 %v3167_v2  ;;  %v3951_v29 = vcombine.low %v5060_v51, %v5060_v51 }
 0x175   :  { %v2402_v32 = vor.u32 %v2401_v17, %v2397_v24  ;;  %4218 = vmatprep.mubr.bf16.mxu1 %v3168_v21  ;;  %v2688_v36 = vrot.slane %v2681_v5, %v4448_v34  ;;  %v5365_v42 = vcombine.low %v5031_v54, %v5043_v14  ;;  %3485 = vmatmul.mubr.bf16.gmra.mrb[36].mxu0 %v3166_v4 }
 0x176   :  { %v2720_v8 = vrot.slane %v5364_v9, %v4448_v34  ;;  %4219 = vmatmul.mubr.bf16.gmra.mrb[32].mxu1 %v3203_v47  ;;  %v2889_v39 = vrot.slane %v2874_v30, %v4785_v52  ;;  %v2937_v35 = vrot.slane %v3951_v29, %v4785_v52  ;;  %v2343_v15 = vrot.slane %v5105_v28, %v4448_v34 }
 0x177   :  { %v2184_v18 = vrot.slane %v5365_v42, %v4448_v34  ;;  %v3950_v22 = vcombine.low %v2144_v16, %v2402_v32  ;;  %v2908_v48 = vcombine.high %v2152_v41, %v2402_v32  ;;  %v2696_v62 = vcombine.low %v2688_v36, %v2695_v45 }
 0x178   :  { %v2191_v51 = vrot.slane %v5047_v3, %v4448_v34  ;;  %v2216_v14 = vrot.slane %v5102_v60, %v4448_v34  ;;  %v2224_v16 = vrot.slane %v5131_v11, %v4448_v34  ;;  %v3179_v49 = vrot.slane %v2882_v0, %v4785_v52 }
 0x179   :  { %v2916_v26 = vrot.slane %v3950_v22, %v4785_v52  ;;  %v2923_v54 = vrot.slane %v2908_v48, %v4785_v52  ;;  %v2964_v38 = vrot.slane %v2696_v62, %v4785_v52  ;;  %v2344_v56 = vcombine.low %v2184_v18, %v2343_v15 }
 0x17a   :  { %v2192_v10 = vcombine.low %v2184_v18, %v2191_v51  ;;  %v2231_v13 = vrot.slane %v2216_v14, %v4448_v34  ;;  %v2352_v60 = vcombine.low %v2216_v14, %v5115_v57  ;;  %v2728_v11 = vrot.slane %v2721_v50, %v4448_v34 }
 0x17b   :  { %v3965_v28 = vcombine.low %v2889_v39, %v2916_v26  ;;  %v2940_v1 = vcombine.low %v2923_v54, %v2937_v35  ;;  %v2939_v3 = vcombine.high %v2916_v26, %v5206_v59  ;;  %v3235_v46 = vrot.slane %v2964_v38, %v4785_v52  ;;  %v4309_v38 = vld [vmem:[%s5347_s5 + $0x18] sm:$0xff]  }
 0x17c   :  { %v2406_v37 = vshll.u32 %v2344_v56, 16  ;;  %v2232_v23 = vcombine.low %v2224_v16, %v2231_v13  ;;  %v2404_v41 = vshrl.u32 %v2344_v56, 16  ;;  %v2359_v31 = vrot.slane %v2352_v60, %v4448_v34  ;;  %v4310_v56 = vld [vmem:[%s5347_s5 + $0x20] sm:$0xff]  }
 0x17d   :  { %v3193_v12 = vrot.slane %v3965_v28, %v4785_v52  ;;  %v3968_v43 = vcombine.high %v5206_v59, %v2940_v1  ;;  %v3967_v55 = vcombine.low %v2939_v3, %v2923_v54  ;;  %v2735_v63 = vrot.slane %v2720_v8, %v4448_v34  ;;  %v4312_v28 = vld [vmem:[%s5347_s5 + $0x30] sm:$0xff]   ;;  %v4313_v1 = vld [vmem:[%s5347_s5 + $0x38] sm:$0xff]  }
 0x17e   :  { %v2408_v7 = vrot.slane %v2406_v37, 1  ;;  %v3953_v20 = vcombine.low %v2695_v45, %v2695_v45  ;;  %v2360_v53 = vcombine.low %v2224_v16, %v2359_v31  ;;  %v5366_v14 = vmov 0.0   ;;  %v5315_v37 = vld [vmem:[%s5348_s4] ss:$0 sm:$0xff] }
 0x17f   :  { %v3202_v24 = vcombine.high %v3179_v49, %v3193_v12  ;;  %v3201_v44 = vcombine.low %v3179_v49, %v3193_v12  ;;  %v3221_v57 = vrot.slane %v3968_v43, %v4785_v52  ;;  %v2736_v40 = vcombine.low %v2728_v11, %v2735_v63  ;;  %v4308_v49 = vld [vmem:[%s5347_s5 + $0x10] sm:$0xff]  }
 0x180   :  { %v2409_v58 = vor.u32 %v2408_v7, %v2404_v41  ;;  %v2413_v33 = vshll.u32 %v2360_v53, 16  ;;  %v2971_v61 = vrot.slane %v3953_v20, %v4785_v52  ;;  %v2411_v25 = vshrl.u32 %v2360_v53, 16 }
 0x181   :  { %3492 = vmatprep.mubr.bf16.mxu0 %v3202_v24  ;;  %v3238_v50 = vcombine.low %v3221_v57, %v3235_v46  ;;  %v2998_v19 = vrot.slane %v2736_v40, %v4785_v52  ;;  %v3214_v27 = vrot.slane %v3967_v55, %v4785_v52  ;;  %v3955_v21 = vcombine.low %v2735_v63, %v2735_v63 }
 0x182   :  { %3493 = vmatmul.mubr.bf16.gmra.mrb[40].mxu0 %v3201_v44  ;;  %v3952_v59 = vcombine.low %v2184_v18, %v2409_v58  ;;  %v2942_v6 = vcombine.high %v2192_v10, %v2409_v58  ;;  %v2415_v47 = vrot.slane %v2413_v33, 1  ;;  %v4311_v10 = vld [vmem:[%s5347_s5 + $0x28] sm:$0xff]  }
 0x183   :  { %4222 = vmatprep.mubr.bf16.mxu1 %v3238_v50  ;;  %v3970_v17 = vcombine.low %v2971_v61, %v2998_v19  ;;  %v3005_v36 = vrot.slane %v3955_v21, %v4785_v52 }
 0x184   :  { %v2950_v34 = vrot.slane %v3952_v59, %v4785_v52  ;;  %v2416_v2 = vor.u32 %v2415_v47, %v2411_v25  ;;  %v2957_v32 = vrot.slane %v2942_v6, %v4785_v52 }
 0x185   :  { %v3256_v35 = vrot.slane %v3970_v17, %v4785_v52 }
 0x186   :  { %v3228_v30 = vrot.slane %v2950_v34, %v4785_v52  ;;  %v3954_v9 = vcombine.low %v2224_v16, %v2416_v2  ;;  %v2976_v8 = vcombine.high %v2232_v23, %v2416_v2  ;;  %v4306_v16 = vld [vmem:[%s5347_s5] sm:$0xff]  }
 0x187   :  { %4227 = vmatpush3.bf16.msra.mxu1 %v4306_v16 }
 0x188   :  { %v3237_v4 = vcombine.high %v3214_v27, %v3228_v30  ;;  %v3236_v5 = vcombine.low %v3214_v27, %v3228_v30  ;;  %v2984_v0 = vrot.slane %v3954_v9, %v4785_v52  ;;  %v2991_v45 = vrot.slane %v2976_v8, %v4785_v52  ;;  %4228 = vmatprep.subr.bf16.mxu1 %v5366_v14 }
 0x18a   :  { %3500 = vmatprep.mubr.bf16.mxu0 %v3237_v4  ;;  %v3007_v29 = vcombine.high %v2984_v0, %v2998_v19  ;;  %v3969_v42 = vcombine.low %v2957_v32, %v2984_v0  ;;  %v3008_v18 = vcombine.low %v2991_v45, %v3005_v36 }
 0x18b   :  { %3501 = vmatmul.mubr.bf16.gmra.mrb[44].mxu0 %v3236_v5 }
 0x18c   :  { %v3971_v39 = vcombine.low %v3007_v29, %v2991_v45  ;;  %v3972_v22 = vcombine.high %v2998_v19, %v3008_v18  ;;  %v3249_v48 = vrot.slane %v3969_v42, %v4785_v52 }
 0x18e   :  { %v3263_v62 = vrot.slane %v3971_v39, %v4785_v52  ;;  %v3270_v15 = vrot.slane %v3972_v22, %v4785_v52  ;;  %v4307_v52 = vld [vmem:[%s5347_s5 + $0x8] sm:$0xff]  }
 0x18f   :  { %4229 = vmatpush3.bf16.msra.mxu1 %v4307_v52 }
 0x190   :  { %v3272_v51 = vcombine.high %v3249_v48, %v3263_v62  ;;  %v3273_v26 = vcombine.low %v3256_v35, %v3270_v15  ;;  %v3271_v54 = vcombine.low %v3249_v48, %v3263_v62  ;;  %4230 = vmatprep.subr.bf16.mxu1 %v5366_v14 }
 0x192   :  { %3508 = vmatprep.mubr.bf16.mxu0 %v3272_v51  ;;  %4223 = vmatmul.mubr.bf16.gmra.mrb[36].mxu1 %v3273_v26 }
 0x193   :  { %3509 = vmatmul.mubr.bf16.gmra.mrb[48].mxu0 %v3271_v54  ;;  %4242 = vmatprep.mubr.msk.bf16.mxu1 %vm4315_vm0, %v5366_v14 }
 0x194   :  { %4231 = vmatpush3.bf16.msra.mxu1 %v4308_v49 }
 0x195   :  { %4232 = vmatprep.subr.bf16.mxu1 %v5366_v14 }
 0x198   :  { %4233 = vmatpush3.bf16.msra.mxu1 %v4309_v38 }
 0x199   :  { %4234 = vmatprep.subr.bf16.mxu1 %v5366_v14 }
 0x19c   :  { %4235 = vmatpush3.bf16.msra.mxu1 %v4310_v56 }
 0x19d   :  { %4236 = vmatprep.subr.bf16.mxu1 %v5366_v14 }
 0x1a0   :  { %4237 = vmatpush3.bf16.msra.mxu1 %v4311_v10 }
 0x1a1   :  { %4238 = vmatprep.subr.bf16.mxu1 %v5366_v14 }
 0x1a4   :  { %4239 = vmatpush3.bf16.msra.mxu1 %v4312_v28 }
 0x1a5   :  { %4240 = vmatprep.subr.bf16.mxu1 %v5366_v14 }
 0x1a8   :  { %4241 = vmatpush3.bf16.msra.mxu1 %v4313_v1 }
 0x235   :  { %v4095_v3 = vpop.f32.mrb[28].mxu0 }
 0x236   :  { %v4096_v13 = vpop.f32.mrb[29].mxu0  ;;  %v4216_v46 = vpop.f32.mrb[28].mxu1 }
 0x237   :  { %v4097_v60 = vadd.f32 %v4096_v13, %v4095_v3  ;;  %v4098_v11 = vpop.f32.mrb[30].mxu0  ;;  %v3551_v12 = vpop.f32.mrb[29].mxu1 }
 0x238   :  { %v4099_v43 = vpop.f32.mrb[31].mxu0  ;;  %v4217_v55 = vpop.f32.mrb[30].mxu1 }
 0x239   :  { %v3471_v23 = vadd.f32 %v4097_v60, %v5315_v37  ;;  %v4100_v41 = vadd.f32 %v4099_v43, %v4098_v11  ;;  %v3554_v7 = vpop.f32.mrb[31].mxu1 }
 0x23b   :  { %v3552_v31 = vadd.f32 %v3551_v12, %v3471_v23  ;;  %v3474_v63 = vadd.f32 %v4100_v41, %v5315_v37 }
 0x23d   :  { %v3598_v24 = vmax.f32 %v3552_v31, 0.0  ;;  %v3555_v44 = vadd.f32 %v3554_v7, %v3474_v63  ;;  %v4101_v57 = vpop.f32.mrb[32].mxu0 }
 0x23e   :  { %v4102_v20 = vpop.f32.mrb[33].mxu0 }
 0x23f   :  { %v3622_v58 = vcombine.high %v3598_v24, %v3598_v24  ;;  %v3599_v53 = vmax.f32 %v3555_v44, 0.0  ;;  %v4103_v40 = vadd.f32 %v4102_v20, %v4101_v57  ;;  %v4104_v50 = vpop.f32.mrb[34].mxu0 }
 0x240   :  { %v4105_v59 = vpop.f32.mrb[35].mxu0 }
 0x241   :  { %v3638_v33 = vcombine.low %v3598_v24, %v3622_v58  ;;  %v3655_v6 = vsel %vm3654_vm1, %v3599_v53, -inf  ;;  %v3479_v19 = vadd.f32 %v4103_v40, %v5315_v37  ;;  %v4106_v61 = vadd.f32 %v4105_v59, %v4104_v50 }
 0x242   :  { %v3623_v17 = vcombine.high %v3599_v53, %v3599_v53 }
 0x243   :  { %v3656_v34 = vmax.f32 %v3638_v33, %v3655_v6  ;;  %v3560_v25 = vadd.f32 %v4216_v46, %v3479_v19  ;;  %v3482_v47 = vadd.f32 %v4106_v61, %v5315_v37 }
 0x245   :  { %v3657_v27 = vrot.slane %v3656_v34, 4  ;;  %v3600_v30 = vmax.f32 %v3560_v25, 0.0  ;;  %v3563_v2 = vadd.f32 %v4217_v55, %v3482_v47 }
 0x247   :  { %v3658_v5 = vmax.f32 %v3656_v34, %v3657_v27  ;;  %v3624_v9 = vcombine.high %v3600_v30, %v3600_v30  ;;  %v3639_v8 = vcombine.low %v3623_v17, %v3600_v30  ;;  %v3601_v45 = vmax.f32 %v3563_v2, 0.0 }
 0x248   :  { %v4107_v21 = vpop.f32.mrb[36].mxu0 }
 0x249   :  { %v4220_v4 = vpop.f32.mrb[32].mxu1  ;;  %v4108_v32 = vpop.f32.mrb[37].mxu0  ;;  %v3659_v18 = vrot.slane %v3658_v5, 2  ;;  %v3663_v39 = vsel %vm3654_vm1, %v3624_v9, -inf  ;;  %v3625_v26 = vcombine.high %v3601_v45, %v3601_v45 }
 0x24a   :  { %v3567_v0 = vpop.f32.mrb[33].mxu1  ;;  %v4109_v36 = vadd.f32 %v4108_v32, %v4107_v21  ;;  %v4110_v29 = vpop.f32.mrb[38].mxu0  ;;  %v3664_v62 = vmax.f32 %v3639_v8, %v3663_v39 }
 0x24b   :  { %v4221_v42 = vpop.f32.mrb[34].mxu1  ;;  %v4111_v22 = vpop.f32.mrb[39].mxu0  ;;  %v3660_v51 = vmax.f32 %v3658_v5, %v3659_v18  ;;  %v3640_v10 = vcombine.low %v3601_v45, %v3625_v26 }
 0x24c   :  { %v3570_v48 = vpop.f32.mrb[35].mxu1  ;;  %v4112_v35 = vadd.f32 %v4111_v22, %v4110_v29  ;;  %v3487_v15 = vadd.f32 %v4109_v36, %v5315_v37  ;;  %v3665_v54 = vrot.slane %v3664_v62, 4 }
 0x24d   :  { %v3661_v52 = vrot.slane %v3660_v51, 1 }
 0x24e   :  { %v3568_v14 = vadd.f32 %v3567_v0, %v3487_v15  ;;  %v3490_v16 = vadd.f32 %v4112_v35, %v5315_v37  ;;  %v3666_v49 = vmax.f32 %v3664_v62, %v3665_v54 }
 0x24f   :  { %v3662_v11 = vmax.f32 %v3660_v51, %v3661_v52 }
 0x250   :  { %v3602_v38 = vmax.f32 %v3568_v14, 0.0  ;;  %v3571_v56 = vadd.f32 %v3570_v48, %v3490_v16  ;;  %v3667_v28 = vrot.slane %v3666_v49, 2 }
 0x251   :  { %v3719_v40 = vpack.c.bf16 %v3662_v11, %v3662_v11 }
 0x252   :  { %v3626_v1 = vcombine.high %v3602_v38, %v3602_v38  ;;  %v3671_v3 = vsel %vm3654_vm1, %v3602_v38, -inf  ;;  %v3603_v13 = vmax.f32 %v3571_v56, 0.0  ;;  %v3668_v12 = vmax.f32 %v3666_v49, %v3667_v28 }
 0x253   :  { %v3672_v46 = vmax.f32 %v3640_v10, %v3671_v3  ;;  %v3758_v27 = vunpack.c.l.b16 %v3719_v40 }
 0x254   :  { %v3627_v43 = vcombine.high %v3603_v13, %v3603_v13  ;;  %v3641_v55 = vcombine.low %v3626_v1, %v3603_v13  ;;  %v3669_v63 = vrot.slane %v3668_v12, 1 }
 0x255   :  { %v4113_v60 = vpop.f32.mrb[40].mxu0  ;;  %v3673_v41 = vrot.slane %v3672_v46, 4 }
 0x256   :  { %v4114_v23 = vpop.f32.mrb[41].mxu0  ;;  %v3679_v24 = vsel %vm3654_vm1, %v3627_v43, -inf  ;;  %v3670_v50 = vmax.f32 %v3668_v12, %v3669_v63 }
 0x257   :  { %v4115_v7 = vadd.f32 %v4114_v23, %v4113_v60  ;;  %v4116_v31 = vpop.f32.mrb[42].mxu0  ;;  %v3674_v57 = vmax.f32 %v3672_v46, %v3673_v41  ;;  %v3680_v20 = vmax.f32 %v3641_v55, %v3679_v24 }
 0x258   :  { %v4117_v44 = vpop.f32.mrb[43].mxu0  ;;  %v3720_v61 = vpack.c.bf16 %v3670_v50, %v3670_v50 }
 0x259   :  { %v3495_v58 = vadd.f32 %v4115_v7, %v5315_v37  ;;  %v4118_v53 = vadd.f32 %v4117_v44, %v4116_v31  ;;  %v3675_v59 = vrot.slane %v3674_v57, 2  ;;  %v3681_v33 = vrot.slane %v3680_v20, 4 }
 0x25a   :  { %v3759_v30 = vunpack.c.l.b16 %v3720_v61 }
 0x25b   :  { %v3576_v6 = vadd.f32 %v4220_v4, %v3495_v58  ;;  %v3498_v19 = vadd.f32 %v4118_v53, %v5315_v37  ;;  %v3676_v34 = vmax.f32 %v3674_v57, %v3675_v59  ;;  %v3682_v25 = vmax.f32 %v3680_v20, %v3681_v33 }
 0x25c   :  { %v3767_v0 = vsel %vm3766_vm2, %v3759_v30, %v3758_v27 }
 0x25d   :  { %v3604_v47 = vmax.f32 %v3576_v6, 0.0  ;;  %v3579_v17 = vadd.f32 %v4221_v42, %v3498_v19  ;;  %v3677_v21 = vrot.slane %v3676_v34, 1  ;;  %v3683_v5 = vrot.slane %v3682_v25, 2 }
 0x25e   :  { %v4119_v2 = vpop.f32.mrb[44].mxu0 }
 0x25f   :  { %v3628_v9 = vcombine.high %v3604_v47, %v3604_v47  ;;  %v3605_v8 = vmax.f32 %v3579_v17, 0.0  ;;  %v4120_v32 = vpop.f32.mrb[45].mxu0  ;;  %v3678_v4 = vmax.f32 %v3676_v34, %v3677_v21  ;;  %v3684_v29 = vmax.f32 %v3682_v25, %v3683_v5 }
 0x260   :  { %v4121_v45 = vadd.f32 %v4120_v32, %v4119_v2  ;;  %v4122_v36 = vpop.f32.mrb[46].mxu0 }
 0x261   :  { %v3642_v18 = vcombine.low %v3604_v47, %v3628_v9  ;;  %v3687_v39 = vsel %vm3654_vm1, %v3605_v8, -inf  ;;  %v4123_v22 = vpop.f32.mrb[47].mxu0  ;;  %v3721_v62 = vpack.c.bf16 %v3678_v4, %v3678_v4  ;;  %v3685_v42 = vrot.slane %v3684_v29, 1 }
 0x262   :  { %v4124_v48 = vadd.f32 %v4123_v22, %v4122_v36  ;;  %v3503_v54 = vadd.f32 %v4121_v45, %v5315_v37  ;;  %v3629_v60 = vcombine.high %v3605_v8, %v3605_v8 }
 0x263   :  { %v3688_v35 = vmax.f32 %v3642_v18, %v3687_v39  ;;  %v3760_v15 = vunpack.c.l.b16 %v3721_v62  ;;  %v3686_v51 = vmax.f32 %v3684_v29, %v3685_v42 }
 0x264   :  { %v3506_v38 = vadd.f32 %v4124_v48, %v5315_v37 }
 0x265   :  { %v3689_v26 = vrot.slane %v3688_v35, 4  ;;  %v3769_v14 = vsel %vm3768_vm3, %v3760_v15, %v3767_v0  ;;  %v3722_v16 = vpack.c.bf16 %v3686_v51, %v3686_v51  ;;  %v4224_v49 = vpop.f32.mrb[36].mxu1 }
 0x266   :  { %v3583_v56 = vpop.f32.mrb[37].mxu1  ;;  %v4125_v10 = vpop.f32.mrb[48].mxu0 }
 0x267   :  { %v3690_v52 = vmax.f32 %v3688_v35, %v3689_v26  ;;  %v3761_v28 = vunpack.c.l.b16 %v3722_v16  ;;  %v3584_v3 = vadd.f32 %v3583_v56, %v3503_v54  ;;  %v4225_v13 = vpop.f32.mrb[38].mxu1  ;;  %v4126_v46 = vpop.f32.mrb[49].mxu0 }
 0x268   :  { %v3586_v11 = vpop.f32.mrb[39].mxu1  ;;  %v4127_v12 = vadd.f32 %v4126_v46, %v4125_v10  ;;  %v4128_v43 = vpop.f32.mrb[50].mxu0  ;;  %v3997_v46 = vld [vmem:[%s5349_s6] ss:$0 sm:$0xff] }
 0x269   :  { %v3691_v1 = vrot.slane %v3690_v52, 2  ;;  %v3771_v55 = vsel %vm3770_vm4, %v3761_v28, %v3769_v14  ;;  %v3606_v41 = vmax.f32 %v3584_v3, 0.0  ;;  %v3587_v7 = vadd.f32 %v3586_v11, %v3506_v38  ;;  %v4129_v31 = vpop.f32.mrb[51].mxu0 }
 0x26a   :  { %v3511_v63 = vadd.f32 %v4127_v12, %v5315_v37  ;;  %v4130_v24 = vadd.f32 %v4129_v31, %v4128_v43 }
 0x26b   :  { %v3692_v23 = vmax.f32 %v3690_v52, %v3691_v1  ;;  %v3630_v57 = vcombine.high %v3606_v41, %v3606_v41  ;;  %v3643_v20 = vcombine.low %v3629_v60, %v3606_v41  ;;  %v3607_v58 = vmax.f32 %v3587_v7, 0.0 }
 0x26c   :  { %v3592_v53 = vadd.f32 %v4224_v49, %v3511_v63  ;;  %v3514_v40 = vadd.f32 %v4130_v24, %v5315_v37 }
 0x26d   :  { %v3693_v44 = vrot.slane %v3692_v23, 1  ;;  %v3695_v59 = vsel %vm3654_vm1, %v3630_v57, -inf  ;;  %v3631_v33 = vcombine.high %v3607_v58, %v3607_v58 }
 0x26e   :  { %v3696_v6 = vmax.f32 %v3643_v20, %v3695_v59  ;;  %v3608_v19 = vmax.f32 %v3592_v53, 0.0  ;;  %v3595_v61 = vadd.f32 %v4225_v13, %v3514_v40 }
 0x26f   :  { %v3694_v50 = vmax.f32 %v3692_v23, %v3693_v44  ;;  %v3644_v25 = vcombine.low %v3607_v58, %v3631_v33 }
 0x270   :  { %v3697_v47 = vrot.slane %v3696_v6, 4  ;;  %v3632_v17 = vcombine.high %v3608_v19, %v3608_v19  ;;  %v3703_v27 = vsel %vm3654_vm1, %v3608_v19, -inf  ;;  %v3609_v30 = vmax.f32 %v3595_v61, 0.0 }
 0x271   :  { %v3723_v34 = vpack.c.bf16 %v3694_v50, %v3694_v50  ;;  %v3704_v21 = vmax.f32 %v3644_v25, %v3703_v27 }
 0x272   :  { %v3698_v5 = vmax.f32 %v3696_v6, %v3697_v47  ;;  %v3633_v9 = vcombine.high %v3609_v30, %v3609_v30  ;;  %v3645_v37 = vcombine.low %v3632_v17, %v3609_v30 }
 0x273   :  { %v3762_v2 = vunpack.c.l.b16 %v3723_v34  ;;  %v3705_v32 = vrot.slane %v3704_v21, 4 }
 0x274   :  { %v3699_v0 = vrot.slane %v3698_v5, 2  ;;  %v3711_v45 = vsel %vm3654_vm1, %v3633_v9, -inf }
 0x275   :  { %v3773_v8 = vsel %vm3772_vm5, %v3762_v2, %v3771_v55  ;;  %v3706_v36 = vmax.f32 %v3704_v21, %v3705_v32  ;;  %v3712_v4 = vmax.f32 %v3645_v37, %v3711_v45 }
 0x276   :  { %v3700_v29 = vmax.f32 %v3698_v5, %v3699_v0 }
 0x277   :  { %v3707_v18 = vrot.slane %v3706_v36, 2  ;;  %v3713_v39 = vrot.slane %v3712_v4, 4 }
 0x278   :  { %v3701_v22 = vrot.slane %v3700_v29, 1 }
 0x279   :  { %v3708_v48 = vmax.f32 %v3706_v36, %v3707_v18  ;;  %v3714_v62 = vmax.f32 %v3712_v4, %v3713_v39 }
 0x27a   :  { %v3702_v42 = vmax.f32 %v3700_v29, %v3701_v22 }
 0x27b   :  { %v3709_v35 = vrot.slane %v3708_v48, 1  ;;  %v3715_v15 = vrot.slane %v3714_v62, 2 }
 0x27c   :  { %v3724_v51 = vpack.c.bf16 %v3702_v42, %v3702_v42 }
 0x27d   :  { %v3710_v26 = vmax.f32 %v3708_v48, %v3709_v35  ;;  %v3716_v54 = vmax.f32 %v3714_v62, %v3715_v15 }
 0x27e   :  { %v3763_v14 = vunpack.c.l.b16 %v3724_v51 }
 0x27f   :  { %v3725_v16 = vpack.c.bf16 %v3710_v26, %v3710_v26  ;;  %v3717_v52 = vrot.slane %v3716_v54, 1 }
 0x280   :  { %v3775_v49 = vsel %vm3774_vm6, %v3763_v14, %v3773_v8 }
 0x281   :  { %v3764_v38 = vunpack.c.l.b16 %v3725_v16  ;;  %v3718_v56 = vmax.f32 %v3716_v54, %v3717_v52 }
 0x283   :  { %v3726_v10 = vpack.c.bf16 %v3718_v56, %v3718_v56  ;;  %v3777_v28 = vsel %vm3776_vm7, %v3764_v38, %v3775_v49 }
 0x285   :  { %v3765_v1 = vunpack.c.l.b16 %v3726_v10 }
 0x287   :  { %v3779_v3 = vsel %vm3778_vm8, %v3765_v1, %v3777_v28 }
 0x288   :  { %v3780_v13 = vpack.c.b16 %v3779_v3, %v3779_v3 }
 0x28a   :  { %4243 = vmatmul.mubr.bf16.vlgmr.msra.gmra.mrb[40].mxu1 %v3780_v13 }
 0x35d   :  { %v3864_v60 = vpop.f32.mrb[40].mxu1 }
 0x35e   :  { %v3865_v11 = vadd.f32 %v3997_v46, %v3864_v60  ;;  %v4244_v12 = vpop.f32.mrb[41].mxu1 }
 0x35f   :  { %v3867_v43 = vpop.f32.mrb[42].mxu1 }
 0x360   :  { %v3870_v55 = vmax.f32 %v3865_v11, 0.0  ;;  %v4245_v23 = vpop.f32.mrb[43].mxu1 }
 0x362   :  { %3871 = vst [vmem:[%s5350_s7] sm:$0xff] %v3870_v55 }

// kernel: strgnn_forward.9
= control target key start
LH: loop header
LB: loop body
LE: loop exit
PB: predicated region body
PF: predicated region fallthrough
CT: control target
= control target key end

     0   :  { %v7043_v0 = vmov 0   ;;  %s9498_s0 = inlined_call_operand.vmem [shape: s32[1024,1], index: 0, kind: input, shape index: {}]   ;;  %s9499_s2 = inlined_call_operand.vmem [shape: f32[128,128], index: 2, kind: input, shape index: {}]   ;;  %s9500_s3 = inlined_call_operand.vmem [shape: f32[128,128], index: 3, kind: input, shape index: {}]   ;;  %s9501_s1 = inlined_call_operand.vmem [shape: s32[1024,1], index: 1, kind: input, shape index: {}]   ;;  %s9502_s4 = inlined_call_operand.vmem [shape: f32[8,128], index: 4, kind: output, shape index: {}]  }
   0x1   :  { %6530 = vset.pattern.permute.xlu1 %v7043_v0  ;;  %6529 = vset.pattern.permute.xlu0 %v7043_v0  ;;  %v19_v1 = vld [vmem:[%s9498_s0 + $0x10] sm:$0xff]  ;;  %v17_v2 = vld [vmem:[%s9498_s0] sm:$0xff]  ;;  %v20_v3 = vld [vmem:[%s9498_s0 + $0x18] sm:$0xff] }
   0x2   :  { %154 = vperm.xlu1 %6530, %v19_v1   ;;  %148 = vperm.xlu0 %6529, %v17_v2   ;;  %v18_v4 = vld [vmem:[%s9498_s0 + $0x8] sm:$0xff]  ;;  %v21_v6 = vld [vmem:[%s9498_s0 + $0x20] sm:$0xff]  ;;  %v24_v7 = vld [vmem:[%s9498_s0 + $0x38] sm:$0xff] }
   0x3   :  { %v22_v5 = vld [vmem:[%s9498_s0 + $0x28] sm:$0xff]  ;;  %v23_v8 = vld [vmem:[%s9498_s0 + $0x30] sm:$0xff]  ;;  %v25_v10 = vld [vmem:[%s9498_s0 + $0x40] sm:$0xff] }
   0x4   :  { %v26_v9 = vld [vmem:[%s9498_s0 + $0x48] sm:$0xff]  ;;  %v1811_v11 = vld [vmem:[%s9499_s2] sm:$0xff]  ;;  %v28_v13 = vld [vmem:[%s9498_s0 + $0x58] sm:$0xff] }
   0x5   :  { %v1812_v12 = vld [vmem:[%s9499_s2 + $0x8] sm:$0xff]  ;;  %v27_v14 = vld [vmem:[%s9498_s0 + $0x50] sm:$0xff]  ;;  %v1814_v17 = vld [vmem:[%s9499_s2 + $0x18] sm:$0xff] }
   0x6   :  { %157 = vperm.xlu1 %6530, %v20_v3   ;;  %151 = vperm.xlu0 %6529, %v18_v4   ;;  %v6463_v15 = vpack.c.bf16 %v1812_v12, %v1811_v11  ;;  %v1813_v16 = vld [vmem:[%s9499_s2 + $0x10] sm:$0xff]  ;;  %v1815_v19 = vld [vmem:[%s9499_s2 + $0x20] sm:$0xff]  ;;  %v1816_v20 = vld [vmem:[%s9499_s2 + $0x28] sm:$0xff] }
   0x7   :  { %v6467_v18 = vpack.c.bf16 %v1814_v17, %v1813_v16  ;;  %v30_v21 = vld [vmem:[%s9498_s0 + $0x68] sm:$0xff]  ;;  %v29_v22 = vld [vmem:[%s9498_s0 + $0x60] sm:$0xff]  ;;  %v6471_v23 = vpack.c.bf16 %v1816_v20, %v1815_v19  ;;  %v1817_v24 = vld [vmem:[%s9499_s2 + $0x30] sm:$0xff] }
   0x8   :  { %6464 = vmatprep.subr.bf16.mxu0 %v6463_v15  ;;  %v1818_v25 = vld [vmem:[%s9499_s2 + $0x38] sm:$0xff]  ;;  %v31_v27 = vld [vmem:[%s9498_s0 + $0x70] sm:$0xff]  ;;  %v1819_v29 = vld [vmem:[%s9499_s2 + $0x40] sm:$0xff] }
   0x9   :  { %6466 = vmatpush3.bf16.msra.mxu0 %v6463_v15  ;;  %v32_v26 = vld [vmem:[%s9498_s0 + $0x78] sm:$0xff]  ;;  %v6475_v28 = vpack.c.bf16 %v1818_v25, %v1817_v24  ;;  %v1820_v30 = vld [vmem:[%s9499_s2 + $0x48] sm:$0xff]  ;;  %v33_v32 = vld [vmem:[%s9498_s0 + $0x80] sm:$0xff] }
   0xa   :  { %163 = vperm.xlu1 %6530, %v22_v5   ;;  %160 = vperm.xlu0 %6529, %v21_v6   ;;  %v34_v31 = vld [vmem:[%s9498_s0 + $0x88] sm:$0xff]  ;;  %v6479_v33 = vpack.c.bf16 %v1820_v30, %v1819_v29  ;;  %v1821_v34 = vld [vmem:[%s9499_s2 + $0x50] sm:$0xff]  ;;  %v1822_v35 = vld [vmem:[%s9499_s2 + $0x58] sm:$0xff] }
   0xb   :  { %6468 = vmatprep.subr.bf16.mxu0 %v6467_v18  ;;  %v36_v36 = vld [vmem:[%s9498_s0 + $0x98] sm:$0xff]  ;;  %v35_v37 = vld [vmem:[%s9498_s0 + $0x90] sm:$0xff]  ;;  %v6483_v38 = vpack.c.bf16 %v1822_v35, %v1821_v34  ;;  %v1823_v39 = vld [vmem:[%s9499_s2 + $0x60] sm:$0xff] }
   0xc   :  { %v1824_v40 = vld [vmem:[%s9499_s2 + $0x68] sm:$0xff]  ;;  %v37_v42 = vld [vmem:[%s9498_s0 + $0xa0] sm:$0xff]  ;;  %v1825_v44 = vld [vmem:[%s9499_s2 + $0x70] sm:$0xff] }
   0xd   :  { %6470 = vmatpush3.bf16.msra.mxu0 %v6467_v18  ;;  %v38_v41 = vld [vmem:[%s9498_s0 + $0xa8] sm:$0xff]  ;;  %v6487_v43 = vpack.c.bf16 %v1824_v40, %v1823_v39  ;;  %v1826_v45 = vld [vmem:[%s9499_s2 + $0x78] sm:$0xff]  ;;  %v39_v47 = vld [vmem:[%s9498_s0 + $0xb0] sm:$0xff] }
   0xe   :  { %169 = vperm.xlu1 %6530, %v24_v7   ;;  %166 = vperm.xlu0 %6529, %v23_v8   ;;  %v40_v46 = vld [vmem:[%s9498_s0 + $0xb8] sm:$0xff]  ;;  %v6491_v48 = vpack.c.bf16 %v1826_v45, %v1825_v44  ;;  %v42_v49 = vld [vmem:[%s9498_s0 + $0xc8] sm:$0xff]  ;;  %v41_v50 = vld [vmem:[%s9498_s0 + $0xc0] sm:$0xff] }
   0xf   :  { %6472 = vmatprep.subr.bf16.mxu0 %v6471_v23  ;;  %v44_v51 = vld [vmem:[%s9498_s0 + $0xd8] sm:$0xff]  ;;  %v43_v52 = vld [vmem:[%s9498_s0 + $0xd0] sm:$0xff]  ;;  %v46_v53 = vld [vmem:[%s9498_s0 + $0xe8] sm:$0xff] }
  0x10   :  { %v45_v54 = vld [vmem:[%s9498_s0 + $0xe0] sm:$0xff]  ;;  %v48_v55 = vld [vmem:[%s9498_s0 + $0xf8] sm:$0xff]  ;;  %v47_v56 = vld [vmem:[%s9498_s0 + $0xf0] sm:$0xff] }
  0x11   :  { %6474 = vmatpush3.bf16.msra.mxu0 %v6471_v23  ;;  %v50_v57 = vld [vmem:[%s9498_s0 + $0x108] sm:$0xff]  ;;  %v49_v58 = vld [vmem:[%s9498_s0 + $0x100] sm:$0xff]  ;;  %v52_v59 = vld [vmem:[%s9498_s0 + $0x118] sm:$0xff]  ;;  %v9503_v23 = vlaneseq }
  0x12   :  { %175 = vperm.xlu1 %6530, %v26_v9   ;;  %172 = vperm.xlu0 %6529, %v25_v10   ;;  %v51_v60 = vld [vmem:[%s9498_s0 + $0x110] sm:$0xff]  ;;  %v54_v61 = vld [vmem:[%s9498_s0 + $0x128] sm:$0xff]  ;;  %v53_v62 = vld [vmem:[%s9498_s0 + $0x120] sm:$0xff] }
  0x13   :  { %6476 = vmatprep.subr.bf16.mxu0 %v6475_v28  ;;  %v56_v63 = vld [vmem:[%s9498_s0 + $0x138] sm:$0xff]  ;;  %v55_v0 = vld [vmem:[%s9498_s0 + $0x130] sm:$0xff]  ;;  %v58_v1 = vld [vmem:[%s9498_s0 + $0x148] sm:$0xff] }
  0x14   :  { %v57_v2 = vld [vmem:[%s9498_s0 + $0x140] sm:$0xff]  ;;  %v60_v3 = vld [vmem:[%s9498_s0 + $0x158] sm:$0xff]  ;;  %v59_v4 = vld [vmem:[%s9498_s0 + $0x150] sm:$0xff] }
  0x15   :  { %6478 = vmatpush3.bf16.msra.mxu0 %v6475_v28  ;;  %v62_v5 = vld [vmem:[%s9498_s0 + $0x168] sm:$0xff]  ;;  %v61_v6 = vld [vmem:[%s9498_s0 + $0x160] sm:$0xff]  ;;  %v64_v7 = vld [vmem:[%s9498_s0 + $0x178] sm:$0xff] }
  0x16   :  { %181 = vperm.xlu1 %6530, %v28_v13   ;;  %178 = vperm.xlu0 %6529, %v27_v14   ;;  %v63_v8 = vld [vmem:[%s9498_s0 + $0x170] sm:$0xff]  ;;  %v66_v9 = vld [vmem:[%s9498_s0 + $0x188] sm:$0xff]  ;;  %v65_v10 = vld [vmem:[%s9498_s0 + $0x180] sm:$0xff] }
  0x17   :  { %6480 = vmatprep.subr.bf16.mxu0 %v6479_v33  ;;  %v68_v11 = vld [vmem:[%s9498_s0 + $0x198] sm:$0xff]  ;;  %v67_v12 = vld [vmem:[%s9498_s0 + $0x190] sm:$0xff]  ;;  %v70_v13 = vld [vmem:[%s9498_s0 + $0x1a8] sm:$0xff] }
  0x18   :  { %v69_v14 = vld [vmem:[%s9498_s0 + $0x1a0] sm:$0xff]  ;;  %v72_v15 = vld [vmem:[%s9498_s0 + $0x1b8] sm:$0xff]  ;;  %v71_v16 = vld [vmem:[%s9498_s0 + $0x1b0] sm:$0xff] }
  0x19   :  { %6482 = vmatpush3.bf16.msra.mxu0 %v6479_v33  ;;  %v74_v17 = vld [vmem:[%s9498_s0 + $0x1c8] sm:$0xff]  ;;  %v73_v18 = vld [vmem:[%s9498_s0 + $0x1c0] sm:$0xff]  ;;  %v76_v19 = vld [vmem:[%s9498_s0 + $0x1d8] sm:$0xff] }
  0x1a   :  { %187 = vperm.xlu1 %6530, %v30_v21   ;;  %184 = vperm.xlu0 %6529, %v29_v22   ;;  %v75_v20 = vld [vmem:[%s9498_s0 + $0x1d0] sm:$0xff]  ;;  %v78_v21 = vld [vmem:[%s9498_s0 + $0x1e8] sm:$0xff]  ;;  %v77_v22 = vld [vmem:[%s9498_s0 + $0x1e0] sm:$0xff] }
  0x1b   :  { %6484 = vmatprep.subr.bf16.mxu0 %v6483_v38  ;;  %v80_v24 = vld [vmem:[%s9498_s0 + $0x1f8] sm:$0xff]  ;;  %v79_v25 = vld [vmem:[%s9498_s0 + $0x1f0] sm:$0xff]  ;;  %v81_v28 = vld [vmem:[%s9498_s0 + $0x200] sm:$0xff] }
  0x1c   :  { %v83_v33 = vld [vmem:[%s9498_s0 + $0x210] sm:$0xff]  ;;  %v88_v40 = vld [vmem:[%s9498_s0 + $0x238] sm:$0xff]  ;;  %v90_v44 = vld [vmem:[%s9498_s0 + $0x248] sm:$0xff] }
  0x1d   :  { %6486 = vmatpush3.bf16.msra.mxu0 %v6483_v38  ;;  %v89_v45 = vld [vmem:[%s9498_s0 + $0x240] sm:$0xff] }
  0x1e   :  { %193 = vperm.xlu1 %6530, %v32_v26   ;;  %190 = vperm.xlu0 %6529, %v31_v27   ;;  %v7311_v26 = vand.u32 127, %v9503_v23  ;;  %v82_v27 = vld [vmem:[%s9498_s0 + $0x208] sm:$0xff]  ;;  %v1015_v23 = vld [vmem:[%s9501_s1 + $0x320] sm:$0xff] }
  0x1f   :  { %6488 = vmatprep.subr.bf16.mxu0 %v6487_v43 }
  0x21   :  { %6490 = vmatpush3.bf16.msra.mxu0 %v6487_v43 }
  0x22   :  { %199 = vperm.xlu1 %6530, %v34_v31   ;;  %196 = vperm.xlu0 %6529, %v33_v32   ;;  %v7044_v31 = vmov 1.0   ;;  %v84_v32 = vld [vmem:[%s9498_s0 + $0x218] sm:$0xff] }
  0x23   :  { %6492 = vmatprep.subr.bf16.mxu0 %v6491_v48 }
  0x25   :  { %6494 = vmatpush3.bf16.msra.mxu0 %v6491_v48  ;;  %v92_v48 = vld [vmem:[%s9498_s0 + $0x258] sm:$0xff] }
  0x26   :  { %205 = vperm.xlu1 %6530, %v36_v36   ;;  %202 = vperm.xlu0 %6529, %v35_v37   ;;  %v86_v36 = vld [vmem:[%s9498_s0 + $0x228] sm:$0xff]  ;;  %v85_v37 = vld [vmem:[%s9498_s0 + $0x220] sm:$0xff] }
  0x2a   :  { %211 = vperm.xlu1 %6530, %v38_v41   ;;  %208 = vperm.xlu0 %6529, %v37_v42   ;;  %v87_v41 = vld [vmem:[%s9498_s0 + $0x230] sm:$0xff] }
  0x2e   :  { %217 = vperm.xlu1 %6530, %v40_v46   ;;  %214 = vperm.xlu0 %6529, %v39_v47  }
  0x32   :  { %223 = vperm.xlu1 %6530, %v42_v49   ;;  %220 = vperm.xlu0 %6529, %v41_v50   ;;  %v91_v49 = vld [vmem:[%s9498_s0 + $0x250] sm:$0xff] }
  0x36   :  { %229 = vperm.xlu1 %6530, %v44_v51   ;;  %226 = vperm.xlu0 %6529, %v43_v52   ;;  %v94_v52 = vld [vmem:[%s9498_s0 + $0x268] sm:$0xff] }
  0x3a   :  { %235 = vperm.xlu1 %6530, %v46_v53   ;;  %232 = vperm.xlu0 %6529, %v45_v54   ;;  %v93_v53 = vld [vmem:[%s9498_s0 + $0x260] sm:$0xff] }
  0x3e   :  { %241 = vperm.xlu1 %6530, %v48_v55   ;;  %238 = vperm.xlu0 %6529, %v47_v56   ;;  %v96_v56 = vld [vmem:[%s9498_s0 + $0x278] sm:$0xff] }
  0x42   :  { %247 = vperm.xlu1 %6530, %v50_v57   ;;  %244 = vperm.xlu0 %6529, %v49_v58   ;;  %v95_v57 = vld [vmem:[%s9498_s0 + $0x270] sm:$0xff] }
  0x46   :  { %253 = vperm.xlu1 %6530, %v52_v59   ;;  %250 = vperm.xlu0 %6529, %v51_v60   ;;  %v98_v60 = vld [vmem:[%s9498_s0 + $0x288] sm:$0xff] }
  0x4a   :  { %259 = vperm.xlu1 %6530, %v54_v61   ;;  %256 = vperm.xlu0 %6529, %v53_v62   ;;  %v97_v61 = vld [vmem:[%s9498_s0 + $0x280] sm:$0xff] }
  0x4e   :  { %265 = vperm.xlu1 %6530, %v56_v63   ;;  %262 = vperm.xlu0 %6529, %v55_v0   ;;  %v100_v0 = vld [vmem:[%s9498_s0 + $0x298] sm:$0xff] }
  0x52   :  { %271 = vperm.xlu1 %6530, %v58_v1   ;;  %268 = vperm.xlu0 %6529, %v57_v2   ;;  %v99_v1 = vld [vmem:[%s9498_s0 + $0x290] sm:$0xff] }
  0x56   :  { %277 = vperm.xlu1 %6530, %v60_v3   ;;  %274 = vperm.xlu0 %6529, %v59_v4   ;;  %v102_v4 = vld [vmem:[%s9498_s0 + $0x2a8] sm:$0xff] }
  0x5a   :  { %283 = vperm.xlu1 %6530, %v62_v5   ;;  %280 = vperm.xlu0 %6529, %v61_v6   ;;  %v101_v5 = vld [vmem:[%s9498_s0 + $0x2a0] sm:$0xff] }
  0x5e   :  { %289 = vperm.xlu1 %6530, %v64_v7   ;;  %286 = vperm.xlu0 %6529, %v63_v8   ;;  %v104_v8 = vld [vmem:[%s9498_s0 + $0x2b8] sm:$0xff] }
  0x62   :  { %295 = vperm.xlu1 %6530, %v66_v9   ;;  %292 = vperm.xlu0 %6529, %v65_v10   ;;  %v103_v9 = vld [vmem:[%s9498_s0 + $0x2b0] sm:$0xff] }
  0x66   :  { %301 = vperm.xlu1 %6530, %v68_v11   ;;  %298 = vperm.xlu0 %6529, %v67_v12   ;;  %v106_v12 = vld [vmem:[%s9498_s0 + $0x2c8] sm:$0xff] }
  0x6a   :  { %307 = vperm.xlu1 %6530, %v70_v13   ;;  %304 = vperm.xlu0 %6529, %v69_v14   ;;  %v105_v13 = vld [vmem:[%s9498_s0 + $0x2c0] sm:$0xff] }
  0x6e   :  { %313 = vperm.xlu1 %6530, %v72_v15   ;;  %310 = vperm.xlu0 %6529, %v71_v16   ;;  %v108_v16 = vld [vmem:[%s9498_s0 + $0x2d8] sm:$0xff] }
  0x72   :  { %319 = vperm.xlu1 %6530, %v74_v17   ;;  %316 = vperm.xlu0 %6529, %v73_v18   ;;  %v107_v17 = vld [vmem:[%s9498_s0 + $0x2d0] sm:$0xff] }
  0x76   :  { %325 = vperm.xlu1 %6530, %v76_v19   ;;  %322 = vperm.xlu0 %6529, %v75_v20   ;;  %v110_v20 = vld [vmem:[%s9498_s0 + $0x2e8] sm:$0xff] }
  0x7a   :  { %331 = vperm.xlu1 %6530, %v78_v21   ;;  %328 = vperm.xlu0 %6529, %v77_v22   ;;  %v109_v21 = vld [vmem:[%s9498_s0 + $0x2e0] sm:$0xff] }
  0x7e   :  { %337 = vperm.xlu1 %6530, %v80_v24   ;;  %334 = vperm.xlu0 %6529, %v79_v25   ;;  %v112_v25 = vld [vmem:[%s9498_s0 + $0x2f8] sm:$0xff] }
  0x81   :  { %v155_v29 = vpop.permute.xlu1 %154  ;;  %v149_v30 = vpop.permute.xlu0 %148 }
  0x82   :  { %343 = vperm.xlu1 %6530, %v82_v27   ;;  %340 = vperm.xlu0 %6529, %v81_v28   ;;  %vm531_vm0 = vcmp.eq.s32.totalorder %v149_v30, %v7311_v26  ;;  %vm533_vm2 = vcmp.eq.s32.totalorder %v155_v29, %v7311_v26  ;;  %v111_v27 = vld [vmem:[%s9498_s0 + $0x2f0] sm:$0xff]  ;;  %v114_v30 = vld [vmem:[%s9498_s0 + $0x308] sm:$0xff] }
  0x83   :  { %6047 = vmatprep.mubr.msk.f32.mxu0 %vm531_vm0, %v7044_v31 }
  0x85   :  { %v158_v34 = vpop.permute.xlu1 %157  ;;  %v152_v35 = vpop.permute.xlu0 %151 }
  0x86   :  { %vm532_vm1 = vcmp.eq.s32.totalorder %v152_v35, %v7311_v26  ;;  %349 = vperm.xlu1 %6530, %v84_v32   ;;  %346 = vperm.xlu0 %6529, %v83_v33   ;;  %vm534_vm3 = vcmp.eq.s32.totalorder %v158_v34, %v7311_v26  ;;  %v113_v32 = vld [vmem:[%s9498_s0 + $0x300] sm:$0xff]  ;;  %v116_v35 = vld [vmem:[%s9498_s0 + $0x318] sm:$0xff] }
  0x87   :  { %6048 = vmatmul.mubr.msk.f32.vlgmr.msra.gmra.mrb[0].mxu0 %vm532_vm1, %v7044_v31 }
  0x88   :  { %6050 = vmatprep.mubr.msk.f32.mxu0 %vm533_vm2, %v7044_v31 }
  0x89   :  { %v164_v38 = vpop.permute.xlu1 %163  ;;  %v161_v39 = vpop.permute.xlu0 %160 }
  0x8a   :  { %vm535_vm4 = vcmp.eq.s32.totalorder %v161_v39, %v7311_v26  ;;  %355 = vperm.xlu1 %6530, %v86_v36   ;;  %352 = vperm.xlu0 %6529, %v85_v37   ;;  %vm536_vm5 = vcmp.eq.s32.totalorder %v164_v38, %v7311_v26  ;;  %v115_v36 = vld [vmem:[%s9498_s0 + $0x310] sm:$0xff]  ;;  %v118_v39 = vld [vmem:[%s9498_s0 + $0x328] sm:$0xff] }
  0x8b   :  { %6051 = vmatmul.mubr.msk.f32.gmra.mrb[2].mxu0 %vm534_vm3, %v7044_v31 }
  0x8c   :  { %6053 = vmatprep.mubr.msk.f32.mxu0 %vm535_vm4, %v7044_v31 }
  0x8d   :  { %v170_v42 = vpop.permute.xlu1 %169  ;;  %v167_v43 = vpop.permute.xlu0 %166 }
  0x8e   :  { %vm537_vm6 = vcmp.eq.s32.totalorder %v167_v43, %v7311_v26  ;;  %361 = vperm.xlu1 %6530, %v88_v40   ;;  %358 = vperm.xlu0 %6529, %v87_v41   ;;  %vm538_vm7 = vcmp.eq.s32.totalorder %v170_v42, %v7311_v26  ;;  %v117_v40 = vld [vmem:[%s9498_s0 + $0x320] sm:$0xff]  ;;  %v120_v43 = vld [vmem:[%s9498_s0 + $0x338] sm:$0xff] }
  0x8f   :  { %6054 = vmatmul.mubr.msk.f32.gmra.mrb[4].mxu0 %vm536_vm5, %v7044_v31 }
  0x90   :  { %6056 = vmatprep.mubr.msk.f32.mxu0 %vm537_vm6, %v7044_v31 }
  0x91   :  { %v176_v46 = vpop.permute.xlu1 %175  ;;  %v173_v47 = vpop.permute.xlu0 %172 }
  0x92   :  { %vm539_vm8 = vcmp.eq.s32.totalorder %v173_v47, %v7311_v26  ;;  %367 = vperm.xlu1 %6530, %v90_v44   ;;  %364 = vperm.xlu0 %6529, %v89_v45   ;;  %vm540_vm9 = vcmp.eq.s32.totalorder %v176_v46, %v7311_v26  ;;  %v119_v44 = vld [vmem:[%s9498_s0 + $0x330] sm:$0xff]  ;;  %v122_v47 = vld [vmem:[%s9498_s0 + $0x348] sm:$0xff] }
  0x93   :  { %6057 = vmatmul.mubr.msk.f32.gmra.mrb[6].mxu0 %vm538_vm7, %v7044_v31 }
  0x94   :  { %6059 = vmatprep.mubr.msk.f32.mxu0 %vm539_vm8, %v7044_v31 }
  0x95   :  { %v182_v50 = vpop.permute.xlu1 %181  ;;  %v179_v51 = vpop.permute.xlu0 %178 }
  0x96   :  { %vm541_vm10 = vcmp.eq.s32.totalorder %v179_v51, %v7311_v26  ;;  %373 = vperm.xlu1 %6530, %v92_v48   ;;  %370 = vperm.xlu0 %6529, %v91_v49   ;;  %vm542_vm11 = vcmp.eq.s32.totalorder %v182_v50, %v7311_v26  ;;  %v121_v48 = vld [vmem:[%s9498_s0 + $0x340] sm:$0xff]  ;;  %v124_v51 = vld [vmem:[%s9498_s0 + $0x358] sm:$0xff] }
  0x97   :  { %6060 = vmatmul.mubr.msk.f32.gmra.mrb[8].mxu0 %vm540_vm9, %v7044_v31 }
  0x98   :  { %6062 = vmatprep.mubr.msk.f32.mxu0 %vm541_vm10, %v7044_v31 }
  0x99   :  { %v188_v54 = vpop.permute.xlu1 %187  ;;  %v185_v55 = vpop.permute.xlu0 %184 }
  0x9a   :  { %vm543_vm12 = vcmp.eq.s32.totalorder %v185_v55, %v7311_v26  ;;  %379 = vperm.xlu1 %6530, %v94_v52   ;;  %376 = vperm.xlu0 %6529, %v93_v53   ;;  %vm544_vm13 = vcmp.eq.s32.totalorder %v188_v54, %v7311_v26  ;;  %v123_v52 = vld [vmem:[%s9498_s0 + $0x350] sm:$0xff]  ;;  %v126_v55 = vld [vmem:[%s9498_s0 + $0x368] sm:$0xff] }
  0x9b   :  { %6063 = vmatmul.mubr.msk.f32.gmra.mrb[10].mxu0 %vm542_vm11, %v7044_v31 }
  0x9c   :  { %6065 = vmatprep.mubr.msk.f32.mxu0 %vm543_vm12, %v7044_v31 }
  0x9d   :  { %v194_v58 = vpop.permute.xlu1 %193  ;;  %v191_v59 = vpop.permute.xlu0 %190 }
  0x9e   :  { %vm545_vm14 = vcmp.eq.s32.totalorder %v191_v59, %v7311_v26  ;;  %385 = vperm.xlu1 %6530, %v96_v56   ;;  %382 = vperm.xlu0 %6529, %v95_v57   ;;  %vm546_vm15 = vcmp.eq.s32.totalorder %v194_v58, %v7311_v26  ;;  %v125_v56 = vld [vmem:[%s9498_s0 + $0x360] sm:$0xff]  ;;  %v128_v59 = vld [vmem:[%s9498_s0 + $0x378] sm:$0xff] }
  0x9f   :  { %6066 = vmatmul.mubr.msk.f32.gmra.mrb[12].mxu0 %vm544_vm13, %v7044_v31 }
  0xa0   :  { %6068 = vmatprep.mubr.msk.f32.mxu0 %vm545_vm14, %v7044_v31 }
  0xa1   :  { %v200_v62 = vpop.permute.xlu1 %199  ;;  %v197_v63 = vpop.permute.xlu0 %196 }
  0xa2   :  { %vm547_vm0 = vcmp.eq.s32.totalorder %v197_v63, %v7311_v26  ;;  %391 = vperm.xlu1 %6530, %v98_v60   ;;  %388 = vperm.xlu0 %6529, %v97_v61   ;;  %vm548_vm1 = vcmp.eq.s32.totalorder %v200_v62, %v7311_v26  ;;  %v127_v60 = vld [vmem:[%s9498_s0 + $0x370] sm:$0xff]  ;;  %v130_v63 = vld [vmem:[%s9498_s0 + $0x388] sm:$0xff] }
  0xa3   :  { %6069 = vmatmul.mubr.msk.f32.gmra.mrb[14].mxu0 %vm546_vm15, %v7044_v31 }
  0xa4   :  { %6071 = vmatprep.mubr.msk.f32.mxu0 %vm547_vm0, %v7044_v31 }
  0xa5   :  { %v206_v2 = vpop.permute.xlu1 %205  ;;  %v203_v3 = vpop.permute.xlu0 %202 }
  0xa6   :  { %vm549_vm2 = vcmp.eq.s32.totalorder %v203_v3, %v7311_v26  ;;  %397 = vperm.xlu1 %6530, %v100_v0   ;;  %394 = vperm.xlu0 %6529, %v99_v1   ;;  %vm550_vm3 = vcmp.eq.s32.totalorder %v206_v2, %v7311_v26  ;;  %v129_v0 = vld [vmem:[%s9498_s0 + $0x380] sm:$0xff] }
  0xa7   :  { %6072 = vmatmul.mubr.msk.f32.gmra.mrb[16].mxu0 %vm548_vm1, %v7044_v31  ;;  %v2532_v3 = vld [vmem:[%s9500_s3] sm:$0xff] }
  0xa8   :  { %6074 = vmatprep.mubr.msk.f32.mxu0 %vm549_vm2, %v7044_v31 }
  0xa9   :  { %v212_v6 = vpop.permute.xlu1 %211  ;;  %v209_v7 = vpop.permute.xlu0 %208 }
  0xaa   :  { %vm551_vm4 = vcmp.eq.s32.totalorder %v209_v7, %v7311_v26  ;;  %403 = vperm.xlu1 %6530, %v102_v4   ;;  %400 = vperm.xlu0 %6529, %v101_v5   ;;  %vm552_vm5 = vcmp.eq.s32.totalorder %v212_v6, %v7311_v26  ;;  %v2533_v4 = vld [vmem:[%s9500_s3 + $0x8] sm:$0xff]  ;;  %v132_v5 = vld [vmem:[%s9498_s0 + $0x398] sm:$0xff]  ;;  %v131_v6 = vld [vmem:[%s9498_s0 + $0x390] sm:$0xff] }
  0xab   :  { %6075 = vmatmul.mubr.msk.f32.gmra.mrb[18].mxu0 %vm550_vm3, %v7044_v31  ;;  %v6495_v7 = vpack.c.bf16 %v2533_v4, %v2532_v3  ;;  %v919_v3 = vld [vmem:[%s9501_s1 + $0x20] sm:$0xff] }
  0xac   :  { %6077 = vmatprep.mubr.msk.f32.mxu0 %vm551_vm4, %v7044_v31 }
  0xad   :  { %v218_v10 = vpop.permute.xlu1 %217  ;;  %v215_v11 = vpop.permute.xlu0 %214  ;;  %6496 = vmatprep.subr.bf16.mxu1 %v6495_v7 }
  0xae   :  { %vm553_vm6 = vcmp.eq.s32.totalorder %v215_v11, %v7311_v26  ;;  %409 = vperm.xlu1 %6530, %v104_v8   ;;  %406 = vperm.xlu0 %6529, %v103_v9   ;;  %vm554_vm7 = vcmp.eq.s32.totalorder %v218_v10, %v7311_v26  ;;  %v2534_v10 = vld [vmem:[%s9500_s3 + $0x10] sm:$0xff]  ;;  %v2535_v11 = vld [vmem:[%s9500_s3 + $0x18] sm:$0xff] }
  0xaf   :  { %6078 = vmatmul.mubr.msk.f32.gmra.mrb[20].mxu0 %vm552_vm5, %v7044_v31  ;;  %6498 = vmatpush3.bf16.msra.mxu1 %v6495_v7  ;;  %v921_v7 = vld [vmem:[%s9501_s1 + $0x30] sm:$0xff] }
  0xb0   :  { %6080 = vmatprep.mubr.msk.f32.mxu0 %vm553_vm6, %v7044_v31 }
  0xb1   :  { %v224_v14 = vpop.permute.xlu1 %223  ;;  %v221_v15 = vpop.permute.xlu0 %220 }
  0xb2   :  { %vm555_vm8 = vcmp.eq.s32.totalorder %v221_v15, %v7311_v26  ;;  %415 = vperm.xlu1 %6530, %v106_v12   ;;  %412 = vperm.xlu0 %6529, %v105_v13   ;;  %vm556_vm9 = vcmp.eq.s32.totalorder %v224_v14, %v7311_v26  ;;  %v134_v12 = vld [vmem:[%s9498_s0 + $0x3a8] sm:$0xff]  ;;  %v133_v13 = vld [vmem:[%s9498_s0 + $0x3a0] sm:$0xff]  ;;  %v6499_v14 = vpack.c.bf16 %v2535_v11, %v2534_v10 }
  0xb3   :  { %6081 = vmatmul.mubr.msk.f32.gmra.mrb[22].mxu0 %vm554_vm7, %v7044_v31  ;;  %v924_v10 = vld [vmem:[%s9501_s1 + $0x48] sm:$0xff]  ;;  %v923_v11 = vld [vmem:[%s9501_s1 + $0x40] sm:$0xff] }
  0xb4   :  { %6083 = vmatprep.mubr.msk.f32.mxu0 %vm555_vm8, %v7044_v31  ;;  %6500 = vmatprep.subr.bf16.mxu1 %v6499_v14 }
  0xb5   :  { %v230_v18 = vpop.permute.xlu1 %229  ;;  %v227_v19 = vpop.permute.xlu0 %226  ;;  %6502 = vmatpush3.bf16.msra.mxu1 %v6499_v14  ;;  %v926_v14 = vld [vmem:[%s9501_s1 + $0x58] sm:$0xff] }
  0xb6   :  { %vm557_vm10 = vcmp.eq.s32.totalorder %v227_v19, %v7311_v26  ;;  %421 = vperm.xlu1 %6530, %v108_v16   ;;  %418 = vperm.xlu0 %6529, %v107_v17   ;;  %vm558_vm11 = vcmp.eq.s32.totalorder %v230_v18, %v7311_v26  ;;  %v2536_v17 = vld [vmem:[%s9500_s3 + $0x20] sm:$0xff]  ;;  %v2537_v18 = vld [vmem:[%s9500_s3 + $0x28] sm:$0xff]  ;;  %v136_v19 = vld [vmem:[%s9498_s0 + $0x3b8] sm:$0xff] }
  0xb7   :  { %6084 = vmatmul.mubr.msk.f32.gmra.mrb[24].mxu0 %vm556_vm9, %v7044_v31 }
  0xb8   :  { %6086 = vmatprep.mubr.msk.f32.mxu0 %vm557_vm10, %v7044_v31 }
  0xb9   :  { %v236_v22 = vpop.permute.xlu1 %235  ;;  %v233_v24 = vpop.permute.xlu0 %232 }
  0xba   :  { %vm559_vm12 = vcmp.eq.s32.totalorder %v233_v24, %v7311_v26  ;;  %427 = vperm.xlu1 %6530, %v110_v20   ;;  %424 = vperm.xlu0 %6529, %v109_v21   ;;  %vm560_vm13 = vcmp.eq.s32.totalorder %v236_v22, %v7311_v26  ;;  %v135_v20 = vld [vmem:[%s9498_s0 + $0x3b0] sm:$0xff]  ;;  %v6503_v21 = vpack.c.bf16 %v2537_v18, %v2536_v17  ;;  %v928_v18 = vld [vmem:[%s9501_s1 + $0x68] sm:$0xff] }
  0xbb   :  { %6087 = vmatmul.mubr.msk.f32.gmra.mrb[26].mxu0 %vm558_vm11, %v7044_v31 }
  0xbc   :  { %6089 = vmatprep.mubr.msk.f32.mxu0 %vm559_vm12, %v7044_v31  ;;  %6504 = vmatprep.subr.bf16.mxu1 %v6503_v21 }
  0xbd   :  { %v242_v28 = vpop.permute.xlu1 %241  ;;  %v239_v29 = vpop.permute.xlu0 %238  ;;  %6506 = vmatpush3.bf16.msra.mxu1 %v6503_v21 }
  0xbe   :  { %vm561_vm14 = vcmp.eq.s32.totalorder %v239_v29, %v7311_v26  ;;  %433 = vperm.xlu1 %6530, %v112_v25   ;;  %430 = vperm.xlu0 %6529, %v111_v27   ;;  %vm562_vm15 = vcmp.eq.s32.totalorder %v242_v28, %v7311_v26  ;;  %v2538_v25 = vld [vmem:[%s9500_s3 + $0x30] sm:$0xff]  ;;  %v2539_v27 = vld [vmem:[%s9500_s3 + $0x38] sm:$0xff]  ;;  %v138_v28 = vld [vmem:[%s9498_s0 + $0x3c8] sm:$0xff] }
  0xbf   :  { %6090 = vmatmul.mubr.msk.f32.gmra.mrb[28].mxu0 %vm560_vm13, %v7044_v31  ;;  %v137_v29 = vld [vmem:[%s9498_s0 + $0x3c0] sm:$0xff] }
  0xc0   :  { %6092 = vmatprep.mubr.msk.f32.mxu0 %vm561_vm14, %v7044_v31 }
  0xc1   :  { %v248_v33 = vpop.permute.xlu1 %247  ;;  %v245_v34 = vpop.permute.xlu0 %244 }
  0xc2   :  { %vm563_vm0 = vcmp.eq.s32.totalorder %v245_v34, %v7311_v26  ;;  %439 = vperm.xlu1 %6530, %v114_v30   ;;  %436 = vperm.xlu0 %6529, %v113_v32   ;;  %vm564_vm1 = vcmp.eq.s32.totalorder %v248_v33, %v7311_v26  ;;  %v6507_v30 = vpack.c.bf16 %v2539_v27, %v2538_v25  ;;  %v2540_v34 = vld [vmem:[%s9500_s3 + $0x40] sm:$0xff] }
  0xc3   :  { %6093 = vmatmul.mubr.msk.f32.gmra.mrb[30].mxu0 %vm562_vm15, %v7044_v31 }
  0xc4   :  { %6095 = vmatprep.mubr.msk.f32.mxu0 %vm563_vm0, %v7044_v31  ;;  %6508 = vmatprep.subr.bf16.mxu1 %v6507_v30 }
  0xc5   :  { %v254_v37 = vpop.permute.xlu1 %253  ;;  %v251_v38 = vpop.permute.xlu0 %250  ;;  %6510 = vmatpush3.bf16.msra.mxu1 %v6507_v30 }
  0xc6   :  { %vm565_vm2 = vcmp.eq.s32.totalorder %v251_v38, %v7311_v26  ;;  %445 = vperm.xlu1 %6530, %v116_v35   ;;  %442 = vperm.xlu0 %6529, %v115_v36   ;;  %vm566_vm3 = vcmp.eq.s32.totalorder %v254_v37, %v7311_v26  ;;  %v2541_v35 = vld [vmem:[%s9500_s3 + $0x48] sm:$0xff]  ;;  %v140_v36 = vld [vmem:[%s9498_s0 + $0x3d8] sm:$0xff]  ;;  %v139_v37 = vld [vmem:[%s9498_s0 + $0x3d0] sm:$0xff] }
  0xc7   :  { %6096 = vmatmul.mubr.msk.f32.gmra.mrb[32].mxu0 %vm564_vm1, %v7044_v31  ;;  %v6511_v38 = vpack.c.bf16 %v2541_v35, %v2540_v34  ;;  %v933_v34 = vld [vmem:[%s9501_s1 + $0x90] sm:$0xff] }
  0xc8   :  { %6098 = vmatprep.mubr.msk.f32.mxu0 %vm565_vm2, %v7044_v31 }
  0xc9   :  { %v260_v41 = vpop.permute.xlu1 %259  ;;  %v257_v42 = vpop.permute.xlu0 %256  ;;  %6512 = vmatprep.subr.bf16.mxu1 %v6511_v38 }
  0xca   :  { %vm567_vm4 = vcmp.eq.s32.totalorder %v257_v42, %v7311_v26  ;;  %451 = vperm.xlu1 %6530, %v118_v39   ;;  %448 = vperm.xlu0 %6529, %v117_v40   ;;  %vm568_vm5 = vcmp.eq.s32.totalorder %v260_v41, %v7311_v26  ;;  %v2542_v41 = vld [vmem:[%s9500_s3 + $0x50] sm:$0xff]  ;;  %v2543_v42 = vld [vmem:[%s9500_s3 + $0x58] sm:$0xff] }
  0xcb   :  { %6099 = vmatmul.mubr.msk.f32.gmra.mrb[34].mxu0 %vm566_vm3, %v7044_v31  ;;  %6514 = vmatpush3.bf16.msra.mxu1 %v6511_v38  ;;  %v935_v38 = vld [vmem:[%s9501_s1 + $0xa0] sm:$0xff] }
  0xcc   :  { %6101 = vmatprep.mubr.msk.f32.mxu0 %vm567_vm4, %v7044_v31 }
  0xcd   :  { %v266_v45 = vpop.permute.xlu1 %265  ;;  %v263_v46 = vpop.permute.xlu0 %262 }
  0xce   :  { %vm569_vm6 = vcmp.eq.s32.totalorder %v263_v46, %v7311_v26  ;;  %457 = vperm.xlu1 %6530, %v120_v43   ;;  %454 = vperm.xlu0 %6529, %v119_v44   ;;  %vm570_vm7 = vcmp.eq.s32.totalorder %v266_v45, %v7311_v26  ;;  %v142_v43 = vld [vmem:[%s9498_s0 + $0x3e8] sm:$0xff]  ;;  %v141_v44 = vld [vmem:[%s9498_s0 + $0x3e0] sm:$0xff]  ;;  %v6515_v45 = vpack.c.bf16 %v2543_v42, %v2542_v41  ;;  %v938_v41 = vld [vmem:[%s9501_s1 + $0xb8] sm:$0xff] }
  0xcf   :  { %6102 = vmatmul.mubr.msk.f32.gmra.mrb[36].mxu0 %vm568_vm5, %v7044_v31  ;;  %v937_v42 = vld [vmem:[%s9501_s1 + $0xb0] sm:$0xff] }
  0xd0   :  { %6104 = vmatprep.mubr.msk.f32.mxu0 %vm569_vm6, %v7044_v31  ;;  %6516 = vmatprep.subr.bf16.mxu1 %v6515_v45 }
  0xd1   :  { %v272_v49 = vpop.permute.xlu1 %271  ;;  %v269_v50 = vpop.permute.xlu0 %268  ;;  %6518 = vmatpush3.bf16.msra.mxu1 %v6515_v45  ;;  %v940_v45 = vld [vmem:[%s9501_s1 + $0xc8] sm:$0xff] }
  0xd2   :  { %vm571_vm8 = vcmp.eq.s32.totalorder %v269_v50, %v7311_v26  ;;  %463 = vperm.xlu1 %6530, %v122_v47   ;;  %460 = vperm.xlu0 %6529, %v121_v48   ;;  %vm572_vm9 = vcmp.eq.s32.totalorder %v272_v49, %v7311_v26  ;;  %v2544_v48 = vld [vmem:[%s9500_s3 + $0x60] sm:$0xff]  ;;  %v2545_v49 = vld [vmem:[%s9500_s3 + $0x68] sm:$0xff]  ;;  %v144_v50 = vld [vmem:[%s9498_s0 + $0x3f8] sm:$0xff] }
  0xd3   :  { %6105 = vmatmul.mubr.msk.f32.gmra.mrb[38].mxu0 %vm570_vm7, %v7044_v31 }
  0xd4   :  { %6107 = vmatprep.mubr.msk.f32.mxu0 %vm571_vm8, %v7044_v31 }
  0xd5   :  { %v278_v53 = vpop.permute.xlu1 %277  ;;  %v275_v54 = vpop.permute.xlu0 %274 }
  0xd6   :  { %vm573_vm10 = vcmp.eq.s32.totalorder %v275_v54, %v7311_v26  ;;  %469 = vperm.xlu1 %6530, %v124_v51   ;;  %466 = vperm.xlu0 %6529, %v123_v52   ;;  %vm574_vm11 = vcmp.eq.s32.totalorder %v278_v53, %v7311_v26  ;;  %v143_v51 = vld [vmem:[%s9498_s0 + $0x3f0] sm:$0xff]  ;;  %v6519_v52 = vpack.c.bf16 %v2545_v49, %v2544_v48  ;;  %v942_v49 = vld [vmem:[%s9501_s1 + $0xd8] sm:$0xff] }
  0xd7   :  { %6108 = vmatmul.mubr.msk.f32.gmra.mrb[40].mxu0 %vm572_vm9, %v7044_v31 }
  0xd8   :  { %6110 = vmatprep.mubr.msk.f32.mxu0 %vm573_vm10, %v7044_v31  ;;  %6520 = vmatprep.subr.bf16.mxu1 %v6519_v52 }
  0xd9   :  { %v284_v57 = vpop.permute.xlu1 %283  ;;  %v281_v58 = vpop.permute.xlu0 %280  ;;  %6522 = vmatpush3.bf16.msra.mxu1 %v6519_v52 }
  0xda   :  { %vm575_vm12 = vcmp.eq.s32.totalorder %v281_v58, %v7311_v26  ;;  %475 = vperm.xlu1 %6530, %v126_v55   ;;  %472 = vperm.xlu0 %6529, %v125_v56   ;;  %vm576_vm13 = vcmp.eq.s32.totalorder %v284_v57, %v7311_v26  ;;  %v2546_v55 = vld [vmem:[%s9500_s3 + $0x70] sm:$0xff]  ;;  %v2547_v56 = vld [vmem:[%s9500_s3 + $0x78] sm:$0xff]  ;;  %v916_v57 = vld [vmem:[%s9501_s1 + $0x8] sm:$0xff] }
  0xdb   :  { %6111 = vmatmul.mubr.msk.f32.gmra.mrb[42].mxu0 %vm574_vm11, %v7044_v31  ;;  %v915_v58 = vld [vmem:[%s9501_s1] sm:$0xff] }
  0xdc   :  { %6113 = vmatprep.mubr.msk.f32.mxu0 %vm575_vm12, %v7044_v31 }
  0xdd   :  { %v290_v61 = vpop.permute.xlu1 %289  ;;  %v287_v62 = vpop.permute.xlu0 %286 }
  0xde   :  { %vm577_vm14 = vcmp.eq.s32.totalorder %v287_v62, %v7311_v26  ;;  %481 = vperm.xlu1 %6530, %v128_v59   ;;  %478 = vperm.xlu0 %6529, %v127_v60   ;;  %vm578_vm15 = vcmp.eq.s32.totalorder %v290_v61, %v7311_v26  ;;  %v6523_v59 = vpack.c.bf16 %v2547_v56, %v2546_v55  ;;  %v918_v62 = vld [vmem:[%s9501_s1 + $0x18] sm:$0xff] }
  0xdf   :  { %6114 = vmatmul.mubr.msk.f32.gmra.mrb[44].mxu0 %vm576_vm13, %v7044_v31 }
  0xe0   :  { %6116 = vmatprep.mubr.msk.f32.mxu0 %vm577_vm14, %v7044_v31  ;;  %6524 = vmatprep.subr.bf16.mxu1 %v6523_v59 }
  0xe1   :  { %v296_v1 = vpop.permute.xlu1 %295  ;;  %v293_v2 = vpop.permute.xlu0 %292  ;;  %6526 = vmatpush3.bf16.msra.mxu1 %v6523_v59 }
  0xe2   :  { %vm579_vm0 = vcmp.eq.s32.totalorder %v293_v2, %v7311_v26  ;;  %487 = vperm.xlu1 %6530, %v130_v63   ;;  %484 = vperm.xlu0 %6529, %v129_v0   ;;  %vm580_vm1 = vcmp.eq.s32.totalorder %v296_v1, %v7311_v26  ;;  %v917_v63 = vld [vmem:[%s9501_s1 + $0x10] sm:$0xff]  ;;  %v920_v2 = vld [vmem:[%s9501_s1 + $0x28] sm:$0xff] }
  0xe3   :  { %6117 = vmatmul.mubr.msk.f32.gmra.mrb[46].mxu0 %vm578_vm15, %v7044_v31 }
  0xe4   :  { %6119 = vmatprep.mubr.msk.f32.mxu0 %vm579_vm0, %v7044_v31 }
  0xe5   :  { %v302_v8 = vpop.permute.xlu1 %301  ;;  %v299_v9 = vpop.permute.xlu0 %298 }
  0xe6   :  { %vm581_vm2 = vcmp.eq.s32.totalorder %v299_v9, %v7311_v26  ;;  %493 = vperm.xlu1 %6530, %v132_v5   ;;  %490 = vperm.xlu0 %6529, %v131_v6   ;;  %vm582_vm3 = vcmp.eq.s32.totalorder %v302_v8, %v7311_v26  ;;  %v922_v6 = vld [vmem:[%s9501_s1 + $0x38] sm:$0xff] }
  0xe7   :  { %6120 = vmatmul.mubr.msk.f32.gmra.mrb[48].mxu0 %vm580_vm1, %v7044_v31 }
  0xe8   :  { %6122 = vmatprep.mubr.msk.f32.mxu0 %vm581_vm2, %v7044_v31 }
  0xe9   :  { %v308_v15 = vpop.permute.xlu1 %307  ;;  %v305_v16 = vpop.permute.xlu0 %304 }
  0xea   :  { %vm583_vm4 = vcmp.eq.s32.totalorder %v305_v16, %v7311_v26  ;;  %499 = vperm.xlu1 %6530, %v134_v12   ;;  %496 = vperm.xlu0 %6529, %v133_v13   ;;  %vm584_vm5 = vcmp.eq.s32.totalorder %v308_v15, %v7311_v26  ;;  %v925_v15 = vld [vmem:[%s9501_s1 + $0x50] sm:$0xff] }
  0xeb   :  { %6123 = vmatmul.mubr.msk.f32.gmra.mrb[50].mxu0 %vm582_vm3, %v7044_v31 }
  0xec   :  { %6125 = vmatprep.mubr.msk.f32.mxu0 %vm583_vm4, %v7044_v31 }
  0xed   :  { %v314_v22 = vpop.permute.xlu1 %313  ;;  %v311_v24 = vpop.permute.xlu0 %310 }
  0xee   :  { %vm585_vm6 = vcmp.eq.s32.totalorder %v311_v24, %v7311_v26  ;;  %505 = vperm.xlu1 %6530, %v136_v19   ;;  %502 = vperm.xlu0 %6529, %v135_v20   ;;  %vm586_vm7 = vcmp.eq.s32.totalorder %v314_v22, %v7311_v26  ;;  %v927_v19 = vld [vmem:[%s9501_s1 + $0x60] sm:$0xff]  ;;  %v930_v22 = vld [vmem:[%s9501_s1 + $0x78] sm:$0xff]  ;;  %v929_v24 = vld [vmem:[%s9501_s1 + $0x70] sm:$0xff] }
  0xef   :  { %6126 = vmatmul.mubr.msk.f32.gmra.mrb[52].mxu0 %vm584_vm5, %v7044_v31 }
  0xf0   :  { %6128 = vmatprep.mubr.msk.f32.mxu0 %vm585_vm6, %v7044_v31 }
  0xf1   :  { %v320_v32 = vpop.permute.xlu1 %319  ;;  %v317_v33 = vpop.permute.xlu0 %316 }
  0xf2   :  { %vm587_vm8 = vcmp.eq.s32.totalorder %v317_v33, %v7311_v26  ;;  %511 = vperm.xlu1 %6530, %v138_v28   ;;  %508 = vperm.xlu0 %6529, %v137_v29   ;;  %vm588_vm9 = vcmp.eq.s32.totalorder %v320_v32, %v7311_v26  ;;  %v932_v28 = vld [vmem:[%s9501_s1 + $0x88] sm:$0xff]  ;;  %v931_v29 = vld [vmem:[%s9501_s1 + $0x80] sm:$0xff]  ;;  %v934_v33 = vld [vmem:[%s9501_s1 + $0x98] sm:$0xff] }
  0xf3   :  { %6129 = vmatmul.mubr.msk.f32.gmra.mrb[54].mxu0 %vm586_vm7, %v7044_v31 }
  0xf4   :  { %6131 = vmatprep.mubr.msk.f32.mxu0 %vm587_vm8, %v7044_v31 }
  0xf5   :  { %v326_v39 = vpop.permute.xlu1 %325  ;;  %v323_v40 = vpop.permute.xlu0 %322 }
  0xf6   :  { %vm589_vm10 = vcmp.eq.s32.totalorder %v323_v40, %v7311_v26  ;;  %517 = vperm.xlu1 %6530, %v140_v36   ;;  %514 = vperm.xlu0 %6529, %v139_v37   ;;  %vm590_vm11 = vcmp.eq.s32.totalorder %v326_v39, %v7311_v26  ;;  %v936_v37 = vld [vmem:[%s9501_s1 + $0xa8] sm:$0xff] }
  0xf7   :  { %6132 = vmatmul.mubr.msk.f32.gmra.mrb[56].mxu0 %vm588_vm9, %v7044_v31 }
  0xf8   :  { %6134 = vmatprep.mubr.msk.f32.mxu0 %vm589_vm10, %v7044_v31 }
  0xf9   :  { %v332_v46 = vpop.permute.xlu1 %331  ;;  %v329_v47 = vpop.permute.xlu0 %328 }
  0xfa   :  { %vm591_vm12 = vcmp.eq.s32.totalorder %v329_v47, %v7311_v26  ;;  %523 = vperm.xlu1 %6530, %v142_v43   ;;  %520 = vperm.xlu0 %6529, %v141_v44   ;;  %vm592_vm13 = vcmp.eq.s32.totalorder %v332_v46, %v7311_v26  ;;  %v939_v46 = vld [vmem:[%s9501_s1 + $0xc0] sm:$0xff] }
  0xfb   :  { %6135 = vmatmul.mubr.msk.f32.gmra.mrb[58].mxu0 %vm590_vm11, %v7044_v31 }
  0xfc   :  { %6137 = vmatprep.mubr.msk.f32.mxu0 %vm591_vm12, %v7044_v31 }
  0xfd   :  { %v338_v53 = vpop.permute.xlu1 %337  ;;  %v335_v54 = vpop.permute.xlu0 %334 }
  0xfe   :  { %vm593_vm14 = vcmp.eq.s32.totalorder %v335_v54, %v7311_v26  ;;  %529 = vperm.xlu1 %6530, %v144_v50   ;;  %526 = vperm.xlu0 %6529, %v143_v51   ;;  %vm594_vm15 = vcmp.eq.s32.totalorder %v338_v53, %v7311_v26  ;;  %v941_v50 = vld [vmem:[%s9501_s1 + $0xd0] sm:$0xff]  ;;  %v944_v53 = vld [vmem:[%s9501_s1 + $0xe8] sm:$0xff]  ;;  %v943_v54 = vld [vmem:[%s9501_s1 + $0xe0] sm:$0xff] }
  0xff   :  { %6138 = vmatmul.mubr.msk.f32.gmra.mrb[60].mxu0 %vm592_vm13, %v7044_v31 }
 0x100   :  { %6140 = vmatprep.mubr.msk.f32.mxu0 %vm593_vm14, %v7044_v31 }
 0x101   :  { %v344_v60 = vpop.permute.xlu1 %343  ;;  %v341_v61 = vpop.permute.xlu0 %340 }
 0x102   :  { %vm595_vm0 = vcmp.eq.s32.totalorder %v341_v61, %v7311_v26  ;;  %1047 = vperm.xlu1 %6530, %v916_v57   ;;  %1044 = vperm.xlu0 %6529, %v915_v58   ;;  %vm596_vm1 = vcmp.eq.s32.totalorder %v344_v60, %v7311_v26  ;;  %v946_v57 = vld [vmem:[%s9501_s1 + $0xf8] sm:$0xff]  ;;  %v945_v58 = vld [vmem:[%s9501_s1 + $0xf0] sm:$0xff]  ;;  %v948_v61 = vld [vmem:[%s9501_s1 + $0x108] sm:$0xff] }
 0x103   :  { %6141 = vmatmul.mubr.msk.f32.gmra.mrb[62].mxu0 %vm594_vm15, %v7044_v31 }
 0x104   :  { %6143 = vmatprep.mubr.msk.f32.mxu0 %vm595_vm0, %v7044_v31 }
 0x105   :  { %v350_v0 = vpop.permute.xlu1 %349  ;;  %v347_v1 = vpop.permute.xlu0 %346 }
 0x106   :  { %vm597_vm2 = vcmp.eq.s32.totalorder %v347_v1, %v7311_v26  ;;  %1053 = vperm.xlu1 %6530, %v918_v62   ;;  %1050 = vperm.xlu0 %6529, %v917_v63   ;;  %vm598_vm3 = vcmp.eq.s32.totalorder %v350_v0, %v7311_v26  ;;  %v947_v62 = vld [vmem:[%s9501_s1 + $0x100] sm:$0xff]  ;;  %v950_v1 = vld [vmem:[%s9501_s1 + $0x118] sm:$0xff] }
 0x107   :  { %6144 = vmatmul.mubr.msk.f32.gmra.mrb[64].mxu0 %vm596_vm1, %v7044_v31 }
 0x108   :  { %6146 = vmatprep.mubr.msk.f32.mxu0 %vm597_vm2, %v7044_v31 }
 0x109   :  { %v356_v4 = vpop.permute.xlu1 %355  ;;  %v353_v5 = vpop.permute.xlu0 %352 }
 0x10a   :  { %vm599_vm4 = vcmp.eq.s32.totalorder %v353_v5, %v7311_v26  ;;  %1059 = vperm.xlu1 %6530, %v920_v2   ;;  %1056 = vperm.xlu0 %6529, %v919_v3   ;;  %vm600_vm5 = vcmp.eq.s32.totalorder %v356_v4, %v7311_v26  ;;  %v949_v2 = vld [vmem:[%s9501_s1 + $0x110] sm:$0xff]  ;;  %v952_v5 = vld [vmem:[%s9501_s1 + $0x128] sm:$0xff] }
 0x10b   :  { %6147 = vmatmul.mubr.msk.f32.gmra.mrb[66].mxu0 %vm598_vm3, %v7044_v31 }
 0x10c   :  { %6149 = vmatprep.mubr.msk.f32.mxu0 %vm599_vm4, %v7044_v31 }
 0x10d   :  { %v362_v8 = vpop.permute.xlu1 %361  ;;  %v359_v9 = vpop.permute.xlu0 %358 }
 0x10e   :  { %vm601_vm6 = vcmp.eq.s32.totalorder %v359_v9, %v7311_v26  ;;  %1065 = vperm.xlu1 %6530, %v922_v6   ;;  %1062 = vperm.xlu0 %6529, %v921_v7   ;;  %vm602_vm7 = vcmp.eq.s32.totalorder %v362_v8, %v7311_v26  ;;  %v951_v6 = vld [vmem:[%s9501_s1 + $0x120] sm:$0xff]  ;;  %v954_v9 = vld [vmem:[%s9501_s1 + $0x138] sm:$0xff] }
 0x10f   :  { %6150 = vmatmul.mubr.msk.f32.gmra.mrb[68].mxu0 %vm600_vm5, %v7044_v31 }
 0x110   :  { %6152 = vmatprep.mubr.msk.f32.mxu0 %vm601_vm6, %v7044_v31 }
 0x111   :  { %v368_v12 = vpop.permute.xlu1 %367  ;;  %v365_v13 = vpop.permute.xlu0 %364 }
 0x112   :  { %vm603_vm8 = vcmp.eq.s32.totalorder %v365_v13, %v7311_v26  ;;  %1071 = vperm.xlu1 %6530, %v924_v10   ;;  %1068 = vperm.xlu0 %6529, %v923_v11   ;;  %vm604_vm9 = vcmp.eq.s32.totalorder %v368_v12, %v7311_v26  ;;  %v953_v10 = vld [vmem:[%s9501_s1 + $0x130] sm:$0xff]  ;;  %v956_v13 = vld [vmem:[%s9501_s1 + $0x148] sm:$0xff] }
 0x113   :  { %6153 = vmatmul.mubr.msk.f32.gmra.mrb[70].mxu0 %vm602_vm7, %v7044_v31 }
 0x114   :  { %6155 = vmatprep.mubr.msk.f32.mxu0 %vm603_vm8, %v7044_v31 }
 0x115   :  { %v374_v16 = vpop.permute.xlu1 %373  ;;  %v371_v17 = vpop.permute.xlu0 %370 }
 0x116   :  { %vm605_vm10 = vcmp.eq.s32.totalorder %v371_v17, %v7311_v26  ;;  %1077 = vperm.xlu1 %6530, %v926_v14   ;;  %1074 = vperm.xlu0 %6529, %v925_v15   ;;  %vm606_vm11 = vcmp.eq.s32.totalorder %v374_v16, %v7311_v26  ;;  %v955_v14 = vld [vmem:[%s9501_s1 + $0x140] sm:$0xff]  ;;  %v958_v17 = vld [vmem:[%s9501_s1 + $0x158] sm:$0xff] }
 0x117   :  { %6156 = vmatmul.mubr.msk.f32.gmra.mrb[72].mxu0 %vm604_vm9, %v7044_v31 }
 0x118   :  { %6158 = vmatprep.mubr.msk.f32.mxu0 %vm605_vm10, %v7044_v31 }
 0x119   :  { %v380_v20 = vpop.permute.xlu1 %379  ;;  %v377_v21 = vpop.permute.xlu0 %376 }
 0x11a   :  { %vm607_vm12 = vcmp.eq.s32.totalorder %v377_v21, %v7311_v26  ;;  %1083 = vperm.xlu1 %6530, %v928_v18   ;;  %1080 = vperm.xlu0 %6529, %v927_v19   ;;  %vm608_vm13 = vcmp.eq.s32.totalorder %v380_v20, %v7311_v26  ;;  %v957_v18 = vld [vmem:[%s9501_s1 + $0x150] sm:$0xff]  ;;  %v960_v21 = vld [vmem:[%s9501_s1 + $0x168] sm:$0xff] }
 0x11b   :  { %6159 = vmatmul.mubr.msk.f32.gmra.mrb[74].mxu0 %vm606_vm11, %v7044_v31 }
 0x11c   :  { %6161 = vmatprep.mubr.msk.f32.mxu0 %vm607_vm12, %v7044_v31 }
 0x11d   :  { %v386_v25 = vpop.permute.xlu1 %385  ;;  %v383_v27 = vpop.permute.xlu0 %382 }
 0x11e   :  { %vm609_vm14 = vcmp.eq.s32.totalorder %v383_v27, %v7311_v26  ;;  %1089 = vperm.xlu1 %6530, %v930_v22   ;;  %1086 = vperm.xlu0 %6529, %v929_v24   ;;  %vm610_vm15 = vcmp.eq.s32.totalorder %v386_v25, %v7311_v26  ;;  %v959_v22 = vld [vmem:[%s9501_s1 + $0x160] sm:$0xff] }
 0x11f   :  { %6162 = vmatmul.mubr.msk.f32.gmra.mrb[76].mxu0 %vm608_vm13, %v7044_v31 }
 0x120   :  { %6164 = vmatprep.mubr.msk.f32.mxu0 %vm609_vm14, %v7044_v31 }
 0x121   :  { %v392_v30 = vpop.permute.xlu1 %391  ;;  %v389_v32 = vpop.permute.xlu0 %388 }
 0x122   :  { %vm611_vm0 = vcmp.eq.s32.totalorder %v389_v32, %v7311_v26  ;;  %1095 = vperm.xlu1 %6530, %v932_v28   ;;  %1092 = vperm.xlu0 %6529, %v931_v29   ;;  %vm612_vm1 = vcmp.eq.s32.totalorder %v392_v30, %v7311_v26  ;;  %v962_v29 = vld [vmem:[%s9501_s1 + $0x178] sm:$0xff]  ;;  %v961_v30 = vld [vmem:[%s9501_s1 + $0x170] sm:$0xff] }
 0x123   :  { %6165 = vmatmul.mubr.msk.f32.gmra.mrb[78].mxu0 %vm610_vm15, %v7044_v31 }
 0x124   :  { %6167 = vmatprep.mubr.msk.f32.mxu0 %vm611_vm0, %v7044_v31 }
 0x125   :  { %v398_v35 = vpop.permute.xlu1 %397  ;;  %v395_v36 = vpop.permute.xlu0 %394 }
 0x126   :  { %vm613_vm2 = vcmp.eq.s32.totalorder %v395_v36, %v7311_v26  ;;  %1101 = vperm.xlu1 %6530, %v934_v33   ;;  %1098 = vperm.xlu0 %6529, %v933_v34   ;;  %vm614_vm3 = vcmp.eq.s32.totalorder %v398_v35, %v7311_v26  ;;  %v964_v36 = vld [vmem:[%s9501_s1 + $0x188] sm:$0xff] }
 0x127   :  { %6168 = vmatmul.mubr.msk.f32.gmra.mrb[80].mxu0 %vm612_vm1, %v7044_v31 }
 0x128   :  { %6170 = vmatprep.mubr.msk.f32.mxu0 %vm613_vm2, %v7044_v31 }
 0x129   :  { %v404_v39 = vpop.permute.xlu1 %403  ;;  %v401_v40 = vpop.permute.xlu0 %400 }
 0x12a   :  { %vm615_vm4 = vcmp.eq.s32.totalorder %v401_v40, %v7311_v26  ;;  %1107 = vperm.xlu1 %6530, %v936_v37   ;;  %1104 = vperm.xlu0 %6529, %v935_v38   ;;  %vm616_vm5 = vcmp.eq.s32.totalorder %v404_v39, %v7311_v26  ;;  %v963_v37 = vld [vmem:[%s9501_s1 + $0x180] sm:$0xff] }
 0x12b   :  { %6171 = vmatmul.mubr.msk.f32.gmra.mrb[82].mxu0 %vm614_vm3, %v7044_v31 }
 0x12c   :  { %6173 = vmatprep.mubr.msk.f32.mxu0 %vm615_vm4, %v7044_v31 }
 0x12d   :  { %v410_v43 = vpop.permute.xlu1 %409  ;;  %v407_v44 = vpop.permute.xlu0 %406 }
 0x12e   :  { %vm617_vm6 = vcmp.eq.s32.totalorder %v407_v44, %v7311_v26  ;;  %1113 = vperm.xlu1 %6530, %v938_v41   ;;  %1110 = vperm.xlu0 %6529, %v937_v42   ;;  %vm618_vm7 = vcmp.eq.s32.totalorder %v410_v43, %v7311_v26  ;;  %v966_v42 = vld [vmem:[%s9501_s1 + $0x198] sm:$0xff]  ;;  %v965_v43 = vld [vmem:[%s9501_s1 + $0x190] sm:$0xff] }
 0x12f   :  { %6174 = vmatmul.mubr.msk.f32.gmra.mrb[84].mxu0 %vm616_vm5, %v7044_v31 }
 0x130   :  { %6176 = vmatprep.mubr.msk.f32.mxu0 %vm617_vm6, %v7044_v31 }
 0x131   :  { %v416_v47 = vpop.permute.xlu1 %415  ;;  %v413_v48 = vpop.permute.xlu0 %412 }
 0x132   :  { %vm619_vm8 = vcmp.eq.s32.totalorder %v413_v48, %v7311_v26  ;;  %1119 = vperm.xlu1 %6530, %v940_v45   ;;  %1116 = vperm.xlu0 %6529, %v939_v46   ;;  %vm620_vm9 = vcmp.eq.s32.totalorder %v416_v47, %v7311_v26  ;;  %v968_v48 = vld [vmem:[%s9501_s1 + $0x1a8] sm:$0xff] }
 0x133   :  { %6177 = vmatmul.mubr.msk.f32.gmra.mrb[86].mxu0 %vm618_vm7, %v7044_v31 }
 0x134   :  { %6179 = vmatprep.mubr.msk.f32.mxu0 %vm619_vm8, %v7044_v31 }
 0x135   :  { %v422_v51 = vpop.permute.xlu1 %421  ;;  %v419_v52 = vpop.permute.xlu0 %418 }
 0x136   :  { %vm621_vm10 = vcmp.eq.s32.totalorder %v419_v52, %v7311_v26  ;;  %1125 = vperm.xlu1 %6530, %v942_v49   ;;  %1122 = vperm.xlu0 %6529, %v941_v50   ;;  %vm622_vm11 = vcmp.eq.s32.totalorder %v422_v51, %v7311_v26  ;;  %v967_v49 = vld [vmem:[%s9501_s1 + $0x1a0] sm:$0xff] }
 0x137   :  { %6180 = vmatmul.mubr.msk.f32.gmra.mrb[88].mxu0 %vm620_vm9, %v7044_v31 }
 0x138   :  { %6182 = vmatprep.mubr.msk.f32.mxu0 %vm621_vm10, %v7044_v31 }
 0x139   :  { %v428_v55 = vpop.permute.xlu1 %427  ;;  %v425_v56 = vpop.permute.xlu0 %424 }
 0x13a   :  { %vm623_vm12 = vcmp.eq.s32.totalorder %v425_v56, %v7311_v26  ;;  %1131 = vperm.xlu1 %6530, %v944_v53   ;;  %1128 = vperm.xlu0 %6529, %v943_v54   ;;  %vm624_vm13 = vcmp.eq.s32.totalorder %v428_v55, %v7311_v26  ;;  %v970_v54 = vld [vmem:[%s9501_s1 + $0x1b8] sm:$0xff]  ;;  %v969_v55 = vld [vmem:[%s9501_s1 + $0x1b0] sm:$0xff] }
 0x13b   :  { %6183 = vmatmul.mubr.msk.f32.gmra.mrb[90].mxu0 %vm622_vm11, %v7044_v31 }
 0x13c   :  { %6185 = vmatprep.mubr.msk.f32.mxu0 %vm623_vm12, %v7044_v31 }
 0x13d   :  { %v434_v59 = vpop.permute.xlu1 %433  ;;  %v431_v60 = vpop.permute.xlu0 %430 }
 0x13e   :  { %vm625_vm14 = vcmp.eq.s32.totalorder %v431_v60, %v7311_v26  ;;  %1137 = vperm.xlu1 %6530, %v946_v57   ;;  %1134 = vperm.xlu0 %6529, %v945_v58   ;;  %vm626_vm15 = vcmp.eq.s32.totalorder %v434_v59, %v7311_v26  ;;  %v972_v60 = vld [vmem:[%s9501_s1 + $0x1c8] sm:$0xff] }
 0x13f   :  { %6186 = vmatmul.mubr.msk.f32.gmra.mrb[92].mxu0 %vm624_vm13, %v7044_v31 }
 0x140   :  { %6188 = vmatprep.mubr.msk.f32.mxu0 %vm625_vm14, %v7044_v31 }
 0x141   :  { %v440_v63 = vpop.permute.xlu1 %439  ;;  %v437_v0 = vpop.permute.xlu0 %436 }
 0x142   :  { %vm627_vm0 = vcmp.eq.s32.totalorder %v437_v0, %v7311_v26  ;;  %1143 = vperm.xlu1 %6530, %v948_v61   ;;  %1140 = vperm.xlu0 %6529, %v947_v62   ;;  %vm628_vm1 = vcmp.eq.s32.totalorder %v440_v63, %v7311_v26  ;;  %v971_v61 = vld [vmem:[%s9501_s1 + $0x1c0] sm:$0xff] }
 0x143   :  { %6189 = vmatmul.mubr.msk.f32.gmra.mrb[94].mxu0 %vm626_vm15, %v7044_v31 }
 0x144   :  { %6191 = vmatprep.mubr.msk.f32.mxu0 %vm627_vm0, %v7044_v31 }
 0x145   :  { %v446_v3 = vpop.permute.xlu1 %445  ;;  %v443_v4 = vpop.permute.xlu0 %442 }
 0x146   :  { %vm629_vm2 = vcmp.eq.s32.totalorder %v443_v4, %v7311_v26  ;;  %1149 = vperm.xlu1 %6530, %v950_v1   ;;  %1146 = vperm.xlu0 %6529, %v949_v2   ;;  %vm630_vm3 = vcmp.eq.s32.totalorder %v446_v3, %v7311_v26  ;;  %v974_v2 = vld [vmem:[%s9501_s1 + $0x1d8] sm:$0xff]  ;;  %v973_v3 = vld [vmem:[%s9501_s1 + $0x1d0] sm:$0xff] }
 0x147   :  { %6192 = vmatmul.mubr.msk.f32.gmra.mrb[96].mxu0 %vm628_vm1, %v7044_v31 }
 0x148   :  { %6194 = vmatprep.mubr.msk.f32.mxu0 %vm629_vm2, %v7044_v31 }
 0x149   :  { %v452_v7 = vpop.permute.xlu1 %451  ;;  %v449_v8 = vpop.permute.xlu0 %448 }
 0x14a   :  { %vm631_vm4 = vcmp.eq.s32.totalorder %v449_v8, %v7311_v26  ;;  %1155 = vperm.xlu1 %6530, %v952_v5   ;;  %1152 = vperm.xlu0 %6529, %v951_v6   ;;  %vm632_vm5 = vcmp.eq.s32.totalorder %v452_v7, %v7311_v26  ;;  %v976_v8 = vld [vmem:[%s9501_s1 + $0x1e8] sm:$0xff] }
 0x14b   :  { %6195 = vmatmul.mubr.msk.f32.gmra.mrb[98].mxu0 %vm630_vm3, %v7044_v31 }
 0x14c   :  { %6197 = vmatprep.mubr.msk.f32.mxu0 %vm631_vm4, %v7044_v31 }
 0x14d   :  { %v458_v11 = vpop.permute.xlu1 %457  ;;  %v455_v12 = vpop.permute.xlu0 %454 }
 0x14e   :  { %vm633_vm6 = vcmp.eq.s32.totalorder %v455_v12, %v7311_v26  ;;  %1161 = vperm.xlu1 %6530, %v954_v9   ;;  %1158 = vperm.xlu0 %6529, %v953_v10   ;;  %vm634_vm7 = vcmp.eq.s32.totalorder %v458_v11, %v7311_v26  ;;  %v975_v9 = vld [vmem:[%s9501_s1 + $0x1e0] sm:$0xff] }
 0x14f   :  { %6198 = vmatmul.mubr.msk.f32.gmra.mrb[100].mxu0 %vm632_vm5, %v7044_v31 }
 0x150   :  { %6200 = vmatprep.mubr.msk.f32.mxu0 %vm633_vm6, %v7044_v31 }
 0x151   :  { %v464_v15 = vpop.permute.xlu1 %463  ;;  %v461_v16 = vpop.permute.xlu0 %460 }
 0x152   :  { %vm635_vm8 = vcmp.eq.s32.totalorder %v461_v16, %v7311_v26  ;;  %1167 = vperm.xlu1 %6530, %v956_v13   ;;  %1164 = vperm.xlu0 %6529, %v955_v14   ;;  %vm636_vm9 = vcmp.eq.s32.totalorder %v464_v15, %v7311_v26  ;;  %v978_v14 = vld [vmem:[%s9501_s1 + $0x1f8] sm:$0xff]  ;;  %v977_v15 = vld [vmem:[%s9501_s1 + $0x1f0] sm:$0xff] }
 0x153   :  { %6201 = vmatmul.mubr.msk.f32.gmra.mrb[102].mxu0 %vm634_vm7, %v7044_v31 }
 0x154   :  { %6203 = vmatprep.mubr.msk.f32.mxu0 %vm635_vm8, %v7044_v31 }
 0x155   :  { %v470_v19 = vpop.permute.xlu1 %469  ;;  %v467_v20 = vpop.permute.xlu0 %466 }
 0x156   :  { %vm637_vm10 = vcmp.eq.s32.totalorder %v467_v20, %v7311_v26  ;;  %1173 = vperm.xlu1 %6530, %v958_v17   ;;  %1170 = vperm.xlu0 %6529, %v957_v18   ;;  %vm638_vm11 = vcmp.eq.s32.totalorder %v470_v19, %v7311_v26  ;;  %v980_v20 = vld [vmem:[%s9501_s1 + $0x208] sm:$0xff] }
 0x157   :  { %6204 = vmatmul.mubr.msk.f32.gmra.mrb[104].mxu0 %vm636_vm9, %v7044_v31 }
 0x158   :  { %6206 = vmatprep.mubr.msk.f32.mxu0 %vm637_vm10, %v7044_v31 }
 0x159   :  { %v476_v24 = vpop.permute.xlu1 %475  ;;  %v473_v25 = vpop.permute.xlu0 %472 }
 0x15a   :  { %vm639_vm12 = vcmp.eq.s32.totalorder %v473_v25, %v7311_v26  ;;  %1179 = vperm.xlu1 %6530, %v960_v21   ;;  %v7907_v27 = vpop.f32.mrb[0].mxu0  ;;  %1176 = vperm.xlu0 %6529, %v959_v22   ;;  %vm640_vm13 = vcmp.eq.s32.totalorder %v476_v24, %v7311_v26  ;;  %v979_v21 = vld [vmem:[%s9501_s1 + $0x200] sm:$0xff] }
 0x15b   :  { %v7909_v28 = vpop.f32.mrb[1].mxu0  ;;  %6207 = vmatmul.mubr.msk.f32.gmra.mrb[106].mxu0 %vm638_vm11, %v7044_v31 }
 0x15c   :  { %6209 = vmatprep.mubr.msk.f32.mxu0 %vm639_vm12, %v7044_v31 }
 0x15d   :  { %v482_v32 = vpop.permute.xlu1 %481  ;;  %v479_v33 = vpop.permute.xlu0 %478 }
 0x15e   :  { %vm641_vm14 = vcmp.eq.s32.totalorder %v479_v33, %v7311_v26  ;;  %1185 = vperm.xlu1 %6530, %v962_v29   ;;  %v7921_v34 = vpop.f32.mrb[2].mxu0  ;;  %1182 = vperm.xlu0 %6529, %v961_v30   ;;  %vm642_vm15 = vcmp.eq.s32.totalorder %v482_v32, %v7311_v26  ;;  %v982_v30 = vld [vmem:[%s9501_s1 + $0x218] sm:$0xff]  ;;  %v981_v32 = vld [vmem:[%s9501_s1 + $0x210] sm:$0xff] }
 0x15f   :  { %v7923_v35 = vpop.f32.mrb[3].mxu0  ;;  %6210 = vmatmul.mubr.msk.f32.gmra.mrb[108].mxu0 %vm640_vm13, %v7044_v31 }
 0x160   :  { %6212 = vmatprep.mubr.msk.f32.mxu0 %vm641_vm14, %v7044_v31 }
 0x161   :  { %v488_v38 = vpop.permute.xlu1 %487  ;;  %v485_v39 = vpop.permute.xlu0 %484 }
 0x162   :  { %vm643_vm0 = vcmp.eq.s32.totalorder %v485_v39, %v7311_v26  ;;  %1191 = vperm.xlu1 %6530, %v964_v36   ;;  %v7935_v40 = vpop.f32.mrb[4].mxu0  ;;  %1188 = vperm.xlu0 %6529, %v963_v37   ;;  %vm644_vm1 = vcmp.eq.s32.totalorder %v488_v38, %v7311_v26  ;;  %v984_v39 = vld [vmem:[%s9501_s1 + $0x228] sm:$0xff] }
 0x163   :  { %v7937_v41 = vpop.f32.mrb[5].mxu0  ;;  %6213 = vmatmul.mubr.msk.f32.gmra.mrb[110].mxu0 %vm642_vm15, %v7044_v31 }
 0x164   :  { %6215 = vmatprep.mubr.msk.f32.mxu0 %vm643_vm0, %v7044_v31 }
 0x165   :  { %v494_v44 = vpop.permute.xlu1 %493  ;;  %v491_v45 = vpop.permute.xlu0 %490 }
 0x166   :  { %vm645_vm2 = vcmp.eq.s32.totalorder %v491_v45, %v7311_v26  ;;  %1197 = vperm.xlu1 %6530, %v966_v42   ;;  %v7949_v46 = vpop.f32.mrb[6].mxu0  ;;  %1194 = vperm.xlu0 %6529, %v965_v43   ;;  %vm646_vm3 = vcmp.eq.s32.totalorder %v494_v44, %v7311_v26  ;;  %v983_v42 = vld [vmem:[%s9501_s1 + $0x220] sm:$0xff] }
 0x167   :  { %v7951_v47 = vpop.f32.mrb[7].mxu0  ;;  %6216 = vmatmul.mubr.msk.f32.gmra.mrb[112].mxu0 %vm644_vm1, %v7044_v31 }
 0x168   :  { %6218 = vmatprep.mubr.msk.f32.mxu0 %vm645_vm2, %v7044_v31 }
 0x169   :  { %v500_v50 = vpop.permute.xlu1 %499  ;;  %v497_v51 = vpop.permute.xlu0 %496 }
 0x16a   :  { %vm647_vm4 = vcmp.eq.s32.totalorder %v497_v51, %v7311_v26  ;;  %1203 = vperm.xlu1 %6530, %v968_v48   ;;  %v7963_v52 = vpop.f32.mrb[8].mxu0  ;;  %1200 = vperm.xlu0 %6529, %v967_v49   ;;  %vm648_vm5 = vcmp.eq.s32.totalorder %v500_v50, %v7311_v26  ;;  %v986_v49 = vld [vmem:[%s9501_s1 + $0x238] sm:$0xff]  ;;  %v985_v50 = vld [vmem:[%s9501_s1 + $0x230] sm:$0xff] }
 0x16b   :  { %v7965_v53 = vpop.f32.mrb[9].mxu0  ;;  %6219 = vmatmul.mubr.msk.f32.gmra.mrb[114].mxu0 %vm646_vm3, %v7044_v31 }
 0x16c   :  { %6221 = vmatprep.mubr.msk.f32.mxu0 %vm647_vm4, %v7044_v31 }
 0x16d   :  { %v506_v56 = vpop.permute.xlu1 %505  ;;  %v503_v57 = vpop.permute.xlu0 %502 }
 0x16e   :  { %vm649_vm6 = vcmp.eq.s32.totalorder %v503_v57, %v7311_v26  ;;  %1209 = vperm.xlu1 %6530, %v970_v54   ;;  %v7977_v58 = vpop.f32.mrb[10].mxu0  ;;  %1206 = vperm.xlu0 %6529, %v969_v55   ;;  %vm650_vm7 = vcmp.eq.s32.totalorder %v506_v56, %v7311_v26  ;;  %v988_v57 = vld [vmem:[%s9501_s1 + $0x248] sm:$0xff] }
 0x16f   :  { %v7979_v59 = vpop.f32.mrb[11].mxu0  ;;  %6222 = vmatmul.mubr.msk.f32.gmra.mrb[116].mxu0 %vm648_vm5, %v7044_v31 }
 0x170   :  { %6224 = vmatprep.mubr.msk.f32.mxu0 %vm649_vm6, %v7044_v31 }
 0x171   :  { %v512_v62 = vpop.permute.xlu1 %511  ;;  %v509_v63 = vpop.permute.xlu0 %508 }
 0x172   :  { %vm651_vm8 = vcmp.eq.s32.totalorder %v509_v63, %v7311_v26  ;;  %1215 = vperm.xlu1 %6530, %v972_v60   ;;  %v7991_v0 = vpop.f32.mrb[12].mxu0  ;;  %1212 = vperm.xlu0 %6529, %v971_v61   ;;  %vm652_vm9 = vcmp.eq.s32.totalorder %v512_v62, %v7311_v26  ;;  %v987_v60 = vld [vmem:[%s9501_s1 + $0x240] sm:$0xff] }
 0x173   :  { %v7993_v1 = vpop.f32.mrb[13].mxu0  ;;  %6225 = vmatmul.mubr.msk.f32.gmra.mrb[118].mxu0 %vm650_vm7, %v7044_v31 }
 0x174   :  { %6227 = vmatprep.mubr.msk.f32.mxu0 %vm651_vm8, %v7044_v31 }
 0x175   :  { %v518_v4 = vpop.permute.xlu1 %517  ;;  %v515_v5 = vpop.permute.xlu0 %514 }
 0x176   :  { %vm653_vm10 = vcmp.eq.s32.totalorder %v515_v5, %v7311_v26  ;;  %1221 = vperm.xlu1 %6530, %v974_v2   ;;  %v8005_v6 = vpop.f32.mrb[14].mxu0  ;;  %1218 = vperm.xlu0 %6529, %v973_v3   ;;  %vm654_vm11 = vcmp.eq.s32.totalorder %v518_v4, %v7311_v26  ;;  %v990_v3 = vld [vmem:[%s9501_s1 + $0x258] sm:$0xff]  ;;  %v989_v4 = vld [vmem:[%s9501_s1 + $0x250] sm:$0xff] }
 0x177   :  { %v8007_v7 = vpop.f32.mrb[15].mxu0  ;;  %6228 = vmatmul.mubr.msk.f32.gmra.mrb[120].mxu0 %vm652_vm9, %v7044_v31 }
 0x178   :  { %6230 = vmatprep.mubr.msk.f32.mxu0 %vm653_vm10, %v7044_v31 }
 0x179   :  { %v524_v10 = vpop.permute.xlu1 %523  ;;  %v521_v11 = vpop.permute.xlu0 %520 }
 0x17a   :  { %vm655_vm12 = vcmp.eq.s32.totalorder %v521_v11, %v7311_v26  ;;  %1227 = vperm.xlu1 %6530, %v976_v8   ;;  %v8019_v12 = vpop.f32.mrb[16].mxu0  ;;  %1224 = vperm.xlu0 %6529, %v975_v9   ;;  %vm656_vm13 = vcmp.eq.s32.totalorder %v524_v10, %v7311_v26  ;;  %v992_v11 = vld [vmem:[%s9501_s1 + $0x268] sm:$0xff] }
 0x17b   :  { %v8021_v13 = vpop.f32.mrb[17].mxu0  ;;  %6231 = vmatmul.mubr.msk.f32.gmra.mrb[122].mxu0 %vm654_vm11, %v7044_v31 }
 0x17c   :  { %6233 = vmatprep.mubr.msk.f32.mxu0 %vm655_vm12, %v7044_v31 }
 0x17d   :  { %v530_v16 = vpop.permute.xlu1 %529  ;;  %v527_v17 = vpop.permute.xlu0 %526 }
 0x17e   :  { %vm657_vm14 = vcmp.eq.s32.totalorder %v527_v17, %v7311_v26  ;;  %1233 = vperm.xlu1 %6530, %v978_v14   ;;  %v8033_v18 = vpop.f32.mrb[18].mxu0  ;;  %1230 = vperm.xlu0 %6529, %v977_v15   ;;  %vm658_vm15 = vcmp.eq.s32.totalorder %v530_v16, %v7311_v26  ;;  %v991_v14 = vld [vmem:[%s9501_s1 + $0x260] sm:$0xff] }
 0x17f   :  { %v8035_v19 = vpop.f32.mrb[19].mxu0  ;;  %6234 = vmatmul.mubr.msk.f32.gmra.mrb[124].mxu0 %vm656_vm13, %v7044_v31 }
 0x180   :  { %6236 = vmatprep.mubr.msk.f32.mxu0 %vm657_vm14, %v7044_v31 }
 0x181   :  { %v1048_v22 = vpop.permute.xlu1 %1047  ;;  %v1045_v24 = vpop.permute.xlu0 %1044 }
 0x182   :  { %vm1428_vm0 = vcmp.eq.s32.totalorder %v1048_v22, %v7311_v26  ;;  %1239 = vperm.xlu1 %6530, %v980_v20   ;;  %v8047_v25 = vpop.f32.mrb[20].mxu0  ;;  %1236 = vperm.xlu0 %6529, %v979_v21   ;;  %vm1427_vm1 = vcmp.eq.s32.totalorder %v1045_v24, %v7311_v26  ;;  %v994_v21 = vld [vmem:[%s9501_s1 + $0x278] sm:$0xff]  ;;  %v993_v22 = vld [vmem:[%s9501_s1 + $0x270] sm:$0xff] }
 0x183   :  { %v8050_v29 = vpop.f32.mrb[21].mxu0  ;;  %6237 = vmatmul.mubr.msk.f32.gmra.mrb[126].mxu0 %vm658_vm15, %v7044_v31  ;;  %6271 = vmatprep.mubr.msk.f32.mxu1 %vm1427_vm1, %v7044_v31 }
 0x184   :  { %6272 = vmatmul.mubr.msk.f32.vlgmr.msra.gmra.mrb[0].mxu1 %vm1428_vm0, %v7044_v31 }
 0x185   :  { %v1054_v33 = vpop.permute.xlu1 %1053  ;;  %v1051_v36 = vpop.permute.xlu0 %1050 }
 0x186   :  { %vm1430_vm2 = vcmp.eq.s32.totalorder %v1054_v33, %v7311_v26  ;;  %vm1429_vm3 = vcmp.eq.s32.totalorder %v1051_v36, %v7311_v26  ;;  %1245 = vperm.xlu1 %6530, %v982_v30   ;;  %v8063_v37 = vpop.f32.mrb[22].mxu0  ;;  %1242 = vperm.xlu0 %6529, %v981_v32   ;;  %v996_v36 = vld [vmem:[%s9501_s1 + $0x288] sm:$0xff] }
 0x187   :  { %v8065_v38 = vpop.f32.mrb[23].mxu0  ;;  %6274 = vmatprep.mubr.msk.f32.mxu1 %vm1429_vm3, %v7044_v31 }
 0x188   :  { %6275 = vmatmul.mubr.msk.f32.gmra.mrb[2].mxu1 %vm1430_vm2, %v7044_v31 }
 0x189   :  { %v1060_v43 = vpop.permute.xlu1 %1059  ;;  %v1057_v44 = vpop.permute.xlu0 %1056 }
 0x18a   :  { %vm1432_vm4 = vcmp.eq.s32.totalorder %v1060_v43, %v7311_v26  ;;  %vm1431_vm5 = vcmp.eq.s32.totalorder %v1057_v44, %v7311_v26  ;;  %1251 = vperm.xlu1 %6530, %v984_v39   ;;  %v8077_v45 = vpop.f32.mrb[24].mxu0  ;;  %1248 = vperm.xlu0 %6529, %v983_v42   ;;  %v995_v39 = vld [vmem:[%s9501_s1 + $0x280] sm:$0xff] }
 0x18b   :  { %v8079_v48 = vpop.f32.mrb[25].mxu0  ;;  %6277 = vmatprep.mubr.msk.f32.mxu1 %vm1431_vm5, %v7044_v31 }
 0x18c   :  { %6278 = vmatmul.mubr.msk.f32.gmra.mrb[4].mxu1 %vm1432_vm4, %v7044_v31 }
 0x18d   :  { %v1066_v51 = vpop.permute.xlu1 %1065  ;;  %v1063_v54 = vpop.permute.xlu0 %1062 }
 0x18e   :  { %vm1434_vm6 = vcmp.eq.s32.totalorder %v1066_v51, %v7311_v26  ;;  %vm1433_vm7 = vcmp.eq.s32.totalorder %v1063_v54, %v7311_v26  ;;  %1257 = vperm.xlu1 %6530, %v986_v49   ;;  %v8091_v55 = vpop.f32.mrb[26].mxu0  ;;  %1254 = vperm.xlu0 %6529, %v985_v50   ;;  %v998_v50 = vld [vmem:[%s9501_s1 + $0x298] sm:$0xff]  ;;  %v997_v51 = vld [vmem:[%s9501_s1 + $0x290] sm:$0xff] }
 0x18f   :  { %v8093_v56 = vpop.f32.mrb[27].mxu0  ;;  %6280 = vmatprep.mubr.msk.f32.mxu1 %vm1433_vm7, %v7044_v31 }
 0x190   :  { %6281 = vmatmul.mubr.msk.f32.gmra.mrb[6].mxu1 %vm1434_vm6, %v7044_v31 }
 0x191   :  { %v1072_v61 = vpop.permute.xlu1 %1071  ;;  %v1069_v62 = vpop.permute.xlu0 %1068 }
 0x192   :  { %vm1436_vm8 = vcmp.eq.s32.totalorder %v1072_v61, %v7311_v26  ;;  %vm1435_vm9 = vcmp.eq.s32.totalorder %v1069_v62, %v7311_v26  ;;  %1263 = vperm.xlu1 %6530, %v988_v57   ;;  %v8105_v63 = vpop.f32.mrb[28].mxu0  ;;  %1260 = vperm.xlu0 %6529, %v987_v60   ;;  %v1000_v62 = vld [vmem:[%s9501_s1 + $0x2a8] sm:$0xff] }
 0x193   :  { %v8107_v2 = vpop.f32.mrb[29].mxu0  ;;  %6283 = vmatprep.mubr.msk.f32.mxu1 %vm1435_vm9, %v7044_v31 }
 0x194   :  { %6284 = vmatmul.mubr.msk.f32.gmra.mrb[8].mxu1 %vm1436_vm8, %v7044_v31 }
 0x195   :  { %v1078_v5 = vpop.permute.xlu1 %1077  ;;  %v1075_v8 = vpop.permute.xlu0 %1074 }
 0x196   :  { %vm1438_vm10 = vcmp.eq.s32.totalorder %v1078_v5, %v7311_v26  ;;  %vm1437_vm11 = vcmp.eq.s32.totalorder %v1075_v8, %v7311_v26  ;;  %1269 = vperm.xlu1 %6530, %v990_v3   ;;  %v8119_v9 = vpop.f32.mrb[30].mxu0  ;;  %1266 = vperm.xlu0 %6529, %v989_v4   ;;  %v999_v3 = vld [vmem:[%s9501_s1 + $0x2a0] sm:$0xff] }
 0x197   :  { %v8121_v10 = vpop.f32.mrb[31].mxu0  ;;  %6286 = vmatprep.mubr.msk.f32.mxu1 %vm1437_vm11, %v7044_v31 }
 0x198   :  { %6287 = vmatmul.mubr.msk.f32.gmra.mrb[10].mxu1 %vm1438_vm10, %v7044_v31 }
 0x199   :  { %v1084_v15 = vpop.permute.xlu1 %1083  ;;  %v1081_v16 = vpop.permute.xlu0 %1080 }
 0x19a   :  { %vm1440_vm12 = vcmp.eq.s32.totalorder %v1084_v15, %v7311_v26  ;;  %vm1439_vm13 = vcmp.eq.s32.totalorder %v1081_v16, %v7311_v26  ;;  %1275 = vperm.xlu1 %6530, %v992_v11   ;;  %v8133_v17 = vpop.f32.mrb[32].mxu0  ;;  %1272 = vperm.xlu0 %6529, %v991_v14   ;;  %v1002_v14 = vld [vmem:[%s9501_s1 + $0x2b8] sm:$0xff]  ;;  %v1001_v15 = vld [vmem:[%s9501_s1 + $0x2b0] sm:$0xff] }
 0x19b   :  { %v8135_v20 = vpop.f32.mrb[33].mxu0  ;;  %6289 = vmatprep.mubr.msk.f32.mxu1 %vm1439_vm13, %v7044_v31 }
 0x19c   :  { %6290 = vmatmul.mubr.msk.f32.gmra.mrb[12].mxu1 %vm1440_vm12, %v7044_v31 }
 0x19d   :  { %v1090_v24 = vpop.permute.xlu1 %1089  ;;  %v1087_v30 = vpop.permute.xlu0 %1086 }
 0x19e   :  { %vm1442_vm14 = vcmp.eq.s32.totalorder %v1090_v24, %v7311_v26  ;;  %vm1441_vm15 = vcmp.eq.s32.totalorder %v1087_v30, %v7311_v26  ;;  %1281 = vperm.xlu1 %6530, %v994_v21   ;;  %v8147_v32 = vpop.f32.mrb[34].mxu0  ;;  %1278 = vperm.xlu0 %6529, %v993_v22   ;;  %v1004_v30 = vld [vmem:[%s9501_s1 + $0x2c8] sm:$0xff] }
 0x19f   :  { %v8149_v33 = vpop.f32.mrb[35].mxu0  ;;  %6292 = vmatprep.mubr.msk.f32.mxu1 %vm1441_vm15, %v7044_v31 }
 0x1a0   :  { %6293 = vmatmul.mubr.msk.f32.gmra.mrb[14].mxu1 %vm1442_vm14, %v7044_v31 }
 0x1a1   :  { %v1096_v42 = vpop.permute.xlu1 %1095  ;;  %v1093_v43 = vpop.permute.xlu0 %1092 }
 0x1a2   :  { %vm1444_vm0 = vcmp.eq.s32.totalorder %v1096_v42, %v7311_v26  ;;  %vm1443_vm1 = vcmp.eq.s32.totalorder %v1093_v43, %v7311_v26  ;;  %1287 = vperm.xlu1 %6530, %v996_v36   ;;  %v8161_v44 = vpop.f32.mrb[36].mxu0  ;;  %1284 = vperm.xlu0 %6529, %v995_v39   ;;  %v1003_v36 = vld [vmem:[%s9501_s1 + $0x2c0] sm:$0xff] }
 0x1a3   :  { %v8163_v49 = vpop.f32.mrb[37].mxu0  ;;  %6295 = vmatprep.mubr.msk.f32.mxu1 %vm1443_vm1, %v7044_v31 }
 0x1a4   :  { %6296 = vmatmul.mubr.msk.f32.gmra.mrb[16].mxu1 %vm1444_vm0, %v7044_v31 }
 0x1a5   :  { %v1102_v54 = vpop.permute.xlu1 %1101  ;;  %v1099_v57 = vpop.permute.xlu0 %1098 }
 0x1a6   :  { %vm1446_vm2 = vcmp.eq.s32.totalorder %v1102_v54, %v7311_v26  ;;  %vm1445_vm3 = vcmp.eq.s32.totalorder %v1099_v57, %v7311_v26  ;;  %1293 = vperm.xlu1 %6530, %v998_v50   ;;  %v8175_v60 = vpop.f32.mrb[38].mxu0  ;;  %1290 = vperm.xlu0 %6529, %v997_v51   ;;  %v1006_v51 = vld [vmem:[%s9501_s1 + $0x2d8] sm:$0xff]  ;;  %v1005_v54 = vld [vmem:[%s9501_s1 + $0x2d0] sm:$0xff] }
 0x1a7   :  { %v8177_v61 = vpop.f32.mrb[39].mxu0  ;;  %6298 = vmatprep.mubr.msk.f32.mxu1 %vm1445_vm3, %v7044_v31 }
 0x1a8   :  { %6299 = vmatmul.mubr.msk.f32.gmra.mrb[18].mxu1 %vm1446_vm2, %v7044_v31 }
 0x1a9   :  { %v1108_v4 = vpop.permute.xlu1 %1107  ;;  %v1105_v5 = vpop.permute.xlu0 %1104 }
 0x1aa   :  { %vm1448_vm4 = vcmp.eq.s32.totalorder %v1108_v4, %v7311_v26  ;;  %vm1447_vm5 = vcmp.eq.s32.totalorder %v1105_v5, %v7311_v26  ;;  %1299 = vperm.xlu1 %6530, %v1000_v62   ;;  %v8189_v8 = vpop.f32.mrb[40].mxu0  ;;  %1296 = vperm.xlu0 %6529, %v999_v3   ;;  %v1008_v5 = vld [vmem:[%s9501_s1 + $0x2e8] sm:$0xff] }
 0x1ab   :  { %v8191_v11 = vpop.f32.mrb[41].mxu0  ;;  %6301 = vmatprep.mubr.msk.f32.mxu1 %vm1447_vm5, %v7044_v31 }
 0x1ac   :  { %6302 = vmatmul.mubr.msk.f32.gmra.mrb[20].mxu1 %vm1448_vm4, %v7044_v31 }
 0x1ad   :  { %v1114_v16 = vpop.permute.xlu1 %1113  ;;  %v1111_v21 = vpop.permute.xlu0 %1110 }
 0x1ae   :  { %vm1450_vm6 = vcmp.eq.s32.totalorder %v1114_v16, %v7311_v26  ;;  %vm1449_vm7 = vcmp.eq.s32.totalorder %v1111_v21, %v7311_v26  ;;  %1305 = vperm.xlu1 %6530, %v1002_v14   ;;  %v8203_v22 = vpop.f32.mrb[42].mxu0  ;;  %1302 = vperm.xlu0 %6529, %v1001_v15   ;;  %v1007_v14 = vld [vmem:[%s9501_s1 + $0x2e0] sm:$0xff] }
 0x1af   :  { %v8205_v24 = vpop.f32.mrb[43].mxu0  ;;  %6304 = vmatprep.mubr.msk.f32.mxu1 %vm1449_vm7, %v7044_v31 }
 0x1b0   :  { %6305 = vmatmul.mubr.msk.f32.gmra.mrb[22].mxu1 %vm1450_vm6, %v7044_v31 }
 0x1b1   :  { %v1120_v39 = vpop.permute.xlu1 %1119  ;;  %v1117_v42 = vpop.permute.xlu0 %1116 }
 0x1b2   :  { %vm1452_vm8 = vcmp.eq.s32.totalorder %v1120_v39, %v7311_v26  ;;  %vm1451_vm9 = vcmp.eq.s32.totalorder %v1117_v42, %v7311_v26  ;;  %1311 = vperm.xlu1 %6530, %v1004_v30   ;;  %v8217_v43 = vpop.f32.mrb[44].mxu0  ;;  %1308 = vperm.xlu0 %6529, %v1003_v36   ;;  %v1010_v36 = vld [vmem:[%s9501_s1 + $0x2f8] sm:$0xff]  ;;  %v1009_v39 = vld [vmem:[%s9501_s1 + $0x2f0] sm:$0xff] }
 0x1b3   :  { %v8219_v50 = vpop.f32.mrb[45].mxu0  ;;  %6307 = vmatprep.mubr.msk.f32.mxu1 %vm1451_vm9, %v7044_v31 }
 0x1b4   :  { %6308 = vmatmul.mubr.msk.f32.gmra.mrb[24].mxu1 %vm1452_vm8, %v7044_v31 }
 0x1b5   :  { %v1126_v57 = vpop.permute.xlu1 %1125  ;;  %v1123_v62 = vpop.permute.xlu0 %1122 }
 0x1b6   :  { %vm1454_vm10 = vcmp.eq.s32.totalorder %v1126_v57, %v7311_v26  ;;  %vm1453_vm11 = vcmp.eq.s32.totalorder %v1123_v62, %v7311_v26  ;;  %1317 = vperm.xlu1 %6530, %v1006_v51   ;;  %v8231_v3 = vpop.f32.mrb[46].mxu0  ;;  %1314 = vperm.xlu0 %6529, %v1005_v54   ;;  %v1012_v62 = vld [vmem:[%s9501_s1 + $0x308] sm:$0xff] }
 0x1b7   :  { %v8233_v4 = vpop.f32.mrb[47].mxu0  ;;  %6310 = vmatprep.mubr.msk.f32.mxu1 %vm1453_vm11, %v7044_v31 }
 0x1b8   :  { %6311 = vmatmul.mubr.msk.f32.gmra.mrb[26].mxu1 %vm1454_vm10, %v7044_v31 }
 0x1b9   :  { %v1132_v15 = vpop.permute.xlu1 %1131  ;;  %v1129_v16 = vpop.permute.xlu0 %1128 }
 0x1ba   :  { %vm1456_vm12 = vcmp.eq.s32.totalorder %v1132_v15, %v7311_v26  ;;  %vm1455_vm13 = vcmp.eq.s32.totalorder %v1129_v16, %v7311_v26  ;;  %1323 = vperm.xlu1 %6530, %v1008_v5   ;;  %v8245_v21 = vpop.f32.mrb[48].mxu0  ;;  %1320 = vperm.xlu0 %6529, %v1007_v14   ;;  %v1011_v5 = vld [vmem:[%s9501_s1 + $0x300] sm:$0xff] }
 0x1bb   :  { %v8247_v30 = vpop.f32.mrb[49].mxu0  ;;  %6313 = vmatprep.mubr.msk.f32.mxu1 %vm1455_vm13, %v7044_v31 }
 0x1bc   :  { %6314 = vmatmul.mubr.msk.f32.gmra.mrb[28].mxu1 %vm1456_vm12, %v7044_v31 }
 0x1bd   :  { %v1138_v42 = vpop.permute.xlu1 %1137  ;;  %v1135_v51 = vpop.permute.xlu0 %1134 }
 0x1be   :  { %vm1458_vm14 = vcmp.eq.s32.totalorder %v1138_v42, %v7311_v26  ;;  %vm1457_vm15 = vcmp.eq.s32.totalorder %v1135_v51, %v7311_v26  ;;  %1329 = vperm.xlu1 %6530, %v1010_v36   ;;  %v8259_v54 = vpop.f32.mrb[50].mxu0  ;;  %1326 = vperm.xlu0 %6529, %v1009_v39   ;;  %v1014_v39 = vld [vmem:[%s9501_s1 + $0x318] sm:$0xff]  ;;  %v1013_v42 = vld [vmem:[%s9501_s1 + $0x310] sm:$0xff] }
 0x1bf   :  { %v8261_v57 = vpop.f32.mrb[51].mxu0  ;;  %6316 = vmatprep.mubr.msk.f32.mxu1 %vm1457_vm15, %v7044_v31 }
 0x1c0   :  { %6317 = vmatmul.mubr.msk.f32.gmra.mrb[30].mxu1 %vm1458_vm14, %v7044_v31 }
 0x1c1   :  { %v1144_v14 = vpop.permute.xlu1 %1143  ;;  %v1141_v15 = vpop.permute.xlu0 %1140 }
 0x1c2   :  { %vm1460_vm0 = vcmp.eq.s32.totalorder %v1144_v14, %v7311_v26  ;;  %vm1459_vm1 = vcmp.eq.s32.totalorder %v1141_v15, %v7311_v26  ;;  %1335 = vperm.xlu1 %6530, %v1012_v62   ;;  %v8273_v16 = vpop.f32.mrb[52].mxu0  ;;  %1332 = vperm.xlu0 %6529, %v1011_v5   ;;  %v1016_v15 = vld [vmem:[%s9501_s1 + $0x328] sm:$0xff] }
 0x1c3   :  { %9505 = vst [vmem:[#allocation2_spill] sm:$0xff] %v8273_v16  ;;  %v8275_v36 = vpop.f32.mrb[53].mxu0  ;;  %6319 = vmatprep.mubr.msk.f32.mxu1 %vm1459_vm1, %v7044_v31 }
 0x1c4   :  { %9506 = vst [vmem:[#allocation3_spill] sm:$0xff] %v8275_v36  ;;  %6320 = vmatmul.mubr.msk.f32.gmra.mrb[32].mxu1 %vm1460_vm0, %v7044_v31 }
 0x1c5   :  { %v1150_v51 = vpop.permute.xlu1 %1149  ;;  %v1147_v14 = vpop.permute.xlu0 %1146 }
 0x1c6   :  { %vm1462_vm2 = vcmp.eq.s32.totalorder %v1150_v51, %v7311_v26  ;;  %vm1461_vm3 = vcmp.eq.s32.totalorder %v1147_v14, %v7311_v26  ;;  %1341 = vperm.xlu1 %6530, %v1014_v39   ;;  %v8287_v62 = vpop.f32.mrb[54].mxu0  ;;  %1338 = vperm.xlu0 %6529, %v1013_v42  }
 0x1c7   :  { %9507 = vst [vmem:[#allocation4_spill] sm:$0xff] %v8287_v62  ;;  %v8289_v5 = vpop.f32.mrb[55].mxu0  ;;  %6322 = vmatprep.mubr.msk.f32.mxu1 %vm1461_vm3, %v7044_v31  ;;  %v1017_v62 = vld [vmem:[%s9501_s1 + $0x330] sm:$0xff] }
 0x1c8   :  { %9508 = vst [vmem:[#allocation5_spill] sm:$0xff] %v8289_v5  ;;  %6323 = vmatmul.mubr.msk.f32.gmra.mrb[34].mxu1 %vm1462_vm2, %v7044_v31  ;;  %v1018_v5 = vld [vmem:[%s9501_s1 + $0x338] sm:$0xff] }
 0x1c9   :  { %v1156_v51 = vpop.permute.xlu1 %1155  ;;  %v1153_v14 = vpop.permute.xlu0 %1152 }
 0x1ca   :  { %vm1464_vm4 = vcmp.eq.s32.totalorder %v1156_v51, %v7311_v26  ;;  %vm1463_vm5 = vcmp.eq.s32.totalorder %v1153_v14, %v7311_v26  ;;  %1347 = vperm.xlu1 %6530, %v1016_v15   ;;  %v8301_v39 = vpop.f32.mrb[56].mxu0  ;;  %1344 = vperm.xlu0 %6529, %v1015_v23  }
 0x1cb   :  { %9509 = vst [vmem:[#allocation6_spill] sm:$0xff] %v8301_v39  ;;  %v8303_v42 = vpop.f32.mrb[57].mxu0  ;;  %6325 = vmatprep.mubr.msk.f32.mxu1 %vm1463_vm5, %v7044_v31  ;;  %v1019_v39 = vld [vmem:[%s9501_s1 + $0x340] sm:$0xff] }
 0x1cc   :  { %9510 = vst [vmem:[#allocation7_spill] sm:$0xff] %v8303_v42  ;;  %6326 = vmatmul.mubr.msk.f32.gmra.mrb[36].mxu1 %vm1464_vm4, %v7044_v31  ;;  %v1020_v42 = vld [vmem:[%s9501_s1 + $0x348] sm:$0xff] }
 0x1cd   :  { %v1162_v51 = vpop.permute.xlu1 %1161  ;;  %v1159_v14 = vpop.permute.xlu0 %1158 }
 0x1ce   :  { %vm1466_vm6 = vcmp.eq.s32.totalorder %v1162_v51, %v7311_v26  ;;  %vm1465_vm7 = vcmp.eq.s32.totalorder %v1159_v14, %v7311_v26  ;;  %1353 = vperm.xlu1 %6530, %v1018_v5   ;;  %v8315_v23 = vpop.f32.mrb[58].mxu0  ;;  %1350 = vperm.xlu0 %6529, %v1017_v62  }
 0x1cf   :  { %9511 = vst [vmem:[#allocation8_spill] sm:$0xff] %v8315_v23  ;;  %v8317_v15 = vpop.f32.mrb[59].mxu0  ;;  %6328 = vmatprep.mubr.msk.f32.mxu1 %vm1465_vm7, %v7044_v31  ;;  %v1021_v23 = vld [vmem:[%s9501_s1 + $0x350] sm:$0xff] }
 0x1d0   :  { %9512 = vst [vmem:[#allocation9_spill] sm:$0xff] %v8317_v15  ;;  %6329 = vmatmul.mubr.msk.f32.gmra.mrb[38].mxu1 %vm1466_vm6, %v7044_v31  ;;  %v1022_v15 = vld [vmem:[%s9501_s1 + $0x358] sm:$0xff] }
 0x1d1   :  { %v1168_v51 = vpop.permute.xlu1 %1167  ;;  %v1165_v14 = vpop.permute.xlu0 %1164 }
 0x1d2   :  { %vm1468_vm8 = vcmp.eq.s32.totalorder %v1168_v51, %v7311_v26  ;;  %vm1467_vm9 = vcmp.eq.s32.totalorder %v1165_v14, %v7311_v26  ;;  %1359 = vperm.xlu1 %6530, %v1020_v42   ;;  %v8329_v62 = vpop.f32.mrb[60].mxu0  ;;  %1356 = vperm.xlu0 %6529, %v1019_v39  }
 0x1d3   :  { %9513 = vst [vmem:[#allocation10_spill] sm:$0xff] %v8329_v62  ;;  %v8331_v5 = vpop.f32.mrb[61].mxu0  ;;  %6331 = vmatprep.mubr.msk.f32.mxu1 %vm1467_vm9, %v7044_v31  ;;  %v1023_v62 = vld [vmem:[%s9501_s1 + $0x360] sm:$0xff] }
 0x1d4   :  { %9514 = vst [vmem:[#allocation11_spill] sm:$0xff] %v8331_v5  ;;  %6332 = vmatmul.mubr.msk.f32.gmra.mrb[40].mxu1 %vm1468_vm8, %v7044_v31  ;;  %v1024_v5 = vld [vmem:[%s9501_s1 + $0x368] sm:$0xff] }
 0x1d5   :  { %v1174_v51 = vpop.permute.xlu1 %1173  ;;  %v1171_v14 = vpop.permute.xlu0 %1170 }
 0x1d6   :  { %vm1470_vm10 = vcmp.eq.s32.totalorder %v1174_v51, %v7311_v26  ;;  %vm1469_vm11 = vcmp.eq.s32.totalorder %v1171_v14, %v7311_v26  ;;  %1365 = vperm.xlu1 %6530, %v1022_v15   ;;  %v8343_v39 = vpop.f32.mrb[62].mxu0  ;;  %1362 = vperm.xlu0 %6529, %v1021_v23  }
 0x1d7   :  { %9515 = vst [vmem:[#allocation12_spill] sm:$0xff] %v8343_v39  ;;  %v8345_v42 = vpop.f32.mrb[63].mxu0  ;;  %6334 = vmatprep.mubr.msk.f32.mxu1 %vm1469_vm11, %v7044_v31  ;;  %v1025_v39 = vld [vmem:[%s9501_s1 + $0x370] sm:$0xff] }
 0x1d8   :  { %9516 = vst [vmem:[#allocation13_spill] sm:$0xff] %v8345_v42  ;;  %6335 = vmatmul.mubr.msk.f32.gmra.mrb[42].mxu1 %vm1470_vm10, %v7044_v31  ;;  %v1026_v42 = vld [vmem:[%s9501_s1 + $0x378] sm:$0xff] }
 0x1d9   :  { %v1180_v51 = vpop.permute.xlu1 %1179  ;;  %v1177_v14 = vpop.permute.xlu0 %1176 }
 0x1da   :  { %vm1472_vm12 = vcmp.eq.s32.totalorder %v1180_v51, %v7311_v26  ;;  %vm1471_vm13 = vcmp.eq.s32.totalorder %v1177_v14, %v7311_v26  ;;  %1371 = vperm.xlu1 %6530, %v1024_v5   ;;  %v8357_v23 = vpop.f32.mrb[64].mxu0  ;;  %1368 = vperm.xlu0 %6529, %v1023_v62  }
 0x1db   :  { %9517 = vst [vmem:[#allocation14_spill] sm:$0xff] %v8357_v23  ;;  %v8359_v15 = vpop.f32.mrb[65].mxu0  ;;  %6337 = vmatprep.mubr.msk.f32.mxu1 %vm1471_vm13, %v7044_v31  ;;  %v1027_v23 = vld [vmem:[%s9501_s1 + $0x380] sm:$0xff] }
 0x1dc   :  { %9518 = vst [vmem:[#allocation15_spill] sm:$0xff] %v8359_v15  ;;  %6338 = vmatmul.mubr.msk.f32.gmra.mrb[44].mxu1 %vm1472_vm12, %v7044_v31  ;;  %v1028_v15 = vld [vmem:[%s9501_s1 + $0x388] sm:$0xff] }
 0x1dd   :  { %v1186_v51 = vpop.permute.xlu1 %1185  ;;  %v1183_v14 = vpop.permute.xlu0 %1182 }
 0x1de   :  { %vm1474_vm14 = vcmp.eq.s32.totalorder %v1186_v51, %v7311_v26  ;;  %vm1473_vm15 = vcmp.eq.s32.totalorder %v1183_v14, %v7311_v26  ;;  %1377 = vperm.xlu1 %6530, %v1026_v42   ;;  %v8371_v62 = vpop.f32.mrb[66].mxu0  ;;  %1374 = vperm.xlu0 %6529, %v1025_v39  }
 0x1df   :  { %9519 = vst [vmem:[#allocation16_spill] sm:$0xff] %v8371_v62  ;;  %v8373_v5 = vpop.f32.mrb[67].mxu0  ;;  %6340 = vmatprep.mubr.msk.f32.mxu1 %vm1473_vm15, %v7044_v31  ;;  %v1029_v62 = vld [vmem:[%s9501_s1 + $0x390] sm:$0xff] }
 0x1e0   :  { %9520 = vst [vmem:[#allocation17_spill] sm:$0xff] %v8373_v5  ;;  %6341 = vmatmul.mubr.msk.f32.gmra.mrb[46].mxu1 %vm1474_vm14, %v7044_v31  ;;  %v1030_v5 = vld [vmem:[%s9501_s1 + $0x398] sm:$0xff] }
 0x1e1   :  { %v1192_v51 = vpop.permute.xlu1 %1191  ;;  %v1189_v14 = vpop.permute.xlu0 %1188 }
 0x1e2   :  { %vm1476_vm0 = vcmp.eq.s32.totalorder %v1192_v51, %v7311_v26  ;;  %vm1475_vm1 = vcmp.eq.s32.totalorder %v1189_v14, %v7311_v26  ;;  %1383 = vperm.xlu1 %6530, %v1028_v15   ;;  %v8385_v39 = vpop.f32.mrb[68].mxu0  ;;  %1380 = vperm.xlu0 %6529, %v1027_v23  }
 0x1e3   :  { %9521 = vst [vmem:[#allocation18_spill] sm:$0xff] %v8385_v39  ;;  %v8387_v42 = vpop.f32.mrb[69].mxu0  ;;  %6343 = vmatprep.mubr.msk.f32.mxu1 %vm1475_vm1, %v7044_v31  ;;  %v1031_v39 = vld [vmem:[%s9501_s1 + $0x3a0] sm:$0xff] }
 0x1e4   :  { %9522 = vst [vmem:[#allocation19_spill] sm:$0xff] %v8387_v42  ;;  %6344 = vmatmul.mubr.msk.f32.gmra.mrb[48].mxu1 %vm1476_vm0, %v7044_v31  ;;  %v1032_v42 = vld [vmem:[%s9501_s1 + $0x3a8] sm:$0xff] }
 0x1e5   :  { %v1198_v51 = vpop.permute.xlu1 %1197  ;;  %v1195_v14 = vpop.permute.xlu0 %1194 }
 0x1e6   :  { %vm1478_vm2 = vcmp.eq.s32.totalorder %v1198_v51, %v7311_v26  ;;  %vm1477_vm3 = vcmp.eq.s32.totalorder %v1195_v14, %v7311_v26  ;;  %1389 = vperm.xlu1 %6530, %v1030_v5   ;;  %v8399_v23 = vpop.f32.mrb[70].mxu0  ;;  %1386 = vperm.xlu0 %6529, %v1029_v62  }
 0x1e7   :  { %9523 = vst [vmem:[#allocation20_spill] sm:$0xff] %v8399_v23  ;;  %v8401_v15 = vpop.f32.mrb[71].mxu0  ;;  %6346 = vmatprep.mubr.msk.f32.mxu1 %vm1477_vm3, %v7044_v31  ;;  %v1033_v23 = vld [vmem:[%s9501_s1 + $0x3b0] sm:$0xff] }
 0x1e8   :  { %9524 = vst [vmem:[#allocation21_spill] sm:$0xff] %v8401_v15  ;;  %6347 = vmatmul.mubr.msk.f32.gmra.mrb[50].mxu1 %vm1478_vm2, %v7044_v31  ;;  %v1034_v15 = vld [vmem:[%s9501_s1 + $0x3b8] sm:$0xff] }
 0x1e9   :  { %v1204_v51 = vpop.permute.xlu1 %1203  ;;  %v1201_v14 = vpop.permute.xlu0 %1200 }
 0x1ea   :  { %vm1480_vm4 = vcmp.eq.s32.totalorder %v1204_v51, %v7311_v26  ;;  %vm1479_vm5 = vcmp.eq.s32.totalorder %v1201_v14, %v7311_v26  ;;  %1395 = vperm.xlu1 %6530, %v1032_v42   ;;  %v8413_v62 = vpop.f32.mrb[72].mxu0  ;;  %1392 = vperm.xlu0 %6529, %v1031_v39  }
 0x1eb   :  { %9525 = vst [vmem:[#allocation22_spill] sm:$0xff] %v8413_v62  ;;  %v8415_v5 = vpop.f32.mrb[73].mxu0  ;;  %6349 = vmatprep.mubr.msk.f32.mxu1 %vm1479_vm5, %v7044_v31  ;;  %v1035_v62 = vld [vmem:[%s9501_s1 + $0x3c0] sm:$0xff] }
 0x1ec   :  { %9526 = vst [vmem:[#allocation23_spill] sm:$0xff] %v8415_v5  ;;  %6350 = vmatmul.mubr.msk.f32.gmra.mrb[52].mxu1 %vm1480_vm4, %v7044_v31  ;;  %v1036_v5 = vld [vmem:[%s9501_s1 + $0x3c8] sm:$0xff] }
 0x1ed   :  { %v1210_v51 = vpop.permute.xlu1 %1209  ;;  %v1207_v14 = vpop.permute.xlu0 %1206 }
 0x1ee   :  { %vm1482_vm6 = vcmp.eq.s32.totalorder %v1210_v51, %v7311_v26  ;;  %vm1481_vm7 = vcmp.eq.s32.totalorder %v1207_v14, %v7311_v26  ;;  %1401 = vperm.xlu1 %6530, %v1034_v15   ;;  %v8427_v39 = vpop.f32.mrb[74].mxu0  ;;  %1398 = vperm.xlu0 %6529, %v1033_v23  }
 0x1ef   :  { %9527 = vst [vmem:[#allocation24_spill] sm:$0xff] %v8427_v39  ;;  %v8429_v42 = vpop.f32.mrb[75].mxu0  ;;  %6352 = vmatprep.mubr.msk.f32.mxu1 %vm1481_vm7, %v7044_v31  ;;  %v1037_v39 = vld [vmem:[%s9501_s1 + $0x3d0] sm:$0xff] }
 0x1f0   :  { %9528 = vst [vmem:[#allocation25_spill] sm:$0xff] %v8429_v42  ;;  %6353 = vmatmul.mubr.msk.f32.gmra.mrb[54].mxu1 %vm1482_vm6, %v7044_v31  ;;  %v1038_v42 = vld [vmem:[%s9501_s1 + $0x3d8] sm:$0xff] }
 0x1f1   :  { %v1216_v51 = vpop.permute.xlu1 %1215  ;;  %v1213_v14 = vpop.permute.xlu0 %1212 }
 0x1f2   :  { %vm1484_vm8 = vcmp.eq.s32.totalorder %v1216_v51, %v7311_v26  ;;  %vm1483_vm9 = vcmp.eq.s32.totalorder %v1213_v14, %v7311_v26  ;;  %1407 = vperm.xlu1 %6530, %v1036_v5   ;;  %v8441_v23 = vpop.f32.mrb[76].mxu0  ;;  %1404 = vperm.xlu0 %6529, %v1035_v62  }
 0x1f3   :  { %9529 = vst [vmem:[#allocation26_spill] sm:$0xff] %v8441_v23  ;;  %v8443_v15 = vpop.f32.mrb[77].mxu0  ;;  %6355 = vmatprep.mubr.msk.f32.mxu1 %vm1483_vm9, %v7044_v31  ;;  %v1039_v23 = vld [vmem:[%s9501_s1 + $0x3e0] sm:$0xff] }
 0x1f4   :  { %9530 = vst [vmem:[#allocation27_spill] sm:$0xff] %v8443_v15  ;;  %6356 = vmatmul.mubr.msk.f32.gmra.mrb[56].mxu1 %vm1484_vm8, %v7044_v31  ;;  %v1040_v15 = vld [vmem:[%s9501_s1 + $0x3e8] sm:$0xff] }
 0x1f5   :  { %v1222_v51 = vpop.permute.xlu1 %1221  ;;  %v1219_v14 = vpop.permute.xlu0 %1218 }
 0x1f6   :  { %vm1486_vm10 = vcmp.eq.s32.totalorder %v1222_v51, %v7311_v26  ;;  %vm1485_vm11 = vcmp.eq.s32.totalorder %v1219_v14, %v7311_v26  ;;  %1413 = vperm.xlu1 %6530, %v1038_v42   ;;  %v8455_v62 = vpop.f32.mrb[78].mxu0  ;;  %1410 = vperm.xlu0 %6529, %v1037_v39  }
 0x1f7   :  { %9531 = vst [vmem:[#allocation28_spill] sm:$0xff] %v8455_v62  ;;  %v8457_v5 = vpop.f32.mrb[79].mxu0  ;;  %6358 = vmatprep.mubr.msk.f32.mxu1 %vm1485_vm11, %v7044_v31  ;;  %v1041_v62 = vld [vmem:[%s9501_s1 + $0x3f0] sm:$0xff] }
 0x1f8   :  { %9532 = vst [vmem:[#allocation29_spill] sm:$0xff] %v8457_v5  ;;  %6359 = vmatmul.mubr.msk.f32.gmra.mrb[58].mxu1 %vm1486_vm10, %v7044_v31  ;;  %v1042_v5 = vld [vmem:[%s9501_s1 + $0x3f8] sm:$0xff] }
 0x1f9   :  { %v1228_v51 = vpop.permute.xlu1 %1227  ;;  %v1225_v14 = vpop.permute.xlu0 %1224 }
 0x1fa   :  { %vm1488_vm12 = vcmp.eq.s32.totalorder %v1228_v51, %v7311_v26  ;;  %vm1487_vm13 = vcmp.eq.s32.totalorder %v1225_v14, %v7311_v26  ;;  %1419 = vperm.xlu1 %6530, %v1040_v15   ;;  %v8469_v39 = vpop.f32.mrb[80].mxu0  ;;  %1416 = vperm.xlu0 %6529, %v1039_v23  }
 0x1fb   :  { %9533 = vst [vmem:[#allocation30_spill] sm:$0xff] %v8469_v39  ;;  %v8471_v42 = vpop.f32.mrb[81].mxu0  ;;  %6361 = vmatprep.mubr.msk.f32.mxu1 %vm1487_vm13, %v7044_v31 }
 0x1fc   :  { %9534 = vst [vmem:[#allocation31_spill] sm:$0xff] %v8471_v42  ;;  %6362 = vmatmul.mubr.msk.f32.gmra.mrb[60].mxu1 %vm1488_vm12, %v7044_v31 }
 0x1fd   :  { %v1234_v51 = vpop.permute.xlu1 %1233  ;;  %v1231_v14 = vpop.permute.xlu0 %1230 }
 0x1fe   :  { %vm1490_vm14 = vcmp.eq.s32.totalorder %v1234_v51, %v7311_v26  ;;  %vm1489_vm15 = vcmp.eq.s32.totalorder %v1231_v14, %v7311_v26  ;;  %1425 = vperm.xlu1 %6530, %v1042_v5   ;;  %v8483_v23 = vpop.f32.mrb[82].mxu0  ;;  %1422 = vperm.xlu0 %6529, %v1041_v62  }
 0x1ff   :  { %9535 = vst [vmem:[#allocation32_spill] sm:$0xff] %v8483_v23  ;;  %v8485_v15 = vpop.f32.mrb[83].mxu0  ;;  %6364 = vmatprep.mubr.msk.f32.mxu1 %vm1489_vm15, %v7044_v31 }
 0x200   :  { %9536 = vst [vmem:[#allocation33_spill] sm:$0xff] %v8485_v15  ;;  %6365 = vmatmul.mubr.msk.f32.gmra.mrb[62].mxu1 %vm1490_vm14, %v7044_v31 }
 0x201   :  { %v1240_v42 = vpop.permute.xlu1 %1239  ;;  %v1237_v39 = vpop.permute.xlu0 %1236 }
 0x202   :  { %vm1492_vm0 = vcmp.eq.s32.totalorder %v1240_v42, %v7311_v26  ;;  %vm1491_vm1 = vcmp.eq.s32.totalorder %v1237_v39, %v7311_v26  ;;  %v8491_v36 = vpop.f32.mrb[84].mxu0 }
 0x203   :  { %9537 = vst [vmem:[#allocation34_spill] sm:$0xff] %v8491_v36  ;;  %v8493_v51 = vpop.f32.mrb[85].mxu0  ;;  %6367 = vmatprep.mubr.msk.f32.mxu1 %vm1491_vm1, %v7044_v31 }
 0x204   :  { %9538 = vst [vmem:[#allocation35_spill] sm:$0xff] %v8493_v51  ;;  %6368 = vmatmul.mubr.msk.f32.gmra.mrb[64].mxu1 %vm1492_vm0, %v7044_v31 }
 0x205   :  { %v1246_v62 = vpop.permute.xlu1 %1245  ;;  %v1243_v5 = vpop.permute.xlu0 %1242 }
 0x206   :  { %vm1494_vm2 = vcmp.eq.s32.totalorder %v1246_v62, %v7311_v26  ;;  %vm1493_vm3 = vcmp.eq.s32.totalorder %v1243_v5, %v7311_v26  ;;  %v8499_v14 = vpop.f32.mrb[86].mxu0 }
 0x207   :  { %9539 = vst [vmem:[#allocation36_spill] sm:$0xff] %v8499_v14  ;;  %v8501_v15 = vpop.f32.mrb[87].mxu0  ;;  %6370 = vmatprep.mubr.msk.f32.mxu1 %vm1493_vm3, %v7044_v31 }
 0x208   :  { %9540 = vst [vmem:[#allocation37_spill] sm:$0xff] %v8501_v15  ;;  %6371 = vmatmul.mubr.msk.f32.gmra.mrb[66].mxu1 %vm1494_vm2, %v7044_v31 }
 0x209   :  { %v1252_v39 = vpop.permute.xlu1 %1251  ;;  %v1249_v42 = vpop.permute.xlu0 %1248 }
 0x20a   :  { %vm1496_vm4 = vcmp.eq.s32.totalorder %v1252_v39, %v7311_v26  ;;  %vm1495_vm5 = vcmp.eq.s32.totalorder %v1249_v42, %v7311_v26  ;;  %v8507_v51 = vpop.f32.mrb[88].mxu0 }
 0x20b   :  { %9541 = vst [vmem:[#allocation38_spill] sm:$0xff] %v8507_v51  ;;  %v8509_v36 = vpop.f32.mrb[89].mxu0  ;;  %6373 = vmatprep.mubr.msk.f32.mxu1 %vm1495_vm5, %v7044_v31 }
 0x20c   :  { %9542 = vst [vmem:[#allocation39_spill] sm:$0xff] %v8509_v36  ;;  %6374 = vmatmul.mubr.msk.f32.gmra.mrb[68].mxu1 %vm1496_vm4, %v7044_v31 }
 0x20d   :  { %v1258_v62 = vpop.permute.xlu1 %1257  ;;  %v1255_v5 = vpop.permute.xlu0 %1254 }
 0x20e   :  { %vm1498_vm6 = vcmp.eq.s32.totalorder %v1258_v62, %v7311_v26  ;;  %vm1497_vm7 = vcmp.eq.s32.totalorder %v1255_v5, %v7311_v26  ;;  %v8515_v15 = vpop.f32.mrb[90].mxu0 }
 0x20f   :  { %9543 = vst [vmem:[#allocation40_spill] sm:$0xff] %v8515_v15  ;;  %v8517_v14 = vpop.f32.mrb[91].mxu0  ;;  %6376 = vmatprep.mubr.msk.f32.mxu1 %vm1497_vm7, %v7044_v31 }
 0x210   :  { %9544 = vst [vmem:[#allocation41_spill] sm:$0xff] %v8517_v14  ;;  %6377 = vmatmul.mubr.msk.f32.gmra.mrb[70].mxu1 %vm1498_vm6, %v7044_v31 }
 0x211   :  { %v1264_v39 = vpop.permute.xlu1 %1263  ;;  %v1261_v42 = vpop.permute.xlu0 %1260 }
 0x212   :  { %vm1500_vm8 = vcmp.eq.s32.totalorder %v1264_v39, %v7311_v26  ;;  %vm1499_vm9 = vcmp.eq.s32.totalorder %v1261_v42, %v7311_v26  ;;  %v8523_v36 = vpop.f32.mrb[92].mxu0 }
 0x213   :  { %9545 = vst [vmem:[#allocation42_spill] sm:$0xff] %v8523_v36  ;;  %v8525_v51 = vpop.f32.mrb[93].mxu0  ;;  %6379 = vmatprep.mubr.msk.f32.mxu1 %vm1499_vm9, %v7044_v31 }
 0x214   :  { %9546 = vst [vmem:[#allocation43_spill] sm:$0xff] %v8525_v51  ;;  %6380 = vmatmul.mubr.msk.f32.gmra.mrb[72].mxu1 %vm1500_vm8, %v7044_v31 }
 0x215   :  { %v1270_v62 = vpop.permute.xlu1 %1269  ;;  %v1267_v5 = vpop.permute.xlu0 %1266 }
 0x216   :  { %vm1502_vm10 = vcmp.eq.s32.totalorder %v1270_v62, %v7311_v26  ;;  %vm1501_vm11 = vcmp.eq.s32.totalorder %v1267_v5, %v7311_v26  ;;  %v8531_v14 = vpop.f32.mrb[94].mxu0 }
 0x217   :  { %9547 = vst [vmem:[#allocation44_spill] sm:$0xff] %v8531_v14  ;;  %v8533_v15 = vpop.f32.mrb[95].mxu0  ;;  %6382 = vmatprep.mubr.msk.f32.mxu1 %vm1501_vm11, %v7044_v31 }
 0x218   :  { %9548 = vst [vmem:[#allocation45_spill] sm:$0xff] %v8533_v15  ;;  %6383 = vmatmul.mubr.msk.f32.gmra.mrb[74].mxu1 %vm1502_vm10, %v7044_v31 }
 0x219   :  { %v1276_v39 = vpop.permute.xlu1 %1275  ;;  %v1273_v42 = vpop.permute.xlu0 %1272 }
 0x21a   :  { %vm1504_vm12 = vcmp.eq.s32.totalorder %v1276_v39, %v7311_v26  ;;  %vm1503_vm13 = vcmp.eq.s32.totalorder %v1273_v42, %v7311_v26  ;;  %v8539_v51 = vpop.f32.mrb[96].mxu0 }
 0x21b   :  { %9549 = vst [vmem:[#allocation46_spill] sm:$0xff] %v8539_v51  ;;  %v8541_v36 = vpop.f32.mrb[97].mxu0  ;;  %6385 = vmatprep.mubr.msk.f32.mxu1 %vm1503_vm13, %v7044_v31 }
 0x21c   :  { %9550 = vst [vmem:[#allocation47_spill] sm:$0xff] %v8541_v36  ;;  %6386 = vmatmul.mubr.msk.f32.gmra.mrb[76].mxu1 %vm1504_vm12, %v7044_v31 }
 0x21d   :  { %v1282_v62 = vpop.permute.xlu1 %1281  ;;  %v1279_v5 = vpop.permute.xlu0 %1278 }
 0x21e   :  { %vm1506_vm14 = vcmp.eq.s32.totalorder %v1282_v62, %v7311_v26  ;;  %vm1505_vm15 = vcmp.eq.s32.totalorder %v1279_v5, %v7311_v26  ;;  %v8547_v15 = vpop.f32.mrb[98].mxu0 }
 0x21f   :  { %9551 = vst [vmem:[#allocation48_spill] sm:$0xff] %v8547_v15  ;;  %v8549_v14 = vpop.f32.mrb[99].mxu0  ;;  %6388 = vmatprep.mubr.msk.f32.mxu1 %vm1505_vm15, %v7044_v31 }
 0x220   :  { %9552 = vst [vmem:[#allocation49_spill] sm:$0xff] %v8549_v14  ;;  %6389 = vmatmul.mubr.msk.f32.gmra.mrb[78].mxu1 %vm1506_vm14, %v7044_v31 }
 0x221   :  { %v1288_v39 = vpop.permute.xlu1 %1287  ;;  %v1285_v42 = vpop.permute.xlu0 %1284 }
 0x222   :  { %vm1508_vm0 = vcmp.eq.s32.totalorder %v1288_v39, %v7311_v26  ;;  %vm1507_vm1 = vcmp.eq.s32.totalorder %v1285_v42, %v7311_v26  ;;  %v8555_v36 = vpop.f32.mrb[100].mxu0 }
 0x223   :  { %9553 = vst [vmem:[#allocation50_spill] sm:$0xff] %v8555_v36  ;;  %v8557_v51 = vpop.f32.mrb[101].mxu0  ;;  %6391 = vmatprep.mubr.msk.f32.mxu1 %vm1507_vm1, %v7044_v31 }
 0x224   :  { %9554 = vst [vmem:[#allocation51_spill] sm:$0xff] %v8557_v51  ;;  %6392 = vmatmul.mubr.msk.f32.gmra.mrb[80].mxu1 %vm1508_vm0, %v7044_v31 }
 0x225   :  { %v1294_v62 = vpop.permute.xlu1 %1293  ;;  %v1291_v5 = vpop.permute.xlu0 %1290 }
 0x226   :  { %vm1510_vm2 = vcmp.eq.s32.totalorder %v1294_v62, %v7311_v26  ;;  %vm1509_vm3 = vcmp.eq.s32.totalorder %v1291_v5, %v7311_v26  ;;  %v8563_v14 = vpop.f32.mrb[102].mxu0 }
 0x227   :  { %9555 = vst [vmem:[#allocation52_spill] sm:$0xff] %v8563_v14  ;;  %v8565_v15 = vpop.f32.mrb[103].mxu0  ;;  %6394 = vmatprep.mubr.msk.f32.mxu1 %vm1509_vm3, %v7044_v31 }
 0x228   :  { %9556 = vst [vmem:[#allocation53_spill] sm:$0xff] %v8565_v15  ;;  %6395 = vmatmul.mubr.msk.f32.gmra.mrb[82].mxu1 %vm1510_vm2, %v7044_v31 }
 0x229   :  { %v1300_v39 = vpop.permute.xlu1 %1299  ;;  %v1297_v42 = vpop.permute.xlu0 %1296 }
 0x22a   :  { %vm1512_vm4 = vcmp.eq.s32.totalorder %v1300_v39, %v7311_v26  ;;  %vm1511_vm5 = vcmp.eq.s32.totalorder %v1297_v42, %v7311_v26  ;;  %v8571_v51 = vpop.f32.mrb[104].mxu0 }
 0x22b   :  { %9557 = vst [vmem:[#allocation54_spill] sm:$0xff] %v8571_v51  ;;  %v8573_v36 = vpop.f32.mrb[105].mxu0  ;;  %6397 = vmatprep.mubr.msk.f32.mxu1 %vm1511_vm5, %v7044_v31 }
 0x22c   :  { %9558 = vst [vmem:[#allocation55_spill] sm:$0xff] %v8573_v36  ;;  %6398 = vmatmul.mubr.msk.f32.gmra.mrb[84].mxu1 %vm1512_vm4, %v7044_v31 }
 0x22d   :  { %v1306_v62 = vpop.permute.xlu1 %1305  ;;  %v1303_v5 = vpop.permute.xlu0 %1302 }
 0x22e   :  { %vm1514_vm6 = vcmp.eq.s32.totalorder %v1306_v62, %v7311_v26  ;;  %vm1513_vm7 = vcmp.eq.s32.totalorder %v1303_v5, %v7311_v26  ;;  %v8579_v15 = vpop.f32.mrb[106].mxu0 }
 0x22f   :  { %9559 = vst [vmem:[#allocation56_spill] sm:$0xff] %v8579_v15  ;;  %v8581_v14 = vpop.f32.mrb[107].mxu0  ;;  %6400 = vmatprep.mubr.msk.f32.mxu1 %vm1513_vm7, %v7044_v31 }
 0x230   :  { %9560 = vst [vmem:[#allocation57_spill] sm:$0xff] %v8581_v14  ;;  %6401 = vmatmul.mubr.msk.f32.gmra.mrb[86].mxu1 %vm1514_vm6, %v7044_v31 }
 0x231   :  { %v1312_v39 = vpop.permute.xlu1 %1311  ;;  %v1309_v42 = vpop.permute.xlu0 %1308 }
 0x232   :  { %vm1516_vm8 = vcmp.eq.s32.totalorder %v1312_v39, %v7311_v26  ;;  %vm1515_vm9 = vcmp.eq.s32.totalorder %v1309_v42, %v7311_v26  ;;  %v8587_v36 = vpop.f32.mrb[108].mxu0 }
 0x233   :  { %9561 = vst [vmem:[#allocation58_spill] sm:$0xff] %v8587_v36  ;;  %v8589_v51 = vpop.f32.mrb[109].mxu0  ;;  %6403 = vmatprep.mubr.msk.f32.mxu1 %vm1515_vm9, %v7044_v31 }
 0x234   :  { %9562 = vst [vmem:[#allocation59_spill] sm:$0xff] %v8589_v51  ;;  %6404 = vmatmul.mubr.msk.f32.gmra.mrb[88].mxu1 %vm1516_vm8, %v7044_v31 }
 0x235   :  { %v1318_v62 = vpop.permute.xlu1 %1317  ;;  %v1315_v5 = vpop.permute.xlu0 %1314 }
 0x236   :  { %vm1518_vm10 = vcmp.eq.s32.totalorder %v1318_v62, %v7311_v26  ;;  %vm1517_vm11 = vcmp.eq.s32.totalorder %v1315_v5, %v7311_v26  ;;  %v8595_v14 = vpop.f32.mrb[110].mxu0 }
 0x237   :  { %9563 = vst [vmem:[#allocation60_spill] sm:$0xff] %v8595_v14  ;;  %v8597_v15 = vpop.f32.mrb[111].mxu0  ;;  %6406 = vmatprep.mubr.msk.f32.mxu1 %vm1517_vm11, %v7044_v31 }
 0x238   :  { %9564 = vst [vmem:[#allocation61_spill] sm:$0xff] %v8597_v15  ;;  %6407 = vmatmul.mubr.msk.f32.gmra.mrb[90].mxu1 %vm1518_vm10, %v7044_v31 }
 0x239   :  { %v1324_v39 = vpop.permute.xlu1 %1323  ;;  %v1321_v42 = vpop.permute.xlu0 %1320 }
 0x23a   :  { %vm1520_vm12 = vcmp.eq.s32.totalorder %v1324_v39, %v7311_v26  ;;  %vm1519_vm13 = vcmp.eq.s32.totalorder %v1321_v42, %v7311_v26  ;;  %v8603_v51 = vpop.f32.mrb[112].mxu0 }
 0x23b   :  { %9565 = vst [vmem:[#allocation62_spill] sm:$0xff] %v8603_v51  ;;  %v8605_v36 = vpop.f32.mrb[113].mxu0  ;;  %6409 = vmatprep.mubr.msk.f32.mxu1 %vm1519_vm13, %v7044_v31 }
 0x23c   :  { %9566 = vst [vmem:[#allocation63_spill] sm:$0xff] %v8605_v36  ;;  %6410 = vmatmul.mubr.msk.f32.gmra.mrb[92].mxu1 %vm1520_vm12, %v7044_v31 }
 0x23d   :  { %v1330_v62 = vpop.permute.xlu1 %1329  ;;  %v1327_v5 = vpop.permute.xlu0 %1326 }
 0x23e   :  { %vm1522_vm14 = vcmp.eq.s32.totalorder %v1330_v62, %v7311_v26  ;;  %vm1521_vm15 = vcmp.eq.s32.totalorder %v1327_v5, %v7311_v26  ;;  %v8611_v15 = vpop.f32.mrb[114].mxu0 }
 0x23f   :  { %9567 = vst [vmem:[#allocation64_spill] sm:$0xff] %v8611_v15  ;;  %v8613_v14 = vpop.f32.mrb[115].mxu0  ;;  %6412 = vmatprep.mubr.msk.f32.mxu1 %vm1521_vm15, %v7044_v31 }
 0x240   :  { %9568 = vst [vmem:[#allocation65_spill] sm:$0xff] %v8613_v14  ;;  %6413 = vmatmul.mubr.msk.f32.gmra.mrb[94].mxu1 %vm1522_vm14, %v7044_v31 }
 0x241   :  { %v1336_v39 = vpop.permute.xlu1 %1335  ;;  %v1333_v42 = vpop.permute.xlu0 %1332 }
 0x242   :  { %vm1524_vm0 = vcmp.eq.s32.totalorder %v1336_v39, %v7311_v26  ;;  %vm1523_vm1 = vcmp.eq.s32.totalorder %v1333_v42, %v7311_v26  ;;  %v8619_v36 = vpop.f32.mrb[116].mxu0 }
 0x243   :  { %9569 = vst [vmem:[#allocation66_spill] sm:$0xff] %v8619_v36  ;;  %v8621_v51 = vpop.f32.mrb[117].mxu0  ;;  %6415 = vmatprep.mubr.msk.f32.mxu1 %vm1523_vm1, %v7044_v31 }
 0x244   :  { %9570 = vst [vmem:[#allocation67_spill] sm:$0xff] %v8621_v51  ;;  %6416 = vmatmul.mubr.msk.f32.gmra.mrb[96].mxu1 %vm1524_vm0, %v7044_v31 }
 0x245   :  { %v1342_v62 = vpop.permute.xlu1 %1341  ;;  %v1339_v5 = vpop.permute.xlu0 %1338 }
 0x246   :  { %vm1526_vm2 = vcmp.eq.s32.totalorder %v1342_v62, %v7311_v26  ;;  %vm1525_vm3 = vcmp.eq.s32.totalorder %v1339_v5, %v7311_v26  ;;  %v8627_v14 = vpop.f32.mrb[118].mxu0 }
 0x247   :  { %9571 = vst [vmem:[#allocation68_spill] sm:$0xff] %v8627_v14  ;;  %v8629_v15 = vpop.f32.mrb[119].mxu0  ;;  %6418 = vmatprep.mubr.msk.f32.mxu1 %vm1525_vm3, %v7044_v31 }
 0x248   :  { %9572 = vst [vmem:[#allocation69_spill] sm:$0xff] %v8629_v15  ;;  %6419 = vmatmul.mubr.msk.f32.gmra.mrb[98].mxu1 %vm1526_vm2, %v7044_v31 }
 0x249   :  { %v1348_v39 = vpop.permute.xlu1 %1347  ;;  %v1345_v42 = vpop.permute.xlu0 %1344 }
 0x24a   :  { %vm1528_vm4 = vcmp.eq.s32.totalorder %v1348_v39, %v7311_v26  ;;  %vm1527_vm5 = vcmp.eq.s32.totalorder %v1345_v42, %v7311_v26  ;;  %v8635_v51 = vpop.f32.mrb[120].mxu0 }
 0x24b   :  { %9573 = vst [vmem:[#allocation70_spill] sm:$0xff] %v8635_v51  ;;  %v8637_v36 = vpop.f32.mrb[121].mxu0  ;;  %6421 = vmatprep.mubr.msk.f32.mxu1 %vm1527_vm5, %v7044_v31 }
 0x24c   :  { %9574 = vst [vmem:[#allocation71_spill] sm:$0xff] %v8637_v36  ;;  %6422 = vmatmul.mubr.msk.f32.gmra.mrb[100].mxu1 %vm1528_vm4, %v7044_v31 }
 0x24d   :  { %v1354_v62 = vpop.permute.xlu1 %1353  ;;  %v1351_v5 = vpop.permute.xlu0 %1350 }
 0x24e   :  { %vm1530_vm6 = vcmp.eq.s32.totalorder %v1354_v62, %v7311_v26  ;;  %vm1529_vm7 = vcmp.eq.s32.totalorder %v1351_v5, %v7311_v26  ;;  %v8643_v15 = vpop.f32.mrb[122].mxu0 }
 0x24f   :  { %9575 = vst [vmem:[#allocation72_spill] sm:$0xff] %v8643_v15  ;;  %v8645_v14 = vpop.f32.mrb[123].mxu0  ;;  %6424 = vmatprep.mubr.msk.f32.mxu1 %vm1529_vm7, %v7044_v31 }
 0x250   :  { %9576 = vst [vmem:[#allocation73_spill] sm:$0xff] %v8645_v14  ;;  %6425 = vmatmul.mubr.msk.f32.gmra.mrb[102].mxu1 %vm1530_vm6, %v7044_v31 }
 0x251   :  { %v1360_v39 = vpop.permute.xlu1 %1359  ;;  %v1357_v42 = vpop.permute.xlu0 %1356 }
 0x252   :  { %vm1532_vm8 = vcmp.eq.s32.totalorder %v1360_v39, %v7311_v26  ;;  %vm1531_vm9 = vcmp.eq.s32.totalorder %v1357_v42, %v7311_v26  ;;  %v8651_v36 = vpop.f32.mrb[124].mxu0 }
 0x253   :  { %9577 = vst [vmem:[#allocation74_spill] sm:$0xff] %v8651_v36  ;;  %v8653_v51 = vpop.f32.mrb[125].mxu0  ;;  %6427 = vmatprep.mubr.msk.f32.mxu1 %vm1531_vm9, %v7044_v31 }
 0x254   :  { %9578 = vst [vmem:[#allocation75_spill] sm:$0xff] %v8653_v51  ;;  %6428 = vmatmul.mubr.msk.f32.gmra.mrb[104].mxu1 %vm1532_vm8, %v7044_v31 }
 0x255   :  { %v1366_v62 = vpop.permute.xlu1 %1365  ;;  %v1363_v5 = vpop.permute.xlu0 %1362 }
 0x256   :  { %vm1534_vm10 = vcmp.eq.s32.totalorder %v1366_v62, %v7311_v26  ;;  %vm1533_vm11 = vcmp.eq.s32.totalorder %v1363_v5, %v7311_v26  ;;  %v8659_v14 = vpop.f32.mrb[126].mxu0 }
 0x257   :  { %v8661_v15 = vpop.f32.mrb[127].mxu0  ;;  %v6273_v39 = vpop.f32.mrb[0].mxu1  ;;  %6430 = vmatprep.mubr.msk.f32.mxu1 %vm1533_vm11, %v7044_v31 }
 0x258   :  { %9579 = vst [vmem:[#allocation76_spill] sm:$0xff] %v8661_v15  ;;  %v3254_v42 = vmul.f32 %v6273_v39, %v7907_v27  ;;  %v2614_v51 = vpop.f32.mrb[1].mxu1  ;;  %6431 = vmatmul.mubr.msk.f32.gmra.mrb[106].mxu1 %vm1534_vm10, %v7044_v31 }
 0x259   :  { %v3253_v36 = vmul.f32 %v2614_v51, %v7909_v28  ;;  %v1372_v23 = vpop.permute.xlu1 %1371  ;;  %v1369_v16 = vpop.permute.xlu0 %1368 }
 0x25a   :  { %vm1536_vm12 = vcmp.eq.s32.totalorder %v1372_v23, %v7311_v26  ;;  %vm1535_vm13 = vcmp.eq.s32.totalorder %v1369_v16, %v7311_v26  ;;  %3383 = vadd.xlane.f32.xlu1 %v3254_v42 }
 0x25b   :  { %v6276_v62 = vpop.f32.mrb[2].mxu1  ;;  %3381 = vadd.xlane.f32.xlu0 %v3253_v36  ;;  %6433 = vmatprep.mubr.msk.f32.mxu1 %vm1535_vm13, %v7044_v31 }
 0x25c   :  { %v3256_v5 = vmul.f32 %v6276_v62, %v7921_v34  ;;  %v2624_v15 = vpop.f32.mrb[3].mxu1  ;;  %6434 = vmatmul.mubr.msk.f32.gmra.mrb[108].mxu1 %vm1536_vm12, %v7044_v31 }
 0x25d   :  { %v3255_v27 = vmul.f32 %v2624_v15, %v7923_v35  ;;  %v1378_v39 = vpop.permute.xlu1 %1377  ;;  %v1375_v28 = vpop.permute.xlu0 %1374 }
 0x25e   :  { %vm1538_vm14 = vcmp.eq.s32.totalorder %v1378_v39, %v7311_v26  ;;  %vm1537_vm15 = vcmp.eq.s32.totalorder %v1375_v28, %v7311_v26 }
 0x25f   :  { %v6279_v23 = vpop.f32.mrb[4].mxu1  ;;  %3385 = vadd.xlane.f32.xlu0 %v3255_v27  ;;  %6436 = vmatprep.mubr.msk.f32.mxu1 %vm1537_vm15, %v7044_v31 }
 0x260   :  { %v3258_v16 = vmul.f32 %v6279_v23, %v7935_v40  ;;  %v2634_v36 = vpop.f32.mrb[5].mxu1  ;;  %6437 = vmatmul.mubr.msk.f32.gmra.mrb[110].mxu1 %vm1538_vm14, %v7044_v31 }
 0x261   :  { %v3257_v34 = vmul.f32 %v2634_v36, %v7937_v41  ;;  %v1384_v51 = vpop.permute.xlu1 %1383  ;;  %v1381_v42 = vpop.permute.xlu0 %1380 }
 0x262   :  { %vm1540_vm0 = vcmp.eq.s32.totalorder %v1384_v51, %v7311_v26  ;;  %vm1539_vm1 = vcmp.eq.s32.totalorder %v1381_v42, %v7311_v26 }
 0x263   :  { %3389 = vadd.xlane.f32.xlu1 %v3257_v34  ;;  %v6282_v35 = vpop.f32.mrb[6].mxu1  ;;  %3387 = vadd.xlane.f32.xlu0 %v3256_v5 }
 0x264   :  { %v3260_v15 = vmul.f32 %v6282_v35, %v7949_v46  ;;  %6439 = vmatprep.mubr.msk.f32.mxu1 %vm1539_vm1, %v7044_v31  ;;  %v2644_v62 = vpop.f32.mrb[7].mxu1  ;;  %vm4549_vm1 = vcmask 195712  }
 0x265   :  { %v3259_v40 = vmul.f32 %v2644_v62, %v7951_v47  ;;  %6440 = vmatmul.mubr.msk.f32.gmra.mrb[112].mxu1 %vm1540_vm0, %v7044_v31  ;;  %v1390_v27 = vpop.permute.xlu1 %1389  ;;  %v1387_v41 = vpop.permute.xlu0 %1386  ;;  %vm4542_vm0 = vcmask 130112  }
 0x266   :  { %vm1542_vm2 = vcmp.eq.s32.totalorder %v1390_v27, %v7311_v26  ;;  %vm1541_vm3 = vcmp.eq.s32.totalorder %v1387_v41, %v7311_v26 }
 0x267   :  { %3393 = vadd.xlane.f32.xlu1 %v3259_v40  ;;  %v6285_v39 = vpop.f32.mrb[8].mxu1  ;;  %3391 = vadd.xlane.f32.xlu0 %v3258_v16 }
 0x268   :  { %v3262_v5 = vmul.f32 %v6285_v39, %v7963_v52  ;;  %6442 = vmatprep.mubr.msk.f32.mxu1 %vm1541_vm3, %v7044_v31  ;;  %v2654_v46 = vpop.f32.mrb[9].mxu1  ;;  %vm4563_vm3 = vcmask 326912  }
 0x269   :  { %v3261_v28 = vmul.f32 %v2654_v46, %v7965_v53  ;;  %6443 = vmatmul.mubr.msk.f32.gmra.mrb[114].mxu1 %vm1542_vm2, %v7044_v31  ;;  %v1396_v47 = vpop.permute.xlu1 %1395  ;;  %v1393_v23 = vpop.permute.xlu0 %1392  ;;  %vm4556_vm2 = vcmask 261312  }
 0x26a   :  { %vm1544_vm4 = vcmp.eq.s32.totalorder %v1396_v47, %v7311_v26  ;;  %vm1543_vm5 = vcmp.eq.s32.totalorder %v1393_v23, %v7311_v26 }
 0x26b   :  { %3397 = vadd.xlane.f32.xlu1 %v3261_v28  ;;  %v6288_v36 = vpop.f32.mrb[10].mxu1  ;;  %3395 = vadd.xlane.f32.xlu0 %v3260_v15 }
 0x26c   :  { %v3264_v16 = vmul.f32 %v6288_v36, %v7977_v58  ;;  %6445 = vmatprep.mubr.msk.f32.mxu1 %vm1543_vm5, %v7044_v31  ;;  %v2664_v52 = vpop.f32.mrb[11].mxu1  ;;  %vm4577_vm5 = vcmask 458112  }
 0x26d   :  { %v3263_v34 = vmul.f32 %v2664_v52, %v7979_v59  ;;  %6446 = vmatmul.mubr.msk.f32.gmra.mrb[116].mxu1 %vm1544_vm4, %v7044_v31  ;;  %v1402_v53 = vpop.permute.xlu1 %1401  ;;  %v1399_v51 = vpop.permute.xlu0 %1398  ;;  %vm4570_vm4 = vcmask 392512  }
 0x26e   :  { %vm1546_vm6 = vcmp.eq.s32.totalorder %v1402_v53, %v7311_v26  ;;  %vm1545_vm7 = vcmp.eq.s32.totalorder %v1399_v51, %v7311_v26 }
 0x26f   :  { %3401 = vadd.xlane.f32.xlu1 %v3263_v34  ;;  %v6291_v42 = vpop.f32.mrb[12].mxu1  ;;  %3399 = vadd.xlane.f32.xlu0 %v3262_v5 }
 0x270   :  { %v3266_v35 = vmul.f32 %v6291_v42, %v7991_v0  ;;  %6448 = vmatprep.mubr.msk.f32.mxu1 %vm1545_vm7, %v7044_v31  ;;  %v2674_v58 = vpop.f32.mrb[13].mxu1  ;;  %vm4591_vm7 = vcmask 589312  }
 0x271   :  { %v3265_v15 = vmul.f32 %v2674_v58, %v7993_v1  ;;  %6449 = vmatmul.mubr.msk.f32.gmra.mrb[118].mxu1 %vm1546_vm6, %v7044_v31  ;;  %v1408_v59 = vpop.permute.xlu1 %1407  ;;  %v1405_v62 = vpop.permute.xlu0 %1404  ;;  %vm4584_vm6 = vcmask 523712  }
 0x272   :  { %vm1548_vm8 = vcmp.eq.s32.totalorder %v1408_v59, %v7311_v26  ;;  %vm1547_vm9 = vcmp.eq.s32.totalorder %v1405_v62, %v7311_v26 }
 0x273   :  { %3405 = vadd.xlane.f32.xlu1 %v3265_v15  ;;  %v6294_v40 = vpop.f32.mrb[14].mxu1  ;;  %3403 = vadd.xlane.f32.xlu0 %v3264_v16 }
 0x274   :  { %v3268_v27 = vmul.f32 %v6294_v40, %v8005_v6  ;;  %6451 = vmatprep.mubr.msk.f32.mxu1 %vm1547_vm9, %v7044_v31  ;;  %v2684_v0 = vpop.f32.mrb[15].mxu1  ;;  %vm4605_vm9 = vcmask 720512  }
 0x275   :  { %v3267_v41 = vmul.f32 %v2684_v0, %v8007_v7  ;;  %6452 = vmatmul.mubr.msk.f32.gmra.mrb[120].mxu1 %vm1548_vm8, %v7044_v31  ;;  %v1414_v1 = vpop.permute.xlu1 %1413  ;;  %v1411_v39 = vpop.permute.xlu0 %1410  ;;  %vm4598_vm8 = vcmask 654912  }
 0x276   :  { %vm1550_vm10 = vcmp.eq.s32.totalorder %v1414_v1, %v7311_v26  ;;  %vm1549_vm11 = vcmp.eq.s32.totalorder %v1411_v39, %v7311_v26 }
 0x277   :  { %3409 = vadd.xlane.f32.xlu1 %v3267_v41  ;;  %v6297_v5 = vpop.f32.mrb[16].mxu1  ;;  %3407 = vadd.xlane.f32.xlu0 %v3266_v35 }
 0x278   :  { %v3270_v46 = vmul.f32 %v6297_v5, %v8019_v12  ;;  %6454 = vmatprep.mubr.msk.f32.mxu1 %vm1549_vm11, %v7044_v31  ;;  %v2694_v6 = vpop.f32.mrb[17].mxu1  ;;  %vm4619_vm11 = vcmask 851712  }
 0x279   :  { %v3269_v28 = vmul.f32 %v2694_v6, %v8021_v13  ;;  %6455 = vmatmul.mubr.msk.f32.gmra.mrb[122].mxu1 %vm1550_vm10, %v7044_v31  ;;  %v1420_v7 = vpop.permute.xlu1 %1419  ;;  %v1417_v47 = vpop.permute.xlu0 %1416  ;;  %vm4612_vm10 = vcmask 786112  }
 0x27a   :  { %vm1552_vm12 = vcmp.eq.s32.totalorder %v1420_v7, %v7311_v26  ;;  %vm1551_vm13 = vcmp.eq.s32.totalorder %v1417_v47, %v7311_v26 }
 0x27b   :  { %3413 = vadd.xlane.f32.xlu1 %v3269_v28  ;;  %v6300_v23 = vpop.f32.mrb[18].mxu1  ;;  %3411 = vadd.xlane.f32.xlu0 %v3268_v27 }
 0x27c   :  { %v3272_v36 = vmul.f32 %v6300_v23, %v8033_v18  ;;  %6457 = vmatprep.mubr.msk.f32.mxu1 %vm1551_vm13, %v7044_v31  ;;  %v2704_v12 = vpop.f32.mrb[19].mxu1  ;;  %vm4633_vm13 = vcmask 982912  }
 0x27d   :  { %v3271_v16 = vmul.f32 %v2704_v12, %v8035_v19  ;;  %6458 = vmatmul.mubr.msk.f32.gmra.mrb[124].mxu1 %vm1552_vm12, %v7044_v31  ;;  %v1426_v13 = vpop.permute.xlu1 %1425  ;;  %v1423_v52 = vpop.permute.xlu0 %1422  ;;  %vm9504_vm12 = vcmask 917312  }
 0x27e   :  { %vm1554_vm14 = vcmp.eq.s32.totalorder %v1426_v13, %v7311_v26  ;;  %vm1553_vm15 = vcmp.eq.s32.totalorder %v1423_v52, %v7311_v26 }
 0x27f   :  { %3417 = vadd.xlane.f32.xlu1 %v3271_v16  ;;  %v6303_v34 = vpop.f32.mrb[20].mxu1  ;;  %3415 = vadd.xlane.f32.xlu0 %v3270_v46 }
 0x280   :  { %v3274_v53 = vmul.f32 %v6303_v34, %v8047_v25  ;;  %6460 = vmatprep.mubr.msk.f32.mxu1 %vm1553_vm15, %v7044_v31  ;;  %v2714_v18 = vpop.f32.mrb[21].mxu1  ;;  %vm5195_vm15 = vcmask 1041409  }
 0x281   :  { %v3273_v51 = vmul.f32 %v2714_v18, %v8050_v29  ;;  %6461 = vmatmul.mubr.msk.f32.gmra.mrb[126].mxu1 %vm1554_vm14, %v7044_v31  ;;  %vm4640_vm14 = vcmask 1048512  }
 0x283   :  { %3421 = vadd.xlane.f32.xlu1 %v3273_v51  ;;  %v6306_v19 = vpop.f32.mrb[22].mxu1  ;;  %3419 = vadd.xlane.f32.xlu0 %v3272_v36 }
 0x284   :  { %v3276_v42 = vmul.f32 %v6306_v19, %v8063_v37  ;;  %v2724_v35 = vpop.f32.mrb[23].mxu1 }
 0x285   :  { %v3275_v58 = vmul.f32 %v2724_v35, %v8065_v38 }
 0x287   :  { %3425 = vadd.xlane.f32.xlu1 %v3275_v58  ;;  %v6309_v15 = vpop.f32.mrb[24].mxu1  ;;  %3423 = vadd.xlane.f32.xlu0 %v3274_v53 }
 0x288   :  { %v3278_v25 = vmul.f32 %v6309_v15, %v8077_v45  ;;  %v2734_v59 = vpop.f32.mrb[25].mxu1 }
 0x289   :  { %v3277_v62 = vmul.f32 %v2734_v59, %v8079_v48  ;;  %v9581_v59 = vld [vmem:[#allocation3_spill] sm:$0xff] }
 0x28b   :  { %3429 = vadd.xlane.f32.xlu1 %v3277_v62  ;;  %v6312_v29 = vpop.f32.mrb[26].mxu1  ;;  %3427 = vadd.xlane.f32.xlu0 %v3276_v42 }
 0x28c   :  { %v3280_v31 = vmul.f32 %v6312_v29, %v8091_v55  ;;  %v2744_v40 = vpop.f32.mrb[27].mxu1 }
 0x28d   :  { %v3279_v27 = vmul.f32 %v2744_v40, %v8093_v56  ;;  %v9583_v40 = vld [vmem:[#allocation5_spill] sm:$0xff] }
 0x28f   :  { %3433 = vadd.xlane.f32.xlu1 %v3279_v27  ;;  %v6315_v37 = vpop.f32.mrb[28].mxu1  ;;  %3431 = vadd.xlane.f32.xlu0 %v3278_v25 }
 0x290   :  { %v3282_v38 = vmul.f32 %v6315_v37, %v8105_v63  ;;  %v2754_v0 = vpop.f32.mrb[29].mxu1 }
 0x291   :  { %v3281_v41 = vmul.f32 %v2754_v0, %v8107_v2  ;;  %v9585_v0 = vld [vmem:[#allocation7_spill] sm:$0xff] }
 0x293   :  { %3437 = vadd.xlane.f32.xlu1 %v3281_v41  ;;  %v6318_v45 = vpop.f32.mrb[30].mxu1  ;;  %3435 = vadd.xlane.f32.xlu0 %v3280_v31 }
 0x294   :  { %v3284_v48 = vmul.f32 %v6318_v45, %v8119_v9  ;;  %v2764_v1 = vpop.f32.mrb[31].mxu1 }
 0x295   :  { %v3283_v39 = vmul.f32 %v2764_v1, %v8121_v10 }
 0x297   :  { %3441 = vadd.xlane.f32.xlu1 %v3283_v39  ;;  %v6321_v55 = vpop.f32.mrb[32].mxu1  ;;  %3439 = vadd.xlane.f32.xlu0 %v3282_v38 }
 0x298   :  { %v3286_v56 = vmul.f32 %v6321_v55, %v8133_v17  ;;  %v2774_v5 = vpop.f32.mrb[33].mxu1  ;;  %v9587_v55 = vld [vmem:[#allocation9_spill] sm:$0xff] }
 0x299   :  { %v3285_v46 = vmul.f32 %v2774_v5, %v8135_v20 }
 0x29b   :  { %3445 = vadd.xlane.f32.xlu1 %v3285_v46  ;;  %v6324_v63 = vpop.f32.mrb[34].mxu1  ;;  %3443 = vadd.xlane.f32.xlu0 %v3284_v48  ;;  %v9586_v48 = vld [vmem:[#allocation8_spill] sm:$0xff]  ;;  %v9588_v46 = vld [vmem:[#allocation10_spill] sm:$0xff] }
 0x29c   :  { %v3288_v2 = vmul.f32 %v6324_v63, %v8147_v32  ;;  %v2784_v6 = vpop.f32.mrb[35].mxu1 }
 0x29d   :  { %v3287_v28 = vmul.f32 %v2784_v6, %v8149_v33  ;;  %v9589_v6 = vld [vmem:[#allocation11_spill] sm:$0xff] }
 0x29f   :  { %3449 = vadd.xlane.f32.xlu1 %v3287_v28  ;;  %v6327_v9 = vpop.f32.mrb[36].mxu1  ;;  %3447 = vadd.xlane.f32.xlu0 %v3286_v56 }
 0x2a0   :  { %v3290_v10 = vmul.f32 %v6327_v9, %v8161_v44  ;;  %v2794_v7 = vpop.f32.mrb[37].mxu1 }
 0x2a1   :  { %v3289_v47 = vmul.f32 %v2794_v7, %v8163_v49 }
 0x2a3   :  { %3453 = vadd.xlane.f32.xlu1 %v3289_v47  ;;  %v6330_v17 = vpop.f32.mrb[38].mxu1  ;;  %3451 = vadd.xlane.f32.xlu0 %v3288_v2 }
 0x2a4   :  { %v3292_v20 = vmul.f32 %v6330_v17, %v8175_v60  ;;  %v2804_v23 = vpop.f32.mrb[39].mxu1  ;;  %v9591_v17 = vld [vmem:[#allocation13_spill] sm:$0xff] }
 0x2a5   :  { %v3291_v36 = vmul.f32 %v2804_v23, %v8177_v61 }
 0x2a7   :  { %3457 = vadd.xlane.f32.xlu1 %v3291_v36  ;;  %v6333_v32 = vpop.f32.mrb[40].mxu1  ;;  %3455 = vadd.xlane.f32.xlu0 %v3290_v10  ;;  %v9590_v10 = vld [vmem:[#allocation12_spill] sm:$0xff]  ;;  %v9592_v36 = vld [vmem:[#allocation14_spill] sm:$0xff] }
 0x2a8   :  { %v3294_v33 = vmul.f32 %v6333_v32, %v8189_v8  ;;  %v2814_v12 = vpop.f32.mrb[41].mxu1 }
 0x2a9   :  { %v3293_v16 = vmul.f32 %v2814_v12, %v8191_v11  ;;  %v9593_v12 = vld [vmem:[#allocation15_spill] sm:$0xff] }
 0x2ab   :  { %3461 = vadd.xlane.f32.xlu1 %v3293_v16  ;;  %v6336_v44 = vpop.f32.mrb[42].mxu1  ;;  %3459 = vadd.xlane.f32.xlu0 %v3292_v20 }
 0x2ac   :  { %v3296_v49 = vmul.f32 %v6336_v44, %v8203_v22  ;;  %v2824_v13 = vpop.f32.mrb[43].mxu1 }
 0x2ad   :  { %v3295_v52 = vmul.f32 %v2824_v13, %v8205_v24 }
 0x2af   :  { %3465 = vadd.xlane.f32.xlu1 %v3295_v52  ;;  %v6339_v60 = vpop.f32.mrb[44].mxu1  ;;  %3463 = vadd.xlane.f32.xlu0 %v3294_v33 }
 0x2b0   :  { %v3298_v61 = vmul.f32 %v6339_v60, %v8217_v43  ;;  %v2834_v34 = vpop.f32.mrb[45].mxu1  ;;  %v9595_v60 = vld [vmem:[#allocation17_spill] sm:$0xff] }
 0x2b1   :  { %v3297_v53 = vmul.f32 %v2834_v34, %v8219_v50 }
 0x2b3   :  { %3469 = vadd.xlane.f32.xlu1 %v3297_v53  ;;  %v6342_v8 = vpop.f32.mrb[46].mxu1  ;;  %3467 = vadd.xlane.f32.xlu0 %v3296_v49  ;;  %v9594_v49 = vld [vmem:[#allocation16_spill] sm:$0xff]  ;;  %v9596_v53 = vld [vmem:[#allocation18_spill] sm:$0xff] }
 0x2b4   :  { %v3300_v11 = vmul.f32 %v6342_v8, %v8231_v3  ;;  %v2844_v18 = vpop.f32.mrb[47].mxu1 }
 0x2b5   :  { %v3299_v51 = vmul.f32 %v2844_v18, %v8233_v4  ;;  %v9580_v4 = vld [vmem:[#allocation2_spill] sm:$0xff]  ;;  %v9597_v18 = vld [vmem:[#allocation19_spill] sm:$0xff] }
 0x2b7   :  { %3473 = vadd.xlane.f32.xlu1 %v3299_v51  ;;  %v6345_v22 = vpop.f32.mrb[48].mxu1  ;;  %3471 = vadd.xlane.f32.xlu0 %v3298_v61 }
 0x2b8   :  { %v3302_v24 = vmul.f32 %v6345_v22, %v8245_v21  ;;  %v2854_v19 = vpop.f32.mrb[49].mxu1 }
 0x2b9   :  { %v3301_v42 = vmul.f32 %v2854_v19, %v8247_v30  ;;  %v9582_v30 = vld [vmem:[#allocation4_spill] sm:$0xff] }
 0x2bb   :  { %3477 = vadd.xlane.f32.xlu1 %v3301_v42  ;;  %v6348_v43 = vpop.f32.mrb[50].mxu1  ;;  %3475 = vadd.xlane.f32.xlu0 %v3300_v11 }
 0x2bc   :  { %v3304_v50 = vmul.f32 %v6348_v43, %v8259_v54  ;;  %v2864_v35 = vpop.f32.mrb[51].mxu1  ;;  %v9599_v43 = vld [vmem:[#allocation21_spill] sm:$0xff] }
 0x2bd   :  { %v3303_v58 = vmul.f32 %v2864_v35, %v8261_v57  ;;  %v9584_v57 = vld [vmem:[#allocation6_spill] sm:$0xff] }
 0x2bf   :  { %3481 = vadd.xlane.f32.xlu1 %v3303_v58  ;;  %v6351_v3 = vpop.f32.mrb[52].mxu1  ;;  %3479 = vadd.xlane.f32.xlu0 %v3302_v24  ;;  %v9598_v24 = vld [vmem:[#allocation20_spill] sm:$0xff] }
 0x2c0   :  { %v3306_v15 = vmul.f32 %v6351_v3, %v9580_v4  ;;  %v2874_v25 = vpop.f32.mrb[53].mxu1  ;;  %v9600_v4 = vld [vmem:[#allocation22_spill] sm:$0xff] }
 0x2c1   :  { %v3305_v62 = vmul.f32 %v2874_v25, %v9581_v59 }
 0x2c3   :  { %3485 = vadd.xlane.f32.xlu1 %v3305_v62  ;;  %v6354_v21 = vpop.f32.mrb[54].mxu1  ;;  %3483 = vadd.xlane.f32.xlu0 %v3304_v50  ;;  %v9601_v62 = vld [vmem:[#allocation23_spill] sm:$0xff] }
 0x2c4   :  { %v3308_v29 = vmul.f32 %v6354_v21, %v9582_v30  ;;  %v2884_v31 = vpop.f32.mrb[55].mxu1 }
 0x2c5   :  { %v3307_v27 = vmul.f32 %v2884_v31, %v9583_v40 }
 0x2c7   :  { %3489 = vadd.xlane.f32.xlu1 %v3307_v27  ;;  %v6357_v54 = vpop.f32.mrb[56].mxu1  ;;  %3487 = vadd.xlane.f32.xlu0 %v3306_v15  ;;  %v9602_v27 = vld [vmem:[#allocation24_spill] sm:$0xff] }
 0x2c8   :  { %v3310_v37 = vmul.f32 %v6357_v54, %v9584_v57  ;;  %v2894_v38 = vpop.f32.mrb[57].mxu1 }
 0x2c9   :  { %v3309_v41 = vmul.f32 %v2894_v38, %v9585_v0  ;;  %v9604_v38 = vld [vmem:[#allocation25_spill] sm:$0xff] }
 0x2cb   :  { %3493 = vadd.xlane.f32.xlu1 %v3309_v41  ;;  %v6360_v45 = vpop.f32.mrb[58].mxu1  ;;  %3491 = vadd.xlane.f32.xlu0 %v3308_v29 }
 0x2cc   :  { %v3312_v1 = vmul.f32 %v6360_v45, %v9586_v48  ;;  %v2904_v39 = vpop.f32.mrb[59].mxu1 }
 0x2cd   :  { %v3311_v56 = vmul.f32 %v2904_v39, %v9587_v55 }
 0x2cf   :  { %3497 = vadd.xlane.f32.xlu1 %v3311_v56  ;;  %v6363_v5 = vpop.f32.mrb[60].mxu1  ;;  %3495 = vadd.xlane.f32.xlu0 %v3310_v37 }
 0x2d0   :  { %v3314_v63 = vmul.f32 %v6363_v5, %v9588_v46  ;;  %v2914_v2 = vpop.f32.mrb[61].mxu1  ;;  %v9608_v46 = vld [vmem:[#allocation27_spill] sm:$0xff] }
 0x2d1   :  { %v3313_v28 = vmul.f32 %v2914_v2, %v9589_v6 }
 0x2d3   :  { %3501 = vadd.xlane.f32.xlu1 %v3313_v28  ;;  %v6366_v9 = vpop.f32.mrb[62].mxu1  ;;  %3499 = vadd.xlane.f32.xlu0 %v3312_v1  ;;  %v9606_v1 = vld [vmem:[#allocation26_spill] sm:$0xff] }
 0x2d4   :  { %v3316_v7 = vmul.f32 %v6366_v9, %v9590_v10  ;;  %v2924_v47 = vpop.f32.mrb[63].mxu1 }
 0x2d5   :  { %v3315_v20 = vmul.f32 %v2924_v47, %v9591_v17 }
 0x2d7   :  { %3505 = vadd.xlane.f32.xlu1 %v3315_v20  ;;  %v6369_v23 = vpop.f32.mrb[64].mxu1  ;;  %3503 = vadd.xlane.f32.xlu0 %v3314_v63 }
 0x2d8   :  { %v3318_v32 = vmul.f32 %v6369_v23, %v9592_v36  ;;  %v2934_v33 = vpop.f32.mrb[65].mxu1  ;;  %v9612_v36 = vld [vmem:[#allocation29_spill] sm:$0xff] }
 0x2d9   :  { %v3317_v16 = vmul.f32 %v2934_v33, %v9593_v12 }
 0x2db   :  { %3509 = vadd.xlane.f32.xlu1 %v3317_v16  ;;  %v6372_v44 = vpop.f32.mrb[66].mxu1  ;;  %3507 = vadd.xlane.f32.xlu0 %v3316_v7  ;;  %v9610_v7 = vld [vmem:[#allocation28_spill] sm:$0xff] }
 0x2dc   :  { %v3320_v13 = vmul.f32 %v6372_v44, %v9594_v49  ;;  %v2944_v52 = vpop.f32.mrb[67].mxu1 }
 0x2dd   :  { %v3319_v61 = vmul.f32 %v2944_v52, %v9595_v60  ;;  %v9614_v52 = vld [vmem:[#allocation30_spill] sm:$0xff] }
 0x2df   :  { %3513 = vadd.xlane.f32.xlu1 %v3319_v61  ;;  %v6375_v34 = vpop.f32.mrb[68].mxu1  ;;  %3511 = vadd.xlane.f32.xlu0 %v3318_v32 }
 0x2e0   :  { %v8774_v8 = vmul.f32 %v6375_v34, %v9596_v53  ;;  %v2954_v11 = vpop.f32.mrb[69].mxu1 }
 0x2e1   :  { %v8777_v51 = vmul.f32 %v2954_v11, %v9597_v18  ;;  %v9615_v18 = vld [vmem:[#allocation31_spill] sm:$0xff] }
 0x2e3   :  { %v6378_v22 = vpop.f32.mrb[70].mxu1  ;;  %3515 = vadd.xlane.f32.xlu0 %v3320_v13 }
 0x2e4   :  { %v8780_v19 = vmul.f32 %v6378_v22, %v9598_v24  ;;  %v2964_v42 = vpop.f32.mrb[71].mxu1 }
 0x2e5   :  { %v8783_v50 = vmul.f32 %v2964_v42, %v9599_v43 }
 0x2e7   :  { %v3384_v35 = vpop.xlane.xlu1 %3383  ;;  %v6381_v58 = vpop.f32.mrb[72].mxu1 }
 0x2e8   :  { %v3638_v3 = vsub.f32 0.0, %v3384_v35  ;;  %v8786_v15 = vmul.f32 %v6381_v58, %v9600_v4  ;;  %v2974_v25 = vpop.f32.mrb[73].mxu1  ;;  %v3382_v59 = vpop.xlane.xlu0 %3381  ;;  %v9616_v58 = vlaneseq  ;;  %v4537_v4 = vadd.s32 4294967288, %v7311_v26 }
 0x2e9   :  { %v8789_v21 = vmul.f32 %v2974_v25, %v9601_v62  ;;  %v3637_v30 = vsub.f32 0.0, %v3382_v59 }
 0x2ea   :  { %v3767_v29 = vmul.f32 1.442695, %v3638_v3  ;;  %v8812_v3 = vshrl.u32 %v9616_v58, 7 }
 0x2eb   :  { %v3765_v31 = vmul.f32 1.442695, %v3637_v30  ;;  %v6384_v40 = vpop.f32.mrb[74].mxu1 }
 0x2ec   :  { %v8792_v54 = vmul.f32 %v6384_v40, %v9602_v27  ;;  %v2984_v57 = vpop.f32.mrb[75].mxu1  ;;  %v3386_v37 = vpop.xlane.xlu0 %3385  ;;  %6531 = vpow2.f32 %v3767_v29  ;;  %v9617_v29 = vld [vmem:[#allocation32_spill] sm:$0xff] }
 0x2ed   :  { %v8795_v0 = vmul.f32 %v2984_v57, %v9604_v38  ;;  %v3639_v41 = vsub.f32 0.0, %v3386_v37  ;;  %6533 = vpow2.f32 %v3765_v31  ;;  %v9618_v37 = vld [vmem:[#allocation33_spill] sm:$0xff] }
 0x2ee   :  { %9603 = vst [vmem:[#allocation2_spill] sm:$0xff] %v8792_v54  ;;  %v9645_v54 = vld [vmem:[#allocation52_spill] sm:$0xff] }
 0x2ef   :  { %9605 = vst [vmem:[#allocation3_spill] sm:$0xff] %v8795_v0  ;;  %v3769_v45 = vmul.f32 1.442695, %v3639_v41  ;;  %v6387_v48 = vpop.f32.mrb[76].mxu1 }
 0x2f0   :  { %v8798_v39 = vmul.f32 %v6387_v48, %v9606_v1  ;;  %v3390_v55 = vpop.xlane.xlu1 %3389  ;;  %v2994_v56 = vpop.f32.mrb[77].mxu1 }
 0x2f1   :  { %6535 = vpow2.f32 %v3769_v45  ;;  %v3641_v5 = vsub.f32 0.0, %v3390_v55  ;;  %v8801_v63 = vmul.f32 %v2994_v56, %v9608_v46  ;;  %v3388_v2 = vpop.xlane.xlu0 %3387  ;;  %v4544_v45 = vadd.s32 4294967280, %v7311_v26 }
 0x2f2   :  { %9607 = vst [vmem:[#allocation4_spill] sm:$0xff] %v8798_v39  ;;  %v3640_v6 = vsub.f32 0.0, %v3388_v2  ;;  %v8821_v56 = vsub.s32 %v4537_v4, %v8812_v3  ;;  %v9622_v4 = vld [vmem:[#allocation37_spill] sm:$0xff] }
 0x2f3   :  { %9609 = vst [vmem:[#allocation5_spill] sm:$0xff] %v8801_v63  ;;  %v3773_v28 = vmul.f32 1.442695, %v3641_v5  ;;  %v6390_v9 = vpop.f32.mrb[78].mxu1  ;;  %v4558_v5 = vadd.s32 4294967264, %v7311_v26 }
 0x2f4   :  { %v3771_v10 = vmul.f32 1.442695, %v3640_v6  ;;  %v8804_v47 = vmul.f32 %v6390_v9, %v9610_v7  ;;  %v3394_v17 = vpop.xlane.xlu1 %3393  ;;  %v3004_v20 = vpop.f32.mrb[79].mxu1 }
 0x2f5   :  { %6537 = vpow2.f32 %v3773_v28  ;;  %v3643_v23 = vsub.f32 0.0, %v3394_v17  ;;  %v8807_v32 = vmul.f32 %v3004_v20, %v9612_v36  ;;  %v3392_v33 = vpop.xlane.xlu0 %3391 }
 0x2f6   :  { %9611 = vst [vmem:[#allocation6_spill] sm:$0xff] %v8804_v47  ;;  %6539 = vpow2.f32 %v3771_v10  ;;  %v3642_v12 = vsub.f32 0.0, %v3392_v33  ;;  %v6532_v16 = vpop.eup %6531  ;;  %v9619_v10 = vld [vmem:[#allocation34_spill] sm:$0xff]  ;;  %v9620_v33 = vld [vmem:[#allocation35_spill] sm:$0xff] }
 0x2f7   :  { %9613 = vst [vmem:[#allocation7_spill] sm:$0xff] %v8807_v32  ;;  %v3777_v44 = vmul.f32 1.442695, %v3643_v23  ;;  %v6393_v49 = vpop.f32.mrb[80].mxu1  ;;  %v6534_v53 = vpop.eup %6533  ;;  %v4022_v42 = vadd.f32 1.0, %v6532_v16  ;;  %v4551_v23 = vadd.s32 4294967272, %v7311_v26 }
 0x2f8   :  { %v3775_v13 = vmul.f32 1.442695, %v3642_v12  ;;  %v3334_v60 = vmul.f32 %v6393_v49, %v9614_v52  ;;  %v3398_v61 = vpop.xlane.xlu1 %3397  ;;  %v3014_v34 = vpop.f32.mrb[81].mxu1  ;;  %v4021_v62 = vadd.f32 1.0, %v6534_v53  ;;  %v8836_v49 = vsub.s32 %v4544_v45, %v8812_v3 }
 0x2f9   :  { %v3645_v11 = vsub.f32 0.0, %v3398_v61  ;;  %v3333_v22 = vmul.f32 %v3014_v34, %v9615_v18  ;;  %v3396_v24 = vpop.xlane.xlu0 %3395  ;;  %6541 = vpow2.f32 %v3777_v44  ;;  %v8833_v44 = vsub.s32 %v7311_v26, %v8812_v3  ;;  %v9621_v18 = vld [vmem:[#allocation36_spill] sm:$0xff] }
 0x2fa   :  { %v3644_v43 = vsub.f32 0.0, %v3396_v24  ;;  %3543 = vadd.xlane.f32.xlu0 %v3334_v60  ;;  %6543 = vpow2.f32 %v3775_v13  ;;  %v4572_v60 = vadd.s32 4294967248, %v7311_v26  ;;  %v8840_v53 = vsub.s32 %v4558_v5, %v8812_v3 }
 0x2fb   :  { %v6536_v35 = vpop.eup %6535  ;;  %v3781_v25 = vmul.f32 1.442695, %v3645_v11  ;;  %3541 = vadd.xlane.f32.xlu1 %v3333_v22  ;;  %v6396_v59 = vpop.f32.mrb[82].mxu1 }
 0x2fc   :  { %v3779_v30 = vmul.f32 1.442695, %v3644_v43  ;;  %v8816_v31 = vmul.f32 %v6396_v59, %v9617_v29  ;;  %v3402_v40 = vpop.xlane.xlu1 %3401  ;;  %v3024_v27 = vpop.f32.mrb[83].mxu1  ;;  %v4023_v48 = vadd.f32 1.0, %v6536_v35  ;;  %v8846_v35 = vsub.s32 %v4551_v23, %v8812_v3 }
 0x2fd   :  { %6545 = vpow2.f32 %v3781_v25  ;;  %v3647_v57 = vsub.f32 0.0, %v3402_v40  ;;  %v3335_v38 = vmul.f32 %v3024_v27, %v9618_v37  ;;  %v3400_v41 = vpop.xlane.xlu0 %3399  ;;  %v4565_v29 = vadd.s32 4294967256, %v7311_v26 }
 0x2fe   :  { %6547 = vrcp.f32 %v4022_v42  ;;  %v3646_v1 = vsub.f32 0.0, %v3400_v41 }
 0x2ff   :  { %v6538_v55 = vpop.eup %6537  ;;  %6549 = vpow2.f32 %v3779_v30  ;;  %v3785_v46 = vmul.f32 1.442695, %v3647_v57  ;;  %3545 = vadd.xlane.f32.xlu1 %v3335_v38  ;;  %v6399_v2 = vpop.f32.mrb[84].mxu1  ;;  %v8853_v57 = vsub.s32 %v4572_v60, %v8812_v3  ;;  %v4600_v60 = vadd.s32 4294967216, %v7311_v26 }
 0x300   :  { %v6540_v6 = vpop.eup %6539  ;;  %6551 = vrcp.f32 %v4021_v62  ;;  %v4025_v28 = vadd.f32 1.0, %v6538_v55  ;;  %v3783_v9 = vmul.f32 1.442695, %v3646_v1  ;;  %v8825_v7 = vmul.f32 %v6399_v2, %v9619_v10  ;;  %v3406_v17 = vpop.xlane.xlu1 %3405  ;;  %v9623_v55 = vld [vmem:[#allocation38_spill] sm:$0xff]  ;;  %v9625_v10 = vld [vmem:[#allocation39_spill] sm:$0xff] }
 0x301   :  { %v3034_v20 = vpop.f32.mrb[85].mxu1  ;;  %6553 = vpow2.f32 %v3785_v46  ;;  %v3649_v36 = vsub.f32 0.0, %v3406_v17  ;;  %v3404_v16 = vpop.xlane.xlu0 %3403  ;;  %v4024_v52 = vadd.f32 1.0, %v6540_v6 }
 0x302   :  { %v8829_v12 = vmul.f32 %v3034_v20, %v9620_v33  ;;  %6555 = vrcp.f32 %v4023_v48  ;;  %v3648_v13 = vsub.f32 0.0, %v3404_v16  ;;  %v4586_v48 = vadd.s32 4294967232, %v7311_v26 }
 0x303   :  { %6557 = vrcp.f32 %v4025_v28  ;;  %v3789_v61 = vmul.f32 1.442695, %v3649_v36  ;;  %v6402_v34 = vpop.f32.mrb[86].mxu1  ;;  %v6542_v43 = vpop.eup %6541  ;;  %v4579_v36 = vadd.s32 4294967240, %v7311_v26 }
 0x304   :  { %6559 = vpow2.f32 %v3783_v9  ;;  %v3787_v11 = vmul.f32 1.442695, %v3648_v13  ;;  %v8843_v22 = vmul.f32 %v6402_v34, %v9621_v18  ;;  %v3410_v24 = vpop.xlane.xlu1 %3409  ;;  %v3044_v42 = vpop.f32.mrb[87].mxu1  ;;  %v4027_v30 = vadd.f32 1.0, %v6542_v43 }
 0x305   :  { %6561 = vpow2.f32 %v3789_v61  ;;  %v3651_v58 = vsub.f32 0.0, %v3410_v24  ;;  %v8849_v25 = vmul.f32 %v3044_v42, %v9622_v4  ;;  %v3408_v59 = vpop.xlane.xlu0 %3407  ;;  %v6544_v62 = vpop.eup %6543  ;;  %v9626_v42 = vld [vmem:[#allocation40_spill] sm:$0xff] }
 0x306   :  { %6563 = vpow2.f32 %v3787_v11  ;;  %v3650_v40 = vsub.f32 0.0, %v3408_v59  ;;  %v4026_v37 = vadd.f32 1.0, %v6544_v62  ;;  %v8879_v62 = vsub.s32 %v4586_v48, %v8812_v3 }
 0x307   :  { %v6546_v27 = vpop.eup %6545  ;;  %6565 = vrcp.f32 %v4024_v52  ;;  %v3793_v38 = vmul.f32 1.442695, %v3651_v58  ;;  %v6405_v41 = vpop.f32.mrb[88].mxu1  ;;  %v8868_v52 = vsub.s32 %v4565_v29, %v8812_v3  ;;  %v9628_v29 = vld [vmem:[#allocation41_spill] sm:$0xff] }
 0x308   :  { %v8855_v45 = vpop.eup %6547  ;;  %6567 = vrcp.f32 %v4027_v30  ;;  %v4029_v1 = vadd.f32 1.0, %v6546_v27  ;;  %v8859_v5 = vmul.f32 %v6405_v41, %v9623_v55  ;;  %v3414_v46 = vpop.xlane.xlu1 %3413  ;;  %v3791_v28 = vmul.f32 1.442695, %v3650_v40 }
 0x309   :  { %v3054_v2 = vpop.f32.mrb[89].mxu1  ;;  %v6550_v6 = vpop.eup %6549  ;;  %6569 = vrcp.f32 %v4026_v37  ;;  %v3653_v9 = vsub.f32 0.0, %v3414_v46  ;;  %v4593_v41 = vadd.s32 4294967224, %v7311_v26  ;;  %v4541_v48 = vrot.slane %v8855_v45, %v8821_v56  ;;  %v9630_v45 = vld [vmem:[#allocation42_spill] sm:$0xff] }
 0x30a   :  { %9624 = vst [vmem:[#allocation8_spill] sm:$0xff] %v8859_v5  ;;  %v8862_v17 = vmul.f32 %v3054_v2, %v9625_v10  ;;  %v3412_v20 = vpop.xlane.xlu0 %3411  ;;  %v8864_v23 = vpop.eup %6551  ;;  %6571 = vrcp.f32 %v4029_v1  ;;  %v4028_v33 = vadd.f32 1.0, %v6550_v6  ;;  %v8891_v46 = vsub.s32 %v4600_v60, %v8812_v3 }
 0x30b   :  { %v3652_v16 = vsub.f32 0.0, %v3412_v20  ;;  %v6554_v13 = vpop.eup %6553  ;;  %6573 = vpow2.f32 %v3793_v38  ;;  %v3797_v61 = vmul.f32 1.442695, %v3653_v9  ;;  %v6408_v34 = vpop.f32.mrb[90].mxu1  ;;  %v8885_v38 = vsub.s32 %v4579_v36, %v8812_v3 }
 0x30c   :  { %v8871_v11 = vpop.eup %6555  ;;  %6575 = vrcp.f32 %v4028_v33  ;;  %v4031_v18 = vadd.f32 1.0, %v6554_v13  ;;  %v8874_v43 = vmul.f32 %v6408_v34, %v9626_v42  ;;  %v3418_v58 = vpop.xlane.xlu1 %3417  ;;  %v4536_v9 = vrot.slane %v8864_v23, %v8833_v44 }
 0x30d   :  { %v3795_v24 = vmul.f32 1.442695, %v3652_v16  ;;  %v3064_v4 = vpop.f32.mrb[91].mxu1  ;;  %v8876_v59 = vpop.eup %6557  ;;  %6577 = vpow2.f32 %v3791_v28  ;;  %v3655_v30 = vsub.f32 0.0, %v3418_v58  ;;  %v9632_v58 = vld [vmem:[#allocation43_spill] sm:$0xff] }
 0x30e   :  { %9627 = vst [vmem:[#allocation9_spill] sm:$0xff] %v8874_v43  ;;  %v8882_v40 = vmul.f32 %v3064_v4, %v9628_v29  ;;  %v3416_v27 = vpop.xlane.xlu0 %3415  ;;  %v6560_v37 = vpop.eup %6559  ;;  %6579 = vrcp.f32 %v4031_v18  ;;  %v8908_v29 = vsub.s32 %v4593_v41, %v8812_v3  ;;  %v9634_v41 = vld [vmem:[#allocation44_spill] sm:$0xff]  ;;  %v9644_v43 = vld [vmem:[#allocation51_spill] sm:$0xff] }
 0x30f   :  { %v3654_v1 = vsub.f32 0.0, %v3416_v27  ;;  %v6562_v55 = vpop.eup %6561  ;;  %v4030_v2 = vadd.f32 1.0, %v6560_v37  ;;  %6581 = vpow2.f32 %v3797_v61  ;;  %v6411_v6 = vpop.f32.mrb[92].mxu1  ;;  %v3801_v20 = vmul.f32 1.442695, %v3655_v30 }
 0x310   :  { %9629 = vst [vmem:[#allocation10_spill] sm:$0xff] %v8882_v40  ;;  %v6564_v28 = vpop.eup %6563  ;;  %v4033_v10 = vadd.f32 1.0, %v6562_v55  ;;  %6583 = vpow2.f32 %v3795_v24  ;;  %v3422_v36 = vpop.xlane.xlu1 %3421  ;;  %v8896_v18 = vmul.f32 %v6411_v6, %v9630_v45  ;;  %v4548_v30 = vrot.slane %v8871_v11, %v8836_v49 }
 0x311   :  { %v3074_v33 = vpop.f32.mrb[93].mxu1  ;;  %v6566_v16 = vpop.eup %6565  ;;  %6585 = vrcp.f32 %v4030_v2  ;;  %v4032_v13 = vadd.f32 1.0, %v6564_v28  ;;  %v3799_v34 = vmul.f32 1.442695, %v3654_v1  ;;  %v3657_v61 = vsub.f32 0.0, %v3422_v36 }
 0x312   :  { %9631 = vst [vmem:[#allocation11_spill] sm:$0xff] %v8896_v18  ;;  %v3420_v60 = vpop.xlane.xlu0 %3419  ;;  %v8898_v42 = vpop.eup %6567  ;;  %6587 = vrcp.f32 %v4033_v10  ;;  %v8901_v4 = vmul.f32 %v3074_v33, %v9632_v58  ;;  %v4614_v27 = vadd.s32 4294967200, %v7311_v26  ;;  %v8914_v55 = vadd.s32 4294967208, %v7311_v26 }
 0x313   :  { %v3656_v23 = vsub.f32 0.0, %v3420_v60  ;;  %v8903_v24 = vpop.eup %6569  ;;  %6589 = vrcp.f32 %v4032_v13  ;;  %v6414_v37 = vpop.f32.mrb[94].mxu1  ;;  %v3805_v2 = vmul.f32 1.442695, %v3657_v61  ;;  %v4555_v36 = vrot.slane %v6566_v16, %v8846_v35 }
 0x314   :  { %9633 = vst [vmem:[#allocation12_spill] sm:$0xff] %v8901_v4  ;;  %v8911_v1 = vpop.eup %6571  ;;  %6591 = vpow2.f32 %v3801_v20  ;;  %v3426_v28 = vpop.xlane.xlu1 %3425  ;;  %v8918_v33 = vmul.f32 %v6414_v37, %v9634_v41  ;;  %v4543_v58 = vsel %vm4542_vm0, %v4541_v48, %v4536_v9  ;;  %v9636_v20 = vld [vmem:[#allocation45_spill] sm:$0xff]  ;;  %v8928_v16 = vsub.s32 %v4614_v27, %v8812_v3  ;;  %v9638_v9 = vld [vmem:[#allocation46_spill] sm:$0xff] }
 0x315   :  { %v3803_v6 = vmul.f32 1.442695, %v3656_v23  ;;  %v3084_v10 = vpop.f32.mrb[95].mxu1  ;;  %v6574_v11 = vpop.eup %6573  ;;  %6593 = vpow2.f32 %v3799_v34  ;;  %v3659_v13 = vsub.f32 0.0, %v3426_v28  ;;  %v4550_v32 = vsel %vm4549_vm1, %v4548_v30, %v4543_v58 }
 0x316   :  { %9635 = vst [vmem:[#allocation13_spill] sm:$0xff] %v8918_v33  ;;  %v3424_v45 = vpop.xlane.xlu0 %3423  ;;  %v8920_v60 = vpop.eup %6575  ;;  %v4035_v47 = vadd.f32 1.0, %v6574_v11  ;;  %6595 = vpow2.f32 %v3805_v2  ;;  %v8924_v61 = vmul.f32 %v3084_v10, %v9636_v20  ;;  %v4562_v30 = vrot.slane %v8876_v59, %v8840_v53 }
 0x317   :  { %v6578_v23 = vpop.eup %6577  ;;  %6597 = vpow2.f32 %v3803_v6  ;;  %v3809_v34 = vmul.f32 1.442695, %v3659_v13  ;;  %v6417_v37 = vpop.f32.mrb[96].mxu1  ;;  %v3658_v48 = vsub.f32 0.0, %v3424_v45  ;;  %v4557_v58 = vsel %vm4556_vm2, %v4555_v36, %v4550_v32 }
 0x318   :  { %9637 = vst [vmem:[#allocation14_spill] sm:$0xff] %v8924_v61  ;;  %v8930_v28 = vpop.eup %6579  ;;  %6599 = vrcp.f32 %v4035_v47  ;;  %v4034_v41 = vadd.f32 1.0, %v6578_v23  ;;  %v3350_v2 = vmul.f32 %v6417_v37, %v9638_v9  ;;  %v3430_v11 = vpop.xlane.xlu1 %3429  ;;  %v4569_v33 = vrot.slane %v8903_v24, %v8868_v52  ;;  %v9639_v61 = vld [vmem:[#allocation47_spill] sm:$0xff] }
 0x319   :  { %v3094_v10 = vpop.f32.mrb[97].mxu1  ;;  %v6582_v20 = vpop.eup %6581  ;;  %6601 = vpow2.f32 %v3809_v34  ;;  %v3661_v27 = vsub.f32 0.0, %v3430_v11  ;;  %v3807_v45 = vmul.f32 1.442695, %v3658_v48  ;;  %v8944_v34 = vadd.s32 4294967184, %v7311_v26 }
 0x31a   :  { %v3428_v6 = vpop.xlane.xlu0 %3427  ;;  %v6584_v13 = vpop.eup %6583  ;;  %6603 = vrcp.f32 %v4034_v41  ;;  %v4037_v47 = vadd.f32 1.0, %v6582_v20  ;;  %3575 = vadd.xlane.f32.xlu1 %v3350_v2  ;;  %v3349_v59 = vmul.f32 %v3094_v10, %v9639_v61  ;;  %v8947_v24 = vadd.s32 4294967192, %v7311_v26  ;;  %v9640_v41 = vld [vmem:[#allocation48_spill] sm:$0xff] }
 0x31b   :  { %v8938_v23 = vpop.eup %6585  ;;  %v4036_v37 = vadd.f32 1.0, %v6584_v13  ;;  %v3813_v9 = vmul.f32 1.442695, %v3661_v27  ;;  %v3660_v18 = vsub.f32 0.0, %v3428_v6  ;;  %v6420_v32 = vpop.f32.mrb[98].mxu1  ;;  %v8955_v61 = vadd.s32 4294967176, %v7311_v26 }
 0x31c   :  { %v8941_v36 = vpop.eup %6587  ;;  %6605 = vrcp.f32 %v4037_v47  ;;  %v8950_v48 = vmul.f32 %v6420_v32, %v9640_v41  ;;  %v3434_v2 = vpop.xlane.xlu1 %3433  ;;  %3573 = vadd.xlane.f32.xlu0 %v3349_v59  ;;  %v4576_v47 = vrot.slane %v8898_v42, %v8853_v57  ;;  %v4564_v32 = vsel %vm4563_vm3, %v4562_v30, %v4557_v58  ;;  %v9641_v41 = vld [vmem:[#allocation49_spill] sm:$0xff] }
 0x31d   :  { %v3104_v11 = vpop.f32.mrb[99].mxu1  ;;  %v8952_v20 = vpop.eup %6589  ;;  %6607 = vrcp.f32 %v4036_v37  ;;  %v3811_v10 = vmul.f32 1.442695, %v3660_v18  ;;  %v3663_v27 = vsub.f32 0.0, %v3434_v2  ;;  %v4571_v26 = vsel %vm4570_vm4, %v4569_v33, %v4564_v32  ;;  %v9642_v33 = vld [vmem:[#allocation50_spill] sm:$0xff] }
 0x31e   :  { %v3432_v6 = vpop.xlane.xlu0 %3431  ;;  %v6592_v13 = vpop.eup %6591  ;;  %6609 = vpow2.f32 %v3807_v45  ;;  %v3351_v39 = vmul.f32 %v3104_v11, %v9641_v41  ;;  %3547 = vadd.xlane.f32.xlu1 %v8816_v31  ;;  %v4590_v18 = vrot.slane %v8911_v1, %v8879_v62  ;;  %v4583_v42 = vrot.slane %v8920_v60, %v8885_v38 }
 0x31f   :  { %v6594_v4 = vpop.eup %6593  ;;  %v4039_v37 = vadd.f32 1.0, %v6592_v13  ;;  %6611 = vpow2.f32 %v3813_v9  ;;  %v6423_v59 = vpop.f32.mrb[100].mxu1  ;;  %v3662_v30 = vsub.f32 0.0, %v3432_v6  ;;  %v3817_v41 = vmul.f32 1.442695, %v3663_v27 }
 0x320   :  { %v6596_v2 = vpop.eup %6595  ;;  %v4038_v63 = vadd.f32 1.0, %v6594_v4  ;;  %6613 = vpow2.f32 %v3811_v10  ;;  %v3438_v58 = vpop.xlane.xlu1 %3437  ;;  %v8968_v32 = vmul.f32 %v6423_v59, %v9642_v33  ;;  %3517 = vadd.xlane.f32.xlu0 %v8777_v51  ;;  %v4578_v13 = vsel %vm4577_vm5, %v4576_v47, %v4571_v26 }
 0x321   :  { %v3114_v45 = vpop.f32.mrb[101].mxu1  ;;  %v6598_v11 = vpop.eup %6597  ;;  %6615 = vrcp.f32 %v4039_v37  ;;  %v4041_v31 = vadd.f32 1.0, %v6596_v2  ;;  %v3665_v60 = vsub.f32 0.0, %v3438_v58  ;;  %v3815_v6 = vmul.f32 1.442695, %v3662_v30 }
 0x322   :  { %v3436_v1 = vpop.xlane.xlu0 %3435  ;;  %v8971_v9 = vpop.eup %6599  ;;  %6617 = vrcp.f32 %v4038_v63  ;;  %v4040_v4 = vadd.f32 1.0, %v6598_v11  ;;  %v8975_v37 = vmul.f32 %v3114_v45, %v9644_v43  ;;  %v4585_v26 = vsel %vm4584_vm6, %v4583_v42, %v4578_v13 }
 0x323   :  { %9643 = vst [vmem:[#allocation15_spill] sm:$0xff] %v8971_v9  ;;  %v6602_v10 = vpop.eup %6601  ;;  %6619 = vrcp.f32 %v4041_v31  ;;  %v3664_v27 = vsub.f32 0.0, %v3436_v1  ;;  %v6426_v2 = vpop.f32.mrb[102].mxu1  ;;  %v3821_v33 = vmul.f32 1.442695, %v3665_v60  ;;  %v8985_v11 = vsub.s32 %v8914_v55, %v8812_v3  ;;  %v9647_v31 = vld [vmem:[#allocation53_spill] sm:$0xff] }
 0x324   :  { %v8977_v59 = vpop.eup %6603  ;;  %6621 = vrcp.f32 %v4040_v4  ;;  %v4043_v51 = vadd.f32 1.0, %v6602_v10  ;;  %v8980_v40 = vmul.f32 %v6426_v2, %v9645_v54  ;;  %v3442_v47 = vpop.xlane.xlu1 %3441  ;;  %3577 = vadd.xlane.f32.xlu0 %v3351_v39  ;;  %v8994_v42 = vsub.s32 %v8944_v34, %v8812_v3 }
 0x325   :  { %v3124_v63 = vpop.f32.mrb[103].mxu1  ;;  %6623 = vpow2.f32 %v3817_v41  ;;  %v3819_v58 = vmul.f32 1.442695, %v3664_v27  ;;  %v3667_v30 = vsub.f32 0.0, %v3442_v47  ;;  %v8998_v39 = vsub.s32 %v8947_v24, %v8812_v3 }
 0x326   :  { %9646 = vst [vmem:[#allocation16_spill] sm:$0xff] %v8980_v40  ;;  %v3440_v43 = vpop.xlane.xlu0 %3439  ;;  %v6606_v45 = vpop.eup %6605  ;;  %6625 = vrcp.f32 %v4043_v51  ;;  %v8988_v1 = vmul.f32 %v3124_v63, %v9647_v31  ;;  %v9003_v10 = vsel %vm4591_vm7, %v4590_v18, %v4585_v26  ;;  %v9007_v27 = vsub.s32 %v8955_v61, %v8812_v3  ;;  %v9651_v26 = vld [vmem:[#allocation55_spill] sm:$0xff] }
 0x327   :  { %v3666_v54 = vsub.f32 0.0, %v3440_v43  ;;  %v8990_v4 = vpop.eup %6607  ;;  %6627 = vpow2.f32 %v3815_v6  ;;  %v3825_v41 = vmul.f32 1.442695, %v3667_v30  ;;  %v6429_v13 = vpop.f32.mrb[104].mxu1  ;;  %v9649_v6 = vld [vmem:[#allocation54_spill] sm:$0xff] }
 0x328   :  { %9648 = vst [vmem:[#allocation17_spill] sm:$0xff] %v8990_v4  ;;  %v6610_v55 = vpop.eup %6609  ;;  %6629 = vpow2.f32 %v3821_v33  ;;  %v3446_v34 = vpop.xlane.xlu1 %3445  ;;  %v9010_v47 = vmul.f32 %v6429_v13, %v9649_v6 }
 0x329   :  { %v3134_v2 = vpop.f32.mrb[105].mxu1  ;;  %v6612_v51 = vpop.eup %6611  ;;  %v4042_v24 = vadd.f32 1.0, %v6610_v55  ;;  %6631 = vpow2.f32 %v3819_v58  ;;  %v3669_v63 = vsub.f32 0.0, %v3446_v34  ;;  %v3823_v18 = vmul.f32 1.442695, %v3666_v54  ;;  %v9653_v34 = vld [vmem:[#allocation56_spill] sm:$0xff] }
 0x32a   :  { %9650 = vst [vmem:[#allocation18_spill] sm:$0xff] %v9010_v47  ;;  %v3444_v30 = vpop.xlane.xlu0 %3443  ;;  %v6614_v43 = vpop.eup %6613  ;;  %v4045_v31 = vadd.f32 1.0, %v6612_v51  ;;  %6633 = vpow2.f32 %v3825_v41  ;;  %v9013_v60 = vmul.f32 %v3134_v2, %v9651_v26  ;;  %v4645_v58 = vrot.slane %v6606_v45, %v8833_v44  ;;  %v9655_v26 = vld [vmem:[#allocation57_spill] sm:$0xff] }
 0x32b   :  { %v6616_v3 = vpop.eup %6615  ;;  %6635 = vrcp.f32 %v4042_v24  ;;  %v4044_v61 = vadd.f32 1.0, %v6614_v43  ;;  %v3829_v33 = vmul.f32 1.442695, %v3669_v63  ;;  %v3668_v0 = vsub.f32 0.0, %v3444_v30  ;;  %v6432_v5 = vpop.f32.mrb[106].mxu1 }
 0x32c   :  { %9652 = vst [vmem:[#allocation19_spill] sm:$0xff] %v9013_v60  ;;  %v6618_v55 = vpop.eup %6617  ;;  %v4654_v13 = vrot.slane %v6616_v3, %v8836_v49  ;;  %6637 = vrcp.f32 %v4045_v31  ;;  %v9018_v6 = vmul.f32 %v6432_v5, %v9653_v34  ;;  %v3450_v41 = vpop.xlane.xlu1 %3449 }
 0x32d   :  { %v3144_v54 = vpop.f32.mrb[107].mxu1  ;;  %v9020_v51 = vpop.eup %6619  ;;  %v4649_v2 = vrot.slane %v6618_v55, %v8821_v56  ;;  %6639 = vrcp.f32 %v4044_v61  ;;  %v3827_v24 = vmul.f32 1.442695, %v3668_v0  ;;  %v3671_v63 = vsub.f32 0.0, %v3450_v41 }
 0x32e   :  { %9654 = vst [vmem:[#allocation20_spill] sm:$0xff] %v9018_v6  ;;  %v3448_v30 = vpop.xlane.xlu0 %3447  ;;  %v6622_v43 = vpop.eup %6621  ;;  %6641 = vpow2.f32 %v3823_v18  ;;  %v9026_v31 = vmul.f32 %v3144_v54, %v9655_v26 }
 0x32f   :  { %v3670_v5 = vsub.f32 0.0, %v3448_v30  ;;  %v6624_v3 = vpop.eup %6623  ;;  %v4650_v34 = vsel %vm4542_vm0, %v4649_v2, %v4645_v58  ;;  %v4659_v6 = vrot.slane %v6622_v43, %v8846_v35  ;;  %6643 = vpow2.f32 %v3829_v33  ;;  %v6435_v61 = vpop.f32.mrb[108].mxu1  ;;  %v9657_v2 = vld [vmem:[#allocation58_spill] sm:$0xff] }
 0x330   :  { %9656 = vst [vmem:[#allocation21_spill] sm:$0xff] %v9026_v31  ;;  %v3833_v55 = vmul.f32 1.442695, %v3671_v63  ;;  %v9030_v0 = vpop.eup %6625  ;;  %v4655_v41 = vsel %vm4549_vm1, %v4654_v13, %v4650_v34  ;;  %v4047_v47 = vadd.f32 1.0, %v6624_v3  ;;  %6645 = vpow2.f32 %v3827_v24  ;;  %v3454_v18 = vpop.xlane.xlu1 %3453  ;;  %v9659_v34 = vld [vmem:[#allocation59_spill] sm:$0xff] }
 0x331   :  { %v3831_v45 = vmul.f32 1.442695, %v3670_v5  ;;  %v3154_v60 = vpop.f32.mrb[109].mxu1  ;;  %v6628_v54 = vpop.eup %6627  ;;  %v4664_v30 = vrot.slane %v9020_v51, %v8840_v53  ;;  %v4660_v58 = vsel %vm4556_vm2, %v4659_v6, %v4655_v41  ;;  %v9037_v33 = vmul.f32 %v6435_v61, %v9657_v2  ;;  %v9661_v2 = vld [vmem:[#allocation60_spill] sm:$0xff] }
 0x332   :  { %6647 = vpow2.f32 %v3833_v55  ;;  %v3452_v63 = vpop.xlane.xlu0 %3451  ;;  %v6630_v43 = vpop.eup %6629  ;;  %v4674_v13 = vrot.slane %v9030_v0, %v8853_v57  ;;  %v4046_v24 = vadd.f32 1.0, %v6628_v54  ;;  %v3673_v26 = vsub.f32 0.0, %v3454_v18 }
 0x333   :  { %9658 = vst [vmem:[#allocation22_spill] sm:$0xff] %v9037_v33  ;;  %6649 = vrcp.f32 %v4047_v47  ;;  %v6632_v5 = vpop.eup %6631  ;;  %v4049_v3 = vadd.f32 1.0, %v6630_v43  ;;  %v9042_v31 = vmul.f32 %v3154_v60, %v9659_v34  ;;  %v3672_v51 = vsub.f32 0.0, %v3452_v63  ;;  %v6438_v6 = vpop.f32.mrb[110].mxu1 }
 0x334   :  { %6651 = vpow2.f32 %v3831_v45  ;;  %v6634_v55 = vpop.eup %6633  ;;  %v4048_v61 = vadd.f32 1.0, %v6632_v5  ;;  %v3837_v41 = vmul.f32 1.442695, %v3673_v26  ;;  %v9045_v33 = vmul.f32 %v6438_v6, %v9661_v2  ;;  %v3458_v4 = vpop.xlane.xlu1 %3457 }
 0x335   :  { %9660 = vst [vmem:[#allocation23_spill] sm:$0xff] %v9042_v31  ;;  %6653 = vrcp.f32 %v4046_v24  ;;  %v3164_v0 = vpop.f32.mrb[111].mxu1  ;;  %v6636_v47 = vpop.eup %6635  ;;  %v4051_v18 = vadd.f32 1.0, %v6634_v55  ;;  %v3835_v54 = vmul.f32 1.442695, %v3672_v51  ;;  %v3675_v45 = vsub.f32 0.0, %v3458_v4 }
 0x336   :  { %9662 = vst [vmem:[#allocation24_spill] sm:$0xff] %v9045_v33  ;;  %6655 = vrcp.f32 %v4049_v3  ;;  %v3456_v43 = vpop.xlane.xlu0 %3455  ;;  %v9047_v60 = vpop.eup %6637  ;;  %v4669_v63 = vrot.slane %v6636_v47, %v8868_v52  ;;  %v9663_v24 = vld [vmem:[#allocation61_spill] sm:$0xff]  ;;  %v4665_v2 = vsel %vm4563_vm3, %v4664_v30, %v4660_v58  ;;  %v9665_v33 = vld [vmem:[#allocation62_spill] sm:$0xff]  ;;  %v9666_v31 = vld [vmem:[#allocation63_spill] sm:$0xff] }
 0x337   :  { %6657 = vrcp.f32 %v4048_v61  ;;  %v9051_v5 = vmul.f32 %v3164_v0, %v9663_v24  ;;  %v3674_v26 = vsub.f32 0.0, %v3456_v43  ;;  %v6640_v34 = vpop.eup %6639  ;;  %v3841_v3 = vmul.f32 1.442695, %v3675_v45 }
 0x338   :  { %6659 = vrcp.f32 %v4051_v18  ;;  %v6642_v51 = vpop.eup %6641  ;;  %v4670_v4 = vsel %vm4570_vm4, %v4669_v63, %v4665_v2  ;;  %v4684_v55 = vrot.slane %v9047_v60, %v8879_v62  ;;  %v4679_v61 = vrot.slane %v6640_v34, %v8885_v38  ;;  %v6441_v0 = vpop.f32.mrb[112].mxu1 }
 0x339   :  { %9664 = vst [vmem:[#allocation25_spill] sm:$0xff] %v9051_v5  ;;  %6661 = vpow2.f32 %v3837_v41  ;;  %v3462_v47 = vpop.xlane.xlu1 %3461  ;;  %v6644_v43 = vpop.eup %6643  ;;  %v4050_v24 = vadd.f32 1.0, %v6642_v51  ;;  %v3839_v6 = vmul.f32 1.442695, %v3674_v26  ;;  %v3366_v30 = vmul.f32 %v6441_v0, %v9665_v33 }
 0x33a   :  { %6663 = vpow2.f32 %v3835_v54  ;;  %v3174_v58 = vpop.f32.mrb[113].mxu1  ;;  %v3460_v18 = vpop.xlane.xlu0 %3459  ;;  %v4675_v63 = vsel %vm4577_vm5, %v4674_v13, %v4670_v4  ;;  %v4053_v2 = vadd.f32 1.0, %v6644_v43  ;;  %v3677_v60 = vsub.f32 0.0, %v3462_v47  ;;  %v9667_v4 = vld [vmem:[#allocation64_spill] sm:$0xff] }
 0x33b   :  { %v6646_v45 = vpop.eup %6645  ;;  %6665 = vpow2.f32 %v3841_v3  ;;  %v4680_v41 = vsel %vm4584_vm6, %v4679_v61, %v4675_v63  ;;  %v3365_v51 = vmul.f32 %v3174_v58, %v9666_v31  ;;  %3607 = vadd.xlane.f32.xlu0 %v3366_v30  ;;  %v3676_v0 = vsub.f32 0.0, %v3460_v18  ;;  %v9668_v58 = vld [vmem:[#allocation65_spill] sm:$0xff] }
 0x33c   :  { %v6648_v5 = vpop.eup %6647  ;;  %6667 = vrcp.f32 %v4050_v24  ;;  %v4052_v34 = vadd.f32 1.0, %v6646_v45  ;;  %v3845_v26 = vmul.f32 1.442695, %v3677_v60  ;;  %v6444_v40 = vpop.f32.mrb[114].mxu1 }
 0x33d   :  { %v6650_v54 = vpop.eup %6649  ;;  %6669 = vrcp.f32 %v4053_v2  ;;  %v4055_v33 = vadd.f32 1.0, %v6648_v5  ;;  %v3466_v9 = vpop.xlane.xlu1 %3465  ;;  %3605 = vadd.xlane.f32.xlu1 %v3365_v51  ;;  %v9066_v47 = vmul.f32 %v6444_v40, %v9667_v4  ;;  %v3843_v5 = vmul.f32 1.442695, %v3676_v0 }
 0x33e   :  { %v6652_v13 = vpop.eup %6651  ;;  %v4694_v3 = vrot.slane %v6650_v54, %v8891_v46  ;;  %6671 = vrcp.f32 %v4052_v34  ;;  %v3679_v61 = vsub.f32 0.0, %v3466_v9  ;;  %v3184_v43 = vpop.f32.mrb[115].mxu1  ;;  %v9669_v9 = vrot.slane %v8938_v23, %v8908_v29 }
 0x33f   :  { %v3464_v24 = vpop.xlane.xlu0 %3463  ;;  %v6654_v31 = vpop.eup %6653  ;;  %6673 = vrcp.f32 %v4055_v33  ;;  %v4054_v30 = vadd.f32 1.0, %v6652_v13  ;;  %v3367_v18 = vmul.f32 %v3184_v43, %v9668_v58  ;;  %3549 = vadd.xlane.f32.xlu0 %v8829_v12  ;;  %v4611_v51 = vrot.slane %v8952_v20, %v8985_v11 }
 0x340   :  { %v6656_v45 = vpop.eup %6655  ;;  %v4689_v63 = vrot.slane %v6654_v31, %v8908_v29  ;;  %6675 = vpow2.f32 %v3839_v6  ;;  %v3849_v2 = vmul.f32 1.442695, %v3679_v61  ;;  %v3678_v60 = vsub.f32 0.0, %v3464_v24  ;;  %v6447_v6 = vpop.f32.mrb[116].mxu1 }
 0x341   :  { %v6658_v40 = vpop.eup %6657  ;;  %v9076_v34 = vsel %vm4598_vm8, %v9669_v9, %v9003_v10  ;;  %v4685_v54 = vsel %vm4591_vm7, %v4684_v55, %v4680_v41  ;;  %6677 = vrcp.f32 %v4054_v30  ;;  %v3470_v33 = vpop.xlane.xlu1 %3469  ;;  %3519 = vadd.xlane.f32.xlu1 %v8774_v8  ;;  %v4704_v43 = vrot.slane %v6656_v45, %v8928_v16  ;;  %v9670_v41 = vld [vmem:[#allocation66_spill] sm:$0xff] }
 0x342   :  { %v6660_v0 = vpop.eup %6659  ;;  %v4690_v12 = vsel %vm4598_vm8, %v4689_v63, %v4685_v54  ;;  %v4699_v13 = vrot.slane %v6658_v40, %v8985_v11  ;;  %6679 = vpow2.f32 %v3845_v26  ;;  %v3847_v23 = vmul.f32 1.442695, %v3678_v60  ;;  %v3194_v10 = vpop.f32.mrb[117].mxu1  ;;  %v9671_v40 = vld [vmem:[#allocation67_spill] sm:$0xff] }
 0x343   :  { %v3468_v4 = vpop.xlane.xlu0 %3467  ;;  %v6662_v61 = vpop.eup %6661  ;;  %v4695_v55 = vsel %vm4605_vm9, %v4694_v3, %v4690_v12  ;;  %6681 = vpow2.f32 %v3843_v5  ;;  %v9087_v24 = vmul.f32 %v6447_v6, %v9670_v41  ;;  %v4714_v30 = vrot.slane %v6660_v0, %v8994_v42  ;;  %3609 = vadd.xlane.f32.xlu0 %v3367_v18 }
 0x344   :  { %v6664_v31 = vpop.eup %6663  ;;  %v4057_v58 = vadd.f32 1.0, %v6662_v61  ;;  %6683 = vpow2.f32 %v3849_v2  ;;  %v3681_v26 = vsub.f32 0.0, %v3470_v33  ;;  %v4700_v8 = vsel %vm4612_vm10, %v4699_v13, %v4695_v55  ;;  %v6450_v3 = vpop.f32.mrb[118].mxu1  ;;  %v9672_v13 = vld [vmem:[#allocation68_spill] sm:$0xff] }
 0x345   :  { %v6666_v63 = vpop.eup %6665  ;;  %v4056_v60 = vadd.f32 1.0, %v6664_v31  ;;  %6685 = vpow2.f32 %v3847_v23  ;;  %v9092_v45 = vmul.f32 %v3194_v10, %v9671_v40  ;;  %v3474_v5 = vpop.xlane.xlu1 %3473  ;;  %v3680_v12 = vsub.f32 0.0, %v3468_v4  ;;  %3579 = vadd.xlane.f32.xlu1 %v8950_v48  ;;  %v9673_v31 = vld [vmem:[#allocation69_spill] sm:$0xff] }
 0x346   :  { %v6668_v9 = vpop.eup %6667  ;;  %6687 = vrcp.f32 %v4057_v58  ;;  %v4059_v54 = vadd.f32 1.0, %v6666_v63  ;;  %v3853_v6 = vmul.f32 1.442695, %v3681_v26  ;;  %v3204_v2 = vpop.f32.mrb[119].mxu1  ;;  %v9097_v23 = vmul.f32 %v6450_v3, %v9672_v13 }
 0x347   :  { %v3472_v33 = vpop.xlane.xlu0 %3471  ;;  %v6670_v18 = vpop.eup %6669  ;;  %v4709_v0 = vrot.slane %v6668_v9, %v8998_v39  ;;  %6689 = vrcp.f32 %v4056_v60  ;;  %v3683_v10 = vsub.f32 0.0, %v3474_v5  ;;  %v4705_v55 = vsel %vm4619_vm11, %v4704_v43, %v4700_v8  ;;  %3551 = vadd.xlane.f32.xlu0 %v8825_v7 }
 0x348   :  { %v6672_v61 = vpop.eup %6671  ;;  %6691 = vrcp.f32 %v4059_v54  ;;  %v3851_v41 = vmul.f32 1.442695, %v3680_v12  ;;  %v9101_v58 = vmul.f32 %v3204_v2, %v9673_v31  ;;  %v6453_v60 = vpop.f32.mrb[120].mxu1  ;;  %v3682_v8 = vsub.f32 0.0, %v3472_v33 }
 0x349   :  { %v6674_v48 = vpop.eup %6673  ;;  %v4710_v4 = vsel %vm9504_vm12, %v4709_v0, %v4705_v55  ;;  %v4719_v26 = vrot.slane %v6672_v61, %v9007_v27  ;;  %6693 = vpow2.f32 %v3853_v6  ;;  %v3857_v63 = vmul.f32 1.442695, %v3683_v10  ;;  %v3478_v40 = vpop.xlane.xlu1 %3477  ;;  %3521 = vadd.xlane.f32.xlu1 %v8783_v50  ;;  %v9674_v6 = vld [vmem:[#allocation70_spill] sm:$0xff] }
 0x34a   :  { %v6676_v3 = vpop.eup %6675  ;;  %v4715_v5 = vsel %vm4633_vm13, %v4714_v30, %v4710_v4  ;;  %v4733_v43 = vrot.slane %v6674_v48, %v8836_v49  ;;  %6695 = vpow2.f32 %v3851_v41  ;;  %v3214_v9 = vpop.f32.mrb[121].mxu1  ;;  %v9113_v0 = vmul.f32 %v6453_v60, %v9674_v6  ;;  %v9675_v41 = vld [vmem:[#allocation71_spill] sm:$0xff]  ;;  %v9676_v6 = vld [vmem:[#allocation72_spill] sm:$0xff] }
 0x34b   :  { %v3476_v7 = vpop.xlane.xlu0 %3475  ;;  %v6678_v54 = vpop.eup %6677  ;;  %v9110_v12 = vsel %vm4640_vm14, %v4719_v26, %v4715_v5  ;;  %v4058_v2 = vadd.f32 1.0, %v6676_v3  ;;  %6697 = vpow2.f32 %v3857_v63  ;;  %v4724_v30 = vrot.slane %v6670_v18, %v8833_v44  ;;  %3611 = vadd.xlane.f32.xlu0 %v9066_v47 }
 0x34c   :  { %v6680_v13 = vpop.eup %6679  ;;  %v4728_v10 = vrot.slane %v6678_v54, %v8821_v56  ;;  %v3855_v61 = vmul.f32 1.442695, %v3682_v8  ;;  %v3685_v33 = vsub.f32 0.0, %v3478_v40  ;;  %v9119_v31 = vmul.f32 %v3214_v9, %v9675_v41  ;;  %v6456_v4 = vpop.f32.mrb[122].mxu1 }
 0x34d   :  { %v6682_v50 = vpop.eup %6681  ;;  %6699 = vrcp.f32 %v4058_v2  ;;  %v4061_v55 = vadd.f32 1.0, %v6680_v13  ;;  %v3684_v48 = vsub.f32 0.0, %v3476_v7  ;;  %v3482_v26 = vpop.xlane.xlu1 %3481  ;;  %3581 = vadd.xlane.f32.xlu1 %v8975_v37  ;;  %v9125_v13 = vmul.f32 %v6456_v4, %v9676_v6  ;;  %v9678_v4 = vld [vmem:[#allocation74_spill] sm:$0xff] }
 0x34e   :  { %v6684_v63 = vpop.eup %6683  ;;  %v4729_v60 = vsel %vm4542_vm0, %v4728_v10, %v4724_v30  ;;  %v4060_v3 = vadd.f32 1.0, %v6682_v50  ;;  %6701 = vpow2.f32 %v3855_v61  ;;  %v3861_v18 = vmul.f32 1.442695, %v3685_v33  ;;  %v3224_v40 = vpop.f32.mrb[123].mxu1  ;;  %v9677_v61 = vld [vmem:[#allocation73_spill] sm:$0xff] }
 0x34f   :  { %v3480_v5 = vpop.xlane.xlu0 %3479  ;;  %v6686_v47 = vpop.eup %6685  ;;  %v4734_v8 = vsel %vm4549_vm1, %v4733_v43, %v4729_v60  ;;  %6703 = vrcp.f32 %v4061_v55  ;;  %v4063_v54 = vadd.f32 1.0, %v6684_v63  ;;  %v3859_v9 = vmul.f32 1.442695, %v3684_v48  ;;  %3553 = vadd.xlane.f32.xlu0 %v8849_v25 }
 0x350   :  { %v6688_v2 = vpop.eup %6687  ;;  %6705 = vrcp.f32 %v4060_v3  ;;  %v4062_v7 = vadd.f32 1.0, %v6686_v47  ;;  %v3687_v30 = vsub.f32 0.0, %v3482_v26  ;;  %v9130_v33 = vmul.f32 %v3224_v40, %v9677_v61  ;;  %v6459_v50 = vpop.f32.mrb[124].mxu1 }
 0x351   :  { %v6690_v10 = vpop.eup %6689  ;;  %v4743_v37 = vrot.slane %v6688_v2, %v8840_v53  ;;  %6707 = vrcp.f32 %v4063_v54  ;;  %v3686_v43 = vsub.f32 0.0, %v3480_v5  ;;  %v3486_v55 = vpop.xlane.xlu1 %3485  ;;  %3523 = vadd.xlane.f32.xlu1 %v8780_v19  ;;  %v9135_v26 = vmul.f32 %v6459_v50, %v9678_v4 }
 0x352   :  { %v6692_v41 = vpop.eup %6691  ;;  %v4738_v48 = vrot.slane %v6690_v10, %v8846_v35  ;;  %6709 = vrcp.f32 %v4062_v7  ;;  %v3865_v63 = vmul.f32 1.442695, %v3687_v30  ;;  %v3234_v25 = vpop.f32.mrb[125].mxu1  ;;  %v3689_v5 = vsub.f32 0.0, %v3486_v55  ;;  %v9679_v7 = vld [vmem:[#allocation75_spill] sm:$0xff] }
 0x353   :  { %v3484_v60 = vpop.xlane.xlu0 %3483  ;;  %v6694_v3 = vpop.eup %6693  ;;  %v4753_v47 = vrot.slane %v6692_v41, %v8853_v57  ;;  %6711 = vpow2.f32 %v3861_v18  ;;  %v3863_v40 = vmul.f32 1.442695, %v3686_v43  ;;  %v9140_v30 = vmul.f32 %v3234_v25, %v9679_v7  ;;  %3613 = vadd.xlane.f32.xlu0 %v9092_v45  ;;  %v9680_v25 = vld [vmem:[#allocation76_spill] sm:$0xff] }
 0x354   :  { %v6696_v54 = vpop.eup %6695  ;;  %v4739_v2 = vsel %vm4556_vm2, %v4738_v48, %v4734_v8  ;;  %v4065_v6 = vadd.f32 1.0, %v6694_v3  ;;  %6713 = vpow2.f32 %v3859_v9  ;;  %v3869_v50 = vmul.f32 1.442695, %v3689_v5  ;;  %v6462_v41 = vpop.f32.mrb[126].mxu1 }
 0x355   :  { %v6698_v19 = vpop.eup %6697  ;;  %v4744_v10 = vsel %vm4563_vm3, %v4743_v37, %v4739_v2  ;;  %v4064_v61 = vadd.f32 1.0, %v6696_v54  ;;  %6715 = vpow2.f32 %v3865_v63  ;;  %v3490_v18 = vpop.xlane.xlu1 %3489  ;;  %v3688_v55 = vsub.f32 0.0, %v3484_v60  ;;  %3583 = vadd.xlane.f32.xlu1 %v8968_v32 }
 0x356   :  { %6717 = vrcp.f32 %v4065_v6  ;;  %v4067_v43 = vadd.f32 1.0, %v6698_v19  ;;  %v9146_v8 = vmul.f32 %v6462_v41, %v8659_v14  ;;  %v3244_v9 = vpop.f32.mrb[127].mxu1  ;;  %v3691_v45 = vsub.f32 0.0, %v3490_v18 }
 0x357   :  { %v3488_v48 = vpop.xlane.xlu0 %3487  ;;  %v6700_v4 = vpop.eup %6699  ;;  %6719 = vrcp.f32 %v4064_v61  ;;  %v9149_v37 = vmul.f32 %v3244_v9, %v9680_v25  ;;  %v9681_v5 = vrot.slane %v8930_v28, %v8891_v46  ;;  %v3867_v14 = vmul.f32 1.442695, %v3688_v55  ;;  %3555 = vadd.xlane.f32.xlu0 %v8843_v22 }
 0x358   :  { %v3690_v63 = vsub.f32 0.0, %v3488_v48  ;;  %v6702_v3 = vpop.eup %6701  ;;  %v4748_v32 = vrot.slane %v6700_v4, %v8868_v52  ;;  %6721 = vrcp.f32 %v4067_v43  ;;  %v3873_v6 = vmul.f32 1.442695, %v3691_v45 }
 0x359   :  { %v4606_v60 = vsel %vm4605_vm9, %v9681_v5, %v9076_v34  ;;  %v6704_v54 = vpop.eup %6703  ;;  %v4066_v2 = vadd.f32 1.0, %v6702_v3  ;;  %6723 = vpow2.f32 %v3863_v40  ;;  %v3494_v19 = vpop.xlane.xlu1 %3493  ;;  %3525 = vadd.xlane.f32.xlu1 %v8789_v21 }
 0x35a   :  { %v3871_v7 = vmul.f32 1.442695, %v3690_v63  ;;  %v6706_v61 = vpop.eup %6705  ;;  %v4749_v41 = vsel %vm4570_vm4, %v4748_v32, %v4744_v10  ;;  %v4763_v18 = vrot.slane %v6704_v54, %v8879_v62  ;;  %6725 = vpow2.f32 %v3869_v50 }
 0x35b   :  { %v3693_v28 = vsub.f32 0.0, %v3494_v19  ;;  %v3492_v34 = vpop.xlane.xlu0 %3491  ;;  %v6708_v43 = vpop.eup %6707  ;;  %v4754_v55 = vsel %vm4577_vm5, %v4753_v47, %v4749_v41  ;;  %v4758_v22 = vrot.slane %v6706_v61, %v8885_v38  ;;  %6727 = vrcp.f32 %v4066_v2  ;;  %3615 = vadd.xlane.f32.xlu0 %v9087_v24 }
 0x35c   :  { %v3692_v40 = vsub.f32 0.0, %v3492_v34  ;;  %v6710_v9 = vpop.eup %6709  ;;  %v4613_v10 = vsel %vm4612_vm10, %v4611_v51, %v4606_v60  ;;  %v4773_v48 = vrot.slane %v6708_v43, %v8891_v46  ;;  %6729 = vpow2.f32 %v3867_v14 }
 0x35d   :  { %v3877_v50 = vmul.f32 1.442695, %v3693_v28  ;;  %v6712_v21 = vpop.eup %6711  ;;  %v4759_v4 = vsel %vm4584_vm6, %v4758_v22, %v4754_v55  ;;  %v4768_v47 = vrot.slane %v6710_v9, %v8908_v29  ;;  %6731 = vpow2.f32 %v3873_v6  ;;  %v3498_v25 = vpop.xlane.xlu1 %3497  ;;  %3585 = vadd.xlane.f32.xlu1 %v8988_v1 }
 0x35e   :  { %v3875_v45 = vmul.f32 1.442695, %v3692_v40  ;;  %v6714_v63 = vpop.eup %6713  ;;  %v4764_v3 = vsel %vm4591_vm7, %v4763_v18, %v4759_v4  ;;  %v4069_v20 = vadd.f32 1.0, %v6712_v21  ;;  %6733 = vpow2.f32 %v3871_v7 }
 0x35f   :  { %v3695_v51 = vsub.f32 0.0, %v3498_v25  ;;  %v3496_v5 = vpop.xlane.xlu0 %3495  ;;  %v6716_v60 = vpop.eup %6715  ;;  %v4769_v24 = vsel %vm4598_vm8, %v4768_v47, %v4764_v3  ;;  %v4068_v32 = vadd.f32 1.0, %v6714_v63  ;;  %6735 = vpow2.f32 %v3877_v50  ;;  %3557 = vadd.xlane.f32.xlu0 %v8862_v17 }
 0x360   :  { %v3694_v14 = vsub.f32 0.0, %v3496_v5  ;;  %v6718_v54 = vpop.eup %6717  ;;  %v4774_v2 = vsel %vm4605_vm9, %v4773_v48, %v4769_v24  ;;  %6737 = vrcp.f32 %v4069_v20  ;;  %v4071_v6 = vadd.f32 1.0, %v6716_v60  ;;  %v9684_v20 = vld [vmem:[#allocation16_spill] sm:$0xff] }
 0x361   :  { %v3881_v19 = vmul.f32 1.442695, %v3695_v51  ;;  %v6720_v61 = vpop.eup %6719  ;;  %v4783_v7 = vrot.slane %v6718_v54, %v8928_v16  ;;  %6739 = vrcp.f32 %v4068_v32  ;;  %v3502_v41 = vpop.xlane.xlu1 %3501  ;;  %3527 = vadd.xlane.f32.xlu1 %v8786_v15  ;;  %v9682_v22 = vrot.slane %v8941_v36, %v8928_v16  ;;  %v9685_v54 = vld [vmem:[#allocation17_spill] sm:$0xff] }
 0x362   :  { %v3879_v1 = vmul.f32 1.442695, %v3694_v14  ;;  %v6722_v18 = vpop.eup %6721  ;;  %v4778_v28 = vrot.slane %v6720_v61, %v8985_v11  ;;  %6741 = vrcp.f32 %v4071_v6  ;;  %v3697_v34 = vsub.f32 0.0, %v3502_v41  ;;  %v9686_v61 = vld [vmem:[#allocation8_spill] sm:$0xff] }
 0x363   :  { %v3500_v43 = vpop.xlane.xlu0 %3499  ;;  %v6724_v55 = vpop.eup %6723  ;;  %v4620_v17 = vsel %vm4619_vm11, %v9682_v22, %v4613_v10  ;;  %v4625_v40 = vrot.slane %v8977_v59, %v8998_v39  ;;  %v4793_v9 = vrot.slane %v6722_v18, %v8994_v42  ;;  %6743 = vpow2.f32 %v3875_v45  ;;  %3617 = vadd.xlane.f32.xlu0 %v9101_v58  ;;  %v9683_v59 = vld [vmem:[#allocation15_spill] sm:$0xff] }
 0x364   :  { %v6726_v48 = vpop.eup %6725  ;;  %v4779_v50 = vsel %vm4612_vm10, %v4778_v28, %v4774_v2  ;;  %v4070_v21 = vadd.f32 1.0, %v6724_v55  ;;  %6745 = vpow2.f32 %v3881_v19  ;;  %v3885_v15 = vmul.f32 1.442695, %v3697_v34  ;;  %v9687_v22 = vld [vmem:[#allocation3_spill] sm:$0xff] }
 0x365   :  { %v6728_v4 = vpop.eup %6727  ;;  %v4784_v47 = vsel %vm4619_vm11, %v4783_v7, %v4779_v50  ;;  %v4073_v36 = vadd.f32 1.0, %v6726_v48  ;;  %6747 = vpow2.f32 %v3879_v1  ;;  %v3696_v10 = vsub.f32 0.0, %v3500_v43  ;;  %v3506_v25 = vpop.xlane.xlu1 %3505  ;;  %3587 = vadd.xlane.f32.xlu1 %v9684_v20  ;;  %v9688_v20 = vld [vmem:[#allocation19_spill] sm:$0xff] }
 0x366   :  { %v6730_v63 = vpop.eup %6729  ;;  %v4632_v3 = vrot.slane %v9683_v59, %v8994_v42  ;;  %v4788_v45 = vrot.slane %v6728_v4, %v8998_v39  ;;  %6749 = vrcp.f32 %v4070_v21  ;;  %v3699_v51 = vsub.f32 0.0, %v3506_v25 }
 0x367   :  { %v3504_v5 = vpop.xlane.xlu0 %3503  ;;  %v6732_v60 = vpop.eup %6731  ;;  %v4627_v58 = vsel %vm9504_vm12, %v4625_v40, %v4620_v17  ;;  %6751 = vrcp.f32 %v4073_v36  ;;  %v4072_v24 = vadd.f32 1.0, %v6730_v63  ;;  %v4639_v2 = vrot.slane %v9685_v54, %v9007_v27  ;;  %3559 = vadd.xlane.f32.xlu0 %v9686_v61 }
 0x368   :  { %v3698_v32 = vsub.f32 0.0, %v3504_v5  ;;  %v6734_v14 = vpop.eup %6733  ;;  %v4789_v6 = vsel %vm9504_vm12, %v4788_v45, %v4784_v47  ;;  %v4075_v19 = vadd.f32 1.0, %v6732_v60  ;;  %6753 = vpow2.f32 %v3885_v15 }
 0x369   :  { %v6736_v7 = vpop.eup %6735  ;;  %v4794_v1 = vsel %vm4633_vm13, %v4793_v9, %v4789_v6  ;;  %6755 = vrcp.f32 %v4072_v24  ;;  %v4074_v41 = vadd.f32 1.0, %v6734_v14  ;;  %v3883_v18 = vmul.f32 1.442695, %v3696_v10  ;;  %v3510_v28 = vpop.xlane.xlu1 %3509  ;;  %3529 = vadd.xlane.f32.xlu1 %v9687_v22 }
 0x36a   :  { %v6738_v34 = vpop.eup %6737  ;;  %6757 = vrcp.f32 %v4075_v19  ;;  %v4077_v43 = vadd.f32 1.0, %v6736_v7  ;;  %v3889_v55 = vmul.f32 1.442695, %v3699_v51  ;;  %v3701_v17 = vsub.f32 0.0, %v3510_v28  ;;  %v9690_v28 = vld [vmem:[#allocation2_spill] sm:$0xff] }
 0x36b   :  { %v3508_v40 = vpop.xlane.xlu0 %3507  ;;  %v6740_v48 = vpop.eup %6739  ;;  %v4634_v50 = vsel %vm4633_vm13, %v4632_v3, %v4627_v58  ;;  %vm5197_vm12 = vcmask 1042434   ;;  %6759 = vrcp.f32 %v4074_v41  ;;  %v3887_v21 = vmul.f32 1.442695, %v3698_v32  ;;  %3619 = vadd.xlane.f32.xlu0 %v9097_v23 }
 0x36c   :  { %v6742_v15 = vpop.eup %6741  ;;  %v4641_v9 = vsel %vm4640_vm14, %v4639_v2, %v4634_v50  ;;  %v4798_v4 = vrot.slane %v6740_v48, %v9007_v27  ;;  %6761 = vrcp.f32 %v4077_v43  ;;  %v3700_v47 = vsub.f32 0.0, %v3508_v40  ;;  %v9689_v2 = vld [vmem:[#allocation10_spill] sm:$0xff] }
 0x36d   :  { %v6744_v36 = vpop.eup %6743  ;;  %v5196_v10 = vsel %vm5195_vm15, %v9110_v12, %v4641_v9  ;;  %6763 = vpow2.f32 %v3883_v18  ;;  %v3893_v25 = vmul.f32 1.442695, %v3701_v17  ;;  %v3514_v63 = vpop.xlane.xlu1 %3513  ;;  %3589 = vadd.xlane.f32.xlu1 %v9688_v20  ;;  %v4812_v32 = vrot.slane %v6742_v15, %v8836_v49 }
 0x36e   :  { %v6746_v59 = vpop.eup %6745  ;;  %v4799_v3 = vsel %vm4640_vm14, %v4798_v4, %v4794_v1  ;;  %v4076_v45 = vadd.f32 1.0, %v6744_v36  ;;  %6765 = vpow2.f32 %v3889_v55  ;;  %v3703_v51 = vsub.f32 0.0, %v3514_v63 }
 0x36f   :  { %v3512_v5 = vpop.xlane.xlu0 %3511  ;;  %v6748_v60 = vpop.eup %6747  ;;  %v9209_v58 = vsel %vm5197_vm12, %v4799_v3, %v5196_v10  ;;  %v4079_v23 = vadd.f32 1.0, %v6746_v59  ;;  %6767 = vpow2.f32 %v3887_v21  ;;  %v3891_v54 = vmul.f32 1.442695, %v3700_v47  ;;  %3561 = vadd.xlane.f32.xlu0 %v9689_v2  ;;  %v9691_v10 = vld [vmem:[#allocation18_spill] sm:$0xff] }
 0x370   :  { %v3702_v24 = vsub.f32 0.0, %v3512_v5  ;;  %v6750_v12 = vpop.eup %6749  ;;  %6769 = vrcp.f32 %v4076_v45  ;;  %v4078_v14 = vadd.f32 1.0, %v6748_v60  ;;  %v4803_v19 = vrot.slane %v6738_v34, %v8833_v44  ;;  %v9692_v45 = vld [vmem:[#allocation9_spill] sm:$0xff] }
 0x371   :  { %v6752_v6 = vpop.eup %6751  ;;  %v4807_v61 = vrot.slane %v6750_v12, %v8821_v56  ;;  %6771 = vrcp.f32 %v4079_v23  ;;  %v3897_v41 = vmul.f32 1.442695, %v3703_v51  ;;  %3531 = vadd.xlane.f32.xlu1 %v9690_v28  ;;  %v9693_v12 = vld [vmem:[#allocation5_spill] sm:$0xff]  ;;  %vm9699_vm12 = vcmask 917312  }
 0x372   :  { %v6754_v7 = vpop.eup %6753  ;;  %v4822_v1 = vrot.slane %v6752_v6, %v8840_v53  ;;  %6773 = vrcp.f32 %v4078_v14  ;;  %v3895_v18 = vmul.f32 1.442695, %v3702_v24  ;;  %vm5199_vm15 = vcmask 1043459  }
 0x373   :  { %v3516_v43 = vpop.xlane.xlu0 %3515  ;;  %v6756_v55 = vpop.eup %6755  ;;  %v4808_v22 = vsel %vm4542_vm0, %v4807_v61, %v4803_v19  ;;  %v4081_v17 = vadd.f32 1.0, %v6754_v7  ;;  %6775 = vpow2.f32 %v3893_v25  ;;  %3621 = vadd.xlane.f32.xlu0 %v9119_v31 }
 0x374   :  { %v3704_v40 = vsub.f32 0.0, %v3516_v43  ;;  %v6758_v48 = vpop.eup %6757  ;;  %v4813_v34 = vsel %vm4549_vm1, %v4812_v32, %v4808_v22  ;;  %v4817_v50 = vrot.slane %v6756_v55, %v8846_v35  ;;  %6777 = vpow2.f32 %v3891_v54 }
 0x375   :  { %v6760_v21 = vpop.eup %6759  ;;  %v4832_v15 = vrot.slane %v6758_v48, %v8853_v57  ;;  %6779 = vrcp.f32 %v4081_v17  ;;  %3591 = vadd.xlane.f32.xlu1 %v9691_v10 }
 0x376   :  { %v3899_v9 = vmul.f32 1.442695, %v3704_v40  ;;  %v6762_v4 = vpop.eup %6761  ;;  %v4818_v47 = vsel %vm4556_vm2, %v4817_v50, %v4813_v34  ;;  %v4827_v36 = vrot.slane %v6760_v21, %v8868_v52  ;;  %6781 = vpow2.f32 %v3897_v41  ;;  %v9695_v40 = vld [vmem:[#allocation12_spill] sm:$0xff] }
 0x377   :  { %v6764_v25 = vpop.eup %6763  ;;  %v4823_v63 = vsel %vm4563_vm3, %v4822_v1, %v4818_v47  ;;  %6783 = vpow2.f32 %v3895_v18  ;;  %3563 = vadd.xlane.f32.xlu0 %v9692_v45  ;;  %v4842_v23 = vrot.slane %v6762_v4, %v8879_v62  ;;  %v9694_v18 = vld [vmem:[#allocation21_spill] sm:$0xff]  ;;  %v9696_v21 = vld [vmem:[#allocation4_spill] sm:$0xff]  ;;  %v9698_v45 = vld [vmem:[#allocation11_spill] sm:$0xff] }
 0x378   :  { %v6766_v59 = vpop.eup %6765  ;;  %v4828_v31 = vsel %vm4570_vm4, %v4827_v36, %v4823_v63  ;;  %v4080_v3 = vadd.f32 1.0, %v6764_v25  ;;  %6785 = vpow2.f32 %v3899_v9  ;;  %v9697_v63 = vld [vmem:[#allocation20_spill] sm:$0xff] }
 0x379   :  { %v6768_v20 = vpop.eup %6767  ;;  %v4833_v51 = vsel %vm4577_vm5, %v4832_v15, %v4828_v31  ;;  %v4083_v5 = vadd.f32 1.0, %v6766_v59  ;;  %3533 = vadd.xlane.f32.xlu1 %v9693_v12 }
 0x37a   :  { %v6770_v60 = vpop.eup %6769  ;;  %6787 = vrcp.f32 %v4080_v3  ;;  %v4082_v24 = vadd.f32 1.0, %v6768_v20 }
 0x37b   :  { %v6772_v32 = vpop.eup %6771  ;;  %v4837_v14 = vrot.slane %v6770_v60, %v8885_v38  ;;  %6789 = vrcp.f32 %v4083_v5  ;;  %3623 = vadd.xlane.f32.xlu0 %v9113_v0 }
 0x37c   :  { %v6774_v54 = vpop.eup %6773  ;;  %v4852_v2 = vrot.slane %v6772_v32, %v8891_v46  ;;  %6791 = vrcp.f32 %v4082_v24 }
 0x37d   :  { %v6776_v6 = vpop.eup %6775  ;;  %v4838_v19 = vsel %vm4584_vm6, %v4837_v14, %v4833_v51  ;;  %v4847_v61 = vrot.slane %v6774_v54, %v8908_v29  ;;  %3593 = vadd.xlane.f32.xlu1 %v9694_v18 }
 0x37e   :  { %v6778_v7 = vpop.eup %6777  ;;  %v4843_v1 = vsel %vm4591_vm7, %v4842_v23, %v4838_v19  ;;  %v4085_v41 = vadd.f32 1.0, %v6776_v6  ;;  %v9700_v23 = vld [vmem:[#allocation7_spill] sm:$0xff] }
 0x37f   :  { %v6780_v28 = vpop.eup %6779  ;;  %v4848_v43 = vsel %vm4598_vm8, %v4847_v61, %v4843_v1  ;;  %v4084_v55 = vadd.f32 1.0, %v6778_v7  ;;  %3565 = vadd.xlane.f32.xlu0 %v9695_v40  ;;  %v9702_v40 = vld [vmem:[#allocation14_spill] sm:$0xff] }
 0x380   :  { %v6782_v22 = vpop.eup %6781  ;;  %v4853_v17 = vsel %vm4605_vm9, %v4852_v2, %v4848_v43  ;;  %v4862_v4 = vrot.slane %v6780_v28, %v8928_v16 }
 0x381   :  { %v6784_v0 = vpop.eup %6783  ;;  %6793 = vrcp.f32 %v4084_v55  ;;  %v4087_v48 = vadd.f32 1.0, %v6782_v22  ;;  %3535 = vadd.xlane.f32.xlu1 %v9696_v21 }
 0x382   :  { %v6786_v34 = vpop.eup %6785  ;;  %6795 = vrcp.f32 %v4085_v41  ;;  %v4086_v50 = vadd.f32 1.0, %v6784_v0  ;;  %v9701_v41 = vld [vmem:[#allocation23_spill] sm:$0xff] }
 0x383   :  { %6797 = vrcp.f32 %v4087_v48  ;;  %v4088_v15 = vadd.f32 1.0, %v6786_v34  ;;  %3625 = vadd.xlane.f32.xlu0 %v9130_v33  ;;  %v9703_v34 = vld [vmem:[#allocation6_spill] sm:$0xff] }
 0x384   :  { %v6788_v9 = vpop.eup %6787  ;;  %6799 = vrcp.f32 %v4086_v50 }
 0x385   :  { %v6790_v47 = vpop.eup %6789  ;;  %v4857_v36 = vrot.slane %v6788_v9, %v8985_v11  ;;  %6801 = vrcp.f32 %v4088_v15  ;;  %3595 = vadd.xlane.f32.xlu1 %v9697_v63 }
 0x386   :  { %v6792_v10 = vpop.eup %6791  ;;  %v4872_v25 = vrot.slane %v6790_v47, %v8994_v42 }
 0x387   :  { %v4858_v59 = vsel %vm4612_vm10, %v4857_v36, %v4853_v17  ;;  %v4867_v31 = vrot.slane %v6792_v10, %v8998_v39  ;;  %3567 = vadd.xlane.f32.xlu0 %v9698_v45  ;;  %v3544_v20 = vpop.xlane.xlu0 %3543  ;;  %v9706_v36 = vld [vmem:[#allocation13_spill] sm:$0xff] }
 0x388   :  { %v4863_v3 = vsel %vm4619_vm11, %v4862_v4, %v4858_v59  ;;  %v3718_v51 = vsub.f32 0.0, %v3544_v20  ;;  %v3542_v5 = vpop.xlane.xlu1 %3541  ;;  %v9705_v4 = vld [vmem:[#allocation25_spill] sm:$0xff] }
 0x389   :  { %v4868_v33 = vsel %vm9699_vm12, %v4867_v31, %v4863_v3  ;;  %3537 = vadd.xlane.f32.xlu1 %v9700_v23  ;;  %v3717_v24 = vsub.f32 0.0, %v3542_v5 }
 0x38a   :  { %v4873_v60 = vsel %vm4633_vm13, %v4872_v25, %v4868_v33  ;;  %v3927_v32 = vmul.f32 1.442695, %v3718_v51  ;;  %v9707_v25 = vld [vmem:[#allocation24_spill] sm:$0xff] }
 0x38b   :  { %v6794_v12 = vpop.eup %6793  ;;  %v3925_v2 = vmul.f32 1.442695, %v3717_v24  ;;  %3627 = vadd.xlane.f32.xlu0 %v9125_v13 }
 0x38c   :  { %v6796_v14 = vpop.eup %6795  ;;  %v4877_v54 = vrot.slane %v6794_v12, %v9007_v27  ;;  %6803 = vpow2.f32 %v3927_v32  ;;  %v3546_v19 = vpop.xlane.xlu1 %3545 }
 0x38d   :  { %v6798_v6 = vpop.eup %6797  ;;  %6805 = vpow2.f32 %v3925_v2  ;;  %3597 = vadd.xlane.f32.xlu1 %v9701_v41  ;;  %v3719_v18 = vsub.f32 0.0, %v3546_v19  ;;  %v4882_v43 = vrot.slane %v6796_v14, %v8833_v44 }
 0x38e   :  { %v6800_v61 = vpop.eup %6799  ;;  %v4878_v7 = vsel %vm4640_vm14, %v4877_v54, %v4873_v60  ;;  %v4891_v1 = vrot.slane %v6798_v6, %v8836_v49 }
 0x38f   :  { %v6802_v28 = vpop.eup %6801  ;;  %v9261_v55 = vsel %vm5199_vm15, %v4878_v7, %v9209_v58  ;;  %v4886_v13 = vrot.slane %v6800_v61, %v8821_v56  ;;  %v3929_v17 = vmul.f32 1.442695, %v3719_v18  ;;  %3569 = vadd.xlane.f32.xlu0 %v9702_v40  ;;  %v9704_v58 = vld [vmem:[#allocation22_spill] sm:$0xff] }
 0x390   :  { %v4896_v22 = vrot.slane %v6802_v28, %v8846_v35 }
 0x391   :  { %v4887_v0 = vsel %vm4542_vm0, %v4886_v13, %v4882_v43  ;;  %6807 = vpow2.f32 %v3929_v17  ;;  %3539 = vadd.xlane.f32.xlu1 %v9703_v34 }
 0x392   :  { %v4892_v48 = vsel %vm4549_vm1, %v4891_v1, %v4887_v0 }
 0x393   :  { %v9270_v50 = vsel %vm4556_vm2, %v4896_v22, %v4892_v48  ;;  %3629 = vadd.xlane.f32.xlu0 %v9140_v30 }
 0x395   :  { %3599 = vadd.xlane.f32.xlu1 %v9704_v58 }
 0x396   :  { %v6804_v21 = vpop.eup %6803 }
 0x397   :  { %v6806_v15 = vpop.eup %6805  ;;  %v4102_v9 = vadd.f32 1.0, %v6804_v21  ;;  %3601 = vadd.xlane.f32.xlu0 %v9705_v4 }
 0x398   :  { %v4101_v47 = vadd.f32 1.0, %v6806_v15 }
 0x399   :  { %6809 = vrcp.f32 %v4102_v9  ;;  %3571 = vadd.xlane.f32.xlu1 %v9706_v36 }
 0x39a   :  { %6811 = vrcp.f32 %v4101_v47 }
 0x39b   :  { %v6808_v10 = vpop.eup %6807  ;;  %3603 = vadd.xlane.f32.xlu0 %v9707_v25 }
 0x39c   :  { %v4103_v63 = vadd.f32 1.0, %v6808_v10 }
 0x39d   :  { %3631 = vadd.xlane.f32.xlu1 %v9135_v26 }
 0x39e   :  { %6813 = vrcp.f32 %v4103_v63 }
 0x39f   :  { %3635 = vadd.xlane.f32.xlu0 %v9146_v8 }
 0x3a1   :  { %3633 = vadd.xlane.f32.xlu1 %v9149_v37 }
 0x3a3   :  { %v6810_v30 = vpop.eup %6809 }
 0x3a4   :  { %v6812_v59 = vpop.eup %6811  ;;  %v4965_v31 = vrot.slane %v6810_v30, %v8821_v56 }
 0x3a5   :  { %v4961_v3 = vrot.slane %v6812_v59, %v8833_v44 }
 0x3a7   :  { %v4966_v45 = vsel %vm4542_vm0, %v4965_v31, %v4961_v3  ;;  %v3576_v20 = vpop.xlane.xlu1 %3575 }
 0x3a8   :  { %v6814_v33 = vpop.eup %6813  ;;  %v3734_v51 = vsub.f32 0.0, %v3576_v20 }
 0x3a9   :  { %v4970_v5 = vrot.slane %v6814_v33, %v8836_v49  ;;  %v3574_v26 = vpop.xlane.xlu0 %3573 }
 0x3aa   :  { %v3959_v60 = vmul.f32 1.442695, %v3734_v51  ;;  %v3733_v8 = vsub.f32 0.0, %v3574_v26 }
 0x3ab   :  { %v4971_v23 = vsel %vm4549_vm1, %v4970_v5, %v4966_v45  ;;  %v3548_v24 = vpop.xlane.xlu1 %3547 }
 0x3ac   :  { %6815 = vpow2.f32 %v3959_v60  ;;  %v3720_v37 = vsub.f32 0.0, %v3548_v24  ;;  %v3957_v12 = vmul.f32 1.442695, %v3733_v8 }
 0x3ad   :  { %v3518_v14 = vpop.xlane.xlu0 %3517 }
 0x3ae   :  { %v3931_v32 = vmul.f32 1.442695, %v3720_v37  ;;  %6817 = vpow2.f32 %v3957_v12  ;;  %v3705_v54 = vsub.f32 0.0, %v3518_v14 }
 0x3b0   :  { %6819 = vpow2.f32 %v3931_v32  ;;  %v3901_v2 = vmul.f32 1.442695, %v3705_v54 }
 0x3b1   :  { %v3578_v6 = vpop.xlane.xlu0 %3577 }
 0x3b2   :  { %6821 = vpow2.f32 %v3901_v2  ;;  %v3735_v19 = vsub.f32 0.0, %v3578_v6 }
 0x3b4   :  { %v3961_v61 = vmul.f32 1.442695, %v3735_v19 }
 0x3b6   :  { %v6816_v7 = vpop.eup %6815  ;;  %6823 = vpow2.f32 %v3961_v61 }
 0x3b7   :  { %v4118_v1 = vadd.f32 1.0, %v6816_v7 }
 0x3b8   :  { %v6818_v41 = vpop.eup %6817 }
 0x3b9   :  { %6825 = vrcp.f32 %v4118_v1  ;;  %v4117_v28 = vadd.f32 1.0, %v6818_v41 }
 0x3ba   :  { %v6820_v18 = vpop.eup %6819 }
 0x3bb   :  { %v4104_v43 = vadd.f32 1.0, %v6820_v18  ;;  %6827 = vrcp.f32 %v4117_v28 }
 0x3bc   :  { %v6822_v13 = vpop.eup %6821 }
 0x3bd   :  { %6829 = vrcp.f32 %v4104_v43  ;;  %v4089_v22 = vadd.f32 1.0, %v6822_v13 }
 0x3bf   :  { %6831 = vrcp.f32 %v4089_v22 }
 0x3c0   :  { %v6824_v17 = vpop.eup %6823 }
 0x3c1   :  { %v4119_v40 = vadd.f32 1.0, %v6824_v17 }
 0x3c3   :  { %v6826_v0 = vpop.eup %6825  ;;  %6833 = vrcp.f32 %v4119_v40 }
 0x3c4   :  { %v5044_v48 = vrot.slane %v6826_v0, %v8821_v56 }
 0x3c5   :  { %v6828_v34 = vpop.eup %6827 }
 0x3c6   :  { %v5040_v21 = vrot.slane %v6828_v34, %v8833_v44 }
 0x3c7   :  { %v6830_v58 = vpop.eup %6829 }
 0x3c8   :  { %v4975_v15 = vrot.slane %v6830_v58, %v8846_v35  ;;  %v3608_v9 = vpop.xlane.xlu0 %3607  ;;  %v5045_v4 = vsel %vm4542_vm0, %v5044_v48, %v5040_v21 }
 0x3c9   :  { %v3750_v47 = vsub.f32 0.0, %v3608_v9  ;;  %v6832_v36 = vpop.eup %6831 }
 0x3ca   :  { %v9290_v10 = vsel %vm4556_vm2, %v4975_v15, %v4971_v23  ;;  %v3606_v25 = vpop.xlane.xlu1 %3605  ;;  %v4901_v63 = vrot.slane %v6832_v36, %v8840_v53 }
 0x3cb   :  { %v3991_v30 = vmul.f32 1.442695, %v3750_v47  ;;  %v3749_v59 = vsub.f32 0.0, %v3606_v25 }
 0x3cc   :  { %v3550_v31 = vpop.xlane.xlu0 %3549  ;;  %v9295_v3 = vsel %vm4563_vm3, %v4901_v63, %v9270_v50 }
 0x3cd   :  { %6835 = vpow2.f32 %v3991_v30  ;;  %v3989_v45 = vmul.f32 1.442695, %v3749_v59  ;;  %v3721_v20 = vsub.f32 0.0, %v3550_v31  ;;  %v6834_v33 = vpop.eup %6833 }
 0x3ce   :  { %v3520_v51 = vpop.xlane.xlu1 %3519  ;;  %v5049_v5 = vrot.slane %v6834_v33, %v8836_v49 }
 0x3cf   :  { %6837 = vpow2.f32 %v3989_v45  ;;  %v3933_v60 = vmul.f32 1.442695, %v3721_v20  ;;  %v3706_v26 = vsub.f32 0.0, %v3520_v51 }
 0x3d0   :  { %v3610_v23 = vpop.xlane.xlu0 %3609  ;;  %v9299_v8 = vsel %vm4549_vm1, %v5049_v5, %v5045_v4 }
 0x3d1   :  { %6839 = vpow2.f32 %v3933_v60  ;;  %v3903_v24 = vmul.f32 1.442695, %v3706_v26  ;;  %v3751_v37 = vsub.f32 0.0, %v3610_v23 }
 0x3d2   :  { %v3580_v12 = vpop.xlane.xlu1 %3579 }
 0x3d3   :  { %6841 = vpow2.f32 %v3903_v24  ;;  %v3993_v50 = vmul.f32 1.442695, %v3751_v37  ;;  %v3736_v32 = vsub.f32 0.0, %v3580_v12 }
 0x3d4   :  { %v3552_v14 = vpop.xlane.xlu0 %3551 }
 0x3d5   :  { %6843 = vpow2.f32 %v3993_v50  ;;  %v3963_v54 = vmul.f32 1.442695, %v3736_v32  ;;  %v3722_v2 = vsub.f32 0.0, %v3552_v14 }
 0x3d6   :  { %v3522_v6 = vpop.xlane.xlu1 %3521 }
 0x3d7   :  { %v6836_v19 = vpop.eup %6835  ;;  %6845 = vpow2.f32 %v3963_v54  ;;  %v3935_v61 = vmul.f32 1.442695, %v3722_v2  ;;  %v3707_v7 = vsub.f32 0.0, %v3522_v6 }
 0x3d8   :  { %v4134_v1 = vadd.f32 1.0, %v6836_v19  ;;  %v3612_v41 = vpop.xlane.xlu0 %3611 }
 0x3d9   :  { %v6838_v18 = vpop.eup %6837  ;;  %6847 = vpow2.f32 %v3935_v61  ;;  %v3905_v28 = vmul.f32 1.442695, %v3707_v7  ;;  %v3752_v43 = vsub.f32 0.0, %v3612_v41 }
 0x3da   :  { %6849 = vrcp.f32 %v4134_v1  ;;  %v4133_v13 = vadd.f32 1.0, %v6838_v18  ;;  %v3582_v22 = vpop.xlane.xlu1 %3581 }
 0x3db   :  { %v6840_v17 = vpop.eup %6839  ;;  %6851 = vpow2.f32 %v3905_v28  ;;  %v3995_v40 = vmul.f32 1.442695, %v3752_v43  ;;  %v3737_v0 = vsub.f32 0.0, %v3582_v22 }
 0x3dc   :  { %6853 = vrcp.f32 %v4133_v13  ;;  %v4105_v48 = vadd.f32 1.0, %v6840_v17  ;;  %v3554_v34 = vpop.xlane.xlu0 %3553 }
 0x3dd   :  { %v6842_v58 = vpop.eup %6841  ;;  %6855 = vpow2.f32 %v3995_v40  ;;  %v3965_v21 = vmul.f32 1.442695, %v3737_v0  ;;  %v3723_v15 = vsub.f32 0.0, %v3554_v34 }
 0x3de   :  { %6857 = vrcp.f32 %v4105_v48  ;;  %v4090_v9 = vadd.f32 1.0, %v6842_v58  ;;  %v3524_v4 = vpop.xlane.xlu1 %3523 }
 0x3df   :  { %v6844_v47 = vpop.eup %6843  ;;  %6859 = vpow2.f32 %v3965_v21  ;;  %v3937_v36 = vmul.f32 1.442695, %v3723_v15  ;;  %v3708_v25 = vsub.f32 0.0, %v3524_v4 }
 0x3e0   :  { %6861 = vrcp.f32 %v4090_v9  ;;  %v4135_v63 = vadd.f32 1.0, %v6844_v47  ;;  %v3614_v30 = vpop.xlane.xlu0 %3613 }
 0x3e1   :  { %v6846_v59 = vpop.eup %6845  ;;  %6863 = vpow2.f32 %v3937_v36  ;;  %v3907_v31 = vmul.f32 1.442695, %v3708_v25  ;;  %v3753_v45 = vsub.f32 0.0, %v3614_v30 }
 0x3e2   :  { %6865 = vrcp.f32 %v4135_v63  ;;  %v4120_v20 = vadd.f32 1.0, %v6846_v59  ;;  %v3584_v33 = vpop.xlane.xlu1 %3583 }
 0x3e3   :  { %v6848_v51 = vpop.eup %6847  ;;  %6867 = vpow2.f32 %v3907_v31  ;;  %v3997_v5 = vmul.f32 1.442695, %v3753_v45  ;;  %v3738_v60 = vsub.f32 0.0, %v3584_v33 }
 0x3e4   :  { %v6850_v26 = vpop.eup %6849  ;;  %6869 = vrcp.f32 %v4120_v20  ;;  %v4106_v23 = vadd.f32 1.0, %v6848_v51  ;;  %v3556_v24 = vpop.xlane.xlu0 %3555 }
 0x3e5   :  { %v6852_v37 = vpop.eup %6851  ;;  %v5123_v12 = vrot.slane %v6850_v26, %v8821_v56  ;;  %6871 = vpow2.f32 %v3997_v5  ;;  %v3967_v50 = vmul.f32 1.442695, %v3738_v60  ;;  %v3724_v32 = vsub.f32 0.0, %v3556_v24 }
 0x3e6   :  { %v6854_v14 = vpop.eup %6853  ;;  %6873 = vrcp.f32 %v4106_v23  ;;  %v4091_v54 = vadd.f32 1.0, %v6852_v37  ;;  %v3526_v2 = vpop.xlane.xlu1 %3525 }
 0x3e7   :  { %v6856_v6 = vpop.eup %6855  ;;  %v5119_v19 = vrot.slane %v6854_v14, %v8833_v44  ;;  %6875 = vpow2.f32 %v3967_v50  ;;  %v3939_v61 = vmul.f32 1.442695, %v3724_v32  ;;  %v3709_v7 = vsub.f32 0.0, %v3526_v2 }
 0x3e8   :  { %v6858_v1 = vpop.eup %6857  ;;  %6877 = vrcp.f32 %v4091_v54  ;;  %v4136_v41 = vadd.f32 1.0, %v6856_v6  ;;  %v3616_v18 = vpop.xlane.xlu0 %3615 }
 0x3e9   :  { %v6860_v28 = vpop.eup %6859  ;;  %v5124_v56 = vsel %vm4542_vm0, %v5123_v12, %v5119_v19  ;;  %v4980_v43 = vrot.slane %v6858_v1, %v8840_v53  ;;  %6879 = vpow2.f32 %v3939_v61  ;;  %v3909_v13 = vmul.f32 1.442695, %v3709_v7 }
 0x3ea   :  { %v6862_v22 = vpop.eup %6861  ;;  %6881 = vrcp.f32 %v4136_v41  ;;  %v4121_v17 = vadd.f32 1.0, %v6860_v28  ;;  %v3754_v40 = vsub.f32 0.0, %v3616_v18  ;;  %v3586_v0 = vpop.xlane.xlu1 %3585  ;;  %vm5201_vm0 = vcmask 1044484  }
 0x3eb   :  { %v6864_v44 = vpop.eup %6863  ;;  %v4981_v48 = vsel %vm4563_vm3, %v4980_v43, %v9290_v10  ;;  %v4906_v34 = vrot.slane %v6862_v22, %v8868_v52  ;;  %6883 = vpow2.f32 %v3909_v13  ;;  %v3739_v58 = vsub.f32 0.0, %v3586_v0 }
 0x3ec   :  { %v6866_v21 = vpop.eup %6865  ;;  %6885 = vrcp.f32 %v4121_v17  ;;  %v4107_v15 = vadd.f32 1.0, %v6864_v44  ;;  %v3999_v9 = vmul.f32 1.442695, %v3754_v40  ;;  %v3558_v4 = vpop.xlane.xlu0 %3557 }
 0x3ed   :  { %v6868_v47 = vpop.eup %6867  ;;  %v4907_v36 = vsel %vm4570_vm4, %v4906_v34, %v9295_v3  ;;  %v5128_v25 = vrot.slane %v6866_v21, %v8836_v49  ;;  %v3969_v63 = vmul.f32 1.442695, %v3739_v58  ;;  %v3725_v30 = vsub.f32 0.0, %v3558_v4 }
 0x3ee   :  { %v6870_v59 = vpop.eup %6869  ;;  %6887 = vrcp.f32 %v4107_v15  ;;  %v4092_v10 = vadd.f32 1.0, %v6868_v47  ;;  %v3528_v31 = vpop.xlane.xlu1 %3527 }
 0x3ef   :  { %v6872_v45 = vpop.eup %6871  ;;  %v5129_v20 = vsel %vm4549_vm1, %v5128_v25, %v5124_v56  ;;  %v5054_v33 = vrot.slane %v6870_v59, %v8846_v35  ;;  %6889 = vpow2.f32 %v3999_v9  ;;  %v3941_v51 = vmul.f32 1.442695, %v3725_v30  ;;  %vm9708_vm1 = vmmov %vm9699_vm12 }
 0x3f0   :  { %v6874_v5 = vpop.eup %6873  ;;  %6891 = vrcp.f32 %v4092_v10  ;;  %v4137_v60 = vadd.f32 1.0, %v6872_v45  ;;  %v3710_v26 = vsub.f32 0.0, %v3528_v31  ;;  %v3618_v3 = vpop.xlane.xlu0 %3617  ;;  %vm9709_vm12 = vmmov %vm9708_vm1 }
 0x3f1   :  { %v6876_v23 = vpop.eup %6875  ;;  %v5055_v49 = vsel %vm4556_vm2, %v5054_v33, %v9299_v8  ;;  %v4985_v24 = vrot.slane %v6874_v5, %v8868_v52  ;;  %6893 = vpow2.f32 %v3969_v63  ;;  %v3755_v37 = vsub.f32 0.0, %v3618_v3 }
 0x3f2   :  { %v6878_v12 = vpop.eup %6877  ;;  %6895 = vrcp.f32 %v4137_v60  ;;  %v4122_v50 = vadd.f32 1.0, %v6876_v23  ;;  %v3911_v32 = vmul.f32 1.442695, %v3710_v26  ;;  %v3588_v14 = vpop.xlane.xlu1 %3587 }
 0x3f3   :  { %v6880_v54 = vpop.eup %6879  ;;  %v4986_v2 = vsel %vm4570_vm4, %v4985_v24, %v4981_v48  ;;  %v4911_v6 = vrot.slane %v6878_v12, %v8853_v57  ;;  %6897 = vpow2.f32 %v3941_v51  ;;  %v3740_v61 = vsub.f32 0.0, %v3588_v14 }
 0x3f4   :  { %v6882_v19 = vpop.eup %6881  ;;  %6899 = vrcp.f32 %v4122_v50  ;;  %v3560_v7 = vpop.xlane.xlu0 %3559  ;;  %v4001_v18 = vmul.f32 1.442695, %v3755_v37  ;;  %v4108_v0 = vadd.f32 1.0, %v6880_v54 }
 0x3f5   :  { %v6884_v8 = vpop.eup %6883  ;;  %v4912_v1 = vsel %vm4577_vm5, %v4911_v6, %v4907_v36  ;;  %v5133_v41 = vrot.slane %v6882_v19, %v8846_v35  ;;  %v3726_v28 = vsub.f32 0.0, %v3560_v7  ;;  %6901 = vpow2.f32 %v3911_v32 }
 0x3f6   :  { %v6886_v56 = vpop.eup %6885  ;;  %v3971_v43 = vmul.f32 1.442695, %v3740_v61  ;;  %v3530_v13 = vpop.xlane.xlu1 %3529  ;;  %6903 = vpow2.f32 %v4001_v18  ;;  %v4093_v4 = vadd.f32 1.0, %v6884_v8 }
 0x3f7   :  { %v5134_v22 = vsel %vm4556_vm2, %v5133_v41, %v5129_v20  ;;  %v5059_v17 = vrot.slane %v6886_v56, %v8840_v53  ;;  %v3943_v44 = vmul.f32 1.442695, %v3726_v28  ;;  %v3711_v48 = vsub.f32 0.0, %v3530_v13 }
 0x3f8   :  { %v6888_v40 = vpop.eup %6887  ;;  %v3620_v34 = vpop.xlane.xlu0 %3619  ;;  %6905 = vpow2.f32 %v3971_v43  ;;  %vm5203_vm2 = vcmask 1045509  }
 0x3f9   :  { %v6890_v58 = vpop.eup %6889  ;;  %v5060_v21 = vsel %vm4563_vm3, %v5059_v17, %v5055_v49  ;;  %v4990_v35 = vrot.slane %v6888_v40, %v8853_v57  ;;  %v3756_v15 = vsub.f32 0.0, %v3620_v34  ;;  %v3913_v30 = vmul.f32 1.442695, %v3711_v48 }
 0x3fa   :  { %v6892_v9 = vpop.eup %6891  ;;  %v3590_v47 = vpop.xlane.xlu1 %3589  ;;  %v4138_v31 = vadd.f32 1.0, %v6890_v58  ;;  %6907 = vpow2.f32 %v3943_v44 }
 0x3fb   :  { %v6894_v36 = vpop.eup %6893  ;;  %v9325_v25 = vsel %vm4577_vm5, %v4990_v35, %v4986_v2  ;;  %v4916_v63 = vrot.slane %v6892_v9, %v8885_v38  ;;  %v3741_v59 = vsub.f32 0.0, %v3590_v47  ;;  %6909 = vrcp.f32 %v4108_v0 }
 0x3fc   :  { %v6896_v10 = vpop.eup %6895  ;;  %v3562_v45 = vpop.xlane.xlu0 %3561  ;;  %v4003_v5 = vmul.f32 1.442695, %v3756_v15  ;;  %6911 = vrcp.f32 %v4093_v4  ;;  %v4123_v50 = vadd.f32 1.0, %v6894_v36 }
 0x3fd   :  { %v6898_v20 = vpop.eup %6897  ;;  %v9329_v33 = vsel %vm4584_vm6, %v4916_v63, %v4912_v1  ;;  %v5138_v51 = vrot.slane %v6896_v10, %v8840_v53  ;;  %v3973_v26 = vmul.f32 1.442695, %v3741_v59  ;;  %v3727_v3 = vsub.f32 0.0, %v3562_v45 }
 0x3fe   :  { %v6900_v60 = vpop.eup %6899  ;;  %v3532_v23 = vpop.xlane.xlu1 %3531  ;;  %6913 = vpow2.f32 %v3913_v30  ;;  %v4109_v54 = vadd.f32 1.0, %v6898_v20 }
 0x3ff   :  { %v9333_v49 = vsel %vm4563_vm3, %v5138_v51, %v5134_v22  ;;  %v5064_v24 = vrot.slane %v6900_v60, %v8868_v52  ;;  %v3712_v37 = vsub.f32 0.0, %v3532_v23  ;;  %v6902_v12 = vpop.eup %6901  ;;  %6915 = vrcp.f32 %v4138_v31 }
 0x400   :  { %v3945_v32 = vmul.f32 1.442695, %v3727_v3  ;;  %v3622_v14 = vpop.xlane.xlu0 %3621  ;;  %6917 = vpow2.f32 %v4003_v5  ;;  %v6904_v61 = vpop.eup %6903  ;;  %v4094_v7 = vadd.f32 1.0, %v6902_v12  ;;  %vm5205_vm3 = vcmask 1046534  }
 0x401   :  { %v9337_v53 = vsel %vm4570_vm4, %v5064_v24, %v5060_v21  ;;  %6919 = vpow2.f32 %v3973_v26  ;;  %v3915_v2 = vmul.f32 1.442695, %v3712_v37  ;;  %v3757_v6 = vsub.f32 0.0, %v3622_v14 }
 0x402   :  { %v3592_v19 = vpop.xlane.xlu1 %3591  ;;  %6921 = vpow2.f32 %v3945_v32  ;;  %v6906_v1 = vpop.eup %6905  ;;  %v4139_v43 = vadd.f32 1.0, %v6904_v61 }
 0x403   :  { %v3742_v8 = vsub.f32 0.0, %v3592_v19  ;;  %6923 = vrcp.f32 %v4123_v50  ;;  %v4005_v41 = vmul.f32 1.442695, %v3757_v6  ;;  %v4124_v44 = vadd.f32 1.0, %v6906_v1 }
 0x404   :  { %v3564_v18 = vpop.xlane.xlu0 %3563  ;;  %6925 = vrcp.f32 %v4109_v54  ;;  %v6908_v56 = vpop.eup %6907 }
 0x405   :  { %v3975_v28 = vmul.f32 1.442695, %v3742_v8  ;;  %6927 = vpow2.f32 %v3915_v2  ;;  %v3728_v13 = vsub.f32 0.0, %v3564_v18  ;;  %v9339_v17 = vpop.eup %6909  ;;  %v4110_v21 = vadd.f32 1.0, %v6908_v56 }
 0x406   :  { %v3534_v22 = vpop.xlane.xlu1 %3533  ;;  %6929 = vrcp.f32 %v4094_v7  ;;  %v9341_v0 = vpop.eup %6911 }
 0x407   :  { %v3713_v40 = vsub.f32 0.0, %v3534_v22  ;;  %6931 = vpow2.f32 %v4005_v41  ;;  %v3947_v48 = vmul.f32 1.442695, %v3728_v13 }
 0x408   :  { %v3624_v34 = vpop.xlane.xlu0 %3623  ;;  %v6914_v58 = vpop.eup %6913  ;;  %6933 = vpow2.f32 %v3975_v28 }
 0x409   :  { %v9343_v35 = vpop.eup %6915  ;;  %6935 = vrcp.f32 %v4139_v43  ;;  %v3917_v15 = vmul.f32 1.442695, %v3713_v40  ;;  %v3758_v9 = vsub.f32 0.0, %v3624_v34  ;;  %v4095_v30 = vadd.f32 1.0, %v6914_v58 }
 0x40a   :  { %v3594_v4 = vpop.xlane.xlu1 %3593  ;;  %v6918_v47 = vpop.eup %6917  ;;  %6937 = vpow2.f32 %v3947_v48 }
 0x40b   :  { %v3743_v36 = vsub.f32 0.0, %v3594_v4  ;;  %v6920_v63 = vpop.eup %6919  ;;  %6939 = vrcp.f32 %v4124_v44  ;;  %v4007_v59 = vmul.f32 1.442695, %v3758_v9  ;;  %v4140_v51 = vadd.f32 1.0, %v6918_v47 }
 0x40c   :  { %v3566_v10 = vpop.xlane.xlu0 %3565  ;;  %v6922_v31 = vpop.eup %6921  ;;  %6941 = vrcp.f32 %v4110_v21  ;;  %v4125_v3 = vadd.f32 1.0, %v6920_v63 }
 0x40d   :  { %v3977_v45 = vmul.f32 1.442695, %v3743_v36  ;;  %v9345_v20 = vpop.eup %6923  ;;  %6943 = vpow2.f32 %v3917_v15  ;;  %v3729_v5 = vsub.f32 0.0, %v3566_v10  ;;  %v4111_v37 = vadd.f32 1.0, %v6922_v31 }
 0x40e   :  { %v3536_v60 = vpop.xlane.xlu1 %3535  ;;  %v9347_v26 = vpop.eup %6925  ;;  %6945 = vpow2.f32 %v4007_v59 }
 0x40f   :  { %v3714_v23 = vsub.f32 0.0, %v3536_v60  ;;  %v6928_v24 = vpop.eup %6927  ;;  %6947 = vrcp.f32 %v4095_v30  ;;  %v3949_v32 = vmul.f32 1.442695, %v3729_v5 }
 0x410   :  { %v3626_v12 = vpop.xlane.xlu0 %3625  ;;  %v9349_v50 = vpop.eup %6929  ;;  %6949 = vpow2.f32 %v3977_v45  ;;  %v4096_v19 = vadd.f32 1.0, %v6928_v24 }
 0x411   :  { %v6932_v14 = vpop.eup %6931  ;;  %6951 = vrcp.f32 %v4140_v51  ;;  %v3919_v54 = vmul.f32 1.442695, %v3714_v23  ;;  %v3759_v61 = vsub.f32 0.0, %v3626_v12 }
 0x412   :  { %v3596_v2 = vpop.xlane.xlu1 %3595  ;;  %v6934_v6 = vpop.eup %6933  ;;  %6953 = vrcp.f32 %v4125_v3  ;;  %v4141_v1 = vadd.f32 1.0, %v6932_v14 }
 0x413   :  { %v3744_v7 = vsub.f32 0.0, %v3596_v2  ;;  %v9351_v8 = vpop.eup %6935  ;;  %6955 = vrcp.f32 %v4111_v37  ;;  %v4126_v43 = vadd.f32 1.0, %v6934_v6  ;;  %v4009_v44 = vmul.f32 1.442695, %v3759_v61 }
 0x414   :  { %v3568_v41 = vpop.xlane.xlu0 %3567  ;;  %v6938_v18 = vpop.eup %6937  ;;  %6957 = vpow2.f32 %v3949_v32 }
 0x415   :  { %v3979_v28 = vmul.f32 1.442695, %v3744_v7  ;;  %v9353_v56 = vpop.eup %6939  ;;  %6959 = vpow2.f32 %v3919_v54  ;;  %v3730_v13 = vsub.f32 0.0, %v3568_v41  ;;  %v4112_v34 = vadd.f32 1.0, %v6938_v18 }
 0x416   :  { %v3538_v22 = vpop.xlane.xlu1 %3537  ;;  %v9355_v40 = vpop.eup %6941  ;;  %6961 = vrcp.f32 %v4096_v19 }
 0x417   :  { %v6944_v48 = vpop.eup %6943  ;;  %6963 = vrcp.f32 %v4141_v1  ;;  %v3715_v58 = vsub.f32 0.0, %v3538_v22  ;;  %v3951_v4 = vmul.f32 1.442695, %v3730_v13 }
 0x418   :  { %v3628_v21 = vpop.xlane.xlu0 %3627  ;;  %v6946_v15 = vpop.eup %6945  ;;  %6965 = vpow2.f32 %v3979_v28  ;;  %v4097_v30 = vadd.f32 1.0, %v6944_v48 }
 0x419   :  { %v9357_v9 = vpop.eup %6947  ;;  %6967 = vrcp.f32 %v4126_v43  ;;  %v3921_v47 = vmul.f32 1.442695, %v3715_v58  ;;  %v4142_v10 = vadd.f32 1.0, %v6946_v15  ;;  %v3760_v31 = vsub.f32 0.0, %v3628_v21 }
 0x41a   :  { %v3598_v36 = vpop.xlane.xlu1 %3597  ;;  %v6950_v63 = vpop.eup %6949  ;;  %6969 = vpow2.f32 %v4009_v44 }
 0x41b   :  { %v9359_v59 = vpop.eup %6951  ;;  %6971 = vrcp.f32 %v4112_v34  ;;  %v3745_v45 = vsub.f32 0.0, %v3598_v36  ;;  %v4127_v60 = vadd.f32 1.0, %v6950_v63  ;;  %v4011_v54 = vmul.f32 1.442695, %v3760_v31 }
 0x41c   :  { %v3570_v51 = vpop.xlane.xlu0 %3569  ;;  %v9361_v5 = vpop.eup %6953  ;;  %6973 = vpow2.f32 %v3921_v47 }
 0x41d   :  { %v3731_v3 = vsub.f32 0.0, %v3570_v51  ;;  %v9363_v23 = vpop.eup %6955  ;;  %6975 = vpow2.f32 %v3951_v4  ;;  %v3981_v24 = vmul.f32 1.442695, %v3745_v45 }
 0x41e   :  { %v3540_v37 = vpop.xlane.xlu1 %3539  ;;  %v6958_v12 = vpop.eup %6957  ;;  %6977 = vrcp.f32 %v4097_v30 }
 0x41f   :  { %v3953_v32 = vmul.f32 1.442695, %v3731_v3  ;;  %v6960_v14 = vpop.eup %6959  ;;  %6979 = vrcp.f32 %v4142_v10  ;;  %v3716_v2 = vsub.f32 0.0, %v3540_v37  ;;  %v4113_v7 = vadd.f32 1.0, %v6958_v12 }
 0x420   :  { %v3630_v6 = vpop.xlane.xlu0 %3629  ;;  %v9365_v19 = vpop.eup %6961  ;;  %6981 = vrcp.f32 %v4127_v60  ;;  %v4098_v43 = vadd.f32 1.0, %v6960_v14 }
 0x421   :  { %v9367_v61 = vpop.eup %6963  ;;  %6983 = vpow2.f32 %v3981_v24  ;;  %v3923_v1 = vmul.f32 1.442695, %v3716_v2  ;;  %v3761_v41 = vsub.f32 0.0, %v3630_v6 }
 0x422   :  { %v3600_v18 = vpop.xlane.xlu1 %3599  ;;  %v6966_v28 = vpop.eup %6965  ;;  %6985 = vpow2.f32 %v3953_v32 }
 0x423   :  { %v9369_v13 = vpop.eup %6967  ;;  %v4128_v22 = vadd.f32 1.0, %v6966_v28  ;;  %6987 = vpow2.f32 %v4011_v54  ;;  %v3746_v44 = vsub.f32 0.0, %v3600_v18  ;;  %v4013_v15 = vmul.f32 1.442695, %v3761_v41 }
 0x424   :  { %v3602_v48 = vpop.xlane.xlu0 %3601  ;;  %v6970_v34 = vpop.eup %6969  ;;  %6989 = vpow2.f32 %v3923_v1 }
 0x425   :  { %v3747_v58 = vsub.f32 0.0, %v3602_v48  ;;  %v9371_v21 = vpop.eup %6971  ;;  %6991 = vrcp.f32 %v4113_v7  ;;  %v3983_v4 = vmul.f32 1.442695, %v3746_v44  ;;  %v4995_v44 = vrot.slane %v9339_v17, %v8885_v38 }
 0x426   :  { %v3572_v47 = vpop.xlane.xlu1 %3571  ;;  %v6974_v36 = vpop.eup %6973  ;;  %6993 = vrcp.f32 %v4098_v43  ;;  %v4926_v17 = vrot.slane %v9349_v50, %v8908_v29 }
 0x427   :  { %v3985_v63 = vmul.f32 1.442695, %v3747_v58  ;;  %v6976_v30 = vpop.eup %6975  ;;  %6995 = vrcp.f32 %v4128_v22  ;;  %v4099_v10 = vadd.f32 1.0, %v6974_v36  ;;  %v3732_v31 = vsub.f32 0.0, %v3572_v47 }
 0x428   :  { %v3604_v45 = vpop.xlane.xlu0 %3603  ;;  %v9373_v51 = vpop.eup %6977  ;;  %6997 = vpow2.f32 %v3983_v4  ;;  %v4114_v32 = vadd.f32 1.0, %v6976_v30  ;;  %v4921_v4 = vrot.slane %v9341_v0, %v8879_v62 }
 0x429   :  { %v3748_v60 = vsub.f32 0.0, %v3604_v45  ;;  %v9375_v3 = vpop.eup %6979  ;;  %6999 = vpow2.f32 %v4013_v15  ;;  %v3955_v24 = vmul.f32 1.442695, %v3732_v31  ;;  %v4143_v45 = vadd.f32 1.0, %v6970_v34 }
 0x42a   :  { %v3632_v37 = vpop.xlane.xlu1 %3631  ;;  %v9377_v12 = vpop.eup %6981  ;;  %7001 = vpow2.f32 %v3985_v63  ;;  %v4922_v0 = vsel %vm4591_vm7, %v4921_v4, %v9329_v33  ;;  %v5000_v34 = vrot.slane %v9347_v26, %v8879_v62 }
 0x42b   :  { %v3987_v14 = vmul.f32 1.442695, %v3748_v60  ;;  %v6984_v54 = vpop.eup %6983  ;;  %7003 = vrcp.f32 %v4099_v10  ;;  %v3762_v2 = vsub.f32 0.0, %v3632_v37 }
 0x42c   :  { %v3636_v6 = vpop.xlane.xlu0 %3635  ;;  %v6986_v7 = vpop.eup %6985  ;;  %v4129_v1 = vadd.f32 1.0, %v6984_v54  ;;  %7005 = vpow2.f32 %v3955_v24  ;;  %v4996_v24 = vsel %vm4584_vm6, %v4995_v44, %v9325_v25  ;;  %v5069_v54 = vrot.slane %v9345_v20, %v8853_v57 }
 0x42d   :  { %v3764_v41 = vsub.f32 0.0, %v3636_v6  ;;  %v6988_v18 = vpop.eup %6987  ;;  %7007 = vpow2.f32 %v3987_v14  ;;  %v4015_v28 = vmul.f32 1.442695, %v3762_v2  ;;  %v4115_v47 = vadd.f32 1.0, %v6986_v7 }
 0x42e   :  { %v3634_v43 = vpop.xlane.xlu1 %3633  ;;  %v6990_v22 = vpop.eup %6989  ;;  %7009 = vrcp.f32 %v4114_v32  ;;  %v5143_v14 = vrot.slane %v9343_v35, %v8868_v52  ;;  %v4144_v2 = vadd.f32 1.0, %v6988_v18  ;;  %v4931_v25 = vrot.slane %v9357_v9, %v8891_v46 }
 0x42f   :  { %v4019_v48 = vmul.f32 1.442695, %v3764_v41  ;;  %v3763_v58 = vsub.f32 0.0, %v3634_v43  ;;  %v9381_v15 = vpop.eup %6991  ;;  %7011 = vrcp.f32 %v4129_v1  ;;  %v4100_v36 = vadd.f32 1.0, %v6990_v22 }
 0x430   :  { %v6994_v63 = vpop.eup %6993  ;;  %7013 = vpow2.f32 %v4015_v28  ;;  %v4927_v7 = vsel %vm4598_vm8, %v4926_v17, %v4922_v0  ;;  %v5074_v1 = vrot.slane %v9353_v56, %v8885_v38  ;;  %v4936_v20 = vrot.slane %v9365_v19, %v8985_v11 }
 0x431   :  { %v4017_v30 = vmul.f32 1.442695, %v3763_v58  ;;  %v9385_v10 = vpop.eup %6995  ;;  %7015 = vrcp.f32 %v4100_v36  ;;  %v4941_v18 = vrot.slane %v9373_v51, %v8928_v16  ;;  %v5005_v43 = vrot.slane %v9355_v40, %v8908_v29 }
 0x432   :  { %v6998_v31 = vpop.eup %6997  ;;  %7017 = vpow2.f32 %v4019_v48  ;;  %v4946_v22 = vrot.slane %v6994_v63, %v8998_v39  ;;  %v5070_v19 = vsel %vm4577_vm5, %v5069_v54, %v9337_v53  ;;  %v4932_v48 = vsel %vm4605_vm9, %v4931_v25, %v4927_v7 }
 0x433   :  { %v7000_v60 = vpop.eup %6999  ;;  %7019 = vrcp.f32 %v4115_v47  ;;  %v4130_v37 = vadd.f32 1.0, %v6998_v31  ;;  %v5001_v4 = vsel %vm4591_vm7, %v5000_v34, %v4996_v24  ;;  %v5079_v47 = vrot.slane %v9361_v5, %v8879_v62 }
 0x434   :  { %v7002_v32 = vpop.eup %7001  ;;  %7021 = vpow2.f32 %v4017_v30  ;;  %v4145_v26 = vadd.f32 1.0, %v7000_v60  ;;  %v4937_v40 = vsel %vm4612_vm10, %v4936_v20, %v4932_v48  ;;  %v5075_v63 = vsel %vm4584_vm6, %v5074_v1, %v5070_v19 }
 0x435   :  { %v7004_v50 = vpop.eup %7003  ;;  %7023 = vrcp.f32 %v4130_v37  ;;  %v4131_v33 = vadd.f32 1.0, %v7002_v32  ;;  %v4942_v30 = vsel %vm4619_vm11, %v4941_v18, %v4937_v40  ;;  %v5006_v17 = vsel %vm4598_vm8, %v5005_v43, %v5001_v4 }
 0x436   :  { %v7006_v6 = vpop.eup %7005  ;;  %7025 = vrcp.f32 %v4143_v45  ;;  %v4951_v51 = vrot.slane %v7004_v50, %v8994_v42  ;;  %v5010_v45 = vrot.slane %v9363_v23, %v8891_v46  ;;  %v4947_v60 = vsel %vm9708_vm1, %v4946_v22, %v4942_v30 }
 0x437   :  { %v7008_v41 = vpop.eup %7007  ;;  %7027 = vrcp.f32 %v4131_v33  ;;  %v4116_v28 = vadd.f32 1.0, %v7006_v6  ;;  %v5084_v0 = vrot.slane %v9369_v13, %v8908_v29  ;;  %v5015_v23 = vrot.slane %v9371_v21, %v8985_v11 }
 0x438   :  { %v9408_v9 = vpop.eup %7009  ;;  %7029 = vrcp.f32 %v4144_v2  ;;  %v4132_v56 = vadd.f32 1.0, %v7008_v41  ;;  %v4952_v37 = vsel %vm4633_vm13, %v4951_v51, %v4947_v60  ;;  %v5080_v2 = vsel %vm4591_vm7, %v5079_v47, %v5075_v63 }
 0x439   :  { %v7012_v44 = vpop.eup %7011  ;;  %7031 = vrcp.f32 %v4116_v28  ;;  %v5089_v50 = vrot.slane %v9377_v12, %v8891_v46  ;;  %v5020_v13 = vrot.slane %v9381_v15, %v8928_v16  ;;  %v5094_v33 = vrot.slane %v9385_v10, %v8985_v11 }
 0x43a   :  { %v7014_v58 = vpop.eup %7013  ;;  %7033 = vrcp.f32 %v4132_v56  ;;  %v5011_v20 = vsel %vm4605_vm9, %v5010_v45, %v5006_v17  ;;  %v5025_v21 = vrot.slane %v9408_v9, %v8998_v39  ;;  %v5099_v12 = vrot.slane %v7012_v44, %v8928_v16 }
 0x43b   :  { %v7016_v36 = vpop.eup %7015  ;;  %7035 = vrcp.f32 %v4145_v26  ;;  %v4146_v53 = vadd.f32 1.0, %v7014_v58  ;;  %v5085_v18 = vsel %vm4598_vm8, %v5084_v0, %v5080_v2  ;;  %v5016_v28 = vsel %vm4612_vm10, %v5015_v23, %v5011_v20 }
 0x43c   :  { %v7018_v31 = vpop.eup %7017  ;;  %v4956_v5 = vrot.slane %v7016_v36, %v9007_v27  ;;  %v5090_v43 = vsel %vm4605_vm9, %v5089_v50, %v5085_v18  ;;  %v5144_v56 = vsel %vm4570_vm4, %v5143_v14, %v9333_v49  ;;  %v5153_v44 = vrot.slane %v9359_v59, %v8885_v38  ;;  %vm9710_vm4 = vmmov %vm9708_vm1 }
 0x43d   :  { %v7020_v24 = vpop.eup %7019  ;;  %7037 = vrcp.f32 %v4146_v53  ;;  %v4148_v32 = vadd.f32 1.0, %v7018_v31  ;;  %v5021_v19 = vsel %vm4619_vm11, %v5020_v13, %v5016_v28  ;;  %v5158_v48 = vrot.slane %v9367_v61, %v8879_v62 }
 0x43e   :  { %v7022_v54 = vpop.eup %7021  ;;  %v4957_v34 = vsel %vm4640_vm14, %v4956_v5, %v4952_v37  ;;  %v5030_v15 = vrot.slane %v7020_v24, %v8994_v42  ;;  %v5026_v51 = vsel %vm9709_vm12, %v5025_v21, %v5021_v19  ;;  %v5163_v49 = vrot.slane %v9375_v3, %v8908_v29 }
 0x43f   :  { %v7024_v25 = vpop.eup %7023  ;;  %v5202_v6 = vsel %vm5201_vm0, %v4957_v34, %v9261_v55  ;;  %v4147_v7 = vadd.f32 1.0, %v7022_v54  ;;  %7039 = vrcp.f32 %v4148_v32  ;;  %v5148_v55 = vrot.slane %v9351_v8, %v8853_v57 }
 0x440   :  { %v7026_v1 = vpop.eup %7025  ;;  %v5104_v10 = vrot.slane %v7024_v25, %v8998_v39  ;;  %v5095_v57 = vsel %vm4612_vm10, %v5094_v33, %v5090_v43  ;;  %v5031_v38 = vsel %vm4633_vm13, %v5030_v15, %v5026_v51 }
 0x441   :  { %v7028_v41 = vpop.eup %7027  ;;  %7041 = vrcp.f32 %v4147_v7  ;;  %v5100_v58 = vsel %vm4619_vm11, %v5099_v12, %v5095_v57  ;;  %v5149_v14 = vsel %vm4577_vm5, %v5148_v55, %v5144_v56  ;;  %v5168_v62 = vrot.slane %v7026_v1, %v8891_v46  ;;  %vm9711_vm5 = vmmov %vm9708_vm1 }
 0x442   :  { %v7030_v26 = vpop.eup %7029  ;;  %v5109_v9 = vrot.slane %v7028_v41, %v8994_v42  ;;  %v5105_v35 = vsel %vm9710_vm4, %v5104_v10, %v5100_v58  ;;  %v5154_v36 = vsel %vm4584_vm6, %v5153_v44, %v5149_v14  ;;  %vm5207_vm6 = vcmask 1047559  }
 0x443   :  { %v7032_v22 = vpop.eup %7031  ;;  %v5173_v63 = vrot.slane %v7030_v26, %v8985_v11  ;;  %v5159_v30 = vsel %vm4591_vm7, %v5158_v48, %v5154_v36 }
 0x444   :  { %v7034_v8 = vpop.eup %7033  ;;  %v5035_v4 = vrot.slane %v7032_v22, %v9007_v27  ;;  %v5110_v61 = vsel %vm4633_vm13, %v5109_v9, %v5105_v35  ;;  %v5164_v46 = vsel %vm4598_vm8, %v5163_v49, %v5159_v30 }
 0x445   :  { %v7036_v52 = vpop.eup %7035  ;;  %v5114_v59 = vrot.slane %v7034_v8, %v9007_v27  ;;  %v5169_v60 = vsel %vm4605_vm9, %v5168_v62, %v5164_v46 }
 0x446   :  { %v5036_v47 = vsel %vm4640_vm14, %v5035_v4, %v5031_v38  ;;  %v5178_v53 = vrot.slane %v7036_v52, %v8928_v16  ;;  %v5174_v11 = vsel %vm4612_vm10, %v5173_v63, %v5169_v60 }
 0x447   :  { %v7038_v40 = vpop.eup %7037  ;;  %v5204_v29 = vsel %vm5203_vm2, %v5036_v47, %v5202_v6  ;;  %v5115_v3 = vsel %vm4640_vm14, %v5114_v59, %v5110_v61 }
 0x448   :  { %v5206_v31 = vsel %vm5205_vm3, %v5115_v3, %v5204_v29  ;;  %v5183_v17 = vrot.slane %v7038_v40, %v8998_v39  ;;  %v5179_v24 = vsel %vm4619_vm11, %v5178_v53, %v5174_v11 }
 0x449   :  { %v7040_v45 = vpop.eup %7039 }
 0x44a   :  { %v5184_v37 = vsel %vm9711_vm5, %v5183_v17, %v5179_v24  ;;  %v5193_v16 = vrot.slane %v7040_v45, %v9007_v27 }
 0x44b   :  { %v7042_v5 = vpop.eup %7041 }
 0x44c   :  { %v5188_v0 = vrot.slane %v7042_v5, %v8994_v42 }
 0x44e   :  { %v5189_v32 = vsel %vm4633_vm13, %v5188_v0, %v5184_v37 }
 0x44f   :  { %v5194_v54 = vsel %vm4640_vm14, %v5193_v16, %v5189_v32 }
 0x450   :  { %v5208_v39 = vsel %vm5207_vm6, %v5194_v54, %v5206_v31 }
 0x451   :  { %5210 = vst [vmem:[%s9502_s4] sm:$0xff] %v5208_v39 }

</bundles_post_ra>
